<compile_context>
chip_gen: v5e
topology: v5e:2x2
jax: 0.10.0
libtpu: 0.0.40
codegen_flags: <defaults>
</compile_context>

<pallas_src>
import functools

import jax
import jax.numpy as jnp
from jax.experimental import pallas as pl
from jax.experimental.pallas import tpu as pltpu

LANE = 128
_GUARD = 8  # spare (zeroed) rows before/after the padded image in the scratch


def _gelu_tanh(v):
    # tanh-approx GELU (max |err| vs exact erf-GELU ~5e-4); tanh runs on EUP.
    c = 0.7978845608028654  # sqrt(2/pi)
    return 0.5 * v * (1.0 + jnp.tanh(c * (v + 0.044715 * v * v * v)))


# ----------------------------------------------------------------------------
# Fused TTS_block kernel (one grid step = one batch element, fully in VMEM).
# ----------------------------------------------------------------------------
def _tts_block_kernel(x_ref, w1_ref, w2_ref, w3_ref,
                      g1_ref, b1_ref, g2_ref, b2_ref,
                      gmap_ref, gmapt_ref, emb_ref, wmask_ref,
                      o_ref, pad_ref, patch_ref,
                      *, H, W, n_per_group, eps):
    HW = H * W
    n_pad = (H + 2) * W          # rows of the H-padded (row-major flattened) image
    base = _GUARD
    Cp = o_ref.shape[-1]
    f32 = jnp.float32
    bf16 = jnp.bfloat16
    inv_n = 1.0 / n_per_group
    hp = jax.lax.Precision.HIGHEST

    # Hoisted loads / constants (JAX does not CSE broadcasts).
    gmap = gmap_ref[...]                     # (Cp, G) one-hot; zero rows for pad chans
    gmapt = gmapt_ref[...]                   # (G, Cp)
    ml = wmask_ref[:, 0:1]                   # (n_pad, 1) 1/0 mask: kills col j==0  rows (kw=0)
    mr = wmask_ref[:, 1:2]                   # (n_pad, 1) 1/0 mask: kills col j==W-1 rows (kw=2)

    # Zero ONLY the border strips + guard rows; the interior is fully rewritten
    # by every conv before it is read.
    zstrip = jnp.zeros((base + W, Cp), f32)
    pad_ref[pl.ds(0, base + W), :] = zstrip                      # guard + top pad row
    pad_ref[pl.ds(base + (H + 1) * W, base + W), :] = zstrip     # bottom pad row + guard

    # ---- conv1 (1x1) == channel matmul; it is also the shortcut (same
    # ---- weights, same input => identical result, computed once). ----------
    h1 = jnp.dot(x_ref[0], w1_ref[...], preferred_element_type=f32)      # (HW, Cp) f32

    def conv3x3(h, w_ref):
        # 3x3 SAME conv as ONE im2col matmul with K = 9*Cp.
        #   padded image P lives at pad_ref rows [base, base + n_pad)
        #   slab[kw][r] = P[r + (kw-1)]  -> the kw shift is just a load offset;
        #   the wrap across image rows is removed by the multiplicative masks.
        pad_ref[pl.ds(base + W, HW), :] = h                              # dense, 8-aligned store
        slabs = (
            (pad_ref[pl.ds(base - 1, n_pad), :] * ml).astype(bf16),      # kw = 0
            pad_ref[pl.ds(base, n_pad), :].astype(bf16),                 # kw = 1
            (pad_ref[pl.ds(base + 1, n_pad), :] * mr).astype(bf16),      # kw = 2
        )
        for kh in range(3):
            lo = kh * W                                                  # static, W-aligned
            for kw in range(3):
                patch_ref[:, pl.ds((3 * kh + kw) * Cp, Cp)] = slabs[kw][lo:lo + HW]
        # Single dot: accumulation over all 9 taps stays inside the MXU.
        return jnp.dot(patch_ref[...], w_ref[...], preferred_element_type=f32)

    def groupnorm(h, gamma_ref, beta_ref):
        # Two-pass GroupNorm; group pooling via one-hot channel<->group matmuls.
        s = jnp.sum(h, axis=0, keepdims=True)                            # (1, Cp)
        mean_g = jnp.dot(s, gmap, precision=hp,
                         preferred_element_type=f32) * inv_n             # (1, G)
        mean_c = jnp.dot(mean_g, gmapt, precision=hp,
                         preferred_element_type=f32)                     # (1, Cp)
        d = h - mean_c
        s2 = jnp.sum(d * d, axis=0, keepdims=True)
        var_g = jnp.dot(s2, gmap, precision=hp,
                        preferred_element_type=f32) * inv_n
        inv_c = jnp.dot(jax.lax.rsqrt(var_g + eps), gmapt, precision=hp,
                        preferred_element_type=f32)
        return d * inv_c * gamma_ref[...] + beta_ref[...]

    h2 = conv3x3(h1, w2_ref)                                             # conv2
    h3 = _gelu_tanh(groupnorm(h2, g1_ref, b1_ref)) + emb_ref[0]          # norm1/act/+emb
    h4 = conv3x3(h3, w3_ref)                                             # conv3
    out = _gelu_tanh(groupnorm(h4, g2_ref, b2_ref)) + h1                 # norm2/act/+shortcut
    o_ref[...] = out[None].astype(o_ref.dtype)


# ----------------------------------------------------------------------------
# Wrapper: NCHW <-> NHWC at the boundary, tiny embedding matmuls in XLA,
# single pallas_call for the whole block.
# ----------------------------------------------------------------------------
def tts_block_forward(x_nchw, t, y_onehot, kp, groups, x_down=None):
    """Forward pass of TTS_block (use_shortcut=True, use_attention=False)."""
    x = jnp.transpose(x_nchw, (0, 2, 3, 1)).astype(jnp.float32)    # NCHW -> NHWC
    if x_down is not None:
        x = jnp.concatenate(
            [x, jnp.transpose(x_down, (0, 2, 3, 1)).astype(jnp.float32)],
            axis=-1)
    B, H, W, Cin = x.shape
    C, Cp = kp["C"], kp["Cp"]
    HW = H * W
    n_pad = (H + 2) * W
    # bf16 input halves the per-step input DMA; numerics identical to casting
    # inside the kernel (the conv1 matmul operands were bf16 already).
    x_flat = x.reshape(B, HW, Cin).astype(jnp.bfloat16)

    # Tiny (B,1)x(1,C) / (B,nc)x(nc,C) embedding linears: plain XLA; the sum is
    # broadcast inside the kernel (no (B, H*W, C) tensor is materialized).
    t32 = t.astype(jnp.float32).reshape(-1, 1)
    emb = (t32 @ kp["wt"] + kp["bt"]
           + y_onehot.astype(jnp.float32) @ kp["wy"] + kp["by"])   # (B, Cp)
    emb = emb.reshape(B, 1, Cp)

    # Multiplicative wrap masks for the kw = 0 / 2 taps (SAME padding along W),
    # expressed in padded-row space (row r corresponds to image column r % W).
    col = jnp.arange(n_pad, dtype=jnp.int32) % W
    wmask = jnp.stack([(col != 0).astype(jnp.float32),
                       (col != W - 1).astype(jnp.float32)], axis=1)  # (n_pad, 2)

    n_per_group = float(H * W * (C // groups))
    kern = functools.partial(_tts_block_kernel, H=H, W=W,
                             n_per_group=n_per_group, eps=1e-5)
    out = pl.pallas_call(
        kern,
        out_shape=jax.ShapeDtypeStruct((B, HW, Cp), jnp.float32),
        grid=(B,),
        in_specs=[
            pl.BlockSpec((1, HW, Cin), lambda b: (b, 0, 0)),        # x (bf16)
            pl.BlockSpec((Cin, Cp), lambda b: (0, 0)),              # w1 (1x1)
            pl.BlockSpec((9 * Cp, Cp), lambda b: (0, 0)),           # w2 (im2col)
            pl.BlockSpec((9 * Cp, Cp), lambda b: (0, 0)),           # w3 (im2col)
            pl.BlockSpec((1, Cp), lambda b: (0, 0)),                # gamma1
            pl.BlockSpec((1, Cp), lambda b: (0, 0)),                # beta1
            pl.BlockSpec((1, Cp), lambda b: (0, 0)),                # gamma2
            pl.BlockSpec((1, Cp), lambda b: (0, 0)),                # beta2
            pl.BlockSpec((Cp, groups), lambda b: (0, 0)),           # gmap
            pl.BlockSpec((groups, Cp), lambda b: (0, 0)),           # gmap^T
            pl.BlockSpec((1, 1, Cp), lambda b: (b, 0, 0)),          # t_emb+y_emb
            pl.BlockSpec((n_pad, 2), lambda b: (0, 0)),             # wrap masks
        ],
        out_specs=pl.BlockSpec((1, HW, Cp), lambda b: (b, 0, 0)),
        scratch_shapes=[
            pltpu.VMEM((n_pad + 2 * _GUARD, Cp), jnp.float32),      # H-padded image
            pltpu.VMEM((HW, 9 * Cp), jnp.bfloat16),                 # im2col patches
        ],
        compiler_params=pltpu.CompilerParams(
            dimension_semantics=("parallel",)),
    )(x_flat, kp["w1"], kp["w2"], kp["w3"],
      kp["gamma1"], kp["beta1"], kp["gamma2"], kp["beta2"],
      kp["gmap"], kp["gmap_t"], emb, wmask)

    out = out[:, :, :C].reshape(B, H, W, C)
    return jnp.transpose(out, (0, 3, 1, 2))                        # NHWC -> NCHW


# ----------------------------------------------------------------------------
# Parameter construction (raw f32) and kernel-side preparation (pad + bf16).
# ----------------------------------------------------------------------------
def make_params(key, in_channels, out_channels, num_classes):
    C = out_channels
    groups = min(8, C)
    ks = jax.random.split(key, 10)
    params = dict(
        w1=jax.random.normal(ks[0], (in_channels, C), jnp.float32) * 0.2,
        w2=jax.random.normal(ks[1], (3, 3, C, C), jnp.float32) * 0.1,   # HWIO
        w3=jax.random.normal(ks[2], (3, 3, C, C), jnp.float32) * 0.1,   # HWIO
        wt=jax.random.normal(ks[3], (1, C), jnp.float32) * 0.5,
        bt=jax.random.normal(ks[4], (1, C), jnp.float32) * 0.1,
        wy=jax.random.normal(ks[5], (num_classes, C), jnp.float32) * 0.2,
        by=jax.random.normal(ks[6], (1, C), jnp.float32) * 0.1,
        gamma1=1.0 + 0.1 * jax.random.normal(ks[7], (1, C), jnp.float32),
        beta1=0.05 * jax.random.normal(ks[8], (1, C), jnp.float32),
        gamma2=1.0 + 0.1 * jax.random.normal(ks[9], (1, C), jnp.float32),
        beta2=jnp.zeros((1, C), jnp.float32),
    )
    return params, groups


def prepare_kernel_params(p, groups, lane=LANE):
    """Zero-pad channels to a lane-dense multiple of 128, reshape the 3x3
    weights to im2col layout, and cast MXU-side weights to bf16.  Padded
    channels stay exactly zero through the whole block."""
    C = p["w1"].shape[1]
    assert C % groups == 0, "GroupNorm requires out_channels divisible by groups"
    Cp = max(lane, ((C + lane - 1) // lane) * lane)
    gs = C // groups

    def pad_c(a, axes):
        cfg = [(0, 0)] * a.ndim
        for ax in axes:
            cfg[ax] = (0, Cp - C)
        return jnp.pad(a, cfg)

    ch = jnp.arange(Cp)
    gmap = ((ch[:, None] // gs == jnp.arange(groups)[None, :])
            & (ch[:, None] < C)).astype(jnp.float32)               # (Cp, G)

    return dict(
        C=C, Cp=Cp,
        w1=pad_c(p["w1"], [1]).astype(jnp.bfloat16),
        # HWIO (3,3,Cp,Cp) -> im2col (9*Cp, Cp); row-block k = 3*kh + kw.
        w2=pad_c(p["w2"], [2, 3]).reshape(9 * Cp, Cp).astype(jnp.bfloat16),
        w3=pad_c(p["w3"], [2, 3]).reshape(9 * Cp, Cp).astype(jnp.bfloat16),
        wt=pad_c(p["wt"], [1]), bt=pad_c(p["bt"], [1]),
        wy=pad_c(p["wy"], [1]), by=pad_c(p["by"], [1]),
        gamma1=pad_c(p["gamma1"], [1]), beta1=pad_c(p["beta1"], [1]),
        gamma2=pad_c(p["gamma2"], [1]), beta2=pad_c(p["beta2"], [1]),
        gmap=gmap, gmap_t=gmap.T,
    )


# ----------------------------------------------------------------------------
# Pure-JAX reference for the numerical sanity check.  Conv operands are cast
# to bf16 (f32 accumulation) to mirror the kernel's deliberate MXU precision
# choice; GroupNorm / GELU are exact f32 (GELU uses exact erf form).
# ----------------------------------------------------------------------------
def ref_forward(x_nchw, t, y_onehot, p, groups):
    dn = ("NHWC", "HWIO", "NHWC")

    def conv(inp, w, padding):
        return jax.lax.conv_general_dilated(
            inp.astype(jnp.bfloat16), w.astype(jnp.bfloat16), (1, 1), padding,
            dimension_numbers=dn, preferred_element_type=jnp.float32)

    def gn(xx, gamma, beta):
        B, H, W, C = xx.shape
        xg = xx.reshape(B, H, W, groups, C // groups)
        mean = xg.mean(axis=(1, 2, 4), keepdims=True)
        var = ((xg - mean) ** 2).mean(axis=(1, 2, 4), keepdims=True)
        xn = ((xg - mean) / jnp.sqrt(var + 1e-5)).reshape(B, H, W, C)
        return xn * gamma.reshape(C) + beta.reshape(C)

    x = jnp.transpose(x_nchw, (0, 2, 3, 1)).astype(jnp.float32)
    w1 = p["w1"].reshape(1, 1, *p["w1"].shape)
    h1 = conv(x, w1, "VALID")
    shortcut = h1
    h2 = conv(h1, p["w2"], "SAME")
    a = jax.nn.gelu(gn(h2, p["gamma1"], p["beta1"]), approximate=False)
    t_emb = t.astype(jnp.float32).reshape(-1, 1) @ p["wt"] + p["bt"]
    y_emb = y_onehot.astype(jnp.float32) @ p["wy"] + p["by"]
    a = a + (t_emb + y_emb)[:, None, None, :]
    h4 = conv(a, p["w3"], "SAME")
    b = jax.nn.gelu(gn(h4, p["gamma2"], p["beta2"]), approximate=False)
    return jnp.transpose(b + shortcut, (0, 3, 1, 2))


# ----------------------------------------------------------------------------
if __name__ == "__main__":
    B, Cin, Cout, num_classes, H, W = 2, 4, 8, 10, 16, 16

    key = jax.random.PRNGKey(0)
    kx, kt, ky, kparam = jax.random.split(key, 4)
    x = jax.random.normal(kx, (B, Cin, H, W), jnp.float32)          # NCHW input
    t = jax.random.uniform(kt, (B, 1), jnp.float32)
    labels = jax.random.randint(ky, (B,), 0, num_classes)
    y_onehot = jax.nn.one_hot(labels, num_classes, dtype=jnp.float32)

    params, groups = make_params(kparam, Cin, Cout, num_classes)
    kparams = prepare_kernel_params(params, groups)

    out = jax.block_until_ready(
        tts_block_forward(x, t, y_onehot, kparams, groups))
    assert out.shape == (B, Cout, H, W)

    ref = jax.block_until_ready(ref_forward(x, t, y_onehot, params, groups))
    max_err = float(jnp.max(jnp.abs(out - ref)))
    # Remaining deltas vs the reference: tanh-approx GELU (~5e-4) and matmul
    # accumulation order; well inside 1e-2.
    assert jnp.allclose(out, ref, rtol=1e-2, atol=1e-2), max_err

    print("KERNEL_OK")
</pallas_src>

<mosaic_0001>
module attributes {stable_mosaic.version = 11 : i64} {
  func.func @_tts_block_kernel(%arg0: i32, %arg1: memref<1x256x4xbf16, #tpu.memory_space<vmem>>, %arg2: memref<4x128xbf16, #tpu.memory_space<vmem>>, %arg3: memref<1152x128xbf16, #tpu.memory_space<vmem>>, %arg4: memref<1152x128xbf16, #tpu.memory_space<vmem>>, %arg5: memref<1x128xf32, #tpu.memory_space<vmem>>, %arg6: memref<1x128xf32, #tpu.memory_space<vmem>>, %arg7: memref<1x128xf32, #tpu.memory_space<vmem>>, %arg8: memref<1x128xf32, #tpu.memory_space<vmem>>, %arg9: memref<128x8xf32, #tpu.memory_space<vmem>>, %arg10: memref<8x128xf32, #tpu.memory_space<vmem>>, %arg11: memref<1x1x128xf32, #tpu.memory_space<vmem>>, %arg12: memref<288x2xf32, #tpu.memory_space<vmem>>, %arg13: memref<1x256x128xf32, #tpu.memory_space<vmem>>, %arg14: memref<304x128xf32, #tpu.memory_space<vmem>>, %arg15: memref<256x1152xbf16, #tpu.memory_space<vmem>>) attributes {dimension_semantics = [#tpu.dimension_semantics<parallel>], iteration_bounds = array<i64: 2>, scalar_prefetch = 0 : i64, scratch_operands = 2 : i64, tpu.core_type = #tpu.core_type<tc>, window_params = [{transform_indices = @transform_0, window_bounds = array<i64: 1, 256, 4>}, {pipeline_mode = #tpu.pipeline_mode<synchronous>, transform_indices = @transform_1, window_bounds = array<i64: 4, 128>}, {pipeline_mode = #tpu.pipeline_mode<synchronous>, transform_indices = @transform_2, window_bounds = array<i64: 1152, 128>}, {pipeline_mode = #tpu.pipeline_mode<synchronous>, transform_indices = @transform_3, window_bounds = array<i64: 1152, 128>}, {pipeline_mode = #tpu.pipeline_mode<synchronous>, transform_indices = @transform_4, window_bounds = array<i64: 1, 128>}, {pipeline_mode = #tpu.pipeline_mode<synchronous>, transform_indices = @transform_5, window_bounds = array<i64: 1, 128>}, {pipeline_mode = #tpu.pipeline_mode<synchronous>, transform_indices = @transform_6, window_bounds = array<i64: 1, 128>}, {pipeline_mode = #tpu.pipeline_mode<synchronous>, transform_indices = @transform_7, window_bounds = array<i64: 1, 128>}, {pipeline_mode = #tpu.pipeline_mode<synchronous>, transform_indices = @transform_8, window_bounds = array<i64: 128, 8>}, {pipeline_mode = #tpu.pipeline_mode<synchronous>, transform_indices = @transform_9, window_bounds = array<i64: 8, 128>}, {transform_indices = @transform_10, window_bounds = array<i64: 1, 1, 128>}, {pipeline_mode = #tpu.pipeline_mode<synchronous>, transform_indices = @transform_11, window_bounds = array<i64: 288, 2>}, {transform_indices = @transform_12, window_bounds = array<i64: 1, 256, 128>}]} {
    %c0 = arith.constant 0 : index
    %c0_0 = arith.constant 0 : index
    %0 = vector.load %arg9[%c0, %c0_0] : memref<128x8xf32, #tpu.memory_space<vmem>>, vector<128x8xf32>
    %c0_1 = arith.constant 0 : index
    %c0_2 = arith.constant 0 : index
    %1 = vector.load %arg10[%c0_1, %c0_2] : memref<8x128xf32, #tpu.memory_space<vmem>>, vector<8x128xf32>
    %c0_3 = arith.constant 0 : index
    %c0_4 = arith.constant 0 : index
    %2 = vector.load %arg12[%c0_3, %c0_4] : memref<288x2xf32, #tpu.memory_space<vmem>>, vector<288x1xf32>
    %c0_5 = arith.constant 0 : index
    %c1 = arith.constant 1 : index
    %3 = vector.load %arg12[%c0_5, %c1] : memref<288x2xf32, #tpu.memory_space<vmem>>, vector<288x1xf32>
    %cst = arith.constant 0.000000e+00 : f32
    %4 = vector.broadcast %cst : f32 to vector<24x128xf32>
    %c0_6 = arith.constant 0 : index
    %c0_7 = arith.constant 0 : index
    %5 = vector.load %arg14[%c0_6, %c0_7] : memref<304x128xf32, #tpu.memory_space<vmem>>, vector<24x128xf32>
    tpu.vector_store %arg14[%c0_6, %c0_7], %4 {strides = array<i32>} : memref<304x128xf32, #tpu.memory_space<vmem>>, vector<24x128xf32>,
    %c280 = arith.constant 280 : index
    %c0_8 = arith.constant 0 : index
    %6 = vector.load %arg14[%c280, %c0_8] : memref<304x128xf32, #tpu.memory_space<vmem>>, vector<24x128xf32>
    tpu.vector_store %arg14[%c280, %c0_8], %4 {strides = array<i32>} : memref<304x128xf32, #tpu.memory_space<vmem>>, vector<24x128xf32>,
    %c0_9 = arith.constant 0 : index
    %c0_10 = arith.constant 0 : index
    %c0_11 = arith.constant 0 : index
    %7 = vector.load %arg1[%c0_9, %c0_10, %c0_11] : memref<1x256x4xbf16, #tpu.memory_space<vmem>>, vector<1x256x4xbf16>
    %8 = vector.shape_cast %7 : vector<1x256x4xbf16> to vector<256x4xbf16>
    %c0_12 = arith.constant 0 : index
    %c0_13 = arith.constant 0 : index
    %9 = vector.load %arg2[%c0_12, %c0_13] : memref<4x128xbf16, #tpu.memory_space<vmem>>, vector<4x128xbf16>
    %cst_14 = arith.constant dense<0.000000e+00> : vector<256x128xf32>
    %10 = tpu.matmul %8, %9, %cst_14 {dimension_numbers = #tpu.dot_dimension_numbers<[1], [0], [0], [1], [0, 0, 1, 1], [], []>} : vector<256x4xbf16>, vector<4x128xbf16>, vector<256x128xf32> -> vector<256x128xf32>
    %c24 = arith.constant 24 : index
    %c0_15 = arith.constant 0 : index
    %11 = vector.load %arg14[%c24, %c0_15] : memref<304x128xf32, #tpu.memory_space<vmem>>, vector<256x128xf32>
    tpu.vector_store %arg14[%c24, %c0_15], %10 {strides = array<i32>} : memref<304x128xf32, #tpu.memory_space<vmem>>, vector<256x128xf32>,
    %c7 = arith.constant 7 : index
    %c0_16 = arith.constant 0 : index
    %12 = vector.load %arg14[%c7, %c0_16] : memref<304x128xf32, #tpu.memory_space<vmem>>, vector<288x128xf32>
    %13 = vector.broadcast %2 : vector<288x1xf32> to vector<288x128xf32>
    %14 = arith.mulf %12, %13 : vector<288x128xf32>
    %15 = arith.truncf %14 : vector<288x128xf32> to vector<288x128xbf16>
    %c8 = arith.constant 8 : index
    %c0_17 = arith.constant 0 : index
    %16 = vector.load %arg14[%c8, %c0_17] : memref<304x128xf32, #tpu.memory_space<vmem>>, vector<288x128xf32>
    %17 = arith.truncf %16 : vector<288x128xf32> to vector<288x128xbf16>
    %c9 = arith.constant 9 : index
    %c0_18 = arith.constant 0 : index
    %18 = vector.load %arg14[%c9, %c0_18] : memref<304x128xf32, #tpu.memory_space<vmem>>, vector<288x128xf32>
    %19 = vector.broadcast %3 : vector<288x1xf32> to vector<288x128xf32>
    %20 = arith.mulf %18, %19 : vector<288x128xf32>
    %21 = arith.truncf %20 : vector<288x128xf32> to vector<288x128xbf16>
    %22 = vector.extract_strided_slice %15 {offsets = [0, 0], sizes = [256, 128], strides = [1, 1]} : vector<288x128xbf16> to vector<256x128xbf16>
    %c0_19 = arith.constant 0 : index
    %c0_20 = arith.constant 0 : index
    %23 = vector.load %arg15[%c0_19, %c0_20] : memref<256x1152xbf16, #tpu.memory_space<vmem>>, vector<256x128xbf16>
    tpu.vector_store %arg15[%c0_19, %c0_20], %22 {strides = array<i32>} : memref<256x1152xbf16, #tpu.memory_space<vmem>>, vector<256x128xbf16>,
    %24 = vector.extract_strided_slice %17 {offsets = [0, 0], sizes = [256, 128], strides = [1, 1]} : vector<288x128xbf16> to vector<256x128xbf16>
    %c0_21 = arith.constant 0 : index
    %c128 = arith.constant 128 : index
    %25 = vector.load %arg15[%c0_21, %c128] : memref<256x1152xbf16, #tpu.memory_space<vmem>>, vector<256x128xbf16>
    tpu.vector_store %arg15[%c0_21, %c128], %24 {strides = array<i32>} : memref<256x1152xbf16, #tpu.memory_space<vmem>>, vector<256x128xbf16>,
    %26 = vector.extract_strided_slice %21 {offsets = [0, 0], sizes = [256, 128], strides = [1, 1]} : vector<288x128xbf16> to vector<256x128xbf16>
    %c0_22 = arith.constant 0 : index
    %c256 = arith.constant 256 : index
    %27 = vector.load %arg15[%c0_22, %c256] : memref<256x1152xbf16, #tpu.memory_space<vmem>>, vector<256x128xbf16>
    tpu.vector_store %arg15[%c0_22, %c256], %26 {strides = array<i32>} : memref<256x1152xbf16, #tpu.memory_space<vmem>>, vector<256x128xbf16>,
    %28 = vector.extract_strided_slice %15 {offsets = [16, 0], sizes = [256, 128], strides = [1, 1]} : vector<288x128xbf16> to vector<256x128xbf16>
    %c0_23 = arith.constant 0 : index
    %c384 = arith.constant 384 : index
    %29 = vector.load %arg15[%c0_23, %c384] : memref<256x1152xbf16, #tpu.memory_space<vmem>>, vector<256x128xbf16>
    tpu.vector_store %arg15[%c0_23, %c384], %28 {strides = array<i32>} : memref<256x1152xbf16, #tpu.memory_space<vmem>>, vector<256x128xbf16>,
    %30 = vector.extract_strided_slice %17 {offsets = [16, 0], sizes = [256, 128], strides = [1, 1]} : vector<288x128xbf16> to vector<256x128xbf16>
    %c0_24 = arith.constant 0 : index
    %c512 = arith.constant 512 : index
    %31 = vector.load %arg15[%c0_24, %c512] : memref<256x1152xbf16, #tpu.memory_space<vmem>>, vector<256x128xbf16>
    tpu.vector_store %arg15[%c0_24, %c512], %30 {strides = array<i32>} : memref<256x1152xbf16, #tpu.memory_space<vmem>>, vector<256x128xbf16>,
    %32 = vector.extract_strided_slice %21 {offsets = [16, 0], sizes = [256, 128], strides = [1, 1]} : vector<288x128xbf16> to vector<256x128xbf16>
    %c0_25 = arith.constant 0 : index
    %c640 = arith.constant 640 : index
    %33 = vector.load %arg15[%c0_25, %c640] : memref<256x1152xbf16, #tpu.memory_space<vmem>>, vector<256x128xbf16>
    tpu.vector_store %arg15[%c0_25, %c640], %32 {strides = array<i32>} : memref<256x1152xbf16, #tpu.memory_space<vmem>>, vector<256x128xbf16>,
    %34 = vector.extract_strided_slice %15 {offsets = [32, 0], sizes = [256, 128], strides = [1, 1]} : vector<288x128xbf16> to vector<256x128xbf16>
    %c0_26 = arith.constant 0 : index
    %c768 = arith.constant 768 : index
    %35 = vector.load %arg15[%c0_26, %c768] : memref<256x1152xbf16, #tpu.memory_space<vmem>>, vector<256x128xbf16>
    tpu.vector_store %arg15[%c0_26, %c768], %34 {strides = array<i32>} : memref<256x1152xbf16, #tpu.memory_space<vmem>>, vector<256x128xbf16>,
    %36 = vector.extract_strided_slice %17 {offsets = [32, 0], sizes = [256, 128], strides = [1, 1]} : vector<288x128xbf16> to vector<256x128xbf16>
    %c0_27 = arith.constant 0 : index
    %c896 = arith.constant 896 : index
    %37 = vector.load %arg15[%c0_27, %c896] : memref<256x1152xbf16, #tpu.memory_space<vmem>>, vector<256x128xbf16>
    tpu.vector_store %arg15[%c0_27, %c896], %36 {strides = array<i32>} : memref<256x1152xbf16, #tpu.memory_space<vmem>>, vector<256x128xbf16>,
    %38 = vector.extract_strided_slice %21 {offsets = [32, 0], sizes = [256, 128], strides = [1, 1]} : vector<288x128xbf16> to vector<256x128xbf16>
    %c0_28 = arith.constant 0 : index
    %c1024 = arith.constant 1024 : index
    %39 = vector.load %arg15[%c0_28, %c1024] : memref<256x1152xbf16, #tpu.memory_space<vmem>>, vector<256x128xbf16>
    tpu.vector_store %arg15[%c0_28, %c1024], %38 {strides = array<i32>} : memref<256x1152xbf16, #tpu.memory_space<vmem>>, vector<256x128xbf16>,
    %c0_29 = arith.constant 0 : index
    %c0_30 = arith.constant 0 : index
    %40 = vector.load %arg15[%c0_29, %c0_30] : memref<256x1152xbf16, #tpu.memory_space<vmem>>, vector<256x1152xbf16>
    %c0_31 = arith.constant 0 : index
    %c0_32 = arith.constant 0 : index
    %41 = vector.load %arg3[%c0_31, %c0_32] : memref<1152x128xbf16, #tpu.memory_space<vmem>>, vector<1152x128xbf16>
    %cst_33 = arith.constant dense<0.000000e+00> : vector<256x128xf32>
    %42 = tpu.matmul %40, %41, %cst_33 {dimension_numbers = #tpu.dot_dimension_numbers<[1], [0], [0], [1], [0, 0, 1, 1], [], []>} : vector<256x1152xbf16>, vector<1152x128xbf16>, vector<256x128xf32> -> vector<256x128xf32>
    %cst_34 = arith.constant dense<0.000000e+00> : vector<128xf32>
    %43 = vector.multi_reduction <add>, %42, %cst_34 [0] : vector<256x128xf32> to vector<128xf32>
    %44 = vector.shape_cast %43 : vector<128xf32> to vector<1x128xf32>
    %cst_35 = arith.constant dense<0.000000e+00> : vector<1x8xf32>
    %45 = tpu.matmul %44, %0, %cst_35 {dimension_numbers = #tpu.dot_dimension_numbers<[1], [0], [0], [1], [0, 0, 1, 1], [], []>, precision = #tpu.contract_precision<fp32>} : vector<1x128xf32>, vector<128x8xf32>, vector<1x8xf32> -> vector<1x8xf32>
    %cst_36 = arith.constant 3.906250e-03 : f32
    %46 = vector.broadcast %cst_36 : f32 to vector<1x8xf32>
    %47 = arith.mulf %45, %46 : vector<1x8xf32>
    %cst_37 = arith.constant dense<0.000000e+00> : vector<1x128xf32>
    %48 = tpu.matmul %47, %1, %cst_37 {dimension_numbers = #tpu.dot_dimension_numbers<[1], [0], [0], [1], [0, 0, 1, 1], [], []>, precision = #tpu.contract_precision<fp32>} : vector<1x8xf32>, vector<8x128xf32>, vector<1x128xf32> -> vector<1x128xf32>
    %49 = vector.broadcast %48 : vector<1x128xf32> to vector<256x128xf32>
    %50 = arith.subf %42, %49 : vector<256x128xf32>
    %51 = arith.mulf %50, %50 : vector<256x128xf32>
    %cst_38 = arith.constant dense<0.000000e+00> : vector<128xf32>
    %52 = vector.multi_reduction <add>, %51, %cst_38 [0] : vector<256x128xf32> to vector<128xf32>
    %53 = vector.shape_cast %52 : vector<128xf32> to vector<1x128xf32>
    %cst_39 = arith.constant dense<0.000000e+00> : vector<1x8xf32>
    %54 = tpu.matmul %53, %0, %cst_39 {dimension_numbers = #tpu.dot_dimension_numbers<[1], [0], [0], [1], [0, 0, 1, 1], [], []>, precision = #tpu.contract_precision<fp32>} : vector<1x128xf32>, vector<128x8xf32>, vector<1x8xf32> -> vector<1x8xf32>
    %cst_40 = arith.constant 3.906250e-03 : f32
    %55 = vector.broadcast %cst_40 : f32 to vector<1x8xf32>
    %56 = arith.mulf %54, %55 : vector<1x8xf32>
    %cst_41 = arith.constant 9.99999974E-6 : f32
    %57 = vector.broadcast %cst_41 : f32 to vector<1x8xf32>
    %58 = arith.addf %56, %57 : vector<1x8xf32>
    %59 = math.rsqrt %58 : vector<1x8xf32>
    %cst_42 = arith.constant dense<0.000000e+00> : vector<1x128xf32>
    %60 = tpu.matmul %59, %1, %cst_42 {dimension_numbers = #tpu.dot_dimension_numbers<[1], [0], [0], [1], [0, 0, 1, 1], [], []>, precision = #tpu.contract_precision<fp32>} : vector<1x8xf32>, vector<8x128xf32>, vector<1x128xf32> -> vector<1x128xf32>
    %61 = vector.broadcast %60 : vector<1x128xf32> to vector<256x128xf32>
    %62 = arith.mulf %50, %61 : vector<256x128xf32>
    %c0_43 = arith.constant 0 : index
    %c0_44 = arith.constant 0 : index
    %63 = vector.load %arg5[%c0_43, %c0_44] : memref<1x128xf32, #tpu.memory_space<vmem>>, vector<1x128xf32>
    %64 = vector.broadcast %63 : vector<1x128xf32> to vector<256x128xf32>
    %65 = arith.mulf %62, %64 : vector<256x128xf32>
    %c0_45 = arith.constant 0 : index
    %c0_46 = arith.constant 0 : index
    %66 = vector.load %arg6[%c0_45, %c0_46] : memref<1x128xf32, #tpu.memory_space<vmem>>, vector<1x128xf32>
    %67 = vector.broadcast %66 : vector<1x128xf32> to vector<256x128xf32>
    %68 = arith.addf %65, %67 : vector<256x128xf32>
    %cst_47 = arith.constant 5.000000e-01 : f32
    %69 = vector.broadcast %cst_47 : f32 to vector<256x128xf32>
    %70 = arith.mulf %69, %68 : vector<256x128xf32>
    %cst_48 = arith.constant 4.471500e-02 : f32
    %71 = vector.broadcast %cst_48 : f32 to vector<256x128xf32>
    %72 = arith.mulf %71, %68 : vector<256x128xf32>
    %73 = arith.mulf %72, %68 : vector<256x128xf32>
    %74 = arith.mulf %73, %68 : vector<256x128xf32>
    %75 = arith.addf %68, %74 : vector<256x128xf32>
    %cst_49 = arith.constant 0.797884583 : f32
    %76 = vector.broadcast %cst_49 : f32 to vector<256x128xf32>
    %77 = arith.mulf %76, %75 : vector<256x128xf32>
    %78 = math.tanh %77 : vector<256x128xf32>
    %cst_50 = arith.constant 1.000000e+00 : f32
    %79 = vector.broadcast %cst_50 : f32 to vector<256x128xf32>
    %80 = arith.addf %79, %78 : vector<256x128xf32>
    %81 = arith.mulf %70, %80 : vector<256x128xf32>
    %c0_51 = arith.constant 0 : index
    %c0_52 = arith.constant 0 : index
    %c0_53 = arith.constant 0 : index
    %82 = vector.load %arg11[%c0_51, %c0_52, %c0_53] : memref<1x1x128xf32, #tpu.memory_space<vmem>>, vector<1x1x128xf32>
    %83 = vector.shape_cast %82 : vector<1x1x128xf32> to vector<1x128xf32>
    %84 = vector.broadcast %83 : vector<1x128xf32> to vector<256x128xf32>
    %85 = arith.addf %81, %84 : vector<256x128xf32>
    %c24_54 = arith.constant 24 : index
    %c0_55 = arith.constant 0 : index
    %86 = vector.load %arg14[%c24_54, %c0_55] : memref<304x128xf32, #tpu.memory_space<vmem>>, vector<256x128xf32>
    tpu.vector_store %arg14[%c24_54, %c0_55], %85 {strides = array<i32>} : memref<304x128xf32, #tpu.memory_space<vmem>>, vector<256x128xf32>,
    %c7_56 = arith.constant 7 : index
    %c0_57 = arith.constant 0 : index
    %87 = vector.load %arg14[%c7_56, %c0_57] : memref<304x128xf32, #tpu.memory_space<vmem>>, vector<288x128xf32>
    %88 = vector.broadcast %2 : vector<288x1xf32> to vector<288x128xf32>
    %89 = arith.mulf %87, %88 : vector<288x128xf32>
    %90 = arith.truncf %89 : vector<288x128xf32> to vector<288x128xbf16>
    %c8_58 = arith.constant 8 : index
    %c0_59 = arith.constant 0 : index
    %91 = vector.load %arg14[%c8_58, %c0_59] : memref<304x128xf32, #tpu.memory_space<vmem>>, vector<288x128xf32>
    %92 = arith.truncf %91 : vector<288x128xf32> to vector<288x128xbf16>
    %c9_60 = arith.constant 9 : index
    %c0_61 = arith.constant 0 : index
    %93 = vector.load %arg14[%c9_60, %c0_61] : memref<304x128xf32, #tpu.memory_space<vmem>>, vector<288x128xf32>
    %94 = vector.broadcast %3 : vector<288x1xf32> to vector<288x128xf32>
    %95 = arith.mulf %93, %94 : vector<288x128xf32>
    %96 = arith.truncf %95 : vector<288x128xf32> to vector<288x128xbf16>
    %97 = vector.extract_strided_slice %90 {offsets = [0, 0], sizes = [256, 128], strides = [1, 1]} : vector<288x128xbf16> to vector<256x128xbf16>
    %c0_62 = arith.constant 0 : index
    %c0_63 = arith.constant 0 : index
    %98 = vector.load %arg15[%c0_62, %c0_63] : memref<256x1152xbf16, #tpu.memory_space<vmem>>, vector<256x128xbf16>
    tpu.vector_store %arg15[%c0_62, %c0_63], %97 {strides = array<i32>} : memref<256x1152xbf16, #tpu.memory_space<vmem>>, vector<256x128xbf16>,
    %99 = vector.extract_strided_slice %92 {offsets = [0, 0], sizes = [256, 128], strides = [1, 1]} : vector<288x128xbf16> to vector<256x128xbf16>
    %c0_64 = arith.constant 0 : index
    %c128_65 = arith.constant 128 : index
    %100 = vector.load %arg15[%c0_64, %c128_65] : memref<256x1152xbf16, #tpu.memory_space<vmem>>, vector<256x128xbf16>
    tpu.vector_store %arg15[%c0_64, %c128_65], %99 {strides = array<i32>} : memref<256x1152xbf16, #tpu.memory_space<vmem>>, vector<256x128xbf16>,
    %101 = vector.extract_strided_slice %96 {offsets = [0, 0], sizes = [256, 128], strides = [1, 1]} : vector<288x128xbf16> to vector<256x128xbf16>
    %c0_66 = arith.constant 0 : index
    %c256_67 = arith.constant 256 : index
    %102 = vector.load %arg15[%c0_66, %c256_67] : memref<256x1152xbf16, #tpu.memory_space<vmem>>, vector<256x128xbf16>
    tpu.vector_store %arg15[%c0_66, %c256_67], %101 {strides = array<i32>} : memref<256x1152xbf16, #tpu.memory_space<vmem>>, vector<256x128xbf16>,
    %103 = vector.extract_strided_slice %90 {offsets = [16, 0], sizes = [256, 128], strides = [1, 1]} : vector<288x128xbf16> to vector<256x128xbf16>
    %c0_68 = arith.constant 0 : index
    %c384_69 = arith.constant 384 : index
    %104 = vector.load %arg15[%c0_68, %c384_69] : memref<256x1152xbf16, #tpu.memory_space<vmem>>, vector<256x128xbf16>
    tpu.vector_store %arg15[%c0_68, %c384_69], %103 {strides = array<i32>} : memref<256x1152xbf16, #tpu.memory_space<vmem>>, vector<256x128xbf16>,
    %105 = vector.extract_strided_slice %92 {offsets = [16, 0], sizes = [256, 128], strides = [1, 1]} : vector<288x128xbf16> to vector<256x128xbf16>
    %c0_70 = arith.constant 0 : index
    %c512_71 = arith.constant 512 : index
    %106 = vector.load %arg15[%c0_70, %c512_71] : memref<256x1152xbf16, #tpu.memory_space<vmem>>, vector<256x128xbf16>
    tpu.vector_store %arg15[%c0_70, %c512_71], %105 {strides = array<i32>} : memref<256x1152xbf16, #tpu.memory_space<vmem>>, vector<256x128xbf16>,
    %107 = vector.extract_strided_slice %96 {offsets = [16, 0], sizes = [256, 128], strides = [1, 1]} : vector<288x128xbf16> to vector<256x128xbf16>
    %c0_72 = arith.constant 0 : index
    %c640_73 = arith.constant 640 : index
    %108 = vector.load %arg15[%c0_72, %c640_73] : memref<256x1152xbf16, #tpu.memory_space<vmem>>, vector<256x128xbf16>
    tpu.vector_store %arg15[%c0_72, %c640_73], %107 {strides = array<i32>} : memref<256x1152xbf16, #tpu.memory_space<vmem>>, vector<256x128xbf16>,
    %109 = vector.extract_strided_slice %90 {offsets = [32, 0], sizes = [256, 128], strides = [1, 1]} : vector<288x128xbf16> to vector<256x128xbf16>
    %c0_74 = arith.constant 0 : index
    %c768_75 = arith.constant 768 : index
    %110 = vector.load %arg15[%c0_74, %c768_75] : memref<256x1152xbf16, #tpu.memory_space<vmem>>, vector<256x128xbf16>
    tpu.vector_store %arg15[%c0_74, %c768_75], %109 {strides = array<i32>} : memref<256x1152xbf16, #tpu.memory_space<vmem>>, vector<256x128xbf16>,
    %111 = vector.extract_strided_slice %92 {offsets = [32, 0], sizes = [256, 128], strides = [1, 1]} : vector<288x128xbf16> to vector<256x128xbf16>
    %c0_76 = arith.constant 0 : index
    %c896_77 = arith.constant 896 : index
    %112 = vector.load %arg15[%c0_76, %c896_77] : memref<256x1152xbf16, #tpu.memory_space<vmem>>, vector<256x128xbf16>
    tpu.vector_store %arg15[%c0_76, %c896_77], %111 {strides = array<i32>} : memref<256x1152xbf16, #tpu.memory_space<vmem>>, vector<256x128xbf16>,
    %113 = vector.extract_strided_slice %96 {offsets = [32, 0], sizes = [256, 128], strides = [1, 1]} : vector<288x128xbf16> to vector<256x128xbf16>
    %c0_78 = arith.constant 0 : index
    %c1024_79 = arith.constant 1024 : index
    %114 = vector.load %arg15[%c0_78, %c1024_79] : memref<256x1152xbf16, #tpu.memory_space<vmem>>, vector<256x128xbf16>
    tpu.vector_store %arg15[%c0_78, %c1024_79], %113 {strides = array<i32>} : memref<256x1152xbf16, #tpu.memory_space<vmem>>, vector<256x128xbf16>,
    %c0_80 = arith.constant 0 : index
    %c0_81 = arith.constant 0 : index
    %115 = vector.load %arg15[%c0_80, %c0_81] : memref<256x1152xbf16, #tpu.memory_space<vmem>>, vector<256x1152xbf16>
    %c0_82 = arith.constant 0 : index
    %c0_83 = arith.constant 0 : index
    %116 = vector.load %arg4[%c0_82, %c0_83] : memref<1152x128xbf16, #tpu.memory_space<vmem>>, vector<1152x128xbf16>
    %cst_84 = arith.constant dense<0.000000e+00> : vector<256x128xf32>
    %117 = tpu.matmul %115, %116, %cst_84 {dimension_numbers = #tpu.dot_dimension_numbers<[1], [0], [0], [1], [0, 0, 1, 1], [], []>} : vector<256x1152xbf16>, vector<1152x128xbf16>, vector<256x128xf32> -> vector<256x128xf32>
    %cst_85 = arith.constant dense<0.000000e+00> : vector<128xf32>
    %118 = vector.multi_reduction <add>, %117, %cst_85 [0] : vector<256x128xf32> to vector<128xf32>
    %119 = vector.shape_cast %118 : vector<128xf32> to vector<1x128xf32>
    %cst_86 = arith.constant dense<0.000000e+00> : vector<1x8xf32>
    %120 = tpu.matmul %119, %0, %cst_86 {dimension_numbers = #tpu.dot_dimension_numbers<[1], [0], [0], [1], [0, 0, 1, 1], [], []>, precision = #tpu.contract_precision<fp32>} : vector<1x128xf32>, vector<128x8xf32>, vector<1x8xf32> -> vector<1x8xf32>
    %cst_87 = arith.constant 3.906250e-03 : f32
    %121 = vector.broadcast %cst_87 : f32 to vector<1x8xf32>
    %122 = arith.mulf %120, %121 : vector<1x8xf32>
    %cst_88 = arith.constant dense<0.000000e+00> : vector<1x128xf32>
    %123 = tpu.matmul %122, %1, %cst_88 {dimension_numbers = #tpu.dot_dimension_numbers<[1], [0], [0], [1], [0, 0, 1, 1], [], []>, precision = #tpu.contract_precision<fp32>} : vector<1x8xf32>, vector<8x128xf32>, vector<1x128xf32> -> vector<1x128xf32>
    %124 = vector.broadcast %123 : vector<1x128xf32> to vector<256x128xf32>
    %125 = arith.subf %117, %124 : vector<256x128xf32>
    %126 = arith.mulf %125, %125 : vector<256x128xf32>
    %cst_89 = arith.constant dense<0.000000e+00> : vector<128xf32>
    %127 = vector.multi_reduction <add>, %126, %cst_89 [0] : vector<256x128xf32> to vector<128xf32>
    %128 = vector.shape_cast %127 : vector<128xf32> to vector<1x128xf32>
    %cst_90 = arith.constant dense<0.000000e+00> : vector<1x8xf32>
    %129 = tpu.matmul %128, %0, %cst_90 {dimension_numbers = #tpu.dot_dimension_numbers<[1], [0], [0], [1], [0, 0, 1, 1], [], []>, precision = #tpu.contract_precision<fp32>} : vector<1x128xf32>, vector<128x8xf32>, vector<1x8xf32> -> vector<1x8xf32>
    %cst_91 = arith.constant 3.906250e-03 : f32
    %130 = vector.broadcast %cst_91 : f32 to vector<1x8xf32>
    %131 = arith.mulf %129, %130 : vector<1x8xf32>
    %cst_92 = arith.constant 9.99999974E-6 : f32
    %132 = vector.broadcast %cst_92 : f32 to vector<1x8xf32>
    %133 = arith.addf %131, %132 : vector<1x8xf32>
    %134 = math.rsqrt %133 : vector<1x8xf32>
    %cst_93 = arith.constant dense<0.000000e+00> : vector<1x128xf32>
    %135 = tpu.matmul %134, %1, %cst_93 {dimension_numbers = #tpu.dot_dimension_numbers<[1], [0], [0], [1], [0, 0, 1, 1], [], []>, precision = #tpu.contract_precision<fp32>} : vector<1x8xf32>, vector<8x128xf32>, vector<1x128xf32> -> vector<1x128xf32>
    %136 = vector.broadcast %135 : vector<1x128xf32> to vector<256x128xf32>
    %137 = arith.mulf %125, %136 : vector<256x128xf32>
    %c0_94 = arith.constant 0 : index
    %c0_95 = arith.constant 0 : index
    %138 = vector.load %arg7[%c0_94, %c0_95] : memref<1x128xf32, #tpu.memory_space<vmem>>, vector<1x128xf32>
    %139 = vector.broadcast %138 : vector<1x128xf32> to vector<256x128xf32>
    %140 = arith.mulf %137, %139 : vector<256x128xf32>
    %c0_96 = arith.constant 0 : index
    %c0_97 = arith.constant 0 : index
    %141 = vector.load %arg8[%c0_96, %c0_97] : memref<1x128xf32, #tpu.memory_space<vmem>>, vector<1x128xf32>
    %142 = vector.broadcast %141 : vector<1x128xf32> to vector<256x128xf32>
    %143 = arith.addf %140, %142 : vector<256x128xf32>
    %cst_98 = arith.constant 5.000000e-01 : f32
    %144 = vector.broadcast %cst_98 : f32 to vector<256x128xf32>
    %145 = arith.mulf %144, %143 : vector<256x128xf32>
    %cst_99 = arith.constant 4.471500e-02 : f32
    %146 = vector.broadcast %cst_99 : f32 to vector<256x128xf32>
    %147 = arith.mulf %146, %143 : vector<256x128xf32>
    %148 = arith.mulf %147, %143 : vector<256x128xf32>
    %149 = arith.mulf %148, %143 : vector<256x128xf32>
    %150 = arith.addf %143, %149 : vector<256x128xf32>
    %cst_100 = arith.constant 0.797884583 : f32
    %151 = vector.broadcast %cst_100 : f32 to vector<256x128xf32>
    %152 = arith.mulf %151, %150 : vector<256x128xf32>
    %153 = math.tanh %152 : vector<256x128xf32>
    %cst_101 = arith.constant 1.000000e+00 : f32
    %154 = vector.broadcast %cst_101 : f32 to vector<256x128xf32>
    %155 = arith.addf %154, %153 : vector<256x128xf32>
    %156 = arith.mulf %145, %155 : vector<256x128xf32>
    %157 = arith.addf %156, %10 : vector<256x128xf32>
    %158 = vector.shape_cast %157 : vector<256x128xf32> to vector<1x256x128xf32>
    %c0_102 = arith.constant 0 : index
    %c0_103 = arith.constant 0 : index
    %c0_104 = arith.constant 0 : index
    %159 = vector.load %arg13[%c0_102, %c0_103, %c0_104] : memref<1x256x128xf32, #tpu.memory_space<vmem>>, vector<1x256x128xf32>
    tpu.vector_store %arg13[%c0_102, %c0_103, %c0_104], %158 {strides = array<i32>} : memref<1x256x128xf32, #tpu.memory_space<vmem>>, vector<1x256x128xf32>,
    return
  }
  func.func @transform_0(%arg0: i32) -> (i32, i32, i32) {
    %c0_i32 = arith.constant 0 : i32
    %c0_i32_0 = arith.constant 0 : i32
    %c0_i32_1 = arith.constant 0 : i32
    return %arg0, %c0_i32, %c0_i32_0 : i32, i32, i32
  }
  func.func @transform_1(%arg0: i32) -> (i32, i32) {
    %c0_i32 = arith.constant 0 : i32
    %c0_i32_0 = arith.constant 0 : i32
    %c0_i32_1 = arith.constant 0 : i32
    return %c0_i32, %c0_i32_0 : i32, i32
  }
  func.func @transform_2(%arg0: i32) -> (i32, i32) {
    %c0_i32 = arith.constant 0 : i32
    %c0_i32_0 = arith.constant 0 : i32
    %c0_i32_1 = arith.constant 0 : i32
    return %c0_i32, %c0_i32_0 : i32, i32
  }
  func.func @transform_3(%arg0: i32) -> (i32, i32) {
    %c0_i32 = arith.constant 0 : i32
    %c0_i32_0 = arith.constant 0 : i32
    %c0_i32_1 = arith.constant 0 : i32
    return %c0_i32, %c0_i32_0 : i32, i32
  }
  func.func @transform_4(%arg0: i32) -> (i32, i32) {
    %c0_i32 = arith.constant 0 : i32
    %c0_i32_0 = arith.constant 0 : i32
    %c0_i32_1 = arith.constant 0 : i32
    return %c0_i32, %c0_i32_0 : i32, i32
  }
  func.func @transform_5(%arg0: i32) -> (i32, i32) {
    %c0_i32 = arith.constant 0 : i32
    %c0_i32_0 = arith.constant 0 : i32
    %c0_i32_1 = arith.constant 0 : i32
    return %c0_i32, %c0_i32_0 : i32, i32
  }
  func.func @transform_6(%arg0: i32) -> (i32, i32) {
    %c0_i32 = arith.constant 0 : i32
    %c0_i32_0 = arith.constant 0 : i32
    %c0_i32_1 = arith.constant 0 : i32
    return %c0_i32, %c0_i32_0 : i32, i32
  }
  func.func @transform_7(%arg0: i32) -> (i32, i32) {
    %c0_i32 = arith.constant 0 : i32
    %c0_i32_0 = arith.constant 0 : i32
    %c0_i32_1 = arith.constant 0 : i32
    return %c0_i32, %c0_i32_0 : i32, i32
  }
  func.func @transform_8(%arg0: i32) -> (i32, i32) {
    %c0_i32 = arith.constant 0 : i32
    %c0_i32_0 = arith.constant 0 : i32
    %c0_i32_1 = arith.constant 0 : i32
    return %c0_i32, %c0_i32_0 : i32, i32
  }
  func.func @transform_9(%arg0: i32) -> (i32, i32) {
    %c0_i32 = arith.constant 0 : i32
    %c0_i32_0 = arith.constant 0 : i32
    %c0_i32_1 = arith.constant 0 : i32
    return %c0_i32, %c0_i32_0 : i32, i32
  }
  func.func @transform_10(%arg0: i32) -> (i32, i32, i32) {
    %c0_i32 = arith.constant 0 : i32
    %c0_i32_0 = arith.constant 0 : i32
    %c0_i32_1 = arith.constant 0 : i32
    return %arg0, %c0_i32, %c0_i32_0 : i32, i32, i32
  }
  func.func @transform_11(%arg0: i32) -> (i32, i32) {
    %c0_i32 = arith.constant 0 : i32
    %c0_i32_0 = arith.constant 0 : i32
    %c0_i32_1 = arith.constant 0 : i32
    return %c0_i32, %c0_i32_0 : i32, i32
  }
  func.func @transform_12(%arg0: i32) -> (i32, i32, i32) {
    %c0_i32 = arith.constant 0 : i32
    %c0_i32_0 = arith.constant 0 : i32
    %c0_i32_1 = arith.constant 0 : i32
    return %arg0, %c0_i32, %c0_i32_0 : i32, i32, i32
  }
}

</mosaic_0001>

<bundles_post_ra>
// kernel: tpu_custom_call.1
= control target key start
LH: loop header
LB: loop body
LE: loop exit
PB: predicated region body
PF: predicated region fallthrough
CT: control target
= control target key end

     0   :  { %17 = vsyncpa [#allocation5], 0  ;;  %s17107_s0 = inlined_call_operand.vmem [shape: bf16[2,256,4], index: 0, kind: input, shape index: {}]   ;;  %s17108_s1 = inlined_call_operand.vmem [shape: bf16[4,128], index: 1, kind: input, shape index: {}]   ;;  %s17109_s2 = inlined_call_operand.hbm [shape: bf16[1152,128], index: 2, kind: input, shape index: {}]   ;;  %s17110_s3 = inlined_call_operand.hbm [shape: bf16[1152,128], index: 3, kind: input, shape index: {}]   ;;  %s17111_s4 = inlined_call_operand.vmem [shape: f32[1,128], index: 4, kind: input, shape index: {}]   ;;  %s17112_s5 = inlined_call_operand.vmem [shape: f32[1,128], index: 5, kind: input, shape index: {}]   ;;  %s17113_s6 = inlined_call_operand.vmem [shape: f32[1,128], index: 6, kind: input, shape index: {}]   ;;  %s17114_s7 = inlined_call_operand.vmem [shape: f32[1,128], index: 7, kind: input, shape index: {}]   ;;  %s17115_s8 = inlined_call_operand.vmem [shape: f32[128,8], index: 8, kind: input, shape index: {}]   ;;  %s17116_s9 = inlined_call_operand.vmem [shape: f32[8,128], index: 9, kind: input, shape index: {}]   ;;  %s17117_s10 = inlined_call_operand.vmem [shape: f32[2,1,128], index: 10, kind: input, shape index: {}]   ;;  %s17118_s11 = inlined_call_operand.vmem [shape: f32[288,2], index: 11, kind: input, shape index: {}]   ;;  %s17119_s12 = inlined_call_operand.hbm [shape: f32[2,256,128], index: 12, kind: output, shape index: {}]  }
   0x1   :  { %18 = vsyncpa [#allocation8], 0 }
   0x2   :  { %19 = vsyncpa [#allocation6], 0 }
   0x3   :  { %21 = vsyncpa [#allocation6 + $0x1], 0  ;;  %s12822_s21 = smov 0   ;;  %s12824_s22 = smov 0  }
   0x4   :  { %s12826_s23 = smov 0   ;;  %s12828_s24 = smov 0  }
   0x5 LB: > { %17536 = sst [smem:[#allocation13_spill]] %s12741_s23  ;;  %s12843_s25 = sadd.s32 4294967295, %s12745_s24   ;;  %s12745_s24 = sphi %s12828_s24, %s18476_s24   ;;  %s12741_s23 = sphi %s12826_s23, %s18478_s23   ;;  %s12737_s22 = sphi %s12824_s22, %s18480_s22   ;;  %s12733_s21 = sphi %s12822_s21, %s18479_s21  }
   0x6   : > { %s10121_s26 = sadd.s32 4294967294, %s12745_s24   ;;  %s12847_s27 = sadd.s32 1, %s12745_s24  }
   0x7   : > { %17537 = sst [smem:[#allocation14_spill]] %s12847_s27  ;;  %s296_s28 = sadd.s32 1, %s12741_s23 }
   0x8   : > { %s293_s29 = ssub.s32 %s12745_s24, %s12847_s27  ;;  %p306_p0 = scmp.ne.s32.totalorder %s12741_s23, %s12737_s22 }
   0x9   : > { %p294_p1 = scmp.eq.s32.totalorder %s293_s29, 0  ;;  %p307_p2 = scmp.eq.s32.totalorder %s12843_s25, 1 }
   0xa   : > { %p312_p3 = scmp.ne.s32.totalorder %s12737_s22, %s12733_s21  ;;  %p313_p4 = scmp.eq.s32.totalorder %s10121_s26, 1 }
   0xb   : > { %s12858_s30 = scalar_select %p294_p1, %s12741_s23, %s296_s28  }
   0xc   : > { %p12860_p5 = por %p307_p2, %p306_p0  ;;  %p12864_p6 = por %p313_p4, %p312_p3 }
   0xd   : > { %17538 = sst [smem:[#allocation15_spill]] %s12858_s30  ;;  %p10122_p7 = scmp.ge.s32.totalorder %s12745_s24, 1 }
   0xe   : > { %p320_p8 = scmp.lt.s32.totalorder %s12745_s24, 3  ;;  %p12418_p9 = scmp.eq.s32.totalorder %s12843_s25, 0 }
   0xf   : > { %s334_s18 = sshll.u32 %s17109_s2, 4  ;;  %s12747_s19 = smov [#allocation4]   ;;  %s335_s18 = int_to_ptr.hbm [resolvable:$true] %s334_s18 }
  0x10   : > { %p12871_p10 = pnand %p10122_p7, %p320_p8  ;;  %s336_s20 = sshll.u32 %s12747_s19, 4  ;;  %s337_s20 = int_to_ptr.vmem [resolvable:$true] %s336_s20 }
  0x11   : > { %s348_s29 = sshll.u32 %s17110_s3, 4  ;;  %s12748_s30 = smov 64   ;;  %s349_s29 = int_to_ptr.hbm [resolvable:$true] %s348_s29 }
  0x12   : > { %p12407_p11 = pneg %p12871_p10  ;;  %s12749_s23 = smov 4  }
  0x13   : > { %s12750_s27 = smov [#allocation7]   ;;  %401 = sbr.rel (%p12871_p10) target bundleno = 4001 (0xfa1), region = 68 }
  0x14   : > { %p12408_p12 = pnand %p12418_p9, %p12407_p11  ;;  %s350_s16 = sshll.u32 %s12750_s27, 4  ;;  %s351_s16 = int_to_ptr.vmem [resolvable:$true] %s350_s16 }
  0x16   : > { %12410 = dma.hbm_to_vmem [thread:$0]  (!%p12408_p12), %s335_s18, 9216, %s337_s20, [#allocation5], %s12748_s30, %s12748_s30, %s12749_s23  }
  0x17   : > { %12413 = dma.hbm_to_vmem [thread:$0]  (!%p12408_p12), %s349_s29, 9216, %s351_s16, [#allocation8], %s12748_s30, %s12748_s30, %s12749_s23  }
  0x18   : > { %12720 = dma.done.wait (%p12418_p9), [#allocation5], 9216  }
  0x19   : > { %12722 = vsyncadd (%p12418_p9), [#allocation5], 4294958080 }
  0x1a   : > { %12724 = dma.done.wait (%p12418_p9), [#allocation8], 9216  }
  0x1b   : > { %12726 = vsyncadd (%p12418_p9), [#allocation8], 4294958080  ;;  %p452_p13 = scmp.lt.s32.totalorder %s12843_s25, 1  ;;  %v17123_v0 = vmov 0   ;;  %vm682_vm0 = vcmask 1041408   ;;  %v12911_v1 = vld [vmem:[%s17118_s11 + $0x20] sm:$0xff] }
  0x1c   : > { %12466 = vset.pattern.permute.xlu2 %v17123_v0  ;;  %12465 = vset.pattern.permute.xlu1 %v17123_v0  ;;  %v12916_v2 = vld [vmem:[%s17118_s11 + $0x10] sm:$0xff]  ;;  %v12921_v3 = vld [vmem:[%s17118_s11] sm:$0xff]  ;;  %vm633_vm1 = vcmask 31744   ;;  %v12941_v9 = vld [vmem:[%s17118_s11 + $0x28] sm:$0xff]  ;;  %v12752_v47 = vmov 0.0   ;;  %v17125_v51 = vmov 1  }
  0x1d   : > { %12464 = vset.pattern.permute.xlu0 %v17123_v0  ;;  %s12900_s23 = scalar_select %p452_p13, %s12843_s25, 1  ;;  %865 = vperm.xlu2 %12466, %v12911_v1   ;;  %v552_v4 = vld [vmem:[%s17108_s1] sm:$0x3]  ;;  %v12946_v10 = vld [vmem:[%s17118_s11 + $0x18] sm:$0xff]  ;;  %v12951_v11 = vld [vmem:[%s17118_s11 + $0x8] sm:$0xff]  ;;  %514 = vst [vmem:[#allocation2] sm:$0xff] %v12752_v47 }
  0x1e   : > { %855 = vperm.xlu1 %12465, %v12916_v2   ;;  %845 = vperm.xlu0 %12464, %v12921_v3   ;;  %v684_v5 = vsel %vm682_vm0, %v552_v4, 0  ;;  %v12960_v12 = vld [vmem:[%s17118_s11 + $0x40] sm:$0xff]  ;;  %v12965_v13 = vld [vmem:[%s17118_s11 + $0x38] sm:$0xff]  ;;  %v12970_v14 = vld [vmem:[%s17118_s11 + $0x30] sm:$0xff]  ;;  %515 = vst [vmem:[#allocation2 + $0x8] sm:$0xff] %v12752_v47  ;;  %v12754_v60 = vmov 0.0|0.0  }
  0x1f   : > { %s11945_s27 = sshll.u32 %s12900_s23, 7  ;;  %s459_s30 = scalar_lea.vmem %s17117_s10, %s12900_s23  ;;  %693 = vmatpush.bf16.msra.mxu0 %v684_v5  ;;  %12395 = vmatpush.bf16.msra.mxu1 %v684_v5  ;;  %v12983_v18 = vld [vmem:[%s17118_s11 + $0x58] sm:$0xff]  ;;  %v12988_v19 = vld [vmem:[%s17118_s11 + $0x50] sm:$0xff]  ;;  %v12993_v20 = vld [vmem:[%s17118_s11 + $0x48] sm:$0xff]  ;;  %516 = vst [vmem:[#allocation2 + $0x10] sm:$0xff] %v12752_v47  ;;  %vm4359_vm2 = vcmask 64512  }
  0x20   : > { %s12906_s17 = scalar_lea.vmem %s17107_s0, %s11945_s27  ;;  %12396 = vmatpush.bf16.msra.mxu3 %v684_v5  ;;  %v13002_v21 = vld [vmem:[%s17118_s11 + $0x70] sm:$0xff]  ;;  %v13007_v22 = vld [vmem:[%s17118_s11 + $0x68] sm:$0xff]  ;;  %v13012_v23 = vld [vmem:[%s17118_s11 + $0x60] sm:$0xff]  ;;  %517 = vst [vmem:[#allocation2 + $0x118] sm:$0xff] %v12752_v47  ;;  %s12394_s27 = sshll.u32 %s12843_s25, 8 }
  0x21   : > { %v11946_v6 = vld [vmem:[%s12906_s17] sm:$0xff]  ;;  %v11957_v7 = vld [vmem:[%s12906_s17 + $0x58] sm:$0xff]  ;;  %v11959_v8 = vld [vmem:[%s12906_s17 + $0x68] sm:$0xff]  ;;  %518 = vst [vmem:[#allocation2 + $0x120] sm:$0xff] %v12752_v47  ;;  %s10024_s18 = scalar_lea.hbm %s17119_s12, %s12394_s27  ;;  %s12695_s27 = scalar_lea.hbm %s17119_s12, 512 }
  0x22   : > { %10196 = vmatmul.msk.bf16.vlgmr.msra.gmra.mxu0 %vm633_vm1, %v11946_v6  ;;  %10207 = vmatmul.msk.bf16.vlgmr.msra.gmra.mxu1 %vm633_vm1, %v11957_v7  ;;  %v11947_v15 = vld [vmem:[%s12906_s17 + $0x8] sm:$0xff]  ;;  %v11958_v16 = vld [vmem:[%s12906_s17 + $0x60] sm:$0xff]  ;;  %v11960_v17 = vld [vmem:[%s12906_s17 + $0x70] sm:$0xff]  ;;  %519 = vst [vmem:[#allocation2 + $0x128] sm:$0xff] %v12752_v47  ;;  %s10027_s20 = sshll.u32 %s10024_s18, 4  ;;  %s10028_s20 = int_to_ptr.hbm [resolvable:$true] %s10027_s20 }
  0x23   : > { %10209 = vmatmul.msk.bf16.vlgmr.msra.gmra.mxu3 %vm633_vm1, %v11959_v8  ;;  %v11948_v24 = vld [vmem:[%s12906_s17 + $0x10] sm:$0xff]  ;;  %v13022_v25 = vld [vmem:[%s17118_s11 + $0x88] sm:$0xff]  ;;  %v13027_v26 = vld [vmem:[%s17118_s11 + $0x80] sm:$0xff]  ;;  %1451 = vst [vmem:[#allocation3 + $0x4] sm:$0xf] %v12754_v60 }
  0x24   : > { %v13032_v27 = vld [vmem:[%s17118_s11 + $0x78] sm:$0xff]  ;;  %v13040_v28 = vld [vmem:[%s17118_s11 + $0xa0] sm:$0xff]  ;;  %v13050_v30 = vld [vmem:[%s17118_s11 + $0x90] sm:$0xff]  ;;  %1452 = vst [vmem:[#allocation3 + $0x28] sm:$0xf] %v12754_v60 }
  0x25   : > { %870 = vperm.xlu2 %12466, %v12941_v9   ;;  %v13045_v29 = vld [vmem:[%s17118_s11 + $0x98] sm:$0xff]  ;;  %v13065_v33 = vld [vmem:[%s17118_s11 + $0xb0] sm:$0xff]  ;;  %v13070_v34 = vld [vmem:[%s17118_s11 + $0xa8] sm:$0xff] }
  0x26   : > { %860 = vperm.xlu1 %12465, %v12946_v10   ;;  %850 = vperm.xlu0 %12464, %v12951_v11   ;;  %v11949_v31 = vld [vmem:[%s12906_s17 + $0x18] sm:$0xff]  ;;  %v13078_v35 = vld [vmem:[%s17118_s11 + $0xd0] sm:$0xff]  ;;  %v13083_v36 = vld [vmem:[%s17118_s11 + $0xc8] sm:$0xff] }
  0x27   : > { %v13060_v32 = vld [vmem:[%s17118_s11 + $0xb8] sm:$0xff]  ;;  %v13088_v37 = vld [vmem:[%s17118_s11 + $0xc0] sm:$0xff]  ;;  %v12121_v39 = vld [vmem:[#allocation4 + $0x78] sm:$0xff] }
  0x28   : > { %v11950_v38 = vld [vmem:[%s12906_s17 + $0x20] sm:$0xff]  ;;  %v13098_v40 = vld [vmem:[%s17118_s11 + $0xe8] sm:$0xff]  ;;  %3268 = vmatpush.bf16.msra.mxu2 %v12121_v39  ;;  %v13108_v43 = vld [vmem:[%s17118_s11 + $0xd8] sm:$0xff] }
  0x29   : > { %v13103_v41 = vld [vmem:[%s17118_s11 + $0xe0] sm:$0xff]  ;;  %v12113_v44 = vld [vmem:[#allocation4 + $0x38] sm:$0xff]  ;;  %v12119_v45 = vld [vmem:[#allocation4 + $0x68] sm:$0xff] }
  0x2a   : > { %v12120_v42 = vld [vmem:[#allocation4 + $0x70] sm:$0xff]  ;;  %3179 = vmatpush.bf16.msrb.mxu1 %v12113_v44  ;;  %v13116_v48 = vld [vmem:[%s17118_s11 + $0xf8] sm:$0xff]  ;;  %v13121_v49 = vld [vmem:[%s17118_s11 + $0xf0] sm:$0xff] }
  0x2b   : > { %v12112_v46 = vld [vmem:[#allocation4 + $0x30] sm:$0xff]  ;;  %v12118_v50 = vld [vmem:[#allocation4 + $0x60] sm:$0xff]  ;;  %v11951_v52 = vld [vmem:[%s12906_s17 + $0x28] sm:$0xff] }
  0x2c   : > { %3269 = vmatpush.bf16.msra.mxu2 %v12120_v42  ;;  %v12111_v53 = vld [vmem:[#allocation4 + $0x28] sm:$0xff]  ;;  %v12117_v54 = vld [vmem:[#allocation4 + $0x58] sm:$0xff]  ;;  %v12110_v55 = vld [vmem:[#allocation4 + $0x20] sm:$0xff] }
  0x2d   : > { %885 = vperm.xlu2 %12466, %v12960_v12   ;;  %v12116_v56 = vld [vmem:[#allocation4 + $0x50] sm:$0xff]  ;;  %v12109_v57 = vld [vmem:[#allocation4 + $0x18] sm:$0xff]  ;;  %v12115_v59 = vld [vmem:[#allocation4 + $0x48] sm:$0xff] }
  0x2e   : > { %880 = vperm.xlu1 %12465, %v12965_v13   ;;  %875 = vperm.xlu0 %12464, %v12970_v14   ;;  %v12108_v61 = vld [vmem:[#allocation4 + $0x10] sm:$0xff]  ;;  %v12114_v62 = vld [vmem:[#allocation4 + $0x40] sm:$0xff]  ;;  %v10216_v5 = vld [vmem:[#allocation3 + $0x24] sm:$0xf0] }
  0x2f   : > { %3180 = vmatpush.bf16.msrb.mxu1 %v12112_v46  ;;  %v11952_v63 = vld [vmem:[%s12906_s17 + $0x30] sm:$0xff]  ;;  %5895 = vst [vmem:[#allocation3 + $0x28] sm:$0xf] %v12754_v60  ;;  %v807_v8 = vld [vmem:[#allocation2 + $0x7] sm:$0xff]  ;;  %v12135_v47 = vld [vmem:[#allocation4 + $0xe8] sm:$0xff] }
  0x30   : > { %3270 = vmatpush.bf16.msra.mxu2 %v12119_v45  ;;  %v11962_v4 = vld [vmem:[#allocation3 + $0x4] sm:$0xf] }
  0x31   : > { %5894 = vst [vmem:[#allocation3 + $0x4] sm:$0xf] %v12754_v60  ;;  %v10219_v6 = vor.u32 %v11962_v4, %v10216_v5 }
  0x32   : > { %10197 = vmatmul.msk.bf16.gmra.mxu0 %vm633_vm1, %v11947_v15  ;;  %10208 = vmatmul.msk.bf16.gmra.mxu1 %vm633_vm1, %v11958_v16 }
  0x33   : > { %10210 = vmatmul.msk.bf16.gmra.mxu3 %vm633_vm1, %v11960_v17  ;;  %3181 = vmatpush.bf16.msrb.mxu1 %v12111_v53  ;;  %v808_v17 = vld [vmem:[#allocation2 + $0xf] sm:$0xff] }
  0x34   : > { %3271 = vmatpush.bf16.msra.mxu2 %v12118_v50 }
  0x35   : > { %900 = vperm.xlu2 %12466, %v12983_v18  }
  0x36   : > { %895 = vperm.xlu1 %12465, %v12988_v19   ;;  %890 = vperm.xlu0 %12464, %v12993_v20  }
  0x37   : > { %3182 = vmatpush.bf16.msrb.mxu1 %v12110_v55  ;;  %v11955_v55 = vld [vmem:[%s12906_s17 + $0x48] sm:$0xff] }
  0x38   : > { %3272 = vmatpush.bf16.msra.mxu2 %v12117_v54 }
  0x3b   : > { %3183 = vmatpush.bf16.msrb.mxu1 %v12109_v57 }
  0x3c   : > { %3273 = vmatpush.bf16.msra.mxu2 %v12116_v56 }
  0x3d   : > { %915 = vperm.xlu2 %12466, %v13002_v21  }
  0x3e   : > { %910 = vperm.xlu1 %12465, %v13007_v22   ;;  %905 = vperm.xlu0 %12464, %v13012_v23  }
  0x3f   : > { %3184 = vmatpush.bf16.msrb.mxu1 %v12108_v61 }
  0x40   : > { %3274 = vmatpush.bf16.msra.mxu2 %v12115_v59 }
  0x42   : > { %10198 = vmatmul.msk.bf16.gmra.mxu0 %vm633_vm1, %v11948_v24 }
  0x44   : > { %3275 = vmatpush.bf16.msra.mxu2 %v12114_v62 }
  0x45   : > { %930 = vperm.xlu2 %12466, %v13022_v25  }
  0x46   : > { %925 = vperm.xlu1 %12465, %v13027_v26   ;;  %920 = vperm.xlu0 %12464, %v13032_v27  }
  0x47   : > { %3276 = vmatmul.bf16.vlgmr.msra.gmra.mxu2 %v10219_v6 }
  0x4d   : > { %945 = vperm.xlu2 %12466, %v13040_v28  }
  0x4e   : > { %940 = vperm.xlu1 %12465, %v13045_v29   ;;  %935 = vperm.xlu0 %12464, %v13050_v30  }
  0x52   : > { %10199 = vmatmul.msk.bf16.gmra.mxu0 %vm633_vm1, %v11949_v31  ;;  %v12136_v31 = vld [vmem:[#allocation4 + $0xf0] sm:$0xff] }
  0x55   : > { %960 = vperm.xlu2 %12466, %v13060_v32  }
  0x56   : > { %955 = vperm.xlu1 %12465, %v13065_v33   ;;  %950 = vperm.xlu0 %12464, %v13070_v34  }
  0x5d   : > { %975 = vperm.xlu2 %12466, %v13078_v35  }
  0x5e   : > { %970 = vperm.xlu1 %12465, %v13083_v36   ;;  %965 = vperm.xlu0 %12464, %v13088_v37  }
  0x62   : > { %10200 = vmatmul.msk.bf16.gmra.mxu0 %vm633_vm1, %v11950_v38  ;;  %v11954_v38 = vld [vmem:[%s12906_s17 + $0x40] sm:$0xff] }
  0x65   : > { %990 = vperm.xlu2 %12466, %v13098_v40  }
  0x66   : > { %985 = vperm.xlu1 %12465, %v13103_v41   ;;  %980 = vperm.xlu0 %12464, %v13108_v43  }
  0x6d   : > { %12467 = vset.pattern.permute.xlu2 %v17125_v51 }
  0x6e   : > { %1000 = vperm.xlu1 %12465, %v13116_v48   ;;  %995 = vperm.xlu0 %12464, %v13121_v49  }
  0x6f   : > { %1204 = vperm.xlu2 %12467, %v12921_v3   ;;  %v12107_v3 = vld [vmem:[#allocation4 + $0x8] sm:$0xff] }
  0x70   : > { %3185 = vmatpush.bf16.msrb.mxu1 %v12107_v3 }
  0x72   : > { %10201 = vmatmul.msk.bf16.gmra.mxu0 %vm633_vm1, %v11951_v52 }
  0x76   : > { %12469 = vset.pattern.permute.xlu1 %v17125_v51  ;;  %12468 = vset.pattern.permute.xlu0 %v17125_v51 }
  0x77   : > { %1212 = vperm.xlu1 %12469, %v12916_v2   ;;  %1216 = vperm.xlu2 %12467, %v12946_v10   ;;  %v13134_v58 = vpop.permute.xlu2 %865 }
  0x78   : > { %1208 = vperm.xlu0 %12468, %v12951_v11   ;;  %17542 = vst [vmem:[#allocation16_spill] sm:$0xff] %v13134_v58  ;;  %v12145_v11 = vld [vmem:[#allocation4 + $0x138] sm:$0xff] }
  0x7f   : > { %1220 = vperm.xlu1 %12469, %v12911_v1   ;;  %1224 = vperm.xlu2 %12467, %v12941_v9   ;;  %v13140_v2 = vpop.permute.xlu2 %870  ;;  %v12106_v1 = vld [vmem:[#allocation4] sm:$0xff]  ;;  %v11953_v9 = vld [vmem:[%s12906_s17 + $0x38] sm:$0xff] }
  0x80   : > { %1228 = vperm.xlu0 %12468, %v12970_v14   ;;  %17543 = vst [vmem:[#allocation17_spill] sm:$0xff] %v13140_v2  ;;  %3186 = vmatpush.bf16.msrb.mxu1 %v12106_v1 }
  0x82   : > { %10202 = vmatmul.msk.bf16.gmra.mxu0 %vm633_vm1, %v11952_v63 }
  0x84   : > { %3535 = vmatpush.bf16.msra.mxu1 %v12145_v11 }
  0x87   : > { %1232 = vperm.xlu1 %12469, %v12965_v13   ;;  %1236 = vperm.xlu2 %12467, %v12960_v12   ;;  %v13146_v7 = vpop.permute.xlu2 %885  ;;  %v12137_v13 = vld [vmem:[#allocation4 + $0xf8] sm:$0xff] }
  0x88   : > { %1240 = vperm.xlu0 %12468, %v12993_v20   ;;  %17544 = vst [vmem:[#allocation18_spill] sm:$0xff] %v13146_v7  ;;  %3446 = vmatpush.bf16.msrb.mxu0 %v12137_v13 }
  0x8c   : > { %3447 = vmatpush.bf16.msrb.mxu0 %v12136_v31 }
  0x8f   : > { %1244 = vperm.xlu1 %12469, %v12988_v19   ;;  %v13151_v10 = vpop.permute.xlu2 %900  ;;  %1248 = vperm.xlu2 %12467, %v12983_v18  }
  0x90   : > { %1252 = vperm.xlu0 %12468, %v13012_v23   ;;  %17545 = vst [vmem:[#allocation19_spill] sm:$0xff] %v13151_v10  ;;  %v846_v14 = vpop.permute.xlu0 %845  ;;  %v13155_v16 = vpop.permute.xlu1 %855  ;;  %3448 = vmatpush.bf16.msrb.mxu0 %v12135_v47 }
  0x91   : > { %v1023_v15 = vmul.f32 %v846_v14, %v807_v8  ;;  %17546 = vst [vmem:[#allocation20_spill] sm:$0xff] %v13155_v16  ;;  %v12134_v8 = vld [vmem:[#allocation4 + $0xe0] sm:$0xff] }
  0x92   : > { %10203 = vmatmul.msk.bf16.gmra.mxu0 %vm633_vm1, %v11953_v9  ;;  %v11956_v9 = vld [vmem:[%s12906_s17 + $0x50] sm:$0xff] }
  0x93   : > { %v1059_v12 = vpack.c.bf16 %v1023_v15, %v1023_v15  ;;  %v12133_v15 = vld [vmem:[#allocation4 + $0xd8] sm:$0xff] }
  0x94   : > { %3449 = vmatpush.bf16.msrb.mxu0 %v12134_v8 }
  0x95   : > { %1419 = vst [vmem:[#allocation3] sm:$0xf] %v1059_v12 }
  0x97   : > { %1256 = vperm.xlu1 %12469, %v13007_v22   ;;  %v13159_v19 = vpop.permute.xlu2 %915  ;;  %1260 = vperm.xlu2 %12467, %v13002_v21  }
  0x98   : > { %1264 = vperm.xlu0 %12468, %v13032_v27   ;;  %17547 = vst [vmem:[#allocation21_spill] sm:$0xff] %v13159_v19  ;;  %v851_v18 = vpop.permute.xlu0 %850  ;;  %v13170_v21 = vpop.permute.xlu1 %860  ;;  %3450 = vmatpush.bf16.msrb.mxu0 %v12133_v15 }
  0x99   : > { %v1024_v20 = vmul.f32 %v851_v18, %v808_v17  ;;  %17550 = vst [vmem:[#allocation24_spill] sm:$0xff] %v13170_v21 }
  0x9b   : > { %v1060_v23 = vpack.c.bf16 %v1024_v20, %v1024_v20 }
  0x9c   : > { %v10214_v24 = vld [vmem:[#allocation3] sm:$0xf] }
  0x9d   : > { %1420 = vst [vmem:[#allocation3 + $0x24] sm:$0xf] %v1060_v23 }
  0x9e   : > { %5862 = vst [vmem:[#allocation3] sm:$0xf] %v1059_v12 }
  0x9f   : > { %1268 = vperm.xlu1 %12469, %v13027_v26   ;;  %v13164_v39 = vpop.f32.mrf.mxu0  ;;  %v13167_v22 = vpop.f32.mrf.mxu1  ;;  %1272 = vperm.xlu2 %12467, %v13022_v25  }
  0xa0   : > { %17548 = vst [vmem:[#allocation22_spill] sm:$0xff] %v13164_v39  ;;  %1276 = vperm.xlu0 %12468, %v13050_v30   ;;  %v1133_v27 = vpack.c.bf16 %v13164_v39, %v13164_v39  ;;  %v1155_v26 = vpack.c.bf16 %v13167_v22, %v13167_v22  ;;  %v13177_v42 = vpop.permute.xlu2 %930  ;;  %v13207_v57 = vpop.permute.xlu0 %875 }
  0xa1   : > { %17549 = vst [vmem:[#allocation23_spill] sm:$0xff] %v13167_v22 }
  0xa2   : > { %775 = vst [vmem:[#allocation2 + $0x18] sm:$0xff] %v13164_v39  ;;  %10204 = vmatmul.msk.bf16.gmra.mxu0 %vm633_vm1, %v11954_v38  ;;  %v1167_v38 = vld [vmem:[#allocation2 + $0x9] sm:$0xff] }
  0xa3   : > { %17551 = vst [vmem:[#allocation25_spill] sm:$0xff] %v13177_v42 }
  0xa4   : > { %797 = vst [vmem:[#allocation2 + $0xc8] sm:$0xff] %v13167_v22  ;;  %v11966_v25 = vld [vmem:[#allocation3 + $0x20] sm:$0xf0] }
  0xa5   : > { %1547 = vst [vmem:[#allocation3 + $0x10] sm:$0xf] %v1133_v27  ;;  %v10215_v30 = vor.u32 %v11966_v25, %v10214_v24  ;;  %v12144_v25 = vld [vmem:[#allocation4 + $0x130] sm:$0xff] }
  0xa6   : > { %1453 = vst [vmem:[#allocation3 + $0x4c] sm:$0xf] %v1133_v27  ;;  %v13198_v54 = vpop.f32.mrf.mxu3  ;;  %3536 = vmatpush.bf16.msra.mxu1 %v12144_v25 }
  0xa7   : > { %1475 = vst [vmem:[#allocation3 + $0x364] sm:$0xf] %v1155_v26  ;;  %1280 = vperm.xlu1 %12469, %v13045_v29   ;;  %v13182_v45 = vpop.f32.mrf.mxu0  ;;  %3187 = vmatmul.bf16.vlgmr.msrb.gmra.mxu1 %v10215_v30  ;;  %v13185_v46 = vpop.f32.mrf.mxu1  ;;  %v1159_v61 = vpack.c.bf16 %v13198_v54, %v13198_v54 }
  0xa8   : > { %1569 = vst [vmem:[#allocation3 + $0x328] sm:$0xf] %v1155_v26  ;;  %1288 = vperm.xlu0 %12468, %v13070_v34   ;;  %v1156_v52 = vpack.c.bf16 %v13185_v46, %v13185_v46  ;;  %v13191_v53 = vpop.permute.xlu2 %945  ;;  %1284 = vperm.xlu2 %12467, %v13040_v28   ;;  %v13195_v34 = vpop.permute.xlu1 %880  ;;  %v1134_v31 = vpack.c.bf16 %v13182_v45, %v13182_v45 }
  0xa9   : > { %1663 = vst [vmem:[#allocation3 + $0x2ec] sm:$0xf] %v1155_v26  ;;  %v809_v44 = vld [vmem:[#allocation2 + $0x17] sm:$0xff]  ;;  %v13231_v4 = vpop.permute.xlu0 %890 }
  0xaa   : > { %17552 = vst [vmem:[#allocation26_spill] sm:$0xff] %v13182_v45  ;;  %v1025_v50 = vmul.f32 %v13155_v16, %v809_v44  ;;  %v12131_v26 = vld [vmem:[#allocation4 + $0xc8] sm:$0xff] }
  0xab   : > { %5863 = vst [vmem:[#allocation3 + $0x24] sm:$0xf] %v1060_v23 }
  0xac   : > { %17553 = vst [vmem:[#allocation27_spill] sm:$0xff] %v13185_v46  ;;  %v1061_v29 = vpack.c.bf16 %v1025_v50, %v1025_v50 }
  0xad   : > { %776 = vst [vmem:[#allocation2 + $0x20] sm:$0xff] %v13182_v45 }
  0xae   : > { %17554 = vst [vmem:[#allocation28_spill] sm:$0xff] %v13191_v53  ;;  %v13238_v1 = vpop.f32.mrf.mxu3 }
  0xaf   : > { %798 = vst [vmem:[#allocation2 + $0xd0] sm:$0xff] %v13185_v46  ;;  %1292 = vperm.xlu1 %12469, %v13065_v33   ;;  %v13201_v56 = vpop.f32.mrf.mxu0  ;;  %v13204_v28 = vpop.f32.mrf.mxu1  ;;  %v1160_v11 = vpack.c.bf16 %v13238_v1, %v13238_v1 }
  0xb0   : > { %17555 = vst [vmem:[#allocation29_spill] sm:$0xff] %v13195_v34  ;;  %1300 = vperm.xlu0 %12468, %v13088_v37   ;;  %v1135_v59 = vpack.c.bf16 %v13201_v56, %v13201_v56  ;;  %v13212_v60 = vpop.permute.xlu2 %960  ;;  %1296 = vperm.xlu2 %12467, %v13060_v32   ;;  %v1157_v33 = vpack.c.bf16 %v13204_v28, %v13204_v28  ;;  %v13219_v37 = vpop.permute.xlu1 %895 }
  0xb1   : > { %1476 = vst [vmem:[#allocation3 + $0x388] sm:$0xf] %v1156_v52  ;;  %v13252_v18 = vpop.permute.xlu0 %905 }
  0xb2   : > { %1570 = vst [vmem:[#allocation3 + $0x34c] sm:$0xf] %v1156_v52  ;;  %10205 = vmatmul.msk.bf16.gmra.mxu0 %vm633_vm1, %v11955_v55 }
  0xb3   : > { %1421 = vst [vmem:[#allocation3 + $0x48] sm:$0xf] %v1061_v29 }
  0xb4   : > { %1515 = vst [vmem:[#allocation3 + $0xc] sm:$0xf] %v1061_v29 }
  0xb5   : > { %1664 = vst [vmem:[#allocation3 + $0x310] sm:$0xf] %v1156_v52  ;;  %v12130_v52 = vld [vmem:[#allocation4 + $0xc0] sm:$0xff] }
  0xb6   : > { %17556 = vst [vmem:[#allocation30_spill] sm:$0xff] %v13198_v54 }
  0xb7   : > { %17557 = vst [vmem:[#allocation31_spill] sm:$0xff] %v13201_v56  ;;  %1304 = vperm.xlu1 %12469, %v13083_v36   ;;  %v13226_v63 = vpop.f32.mrf.mxu0 }
  0xb8   : > { %17558 = vst [vmem:[#allocation32_spill] sm:$0xff] %v13204_v28  ;;  %1312 = vperm.xlu0 %12468, %v13108_v43   ;;  %v13228_v3 = vpop.permute.xlu2 %975  ;;  %1308 = vperm.xlu2 %12467, %v13078_v35   ;;  %v1136_v36 = vpack.c.bf16 %v13226_v63, %v13226_v63  ;;  %v13236_v6 = vpop.permute.xlu1 %910 }
  0xb9   : > { %801 = vst [vmem:[#allocation2 + $0xe8] sm:$0xff] %v13198_v54  ;;  %v13267_v29 = vpop.permute.xlu0 %920 }
  0xba   : > { %17559 = vst [vmem:[#allocation33_spill] sm:$0xff] %v13207_v57 }
  0xbb   : > { %777 = vst [vmem:[#allocation2 + $0x28] sm:$0xff] %v13201_v56  ;;  %v11963_v8 = vld [vmem:[#allocation3 + $0xc] sm:$0xf] }
  0xbc   : > { %17560 = vst [vmem:[#allocation34_spill] sm:$0xff] %v13212_v60 }
  0xbd   : > { %799 = vst [vmem:[#allocation2 + $0xd8] sm:$0xff] %v13204_v28 }
  0xbe   : > { %1643 = vst [vmem:[#allocation3 + $0x1c] sm:$0xf] %v1135_v59 }
  0xbf   : > { %1455 = vst [vmem:[#allocation3 + $0x94] sm:$0xf] %v1135_v59  ;;  %1316 = vperm.xlu1 %12469, %v13103_v41   ;;  %v810_v41 = vld [vmem:[#allocation2 + $0x1f] sm:$0xff]  ;;  %v13254_v20 = vpop.f32.mrf.mxu0 }
  0xc0   : > { %17561 = vst [vmem:[#allocation35_spill] sm:$0xff] %v13219_v37  ;;  %1324 = vperm.xlu0 %12468, %v13121_v49   ;;  %v13246_v14 = vpop.permute.xlu2 %990  ;;  %1320 = vperm.xlu2 %12467, %v13098_v40   ;;  %v12132_v40 = vld [vmem:[#allocation4 + $0xd0] sm:$0xff]  ;;  %v1026_v23 = vmul.f32 %v13170_v21, %v810_v41  ;;  %v13259_v24 = vpop.permute.xlu1 %925  ;;  %v1137_v50 = vpack.c.bf16 %v13254_v20, %v13254_v20 }
  0xc1   : > { %1549 = vst [vmem:[#allocation3 + $0x58] sm:$0xf] %v1135_v59  ;;  %3451 = vmatpush.bf16.msrb.mxu0 %v12132_v40  ;;  %v13280_v41 = vpop.permute.xlu0 %935 }
  0xc2   : > { %1477 = vst [vmem:[#allocation3 + $0x3ac] sm:$0xf] %v1157_v33  ;;  %v811_v32 = vld [vmem:[#allocation2 + $0x27] sm:$0xff]  ;;  %10206 = vmatmul.msk.bf16.gmra.mxu0 %vm633_vm1, %v11956_v9 }
  0xc3   : > { %1571 = vst [vmem:[#allocation3 + $0x370] sm:$0xf] %v1157_v33  ;;  %v1027_v62 = vmul.f32 %v13134_v58, %v811_v32 }
  0xc4   : > { %1665 = vst [vmem:[#allocation3 + $0x334] sm:$0xf] %v1157_v33  ;;  %v833_v43 = vld [vmem:[#allocation2 + $0xd7] sm:$0xff] }
  0xc5   : > { %1479 = vst [vmem:[#allocation3 + $0x3f4] sm:$0xf] %v1159_v61  ;;  %v1063_v5 = vpack.c.bf16 %v1027_v62, %v1027_v62  ;;  %v1049_v35 = vmul.f32 %v13228_v3, %v833_v43  ;;  %3452 = vmatpush.bf16.msrb.mxu0 %v12131_v26  ;;  %v12129_v26 = vld [vmem:[#allocation4 + $0xb8] sm:$0xff] }
  0xc6   : > { %17562 = vst [vmem:[#allocation36_spill] sm:$0xff] %v13226_v63  ;;  %3357 = vmatpush.bf16.msrb.mxu3 %v12129_v26 }
  0xc7   : > { %17563 = vst [vmem:[#allocation37_spill] sm:$0xff] %v13228_v3  ;;  %v1085_v13 = vpack.c.bf16 %v1049_v35, %v1049_v35  ;;  %1328 = vperm.xlu1 %12469, %v13116_v48   ;;  %v1062_v48 = vpack.c.bf16 %v1026_v23, %v1026_v23  ;;  %v13269_v55 = vpop.f32.mrf.mxu0  ;;  %v510_v3 = vld [vmem:[%s17118_s11 + $0x100] sm:$0xff] }
  0xc8   : > { %1573 = vst [vmem:[#allocation3 + $0x3b8] sm:$0xf] %v1159_v61  ;;  %12471 = vset.pattern.permute.xlu0 %v17123_v0  ;;  %12470 = vset.pattern.permute.xlu2 %v17123_v0  ;;  %v13272_v33 = vpop.permute.xlu1 %940 }
  0xc9   : > { %17564 = vst [vmem:[#allocation38_spill] sm:$0xff] %v13231_v4  ;;  %v1205_v27 = vpop.permute.xlu2 %1204  ;;  %3453 = vmatpush.bf16.msrb.mxu0 %v12130_v52  ;;  %1005 = vperm.xlu2 %12470, %v510_v3  }
  0xca   : > { %1667 = vst [vmem:[#allocation3 + $0x37c] sm:$0xf] %v1159_v61  ;;  %v5790_v44 = vmul.f32 %v1205_v27, %v1167_v38  ;;  %v11971_v61 = vld [vmem:[#allocation3 + $0x4c] sm:$0xf] }
  0xcb   : > { %778 = vst [vmem:[#allocation2 + $0x30] sm:$0xff] %v13226_v63 }
  0xcc   : > { %1611 = vst [vmem:[#allocation3 + $0x18] sm:$0xf] %v1063_v5  ;;  %v13277_v15 = vpack.c.bf16 %v5790_v44, %v5790_v44 }
  0xcd   : > { %1423 = vst [vmem:[#allocation3 + $0x90] sm:$0xf] %v1063_v5 }
  0xce   : > { %1517 = vst [vmem:[#allocation3 + $0x54] sm:$0xf] %v1063_v5  ;;  %v1138_v5 = vpack.c.bf16 %v13269_v55, %v13269_v55 }
  0xcf   : > { %17565 = vst [vmem:[#allocation39_spill] sm:$0xff] %v13236_v6  ;;  %1332 = vperm.xlu1 %12469, %v510_v3  }
  0xd0   : > { %17566 = vst [vmem:[#allocation40_spill] sm:$0xff] %v13238_v1  ;;  %v13285_v40 = vpop.permute.xlu1 %955 }
  0xd1   : > { %1644 = vst [vmem:[#allocation3 + $0x40] sm:$0xf] %v1136_v36 }
  0xd2   : > { %1456 = vst [vmem:[#allocation3 + $0xb8] sm:$0xf] %v1136_v36  ;;  %v812_v12 = vld [vmem:[#allocation2 + $0x2f] sm:$0xff] }
  0xd3   : > { %17567 = vst [vmem:[#allocation41_spill] sm:$0xff] %v13246_v14  ;;  %v1028_v17 = vmul.f32 %v13140_v2, %v812_v12 }
  0xd4   : > { %1550 = vst [vmem:[#allocation3 + $0x7c] sm:$0xf] %v1136_v36  ;;  %v10250_v36 = vld [vmem:[#allocation3 + $0x48] sm:$0xf]  ;;  %v10286_v52 = vld [vmem:[#allocation3 + $0x90] sm:$0xf] }
  0xd5   : > { %802 = vst [vmem:[#allocation2 + $0xf0] sm:$0xff] %v13238_v1  ;;  %v1064_v49 = vpack.c.bf16 %v1028_v17, %v1028_v17  ;;  %v13282_v17 = vpop.f32.mrf.mxu0 }
  0xd6   : > { %1480 = vst [vmem:[#allocation3 + $0x418] sm:$0xf] %v1160_v11  ;;  %v1139_v23 = vpack.c.bf16 %v13282_v17, %v13282_v17 }
  0xd7   : > { %17568 = vst [vmem:[#allocation42_spill] sm:$0xff] %v13252_v18 }
  0xd8   : > { %1574 = vst [vmem:[#allocation3 + $0x3dc] sm:$0xf] %v1160_v11 }
  0xd9   : > { %1668 = vst [vmem:[#allocation3 + $0x3a0] sm:$0xf] %v1160_v11  ;;  %v10288_v27 = vld [vmem:[#allocation3 + $0xb4] sm:$0xf0] }
  0xda   : > { %17569 = vst [vmem:[#allocation43_spill] sm:$0xff] %v13254_v20 }
  0xdb   : > { %1445 = vst [vmem:[#allocation3 + $0x3a8] sm:$0xf] %v1085_v13 }
  0xdc   : > { %1612 = vst [vmem:[#allocation3 + $0x3c] sm:$0xf] %v1064_v49  ;;  %v836_v30 = vld [vmem:[#allocation2 + $0xef] sm:$0xff] }
  0xdd   : > { %1424 = vst [vmem:[#allocation3 + $0xb4] sm:$0xf] %v1064_v49  ;;  %v1052_v47 = vmul.f32 %v13246_v14, %v836_v30  ;;  %v11980_v30 = vld [vmem:[#allocation3 + $0x94] sm:$0xf] }
  0xde   : > { %17570 = vst [vmem:[#allocation44_spill] sm:$0xff] %v13259_v24 }
  0xdf   : > { %1518 = vst [vmem:[#allocation3 + $0x78] sm:$0xf] %v1064_v49  ;;  %v1088_v59 = vpack.c.bf16 %v1052_v47, %v1052_v47  ;;  %v10291_v47 = vor.u32 %v11980_v30, %v10288_v27 }
  0xe0   : > { %1539 = vst [vmem:[#allocation3 + $0x36c] sm:$0xf] %v1085_v13 }
  0xe1   : > { %1633 = vst [vmem:[#allocation3 + $0x330] sm:$0xf] %v1085_v13 }
  0xe2   : > { %1454 = vst [vmem:[#allocation3 + $0x70] sm:$0xf] %v1134_v31 }
  0xe3   : > { %1548 = vst [vmem:[#allocation3 + $0x34] sm:$0xf] %v1134_v31 }
  0xe4   : > { %17571 = vst [vmem:[#allocation45_spill] sm:$0xff] %v13267_v29  ;;  %v11984_v44 = vld [vmem:[#allocation3 + $0xb0] sm:$0xf0] }
  0xe5   : > { %1422 = vst [vmem:[#allocation3 + $0x6c] sm:$0xf] %v1062_v48 }
  0xe6   : > { %1516 = vst [vmem:[#allocation3 + $0x30] sm:$0xf] %v1062_v48  ;;  %v13291_v48 = vpop.permute.xlu0 %950 }
  0xe7   : > { %17572 = vst [vmem:[#allocation46_spill] sm:$0xff] %v13269_v55 }
  0xe8   : > { %779 = vst [vmem:[#allocation2 + $0x38] sm:$0xff] %v13254_v20 }
  0xe9   : > { %1457 = vst [vmem:[#allocation3 + $0xdc] sm:$0xf] %v1137_v50  ;;  %v10252_v32 = vld [vmem:[#allocation3 + $0x6c] sm:$0xf0] }
  0xea   : > { %1551 = vst [vmem:[#allocation3 + $0xa0] sm:$0xf] %v1137_v50  ;;  %v10255_v62 = vor.u32 %v11971_v61, %v10252_v32  ;;  %v10287_v61 = vor.u32 %v11984_v44, %v10286_v52  ;;  %v10260_v32 = vld [vmem:[#allocation3 + $0x74] sm:$0xf0] }
  0xeb   : > { %17573 = vst [vmem:[#allocation47_spill] sm:$0xff] %v13272_v33 }
  0xec   : > { %1645 = vst [vmem:[#allocation3 + $0x64] sm:$0xf] %v1137_v50  ;;  %v11975_v43 = vld [vmem:[#allocation3 + $0x68] sm:$0xf0]  ;;  %3281 = vmatmul.bf16.gmra.mxu2 %v10255_v62  ;;  %v13293_v50 = vpop.f32.mrf.mxu1  ;;  %v832_v62 = vld [vmem:[#allocation2 + $0xcf] sm:$0xff] }
  0xed   : > { %1448 = vst [vmem:[#allocation3 + $0x414] sm:$0xf] %v1088_v59  ;;  %v10251_v35 = vor.u32 %v11975_v43, %v10250_v36  ;;  %v10224_v9 = vld [vmem:[#allocation3 + $0x2c] sm:$0xf0]  ;;  %v13298_v36 = vpop.permute.xlu1 %970 }
  0xee   : > { %1542 = vst [vmem:[#allocation3 + $0x3d8] sm:$0xf] %v1088_v59  ;;  %v10227_v12 = vor.u32 %v11963_v8, %v10224_v9  ;;  %v12128_v43 = vld [vmem:[#allocation4 + $0xb0] sm:$0xff] }
  0xef   : > { %1636 = vst [vmem:[#allocation3 + $0x39c] sm:$0xf] %v1088_v59  ;;  %v813_v11 = vld [vmem:[#allocation2 + $0x37] sm:$0xff]  ;;  %3192 = vmatmul.bf16.gmra.mxu1 %v10251_v35  ;;  %v1158_v59 = vpack.c.bf16 %v13293_v50, %v13293_v50  ;;  %v11972_v35 = vld [vmem:[#allocation3 + $0x54] sm:$0xf]  ;;  %3358 = vmatpush.bf16.msrb.mxu3 %v12128_v43 }
  0xf0   : > { %780 = vst [vmem:[#allocation2 + $0x40] sm:$0xff] %v13269_v55  ;;  %v1029_v13 = vmul.f32 %v13207_v57, %v813_v11  ;;  %3454 = vmatmul.bf16.vlgmr.msrb.gmra.mxu0 %v10227_v12  ;;  %v10263_v9 = vor.u32 %v11972_v35, %v10260_v32  ;;  %v13301_v12 = vpop.f32.mrf.mxu3  ;;  %v11989_v52 = vld [vmem:[#allocation3 + $0xdc] sm:$0xf] }
  0xf1   : > { %17574 = vst [vmem:[#allocation48_spill] sm:$0xff] %v13280_v41 }
  0xf2   : > { %1458 = vst [vmem:[#allocation3 + $0x100] sm:$0xf] %v1138_v5  ;;  %v1065_v49 = vpack.c.bf16 %v1029_v13, %v1029_v13  ;;  %v1048_v13 = vmul.f32 %v13298_v36, %v832_v62 }
  0xf3   : > { %1552 = vst [vmem:[#allocation3 + $0xc4] sm:$0xf] %v1138_v5 }
  0xf4   : > { %17575 = vst [vmem:[#allocation49_spill] sm:$0xff] %v13282_v17  ;;  %v1084_v26 = vpack.c.bf16 %v1048_v13, %v1048_v13 }
  0xf5   : > { %1646 = vst [vmem:[#allocation3 + $0x88] sm:$0xf] %v1138_v5 }
  0xf6   : > { %1483 = vst [vmem:[#allocation3 + $0x8] sm:$0xf] %v13277_v15 }
  0xf7   : > { %1425 = vst [vmem:[#allocation3 + $0xd8] sm:$0xf] %v1065_v49  ;;  %v814_v31 = vld [vmem:[#allocation2 + $0x3f] sm:$0xff] }
  0xf8   : > { %17576 = vst [vmem:[#allocation50_spill] sm:$0xff] %v13285_v40  ;;  %v1030_v38 = vmul.f32 %v13195_v34, %v814_v31  ;;  %v1170_v31 = vld [vmem:[#allocation2 + $0x21] sm:$0xff]  ;;  %v1173_v1 = vld [vmem:[#allocation2 + $0x39] sm:$0xff] }
  0xf9   : > { %1519 = vst [vmem:[#allocation3 + $0x9c] sm:$0xf] %v1065_v49  ;;  %v10324_v30 = vld [vmem:[#allocation3 + $0xfc] sm:$0xf0] }
  0xfa   : > { %1613 = vst [vmem:[#allocation3 + $0x60] sm:$0xf] %v1065_v49  ;;  %v1066_v25 = vpack.c.bf16 %v1030_v38, %v1030_v38  ;;  %v13304_v49 = vpop.permute.xlu2 %1216  ;;  %v13309_v38 = vpop.permute.xlu0 %965 }
  0xfb   : > { %781 = vst [vmem:[#allocation2 + $0x48] sm:$0xff] %v13282_v17  ;;  %v1350_v27 = vmul.f32 %v13304_v49, %v1170_v31  ;;  %v12126_v31 = vld [vmem:[#allocation4 + $0xa0] sm:$0xff] }
  0xfc   : > { %1459 = vst [vmem:[#allocation3 + $0x124] sm:$0xf] %v1139_v23  ;;  %3286 = vmatmul.bf16.gmra.mxu2 %v10291_v47  ;;  %v13312_v47 = vpop.f32.mrf.mxu0 }
  0xfd   : > { %1553 = vst [vmem:[#allocation3 + $0xe8] sm:$0xf] %v1139_v23  ;;  %v1386_v44 = vpack.c.bf16 %v1350_v27, %v1350_v27  ;;  %v1140_v32 = vpack.c.bf16 %v13312_v47, %v13312_v47 }
  0xfe   : > { %17577 = vst [vmem:[#allocation51_spill] sm:$0xff] %v13291_v48  ;;  %v10322_v43 = vld [vmem:[#allocation3 + $0xd8] sm:$0xf] }
  0xff   : > { %1647 = vst [vmem:[#allocation3 + $0xac] sm:$0xf] %v1139_v23  ;;  %3197 = vmatmul.bf16.gmra.mxu1 %v10287_v61  ;;  %v1161_v23 = vpack.c.bf16 %v13301_v12, %v13301_v12  ;;  %v10327_v61 = vor.u32 %v11989_v52, %v10324_v30  ;;  %v11961_v52 = vld [vmem:[%s12906_s17 + $0x78] sm:$0xff]  ;;  %s449_s17 = sand.u32 1, %s12737_s22  }
 0x100   : > { %17578 = vst [vmem:[#allocation52_spill] sm:$0xff] %v13293_v50  ;;  %3459 = vmatmul.bf16.gmra.mxu0 %v10263_v9  ;;  %v13319_v9 = vpop.f32.mrf.mxu3  ;;  %v11981_v27 = vld [vmem:[#allocation3 + $0x9c] sm:$0xf]  ;;  %10211 = vmatmul.msk.bf16.gmra.mxu3 %vm633_vm1, %v11961_v52  ;;  %s16953_s29 = sshll.u32 %s449_s17, 8  ;;  %s10013_s23 = scalar_lea.sflag [#allocation6], %s449_s17 }
 0x101   : > { %1426 = vst [vmem:[#allocation3 + $0xfc] sm:$0xf] %v1066_v25  ;;  %s16970_s16 = scalar_lea.vmem [#allocation9], %s16953_s29 }
 0x102   : > { %1520 = vst [vmem:[#allocation3 + $0xc0] sm:$0xf] %v1066_v25  ;;  %v815_v5 = vld [vmem:[#allocation2 + $0x47] sm:$0xff]  ;;  %s10025_s19 = sshll.u32 %s16970_s16, 4  ;;  %s10026_s19 = int_to_ptr.vmem [resolvable:$true] %s10025_s19 }
 0x103   : > { %1614 = vst [vmem:[#allocation3 + $0x84] sm:$0xf] %v1066_v25  ;;  %v1031_v8 = vmul.f32 %v13146_v7, %v815_v5  ;;  %v12127_v25 = vld [vmem:[#allocation4 + $0xa8] sm:$0xff]  ;;  %v13316_v5 = vpop.permute.xlu1 %985 }
 0x104   : > { %800 = vst [vmem:[#allocation2 + $0xe0] sm:$0xff] %v13293_v50  ;;  %3359 = vmatpush.bf16.msrb.mxu3 %v12127_v25 }
 0x105   : > { %17579 = vst [vmem:[#allocation53_spill] sm:$0xff] %v13298_v36  ;;  %v1067_v11 = vpack.c.bf16 %v1031_v8, %v1031_v8 }
 0x106   : > { %1478 = vst [vmem:[#allocation3 + $0x3d0] sm:$0xf] %v1158_v59 }
 0x107   : > { %1572 = vst [vmem:[#allocation3 + $0x394] sm:$0xf] %v1158_v59 }
 0x108   : > { %1666 = vst [vmem:[#allocation3 + $0x358] sm:$0xf] %v1158_v59  ;;  %v11993_v59 = vld [vmem:[#allocation3 + $0xf8] sm:$0xf0]  ;;  %3360 = vmatpush.bf16.msrb.mxu3 %v12126_v31 }
 0x109   : > { %17580 = vst [vmem:[#allocation54_spill] sm:$0xff] %v13301_v12  ;;  %v10323_v35 = vor.u32 %v11993_v59, %v10322_v43  ;;  %v10296_v8 = vld [vmem:[#allocation3 + $0xbc] sm:$0xf0]  ;;  %v12125_v59 = vld [vmem:[#allocation4 + $0x98] sm:$0xff] }
 0x10a   : > { %17581 = vst [vmem:[#allocation55_spill] sm:$0xff] %v13304_v49  ;;  %v10299_v25 = vor.u32 %v11981_v27, %v10296_v8  ;;  %v11998_v27 = vld [vmem:[#allocation3 + $0x124] sm:$0xf] }
 0x10b   : > { %803 = vst [vmem:[#allocation2 + $0xf8] sm:$0xff] %v13301_v12  ;;  %v835_v62 = vld [vmem:[#allocation2 + $0xe7] sm:$0xff]  ;;  %v834_v13 = vld [vmem:[#allocation2 + $0xdf] sm:$0xff]  ;;  %v13334_v52 = vpop.permute.xlu1 %1000 }
 0x10c   : > { %1427 = vst [vmem:[#allocation3 + $0x120] sm:$0xf] %v1067_v11  ;;  %3291 = vmatmul.bf16.gmra.mxu2 %v10327_v61  ;;  %v13329_v61 = vpop.permute.xlu2 %1224  ;;  %3361 = vmatpush.bf16.msrb.mxu3 %v12125_v59  ;;  %v12123_v59 = vld [vmem:[#allocation4 + $0x88] sm:$0xff] }
 0x10d   : > { %1521 = vst [vmem:[#allocation3 + $0xe4] sm:$0xf] %v1067_v11 }
 0x10e   : > { %17582 = vst [vmem:[#allocation56_spill] sm:$0xff] %v13309_v38 }
 0x10f   : > { %1615 = vst [vmem:[#allocation3 + $0xa8] sm:$0xf] %v1067_v11  ;;  %v1051_v11 = vmul.f32 %v13316_v5, %v835_v62  ;;  %3202 = vmatmul.bf16.gmra.mxu1 %v10323_v35  ;;  %v1172_v35 = vld [vmem:[#allocation2 + $0x31] sm:$0xff] }
 0x110   : > { %1481 = vst [vmem:[#allocation3 + $0x43c] sm:$0xf] %v1161_v23  ;;  %3464 = vmatmul.bf16.gmra.mxu0 %v10299_v25  ;;  %v1352_v8 = vmul.f32 %v13329_v61, %v1172_v35 }
 0x111   : > { %1575 = vst [vmem:[#allocation3 + $0x400] sm:$0xf] %v1161_v23 }
 0x112   : > { %1669 = vst [vmem:[#allocation3 + $0x3c4] sm:$0xf] %v1161_v23  ;;  %v13322_v23 = vpop.permute.xlu0 %980 }
 0x113   : > { %17583 = vst [vmem:[#allocation57_spill] sm:$0xff] %v13312_v47  ;;  %v1050_v30 = vmul.f32 %v13322_v23, %v834_v13  ;;  %v12124_v13 = vld [vmem:[#allocation4 + $0x90] sm:$0xff] }
 0x114   : > { %1444 = vst [vmem:[#allocation3 + $0x384] sm:$0xf] %v1084_v26  ;;  %3362 = vmatpush.bf16.msrb.mxu3 %v12124_v13  ;;  %v11990_v12 = vld [vmem:[#allocation3 + $0xe4] sm:$0xf] }
 0x115   : > { %1538 = vst [vmem:[#allocation3 + $0x348] sm:$0xf] %v1084_v26  ;;  %v1086_v43 = vpack.c.bf16 %v1050_v30, %v1050_v30 }
 0x116   : > { %1632 = vst [vmem:[#allocation3 + $0x30c] sm:$0xf] %v1084_v26  ;;  %v1162_v26 = vpack.c.bf16 %v13319_v9, %v13319_v9 }
 0x117   : > { %17584 = vst [vmem:[#allocation58_spill] sm:$0xff] %v13316_v5 }
 0x118   : > { %1486 = vst [vmem:[#allocation3 + $0x74] sm:$0xf] %v1386_v44  ;;  %3363 = vmatpush.bf16.msrb.mxu3 %v12123_v59 }
 0x119   : > { %1580 = vst [vmem:[#allocation3 + $0x38] sm:$0xf] %v1386_v44  ;;  %v1087_v44 = vpack.c.bf16 %v1051_v11, %v1051_v11 }
 0x11a   : > { %782 = vst [vmem:[#allocation2 + $0x50] sm:$0xff] %v13312_v47  ;;  %v13339_v35 = vpop.permute.xlu0 %995  ;;  %v12142_v47 = vld [vmem:[#allocation4 + $0x120] sm:$0xff] }
 0x11b   : > { %17585 = vst [vmem:[#allocation59_spill] sm:$0xff] %v13319_v9 }
 0x11c   : > { %17586 = vst [vmem:[#allocation60_spill] sm:$0xff] %v13322_v23 }
 0x11d   : > { %1460 = vst [vmem:[#allocation3 + $0x148] sm:$0xf] %v1140_v32 }
 0x11e   : > { %1554 = vst [vmem:[#allocation3 + $0x10c] sm:$0xf] %v1140_v32 }
 0x11f   : > { %1648 = vst [vmem:[#allocation3 + $0xd0] sm:$0xf] %v1140_v32 }
 0x120   : > { %804 = vst [vmem:[#allocation2 + $0x100] sm:$0xff] %v13319_v9  ;;  %v13348_v9 = vpop.permute.xlu1 %1212 }
 0x121   : > { %1482 = vst [vmem:[#allocation3 + $0x460] sm:$0xf] %v1162_v26  ;;  %v816_v62 = vld [vmem:[#allocation2 + $0x4f] sm:$0xff] }
 0x122   : > { %1576 = vst [vmem:[#allocation3 + $0x424] sm:$0xf] %v1162_v26  ;;  %v1032_v32 = vmul.f32 %v13231_v4, %v816_v62  ;;  %v13336_v62 = vpop.f32.mrf.mxu0 }
 0x123   : > { %17587 = vst [vmem:[#allocation61_spill] sm:$0xff] %v13329_v61 }
 0x124   : > { %1670 = vst [vmem:[#allocation3 + $0x3e8] sm:$0xf] %v1162_v26  ;;  %v10360_v11 = vld [vmem:[#allocation3 + $0x144] sm:$0xf0]  ;;  %v1068_v31 = vpack.c.bf16 %v1032_v32, %v1032_v32  ;;  %v1388_v26 = vpack.c.bf16 %v1352_v8, %v1352_v8  ;;  %v1141_v8 = vpack.c.bf16 %v13336_v62, %v13336_v62 }
 0x125   : > { %1447 = vst [vmem:[#allocation3 + $0x3f0] sm:$0xf] %v1087_v44  ;;  %v10363_v25 = vor.u32 %v11998_v27, %v10360_v11  ;;  %v12143_v11 = vld [vmem:[#allocation4 + $0x128] sm:$0xff]  ;;  %v10358_v27 = vld [vmem:[#allocation3 + $0x120] sm:$0xf] }
 0x126   : > { %1541 = vst [vmem:[#allocation3 + $0x3b4] sm:$0xf] %v1087_v44  ;;  %3537 = vmatpush.bf16.msra.mxu1 %v12143_v11 }
 0x127   : > { %1635 = vst [vmem:[#allocation3 + $0x378] sm:$0xf] %v1087_v44  ;;  %v838_v30 = vld [vmem:[#allocation2 + $0xff] sm:$0xff]  ;;  %v837_v44 = vld [vmem:[#allocation2 + $0xf7] sm:$0xff]  ;;  %3296 = vmatmul.bf16.gmra.mxu2 %v10363_v25  ;;  %v1175_v25 = vld [vmem:[#allocation2 + $0x49] sm:$0xff] }
 0x128   : > { %1446 = vst [vmem:[#allocation3 + $0x3cc] sm:$0xf] %v1086_v43  ;;  %v1054_v32 = vmul.f32 %v13334_v52, %v838_v30  ;;  %v1053_v13 = vmul.f32 %v13339_v35, %v837_v44 }
 0x129   : > { %1428 = vst [vmem:[#allocation3 + $0x144] sm:$0xf] %v1068_v31 }
 0x12a   : > { %1522 = vst [vmem:[#allocation3 + $0x108] sm:$0xf] %v1068_v31  ;;  %v1089_v51 = vpack.c.bf16 %v1053_v13, %v1053_v13  ;;  %v13350_v11 = vpop.f32.mrf.mxu0  ;;  %v1169_v13 = vld [vmem:[#allocation2 + $0x19] sm:$0xff]  ;;  %3538 = vmatpush.bf16.msra.mxu1 %v12142_v47 }
 0x12b   : > { %17588 = vst [vmem:[#allocation62_spill] sm:$0xff] %v13334_v52  ;;  %v3277_v52 = vpop.f32.mrf.mxu2 }
 0x12c   : > { %1616 = vst [vmem:[#allocation3 + $0xcc] sm:$0xf] %v1068_v31  ;;  %v13344_v31 = vpop.permute.xlu2 %1236 }
 0x12d   : > { %17589 = vst [vmem:[#allocation63_spill] sm:$0xff] %v13336_v62  ;;  %v1355_v0 = vmul.f32 %v13344_v31, %v1175_v25 }
 0x12e   : > { %1540 = vst [vmem:[#allocation3 + $0x390] sm:$0xf] %v1086_v43 }
 0x12f   : > { %1634 = vst [vmem:[#allocation3 + $0x354] sm:$0xf] %v1086_v43  ;;  %v1090_v43 = vpack.c.bf16 %v1054_v32, %v1054_v32  ;;  %v1391_v44 = vpack.c.bf16 %v1355_v0, %v1355_v0  ;;  %v1349_v0 = vmul.f32 %v13348_v9, %v1169_v13 }
 0x130   : > { %17590 = vst [vmem:[#allocation64_spill] sm:$0xff] %v13339_v35  ;;  %v12002_v59 = vld [vmem:[#allocation3 + $0x140] sm:$0xf0] }
 0x131   : > { %1488 = vst [vmem:[#allocation3 + $0xbc] sm:$0xf] %v1388_v26  ;;  %v10359_v30 = vor.u32 %v12002_v59, %v10358_v27  ;;  %v10332_v32 = vld [vmem:[#allocation3 + $0x104] sm:$0xf0] }
 0x132   : > { %1582 = vst [vmem:[#allocation3 + $0x80] sm:$0xf] %v1388_v26  ;;  %v10335_v59 = vor.u32 %v11990_v12, %v10332_v32  ;;  %v13360_v32 = vpop.permute.xlu1 %1220 }
 0x133   : > { %1676 = vst [vmem:[#allocation3 + $0x44] sm:$0xf] %v1388_v26  ;;  %3207 = vmatmul.bf16.gmra.mxu1 %v10359_v30  ;;  %v12122_v26 = vld [vmem:[#allocation4 + $0x80] sm:$0xff]  ;;  %v1142_v30 = vpack.c.bf16 %v13350_v11, %v13350_v11 }
 0x134   : > { %17591 = vst [vmem:[#allocation65_spill] sm:$0xff] %v13344_v31  ;;  %3364 = vmatpush.bf16.msrb.mxu3 %v12122_v26  ;;  %3469 = vmatmul.bf16.gmra.mxu0 %v10335_v59  ;;  %v1168_v26 = vld [vmem:[#allocation2 + $0x11] sm:$0xff] }
 0x135   : > { %783 = vst [vmem:[#allocation2 + $0x58] sm:$0xff] %v13336_v62 }
 0x136   : > { %1461 = vst [vmem:[#allocation3 + $0x16c] sm:$0xf] %v1141_v8 }
 0x137   : > { %1555 = vst [vmem:[#allocation3 + $0x130] sm:$0xf] %v1141_v8 }
 0x138   : > { %1649 = vst [vmem:[#allocation3 + $0xf4] sm:$0xf] %v1141_v8  ;;  %v11985_v17 = vld [vmem:[#allocation3 + $0xb8] sm:$0xf0] }
 0x139   : > { %1450 = vst [vmem:[#allocation3 + $0x45c] sm:$0xf] %v1090_v43 }
 0x13a   : > { %1544 = vst [vmem:[#allocation3 + $0x420] sm:$0xf] %v1090_v43 }
 0x13b   : > { %1638 = vst [vmem:[#allocation3 + $0x3e4] sm:$0xf] %v1090_v43  ;;  %v13353_v43 = vpop.permute.xlu0 %1208 }
 0x13c   : > { %17592 = vst [vmem:[#allocation66_spill] sm:$0xff] %v13348_v9  ;;  %v817_v27 = vld [vmem:[#allocation2 + $0x57] sm:$0xff]  ;;  %v1348_v12 = vmul.f32 %v13353_v43, %v1168_v26  ;;  %v12328_v9 = vld [vmem:[#allocation7 + $0x30] sm:$0xff] }
 0x13d   : > { %1449 = vst [vmem:[#allocation3 + $0x438] sm:$0xf] %v1089_v51  ;;  %v1033_v25 = vmul.f32 %v13219_v37, %v817_v27  ;;  %v13362_v27 = vpop.f32.mrf.mxu0  ;;  %v1176_v62 = vld [vmem:[#allocation2 + $0x51] sm:$0xff] }
 0x13e   : > { %17593 = vst [vmem:[#allocation67_spill] sm:$0xff] %v13350_v11  ;;  %v1384_v59 = vpack.c.bf16 %v1348_v12, %v1348_v12  ;;  %v12007_v12 = vld [vmem:[#allocation3 + $0x16c] sm:$0xf] }
 0x13f   : > { %1543 = vst [vmem:[#allocation3 + $0x3fc] sm:$0xf] %v1089_v51  ;;  %v1069_v8 = vpack.c.bf16 %v1033_v25, %v1033_v25  ;;  %v1171_v25 = vld [vmem:[#allocation2 + $0x29] sm:$0xff] }
 0x140   : > { %1637 = vst [vmem:[#allocation3 + $0x3c0] sm:$0xf] %v1089_v51  ;;  %v1385_v51 = vpack.c.bf16 %v1349_v0, %v1349_v0  ;;  %v1351_v13 = vmul.f32 %v13360_v32, %v1171_v25 }
 0x141   : > { %1491 = vst [vmem:[#allocation3 + $0x128] sm:$0xf] %v1391_v44 }
 0x142   : > { %1585 = vst [vmem:[#allocation3 + $0xec] sm:$0xf] %v1391_v44  ;;  %v1387_v26 = vpack.c.bf16 %v1351_v13, %v1351_v13 }
 0x143   : > { %17594 = vst [vmem:[#allocation68_spill] sm:$0xff] %v13353_v43 }
 0x144   : > { %1429 = vst [vmem:[#allocation3 + $0x168] sm:$0xf] %v1069_v8 }
 0x145   : > { %1523 = vst [vmem:[#allocation3 + $0x12c] sm:$0xf] %v1069_v8 }
 0x146   : > { %1617 = vst [vmem:[#allocation3 + $0xf0] sm:$0xf] %v1069_v8  ;;  %v1143_v8 = vpack.c.bf16 %v13362_v27, %v13362_v27 }
 0x147   : > { %1679 = vst [vmem:[#allocation3 + $0xb0] sm:$0xf] %v1391_v44  ;;  %v13367_v44 = vpop.permute.xlu0 %1228 }
 0x148   : > { %784 = vst [vmem:[#allocation2 + $0x60] sm:$0xff] %v13350_v11  ;;  %v1353_v25 = vmul.f32 %v13367_v44, %v1173_v1  ;;  %v13373_v11 = vpop.permute.xlu2 %1248  ;;  %v13375_v1 = vpop.f32.mrf.mxu0 }
 0x149   : > { %17595 = vst [vmem:[#allocation69_spill] sm:$0xff] %v13360_v32 }
 0x14a   : > { %1462 = vst [vmem:[#allocation3 + $0x190] sm:$0xf] %v1142_v30 }
 0x14b   : > { %17596 = vst [vmem:[#allocation70_spill] sm:$0xff] %v13362_v27 }
 0x14c   : > { %1556 = vst [vmem:[#allocation3 + $0x154] sm:$0xf] %v1142_v30 }
 0x14d   : > { %1650 = vst [vmem:[#allocation3 + $0x118] sm:$0xf] %v1142_v30 }
 0x14e   : > { %1485 = vst [vmem:[#allocation3 + $0x50] sm:$0xf] %v1385_v51 }
 0x14f   : > { %1579 = vst [vmem:[#allocation3 + $0x14] sm:$0xf] %v1385_v51  ;;  %v818_v0 = vld [vmem:[#allocation2 + $0x5f] sm:$0xff]  ;;  %v10222_v51 = vld [vmem:[#allocation3 + $0x8] sm:$0xf] }
 0x150   : > { %1484 = vst [vmem:[#allocation3 + $0x2c] sm:$0xf] %v1384_v59  ;;  %v1034_v54 = vmul.f32 %v13151_v10, %v818_v0  ;;  %v1389_v59 = vpack.c.bf16 %v1353_v25, %v1353_v25 }
 0x151   : > { %17597 = vst [vmem:[#allocation71_spill] sm:$0xff] %v13367_v44  ;;  %v10396_v30 = vld [vmem:[#allocation3 + $0x18c] sm:$0xf0] }
 0x152   : > { %785 = vst [vmem:[#allocation2 + $0x68] sm:$0xff] %v13362_v27  ;;  %v10399_v50 = vor.u32 %v12007_v12, %v10396_v30  ;;  %v1070_v28 = vpack.c.bf16 %v1034_v54, %v1034_v54  ;;  %v13380_v12 = vpop.permute.xlu1 %1232  ;;  %v11999_v30 = vld [vmem:[#allocation3 + $0x12c] sm:$0xf] }
 0x153   : > { %1463 = vst [vmem:[#allocation3 + $0x1b4] sm:$0xf] %v1143_v8 }
 0x154   : > { %1557 = vst [vmem:[#allocation3 + $0x178] sm:$0xf] %v1143_v8  ;;  %3301 = vmatmul.bf16.gmra.mxu2 %v10399_v50 }
 0x155   : > { %1651 = vst [vmem:[#allocation3 + $0x13c] sm:$0xf] %v1143_v8  ;;  %v10394_v8 = vld [vmem:[#allocation3 + $0x168] sm:$0xf] }
 0x156   : > { %1487 = vst [vmem:[#allocation3 + $0x98] sm:$0xf] %v1387_v26 }
 0x157   : > { %1430 = vst [vmem:[#allocation3 + $0x18c] sm:$0xf] %v1070_v28  ;;  %v11967_v46 = vld [vmem:[#allocation3 + $0x28] sm:$0xf0] }
 0x158   : > { %1524 = vst [vmem:[#allocation3 + $0x150] sm:$0xf] %v1070_v28  ;;  %v10223_v22 = vor.u32 %v11967_v46, %v10222_v51  ;;  %v1144_v46 = vpack.c.bf16 %v13375_v1, %v13375_v1  ;;  %v1174_v51 = vld [vmem:[#allocation2 + $0x41] sm:$0xff] }
 0x159   : > { %1618 = vst [vmem:[#allocation3 + $0x114] sm:$0xf] %v1070_v28  ;;  %v819_v13 = vld [vmem:[#allocation2 + $0x67] sm:$0xff] }
 0x15a   : > { %v1035_v0 = vmul.f32 %v13252_v18, %v819_v13  ;;  %1581 = vst [vmem:[#allocation3 + $0x5c] sm:$0xf] %v1387_v26  ;;  %v1178_v27 = vld [vmem:[#allocation2 + $0x61] sm:$0xff]  ;;  %3365 = vmatmul.bf16.vlgmr.msrb.gmra.mxu3 %v10223_v22 }
 0x15b   : > { %1675 = vst [vmem:[#allocation3 + $0x20] sm:$0xf] %v1387_v26  ;;  %v1358_v50 = vmul.f32 %v13373_v11, %v1178_v27  ;;  %v1354_v27 = vmul.f32 %v13380_v12, %v1174_v51  ;;  %v12016_v51 = vld [vmem:[#allocation3 + $0x1b4] sm:$0xf] }
 0x15c   : > { %17598 = vst [vmem:[#allocation72_spill] sm:$0xff] %v13373_v11  ;;  %v1071_v54 = vpack.c.bf16 %v1035_v0, %v1035_v0  ;;  %v13384_v0 = vpop.permute.xlu0 %1240 }
 0x15d   : > { %1489 = vst [vmem:[#allocation3 + $0xe0] sm:$0xf] %v1389_v59  ;;  %v1394_v13 = vpack.c.bf16 %v1358_v50, %v1358_v50 }
 0x15e   : > { %17599 = vst [vmem:[#allocation73_spill] sm:$0xff] %v13375_v1  ;;  %v12011_v28 = vld [vmem:[#allocation3 + $0x188] sm:$0xf0] }
 0x15f   : > { %1583 = vst [vmem:[#allocation3 + $0xa4] sm:$0xf] %v1389_v59  ;;  %v10395_v26 = vor.u32 %v12011_v28, %v10394_v8  ;;  %v10368_v25 = vld [vmem:[#allocation3 + $0x14c] sm:$0xf0]  ;;  %v1356_v8 = vmul.f32 %v13384_v0, %v1176_v62 }
 0x160   : > { %1431 = vst [vmem:[#allocation3 + $0x1b0] sm:$0xf] %v1071_v54  ;;  %v10371_v22 = vor.u32 %v11999_v30, %v10368_v25  ;;  %v10258_v28 = vld [vmem:[#allocation3 + $0x50] sm:$0xf]  ;;  %v11996_v4 = vld [vmem:[#allocation3 + $0x110] sm:$0xf0] }
 0x161   : > { %1525 = vst [vmem:[#allocation3 + $0x174] sm:$0xf] %v1071_v54  ;;  %3212 = vmatmul.bf16.gmra.mxu1 %v10395_v26  ;;  %v11976_v26 = vld [vmem:[#allocation3 + $0x70] sm:$0xf0]  ;;  %v1392_v30 = vpack.c.bf16 %v1356_v8, %v1356_v8 }
 0x162   : > { %17600 = vst [vmem:[#allocation74_spill] sm:$0xff] %v13380_v12  ;;  %3474 = vmatmul.bf16.gmra.mxu0 %v10371_v22  ;;  %v10259_v25 = vor.u32 %v11976_v26, %v10258_v28 }
 0x163   : > { %1619 = vst [vmem:[#allocation3 + $0x138] sm:$0xf] %v1071_v54  ;;  %v1390_v54 = vpack.c.bf16 %v1354_v27, %v1354_v27 }
 0x164   : > { %1677 = vst [vmem:[#allocation3 + $0x68] sm:$0xf] %v1389_v59  ;;  %v13387_v59 = vpop.f32.mrf.mxu0  ;;  %v13394_v8 = vpop.permute.xlu0 %1252 }
 0x165   : > { %786 = vst [vmem:[#allocation2 + $0x70] sm:$0xff] %v13375_v1  ;;  %v13391_v1 = vpop.permute.xlu1 %1244  ;;  %v1145_v28 = vpack.c.bf16 %v13387_v59, %v13387_v59 }
 0x166   : > { %17601 = vst [vmem:[#allocation75_spill] sm:$0xff] %v13384_v0 }
 0x167   : > { %1464 = vst [vmem:[#allocation3 + $0x1d8] sm:$0xf] %v1144_v46  ;;  %v10430_v47 = vld [vmem:[#allocation3 + $0x1b0] sm:$0xf] }
 0x168   : > { %1558 = vst [vmem:[#allocation3 + $0x19c] sm:$0xf] %v1144_v46 }
 0x169   : > { %1652 = vst [vmem:[#allocation3 + $0x160] sm:$0xf] %v1144_v46 }
 0x16a   : > { %1494 = vst [vmem:[#allocation3 + $0x194] sm:$0xf] %v1394_v13  ;;  %3370 = vmatmul.bf16.gmra.mxu3 %v10259_v25  ;;  %v13404_v25 = vld [vmem:[%s17118_s11 + $0x108] sm:$0xff] }
 0x16b   : > { %1588 = vst [vmem:[#allocation3 + $0x158] sm:$0xf] %v1394_v13  ;;  %1010 = vperm.xlu0 %12471, %v13404_v25  }
 0x16c   : > { %17602 = vst [vmem:[#allocation76_spill] sm:$0xff] %v13387_v59  ;;  %v820_v50 = vld [vmem:[#allocation2 + $0x6f] sm:$0xff] }
 0x16d   : > { %1682 = vst [vmem:[#allocation3 + $0x11c] sm:$0xf] %v1394_v13  ;;  %v1036_v22 = vmul.f32 %v13236_v6, %v820_v50  ;;  %v1177_v13 = vld [vmem:[#allocation2 + $0x59] sm:$0xff]  ;;  %v1179_v26 = vld [vmem:[#allocation2 + $0x69] sm:$0xff] }
 0x16e   : > { %5926 = vst [vmem:[#allocation3 + $0x8] sm:$0xf] %v13277_v15  ;;  %v10432_v46 = vld [vmem:[#allocation3 + $0x1d4] sm:$0xf0]  ;;  %v1357_v15 = vmul.f32 %v13391_v1, %v1177_v13  ;;  %v1359_v50 = vmul.f32 %v13394_v8, %v1179_v26  ;;  %v10620_v6 = vld [vmem:[#allocation3 + $0x344] sm:$0xf0] }
 0x16f   : > { %1490 = vst [vmem:[#allocation3 + $0x104] sm:$0xf] %v1390_v54  ;;  %v10435_v62 = vor.u32 %v12016_v51, %v10432_v46  ;;  %v1072_v27 = vpack.c.bf16 %v1036_v22, %v1036_v22  ;;  %v10294_v51 = vld [vmem:[#allocation3 + $0x98] sm:$0xf] }
 0x170   : > { %1584 = vst [vmem:[#allocation3 + $0xc8] sm:$0xf] %v1390_v54  ;;  %v1393_v22 = vpack.c.bf16 %v1357_v15, %v1357_v15  ;;  %v10295_v15 = vor.u32 %v11985_v17, %v10294_v51 }
 0x171   : > { %1678 = vst [vmem:[#allocation3 + $0x8c] sm:$0xf] %v1390_v54  ;;  %3306 = vmatmul.bf16.gmra.mxu2 %v10435_v62  ;;  %v13398_v54 = vpop.f32.mrf.mxu0  ;;  %v1395_v62 = vpack.c.bf16 %v1359_v50, %v1359_v50  ;;  %v13413_v50 = vpop.permute.xlu2 %1260 }
 0x172   : > { %17603 = vst [vmem:[#allocation77_spill] sm:$0xff] %v13391_v1  ;;  %v1146_v20 = vpack.c.bf16 %v13398_v54, %v13398_v54 }
 0x173   : > { %1492 = vst [vmem:[#allocation3 + $0x14c] sm:$0xf] %v1392_v30 }
 0x174   : > { %1432 = vst [vmem:[#allocation3 + $0x1d4] sm:$0xf] %v1072_v27 }
 0x175   : > { %1526 = vst [vmem:[#allocation3 + $0x198] sm:$0xf] %v1072_v27 }
 0x176   : > { %17604 = vst [vmem:[#allocation78_spill] sm:$0xff] %v13394_v8  ;;  %v11994_v63 = vld [vmem:[#allocation3 + $0x100] sm:$0xf0] }
 0x177   : > { %1620 = vst [vmem:[#allocation3 + $0x15c] sm:$0xf] %v1072_v27  ;;  %v12008_v27 = vld [vmem:[#allocation3 + $0x174] sm:$0xf] }
 0x178   : > { %1586 = vst [vmem:[#allocation3 + $0x110] sm:$0xf] %v1392_v30 }
 0x179   : > { %17605 = vst [vmem:[#allocation79_spill] sm:$0xff] %v13398_v54 }
 0x17a   : > { %1680 = vst [vmem:[#allocation3 + $0xd4] sm:$0xf] %v1392_v30  ;;  %3375 = vmatmul.bf16.gmra.mxu3 %v10295_v15  ;;  %v12003_v5 = vld [vmem:[#allocation3 + $0x148] sm:$0xf0] }
 0x17b   : > { %787 = vst [vmem:[#allocation2 + $0x78] sm:$0xff] %v13387_v59  ;;  %v12020_v46 = vld [vmem:[#allocation3 + $0x1d0] sm:$0xf0]  ;;  %v13408_v59 = vpop.permute.xlu1 %1256 }
 0x17c   : > { %1465 = vst [vmem:[#allocation3 + $0x1fc] sm:$0xf] %v1145_v28  ;;  %v10431_v30 = vor.u32 %v12020_v46, %v10430_v47  ;;  %v10404_v13 = vld [vmem:[#allocation3 + $0x194] sm:$0xf0]  ;;  %v13415_v46 = vpop.f32.mrf.mxu0 }
 0x17d   : > { %1559 = vst [vmem:[#allocation3 + $0x1c0] sm:$0xf] %v1145_v28  ;;  %v10407_v26 = vor.u32 %v12008_v27, %v10404_v13 }
 0x17e   : > { %1653 = vst [vmem:[#allocation3 + $0x184] sm:$0xf] %v1145_v28  ;;  %3217 = vmatmul.bf16.gmra.mxu1 %v10431_v30  ;;  %v17609_v30 = vmov 1  }
 0x17f   : > { %1493 = vst [vmem:[#allocation3 + $0x170] sm:$0xf] %v1393_v22  ;;  %3479 = vmatmul.bf16.gmra.mxu0 %v10407_v26  ;;  %12475 = vset.pattern.permute.xlu0 %v17609_v30 }
 0x180   : > { %1587 = vst [vmem:[#allocation3 + $0x134] sm:$0xf] %v1393_v22  ;;  %12472 = vset.pattern.permute.xlu2 %v17609_v30 }
 0x181   : > { %1681 = vst [vmem:[#allocation3 + $0xf8] sm:$0xf] %v1393_v22  ;;  %v13419_v22 = vpop.permute.xlu0 %1264  ;;  %1336 = vperm.xlu2 %12472, %v13404_v25   ;;  %v12012_v25 = vld [vmem:[#allocation3 + $0x190] sm:$0xf0] }
 0x182   : > { %17606 = vst [vmem:[#allocation80_spill] sm:$0xff] %v13408_v59  ;;  %v821_v55 = vld [vmem:[#allocation2 + $0x77] sm:$0xff] }
 0x183   : > { %1495 = vst [vmem:[#allocation3 + $0x1b8] sm:$0xf] %v1395_v62  ;;  %v1037_v28 = vmul.f32 %v13159_v19, %v821_v55  ;;  %v1180_v47 = vld [vmem:[#allocation2 + $0x71] sm:$0xff]  ;;  %v13433_v39 = vpop.permute.xlu1 %1268 }
 0x184   : > { %1589 = vst [vmem:[#allocation3 + $0x17c] sm:$0xf] %v1395_v62  ;;  %v1360_v17 = vmul.f32 %v13408_v59, %v1180_v47  ;;  %v13428_v47 = vpop.f32.mrf.mxu0 }
 0x185   : > { %17607 = vst [vmem:[#allocation81_spill] sm:$0xff] %v13413_v50  ;;  %v1073_v51 = vpack.c.bf16 %v1037_v28, %v1037_v28  ;;  %v13426_v28 = vpop.permute.xlu2 %1272 }
 0x186   : > { %17608 = vst [vmem:[#allocation82_spill] sm:$0xff] %v13415_v46  ;;  %v1396_v55 = vpack.c.bf16 %v1360_v17, %v1360_v17 }
 0x187   : > { %1683 = vst [vmem:[#allocation3 + $0x140] sm:$0xf] %v1395_v62  ;;  %v1147_v62 = vpack.c.bf16 %v13415_v46, %v13415_v46 }
 0x188   : > { %17610 = vst [vmem:[#allocation83_spill] sm:$0xff] %v13419_v22 }
 0x189   : > { %788 = vst [vmem:[#allocation2 + $0x80] sm:$0xff] %v13398_v54  ;;  %v12025_v54 = vld [vmem:[#allocation3 + $0x1fc] sm:$0xf] }
 0x18a   : > { %1466 = vst [vmem:[#allocation3 + $0x220] sm:$0xf] %v1146_v20 }
 0x18b   : > { %1433 = vst [vmem:[#allocation3 + $0x1f8] sm:$0xf] %v1073_v51 }
 0x18c   : > { %1527 = vst [vmem:[#allocation3 + $0x1bc] sm:$0xf] %v1073_v51 }
 0x18d   : > { %1621 = vst [vmem:[#allocation3 + $0x180] sm:$0xf] %v1073_v51  ;;  %v13430_v51 = vpop.permute.xlu0 %1276 }
 0x18e   : > { %1560 = vst [vmem:[#allocation3 + $0x1e4] sm:$0xf] %v1146_v20 }
 0x18f   : > { %1654 = vst [vmem:[#allocation3 + $0x1a8] sm:$0xf] %v1146_v20 }
 0x190   : > { %v822_v27 = vld [vmem:[#allocation2 + $0x7f] sm:$0xff]  ;;  %1496 = vst [vmem:[#allocation3 + $0x1dc] sm:$0xf] %v1396_v55 }
 0x191   : > { %v1181_v13 = vld [vmem:[#allocation2 + $0x79] sm:$0xff]  ;;  %v1038_v26 = vmul.f32 %v13267_v29, %v822_v27  ;;  %1590 = vst [vmem:[#allocation3 + $0x1a0] sm:$0xf] %v1396_v55  ;;  %v10468_v17 = vld [vmem:[#allocation3 + $0x21c] sm:$0xf0] }
 0x192   : > { %v1361_v15 = vmul.f32 %v13413_v50, %v1181_v13  ;;  %17611 = vst [vmem:[#allocation84_spill] sm:$0xff] %v13426_v28  ;;  %v10471_v20 = vor.u32 %v12025_v54, %v10468_v17  ;;  %v10330_v27 = vld [vmem:[#allocation3 + $0xe0] sm:$0xf]  ;;  %v1148_v17 = vpack.c.bf16 %v13428_v47, %v13428_v47 }
 0x193   : > { %17612 = vst [vmem:[#allocation85_spill] sm:$0xff] %v13428_v47  ;;  %v1074_v56 = vpack.c.bf16 %v1038_v26, %v1038_v26  ;;  %v10331_v13 = vor.u32 %v11994_v63, %v10330_v27  ;;  %v13441_v27 = vpop.permute.xlu2 %1284  ;;  %v12017_v14 = vld [vmem:[#allocation3 + $0x1bc] sm:$0xf] }
 0x194   : > { %1684 = vst [vmem:[#allocation3 + $0x164] sm:$0xf] %v1396_v55  ;;  %v1397_v45 = vpack.c.bf16 %v1361_v15, %v1361_v15  ;;  %3311 = vmatmul.bf16.gmra.mxu2 %v10471_v20  ;;  %v3188_v55 = vpop.f32.mrf.mxu1 }
 0x195   : > { %17613 = vst [vmem:[#allocation86_spill] sm:$0xff] %v13430_v51  ;;  %3380 = vmatmul.bf16.gmra.mxu3 %v10331_v13  ;;  %v13435_v54 = vadd.f32 %v3277_v52, %v3188_v55  ;;  %v13443_v13 = vpop.f32.mrf.mxu0 }
 0x196   : > { %789 = vst [vmem:[#allocation2 + $0x88] sm:$0xff] %v13415_v46  ;;  %v13445_v46 = vpop.permute.xlu0 %1288 }
 0x197   : > { %1467 = vst [vmem:[#allocation3 + $0x244] sm:$0xf] %v1147_v62 }
 0x198   : > { %1434 = vst [vmem:[#allocation3 + $0x21c] sm:$0xf] %v1074_v56 }
 0x199   : > { %1497 = vst [vmem:[#allocation3 + $0x200] sm:$0xf] %v1397_v45 }
 0x19a   : > { %1528 = vst [vmem:[#allocation3 + $0x1e0] sm:$0xf] %v1074_v56 }
 0x19b   : > { %17614 = vst [vmem:[#allocation87_spill] sm:$0xff] %v13433_v39 }
 0x19c   : > { %1591 = vst [vmem:[#allocation3 + $0x1c4] sm:$0xf] %v1397_v45 }
 0x19d   : > { %1622 = vst [vmem:[#allocation3 + $0x1a4] sm:$0xf] %v1074_v56  ;;  %v823_v26 = vld [vmem:[#allocation2 + $0x87] sm:$0xff] }
 0x19e   : > { %1685 = vst [vmem:[#allocation3 + $0x188] sm:$0xf] %v1397_v45  ;;  %v1182_v15 = vld [vmem:[#allocation2 + $0x81] sm:$0xff]  ;;  %v1039_v20 = vmul.f32 %v13259_v24, %v823_v26 }
 0x19f   : > { %v1362_v63 = vmul.f32 %v13419_v22, %v1182_v15  ;;  %1561 = vst [vmem:[#allocation3 + $0x208] sm:$0xf] %v1147_v62  ;;  %v10466_v56 = vld [vmem:[#allocation3 + $0x1f8] sm:$0xf]  ;;  %v12029_v52 = vld [vmem:[#allocation3 + $0x218] sm:$0xf0] }
 0x1a0   : > { %17615 = vst [vmem:[#allocation88_spill] sm:$0xff] %v13441_v27  ;;  %v1075_v45 = vpack.c.bf16 %v1039_v20, %v1039_v20  ;;  %v10467_v35 = vor.u32 %v12029_v52, %v10466_v56  ;;  %v1149_v56 = vpack.c.bf16 %v13443_v13, %v13443_v13  ;;  %v10366_v52 = vld [vmem:[#allocation3 + $0x128] sm:$0xf] }
 0x1a1   : > { %17616 = vst [vmem:[#allocation89_spill] sm:$0xff] %v13443_v13  ;;  %v1398_v55 = vpack.c.bf16 %v1362_v63, %v1362_v63  ;;  %v10440_v26 = vld [vmem:[#allocation3 + $0x1dc] sm:$0xf0]  ;;  %v10367_v36 = vor.u32 %v12003_v5, %v10366_v52 }
 0x1a2   : > { %1655 = vst [vmem:[#allocation3 + $0x1cc] sm:$0xf] %v1147_v62  ;;  %3222 = vmatmul.bf16.gmra.mxu1 %v10467_v35  ;;  %v10443_v15 = vor.u32 %v12017_v14, %v10440_v26  ;;  %v13448_v62 = vpop.permute.xlu1 %1280  ;;  %v13454_v14 = vpop.permute.xlu2 %1296 }
 0x1a3   : > { %17617 = vst [vmem:[#allocation90_spill] sm:$0xff] %v13445_v46  ;;  %v13456_v26 = vpop.f32.mrf.mxu0 }
 0x1a4   : > { %790 = vst [vmem:[#allocation2 + $0x90] sm:$0xff] %v13428_v47  ;;  %3484 = vmatmul.bf16.gmra.mxu0 %v10443_v15  ;;  %v12034_v15 = vld [vmem:[#allocation3 + $0x244] sm:$0xf] }
 0x1a5   : > { %1468 = vst [vmem:[#allocation3 + $0x268] sm:$0xf] %v1148_v17  ;;  %3385 = vmatmul.bf16.gmra.mxu3 %v10367_v36  ;;  %v1193_v36 = vld [vmem:[#allocation2 + $0xd9] sm:$0xff] }
 0x1a6   : > { %1435 = vst [vmem:[#allocation3 + $0x240] sm:$0xf] %v1075_v45 }
 0x1a7   : > { %1498 = vst [vmem:[#allocation3 + $0x224] sm:$0xf] %v1398_v55 }
 0x1a8   : > { %1529 = vst [vmem:[#allocation3 + $0x204] sm:$0xf] %v1075_v45 }
 0x1a9   : > { %1592 = vst [vmem:[#allocation3 + $0x1e8] sm:$0xf] %v1398_v55 }
 0x1aa   : > { %17618 = vst [vmem:[#allocation91_spill] sm:$0xff] %v13448_v62 }
 0x1ab   : > { %1623 = vst [vmem:[#allocation3 + $0x1c8] sm:$0xf] %v1075_v45  ;;  %v824_v20 = vld [vmem:[#allocation2 + $0x8f] sm:$0xff]  ;;  %v13458_v45 = vpop.permute.xlu0 %1300 }
 0x1ac   : > { %1686 = vst [vmem:[#allocation3 + $0x1ac] sm:$0xf] %v1398_v55  ;;  %v1183_v63 = vld [vmem:[#allocation2 + $0x89] sm:$0xff]  ;;  %v1040_v47 = vmul.f32 %v13177_v42, %v824_v20  ;;  %v10504_v23 = vld [vmem:[#allocation3 + $0x264] sm:$0xf0] }
 0x1ad   : > { %v1363_v35 = vmul.f32 %v13433_v39, %v1183_v63  ;;  %1562 = vst [vmem:[#allocation3 + $0x22c] sm:$0xf] %v1148_v17  ;;  %v10507_v55 = vor.u32 %v12034_v15, %v10504_v23  ;;  %v1191_v63 = vld [vmem:[#allocation2 + $0xc9] sm:$0xff]  ;;  %v13465_v23 = vpop.permute.xlu1 %1292 }
 0x1ae   : > { %17619 = vst [vmem:[#allocation92_spill] sm:$0xff] %v13454_v14  ;;  %v1076_v22 = vpack.c.bf16 %v1040_v47, %v1040_v47 }
 0x1af   : > { %17620 = vst [vmem:[#allocation93_spill] sm:$0xff] %v13456_v26  ;;  %v1399_v20 = vpack.c.bf16 %v1363_v35, %v1363_v35  ;;  %3316 = vmatmul.bf16.gmra.mxu2 %v10507_v55  ;;  %v12141_v35 = vld [vmem:[#allocation4 + $0x118] sm:$0xff]  ;;  %v13469_v55 = vpop.permute.xlu2 %1308 }
 0x1b0   : > { %1656 = vst [vmem:[#allocation3 + $0x1f0] sm:$0xf] %v1148_v17  ;;  %v1371_v17 = vmul.f32 %v13458_v45, %v1191_v63  ;;  %v13471_v63 = vpop.f32.mrf.mxu0  ;;  %3539 = vmatpush.bf16.msra.mxu1 %v12141_v35  ;;  %v13479_v35 = vpop.f32.mrf.mxu2 }
 0x1b1   : > { %17621 = vst [vmem:[#allocation94_spill] sm:$0xff] %v13458_v45  ;;  %v1373_v45 = vmul.f32 %v13469_v55, %v1193_v36  ;;  %v1192_v36 = vld [vmem:[#allocation2 + $0xd1] sm:$0xff] }
 0x1b2   : > { %791 = vst [vmem:[#allocation2 + $0x98] sm:$0xff] %v13443_v13  ;;  %v1407_v5 = vpack.c.bf16 %v1371_v17, %v1371_v17  ;;  %v17625_v13 = vmov 0  }
 0x1b3   : > { %1469 = vst [vmem:[#allocation3 + $0x28c] sm:$0xf] %v1149_v56  ;;  %12473 = vset.pattern.permute.xlu1 %v17625_v13  ;;  %12474 = vset.pattern.permute.xlu2 %v17625_v13 }
 0x1b4   : > { %1436 = vst [vmem:[#allocation3 + $0x264] sm:$0xf] %v1076_v22 }
 0x1b5   : > { %1499 = vst [vmem:[#allocation3 + $0x248] sm:$0xf] %v1399_v20 }
 0x1b6   : > { %1530 = vst [vmem:[#allocation3 + $0x228] sm:$0xf] %v1076_v22 }
 0x1b7   : > { %1593 = vst [vmem:[#allocation3 + $0x20c] sm:$0xf] %v1399_v20 }
 0x1b8   : > { %17622 = vst [vmem:[#allocation95_spill] sm:$0xff] %v13465_v23 }
 0x1b9   : > { %1624 = vst [vmem:[#allocation3 + $0x1ec] sm:$0xf] %v1076_v22  ;;  %v825_v47 = vld [vmem:[#allocation2 + $0x97] sm:$0xff]  ;;  %v10502_v22 = vld [vmem:[#allocation3 + $0x240] sm:$0xf] }
 0x1ba   : > { %1687 = vst [vmem:[#allocation3 + $0x1d0] sm:$0xf] %v1399_v20  ;;  %v1184_v52 = vld [vmem:[#allocation2 + $0x91] sm:$0xff]  ;;  %v1041_v3 = vmul.f32 %v13280_v41, %v825_v47  ;;  %v13477_v41 = vpop.f32.mrf.mxu1 }
 0x1bb   : > { %v1364_v15 = vmul.f32 %v13426_v28, %v1184_v52  ;;  %1563 = vst [vmem:[#allocation3 + $0x250] sm:$0xf] %v1149_v56  ;;  %v12038_v20 = vld [vmem:[#allocation3 + $0x260] sm:$0xf0] }
 0x1bc   : > { %17623 = vst [vmem:[#allocation96_spill] sm:$0xff] %v13469_v55  ;;  %v1077_v17 = vpack.c.bf16 %v1041_v3, %v1041_v3  ;;  %v10503_v52 = vor.u32 %v12038_v20, %v10502_v22  ;;  %v12026_v28 = vld [vmem:[#allocation3 + $0x204] sm:$0xf]  ;;  %v1409_v3 = vpack.c.bf16 %v1373_v45, %v1373_v45  ;;  %v13487_v20 = vpop.f32.mrf.mxu0  ;;  %v1194_v45 = vld [vmem:[#allocation2 + $0xe1] sm:$0xff] }
 0x1bd   : > { %17624 = vst [vmem:[#allocation97_spill] sm:$0xff] %v13471_v63  ;;  %v1400_v47 = vpack.c.bf16 %v1364_v15, %v1364_v15  ;;  %v10476_v39 = vld [vmem:[#allocation3 + $0x224] sm:$0xf0]  ;;  %v13481_v15 = vpop.permute.xlu1 %1304 }
 0x1be   : > { %1657 = vst [vmem:[#allocation3 + $0x214] sm:$0xf] %v1149_v56  ;;  %3227 = vmatmul.bf16.gmra.mxu1 %v10503_v52  ;;  %v10479_v50 = vor.u32 %v12026_v28, %v10476_v39  ;;  %v10402_v56 = vld [vmem:[#allocation3 + $0x170] sm:$0xf]  ;;  %v1372_v39 = vmul.f32 %v13481_v15, %v1192_v36  ;;  %v13485_v28 = vpop.permute.xlu0 %1312 }
 0x1bf   : > { %1507 = vst [vmem:[#allocation3 + $0x368] sm:$0xf] %v1407_v5  ;;  %v10403_v22 = vor.u32 %v12012_v25, %v10402_v56 }
 0x1c0   : > { %1601 = vst [vmem:[#allocation3 + $0x32c] sm:$0xf] %v1407_v5  ;;  %3489 = vmatmul.bf16.gmra.mxu0 %v10479_v50  ;;  %v1150_v50 = vpack.c.bf16 %v13456_v26, %v13456_v26  ;;  %v1408_v13 = vpack.c.bf16 %v1372_v39, %v1372_v39  ;;  %v10438_v39 = vld [vmem:[#allocation3 + $0x1b8] sm:$0xf] }
 0x1c1   : > { %1437 = vst [vmem:[#allocation3 + $0x288] sm:$0xf] %v1077_v17  ;;  %3390 = vmatmul.bf16.gmra.mxu3 %v10403_v22  ;;  %v12021_v22 = vld [vmem:[#allocation3 + $0x1d8] sm:$0xf0] }
 0x1c2   : > { %1500 = vst [vmem:[#allocation3 + $0x26c] sm:$0xf] %v1400_v47  ;;  %v3193_v52 = vpop.f32.mrf.mxu1 }
 0x1c3   : > { %1531 = vst [vmem:[#allocation3 + $0x24c] sm:$0xf] %v1077_v17 }
 0x1c4   : > { %1594 = vst [vmem:[#allocation3 + $0x230] sm:$0xf] %v1400_v47  ;;  %v13495_v25 = vpop.f32.mrf.mxu0 }
 0x1c5   : > { %17626 = vst [vmem:[#allocation98_spill] sm:$0xff] %v13481_v15 }
 0x1c6   : > { %1625 = vst [vmem:[#allocation3 + $0x210] sm:$0xf] %v1077_v17  ;;  %v1374_v17 = vmul.f32 %v13485_v28, %v1194_v45  ;;  %v1151_v45 = vpack.c.bf16 %v13471_v63, %v13471_v63  ;;  %v13572_v19 = vpop.permute.xlu0 %1324 }
 0x1c7   : > { %1688 = vst [vmem:[#allocation3 + $0x1f4] sm:$0xf] %v1400_v47 }
 0x1c8   : > { %1695 = vst [vmem:[#allocation3 + $0x2f0] sm:$0xf] %v1407_v5  ;;  %v3282_v5 = vpop.f32.mrf.mxu2  ;;  %v1410_v56 = vpack.c.bf16 %v1374_v17, %v1374_v17 }
 0x1c9   : > { %17627 = vst [vmem:[#allocation99_spill] sm:$0xff] %v13485_v28  ;;  %v13493_v47 = vadd.f32 %v3282_v5, %v3193_v52 }
 0x1ca   : > { %17628 = vst [vmem:[#allocation100_spill] sm:$0xff] %v13487_v20  ;;  %v13504_v42 = vpop.f32.mrf.mxu1 }
 0x1cb   : > { %1509 = vst [vmem:[#allocation3 + $0x3b0] sm:$0xf] %v1409_v3 }
 0x1cc   : > { %1603 = vst [vmem:[#allocation3 + $0x374] sm:$0xf] %v1409_v3 }
 0x1cd   : > { %1697 = vst [vmem:[#allocation3 + $0x338] sm:$0xf] %v1409_v3 }
 0x1ce   : > { %792 = vst [vmem:[#allocation2 + $0xa0] sm:$0xff] %v13456_v26 }
 0x1cf   : > { %1470 = vst [vmem:[#allocation3 + $0x2b0] sm:$0xf] %v1150_v50 }
 0x1d0   : > { %1564 = vst [vmem:[#allocation3 + $0x274] sm:$0xf] %v1150_v50  ;;  %v13502_v15 = vpop.f32.mrf.mxu2 }
 0x1d1   : > { %1658 = vst [vmem:[#allocation3 + $0x238] sm:$0xf] %v1150_v50  ;;  %v12043_v50 = vld [vmem:[#allocation3 + $0x28c] sm:$0xf] }
 0x1d2   : > { %1508 = vst [vmem:[#allocation3 + $0x38c] sm:$0xf] %v1408_v13 }
 0x1d3   : > { %1602 = vst [vmem:[#allocation3 + $0x350] sm:$0xf] %v1408_v13 }
 0x1d4   : > { %1696 = vst [vmem:[#allocation3 + $0x314] sm:$0xf] %v1408_v13  ;;  %v10439_v13 = vor.u32 %v12021_v22, %v10438_v39  ;;  %v1152_v22 = vpack.c.bf16 %v13487_v20, %v13487_v20 }
 0x1d5   : > { %17629 = vst [vmem:[#allocation101_spill] sm:$0xff] %v13495_v25  ;;  %v826_v36 = vld [vmem:[#allocation2 + $0x9f] sm:$0xff] }
 0x1d6   : > { %v1185_v3 = vld [vmem:[#allocation2 + $0x99] sm:$0xff]  ;;  %1510 = vst [vmem:[#allocation3 + $0x3d4] sm:$0xf] %v1410_v56  ;;  %v1042_v26 = vmul.f32 %v13272_v33, %v826_v36  ;;  %3395 = vmatmul.bf16.gmra.mxu3 %v10439_v13  ;;  %v13506_v36 = vpop.f32.mrf.mxu0 }
 0x1d7   : > { %v1365_v52 = vmul.f32 %v13430_v51, %v1185_v3  ;;  %1604 = vst [vmem:[#allocation3 + $0x398] sm:$0xf] %v1410_v56  ;;  %v10540_v17 = vld [vmem:[#allocation3 + $0x2ac] sm:$0xf0]  ;;  %v3198_v51 = vpop.f32.mrf.mxu1 }
 0x1d8   : > { %1698 = vst [vmem:[#allocation3 + $0x35c] sm:$0xf] %v1410_v56  ;;  %v10543_v5 = vor.u32 %v12043_v50, %v10540_v17  ;;  %v1078_v28 = vpack.c.bf16 %v1042_v26, %v1042_v26  ;;  %v10538_v50 = vld [vmem:[#allocation3 + $0x288] sm:$0xf] }
 0x1d9   : > { %v1401_v55 = vpack.c.bf16 %v1365_v52, %v1365_v52  ;;  %793 = vst [vmem:[#allocation2 + $0xa8] sm:$0xff] %v13471_v63  ;;  %v3287_v52 = vpop.f32.mrf.mxu2 }
 0x1da   : > { %1471 = vst [vmem:[#allocation3 + $0x2d4] sm:$0xf] %v1151_v45  ;;  %3321 = vmatmul.bf16.gmra.mxu2 %v10543_v5 }
 0x1db   : > { %1438 = vst [vmem:[#allocation3 + $0x2ac] sm:$0xf] %v1078_v28 }
 0x1dc   : > { %1501 = vst [vmem:[#allocation3 + $0x290] sm:$0xf] %v1401_v55 }
 0x1dd   : > { %1532 = vst [vmem:[#allocation3 + $0x270] sm:$0xf] %v1078_v28 }
 0x1de   : > { %1595 = vst [vmem:[#allocation3 + $0x254] sm:$0xf] %v1401_v55 }
 0x1df   : > { %1626 = vst [vmem:[#allocation3 + $0x234] sm:$0xf] %v1078_v28 }
 0x1e0   : > { %17630 = vst [vmem:[#allocation102_spill] sm:$0xff] %v13506_v36  ;;  %v827_v56 = vld [vmem:[#allocation2 + $0xa7] sm:$0xff] }
 0x1e1   : > { %1689 = vst [vmem:[#allocation3 + $0x218] sm:$0xf] %v1401_v55  ;;  %v1186_v26 = vld [vmem:[#allocation2 + $0xa1] sm:$0xff]  ;;  %v1043_v3 = vmul.f32 %v13191_v53, %v827_v56  ;;  %v12035_v55 = vld [vmem:[#allocation3 + $0x24c] sm:$0xf] }
 0x1e2   : > { %v1366_v39 = vmul.f32 %v13448_v62, %v1186_v26  ;;  %1565 = vst [vmem:[#allocation3 + $0x298] sm:$0xf] %v1151_v45  ;;  %v12047_v17 = vld [vmem:[#allocation3 + $0x2a8] sm:$0xf0]  ;;  %v12030_v56 = vld [vmem:[#allocation3 + $0x220] sm:$0xf0]  ;;  %v13513_v26 = vadd.f32 %v3287_v52, %v3198_v51 }
 0x1e3   : > { %1659 = vst [vmem:[#allocation3 + $0x25c] sm:$0xf] %v1151_v45  ;;  %v1079_v5 = vpack.c.bf16 %v1043_v3, %v1043_v3  ;;  %v10539_v28 = vor.u32 %v12047_v17, %v10538_v50  ;;  %v10474_v45 = vld [vmem:[#allocation3 + $0x200] sm:$0xf]  ;;  %v13517_v50 = vpop.f32.mrf.mxu2  ;;  %v10510_v53 = vld [vmem:[#allocation3 + $0x248] sm:$0xf] }
 0x1e4   : > { %v1402_v13 = vpack.c.bf16 %v1366_v39, %v1366_v39  ;;  %794 = vst [vmem:[#allocation2 + $0xb0] sm:$0xff] %v13487_v20  ;;  %v10512_v63 = vld [vmem:[#allocation3 + $0x26c] sm:$0xf0]  ;;  %v10475_v3 = vor.u32 %v12030_v56, %v10474_v45  ;;  %v13515_v39 = vpop.f32.mrf.mxu0 }
 0x1e5   : > { %1472 = vst [vmem:[#allocation3 + $0x2f8] sm:$0xf] %v1152_v22  ;;  %3232 = vmatmul.bf16.gmra.mxu1 %v10539_v28  ;;  %v10515_v33 = vor.u32 %v12035_v55, %v10512_v63  ;;  %v1153_v63 = vpack.c.bf16 %v13495_v25, %v13495_v25  ;;  %v12140_v45 = vld [vmem:[#allocation4 + $0x110] sm:$0xff] }
 0x1e6   : > { %1439 = vst [vmem:[#allocation3 + $0x2d0] sm:$0xf] %v1079_v5  ;;  %3400 = vmatmul.bf16.gmra.mxu3 %v10475_v3  ;;  %3540 = vmatpush.bf16.msra.mxu1 %v12140_v45  ;;  %v12039_v45 = vld [vmem:[#allocation3 + $0x268] sm:$0xf0] }
 0x1e7   : > { %1502 = vst [vmem:[#allocation3 + $0x2b4] sm:$0xf] %v1402_v13  ;;  %3494 = vmatmul.bf16.gmra.mxu0 %v10515_v33  ;;  %v12052_v33 = vld [vmem:[#allocation3 + $0x2d4] sm:$0xf] }
 0x1e8   : > { %1533 = vst [vmem:[#allocation3 + $0x294] sm:$0xf] %v1079_v5 }
 0x1e9   : > { %1596 = vst [vmem:[#allocation3 + $0x278] sm:$0xf] %v1402_v13 }
 0x1ea   : > { %1627 = vst [vmem:[#allocation3 + $0x258] sm:$0xf] %v1079_v5 }
 0x1eb   : > { %1690 = vst [vmem:[#allocation3 + $0x23c] sm:$0xf] %v1402_v13  ;;  %v828_v17 = vld [vmem:[#allocation2 + $0xaf] sm:$0xff]  ;;  %v13524_v13 = vpop.f32.mrf.mxu1 }
 0x1ec   : > { %v1187_v20 = vld [vmem:[#allocation2 + $0xa9] sm:$0xff]  ;;  %v1044_v51 = vmul.f32 %v13291_v48, %v828_v17  ;;  %1566 = vst [vmem:[#allocation3 + $0x2bc] sm:$0xf] %v1152_v22  ;;  %v13526_v3 = vpop.f32.mrf.mxu0 }
 0x1ed   : > { %v1367_v52 = vmul.f32 %v13441_v27, %v1187_v20  ;;  %v10576_v28 = vld [vmem:[#allocation3 + $0x2f4] sm:$0xf0]  ;;  %1660 = vst [vmem:[#allocation3 + $0x280] sm:$0xf] %v1152_v22  ;;  %v3292_v20 = vpop.f32.mrf.mxu2  ;;  %v13528_v22 = vpop.f32.mrf.mxu3 }
 0x1ee   : > { %v10579_v5 = vor.u32 %v12052_v33, %v10576_v28  ;;  %v1080_v55 = vpack.c.bf16 %v1044_v51, %v1044_v51  ;;  %795 = vst [vmem:[#allocation2 + $0xb8] sm:$0xff] %v13495_v25  ;;  %v10574_v25 = vld [vmem:[#allocation3 + $0x2d0] sm:$0xf] }
 0x1ef   : > { %v1403_v56 = vpack.c.bf16 %v1367_v52, %v1367_v52  ;;  %1473 = vst [vmem:[#allocation3 + $0x31c] sm:$0xf] %v1153_v63  ;;  %v1154_v52 = vpack.c.bf16 %v13506_v36, %v13506_v36  ;;  %v12044_v24 = vld [vmem:[#allocation3 + $0x294] sm:$0xf] }
 0x1f0   : > { %3326 = vmatmul.bf16.gmra.mxu2 %v10579_v5  ;;  %1440 = vst [vmem:[#allocation3 + $0x2f4] sm:$0xf] %v1080_v55 }
 0x1f1   : > { %1503 = vst [vmem:[#allocation3 + $0x2d8] sm:$0xf] %v1403_v56 }
 0x1f2   : > { %1534 = vst [vmem:[#allocation3 + $0x2b8] sm:$0xf] %v1080_v55 }
 0x1f3   : > { %1597 = vst [vmem:[#allocation3 + $0x29c] sm:$0xf] %v1403_v56  ;;  %v3203_v5 = vpop.f32.mrf.mxu1 }
 0x1f4   : > { %1628 = vst [vmem:[#allocation3 + $0x27c] sm:$0xf] %v1080_v55  ;;  %v13534_v62 = vadd.f32 %v3292_v20, %v3203_v5 }
 0x1f5   : > { %17631 = vst [vmem:[#allocation103_spill] sm:$0xff] %v13528_v22  ;;  %v829_v17 = vld [vmem:[#allocation2 + $0xb7] sm:$0xff] }
 0x1f6   : > { %1691 = vst [vmem:[#allocation3 + $0x260] sm:$0xf] %v1403_v56  ;;  %v1188_v51 = vld [vmem:[#allocation2 + $0xb1] sm:$0xff]  ;;  %v1045_v33 = vmul.f32 %v13285_v40, %v829_v17  ;;  %v10511_v17 = vor.u32 %v12039_v45, %v10510_v53  ;;  %v12061_v20 = vld [vmem:[#allocation3 + $0x31c] sm:$0xf] }
 0x1f7   : > { %v1368_v28 = vmul.f32 %v13445_v46, %v1188_v51  ;;  %1567 = vst [vmem:[#allocation3 + $0x2e0] sm:$0xf] %v1153_v63  ;;  %v12056_v27 = vld [vmem:[#allocation3 + $0x2f0] sm:$0xf0]  ;;  %v13537_v51 = vpop.f32.mrf.mxu0 }
 0x1f8   : > { %1661 = vst [vmem:[#allocation3 + $0x2a4] sm:$0xf] %v1153_v63  ;;  %v1081_v55 = vpack.c.bf16 %v1045_v33, %v1045_v33  ;;  %v10575_v56 = vor.u32 %v12056_v27, %v10574_v25  ;;  %v13539_v63 = vpop.f32.mrf.mxu2  ;;  %3405 = vmatmul.bf16.gmra.mxu3 %v10511_v17  ;;  %v12139_v25 = vld [vmem:[#allocation4 + $0x108] sm:$0xff]  ;;  %v13543_v33 = vpop.f32.mrf.mxu3 }
 0x1f9   : > { %v1404_v48 = vpack.c.bf16 %v1368_v28, %v1368_v28  ;;  %796 = vst [vmem:[#allocation2 + $0xc0] sm:$0xff] %v13506_v36  ;;  %v10548_v59 = vld [vmem:[#allocation3 + $0x2b4] sm:$0xf0]  ;;  %3541 = vmatpush.bf16.msra.mxu1 %v12139_v25 }
 0x1fa   : > { %1474 = vst [vmem:[#allocation3 + $0x340] sm:$0xf] %v1154_v52  ;;  %3237 = vmatmul.bf16.gmra.mxu1 %v10575_v56  ;;  %v10551_v46 = vor.u32 %v12044_v24, %v10548_v59  ;;  %v1163_v24 = vpack.c.bf16 %v13528_v22, %v13528_v22 }
 0x1fb   : > { %1441 = vst [vmem:[#allocation3 + $0x318] sm:$0xf] %v1081_v55  ;;  %v13541_v27 = vpop.f32.mrf.mxu1 }
 0x1fc   : > { %1504 = vst [vmem:[#allocation3 + $0x2fc] sm:$0xf] %v1404_v48  ;;  %3499 = vmatmul.bf16.gmra.mxu0 %v10551_v46 }
 0x1fd   : > { %1535 = vst [vmem:[#allocation3 + $0x2dc] sm:$0xf] %v1081_v55 }
 0x1fe   : > { %1598 = vst [vmem:[#allocation3 + $0x2c0] sm:$0xf] %v1404_v48 }
 0x1ff   : > { %1629 = vst [vmem:[#allocation3 + $0x2a0] sm:$0xf] %v1081_v55  ;;  %v13551_v29 = vpop.f32.mrf.mxu0 }
 0x200   : > { %17632 = vst [vmem:[#allocation104_spill] sm:$0xff] %v13543_v33  ;;  %v830_v53 = vld [vmem:[#allocation2 + $0xbf] sm:$0xff]  ;;  %v831_v28 = vld [vmem:[#allocation2 + $0xc7] sm:$0xff]  ;;  %v3366_v25 = vpop.f32.mrf.mxu3 }
 0x201   : > { %1692 = vst [vmem:[#allocation3 + $0x284] sm:$0xf] %v1404_v48  ;;  %v1189_v5 = vld [vmem:[#allocation2 + $0xb9] sm:$0xff]  ;;  %v1046_v59 = vmul.f32 %v13212_v60, %v830_v53  ;;  %v1047_v45 = vmul.f32 %v13309_v38, %v831_v28  ;;  %v1190_v46 = vld [vmem:[#allocation2 + $0xc1] sm:$0xff]  ;;  %v10612_v56 = vld [vmem:[#allocation3 + $0x33c] sm:$0xf0]  ;;  %v3297_v53 = vpop.f32.mrf.mxu2 }
 0x202   : > { %v1369_v55 = vmul.f32 %v13465_v23, %v1189_v5  ;;  %1568 = vst [vmem:[#allocation3 + $0x304] sm:$0xf] %v1154_v52  ;;  %v1370_v17 = vmul.f32 %v13454_v14, %v1190_v46  ;;  %v10615_v48 = vor.u32 %v12061_v20, %v10612_v56  ;;  %v12048_v5 = vld [vmem:[#allocation3 + $0x2b0] sm:$0xf0]  ;;  %v13557_v20 = vadd.f32 %v3366_v25, %v13435_v54  ;;  %v13559_v46 = vpop.permute.xlu1 %1316  ;;  %v13566_v25 = vpop.permute.xlu2 %1320  ;;  %v12070_v14 = vld [vmem:[#allocation3 + $0x364] sm:$0xf] }
 0x203   : > { %1662 = vst [vmem:[#allocation3 + $0x2c8] sm:$0xf] %v1154_v52  ;;  %v1082_v36 = vpack.c.bf16 %v1046_v59, %v1046_v59  ;;  %v1083_v40 = vpack.c.bf16 %v1047_v45, %v1047_v45  ;;  %v3208_v28 = vpop.f32.mrf.mxu1  ;;  %v10546_v59 = vld [vmem:[#allocation3 + $0x290] sm:$0xf]  ;;  %v1195_v45 = vld [vmem:[#allocation2 + $0xe9] sm:$0xff]  ;;  %v1164_v23 = vpack.c.bf16 %v13543_v33, %v13543_v33 }
 0x204   : > { %v1405_v8 = vpack.c.bf16 %v1369_v55, %v1369_v55  ;;  %805 = vst [vmem:[#allocation2 + $0x108] sm:$0xff] %v13528_v22  ;;  %v1406_v60 = vpack.c.bf16 %v1370_v17, %v1370_v17  ;;  %3331 = vmatmul.bf16.gmra.mxu2 %v10615_v48  ;;  %v13554_v52 = vadd.f32 %v3297_v53, %v3208_v28  ;;  %v10610_v48 = vld [vmem:[#allocation3 + $0x318] sm:$0xf]  ;;  %v1196_v28 = vld [vmem:[#allocation2 + $0xf1] sm:$0xff] }
 0x205   : > { %1577 = vst [vmem:[#allocation3 + $0x448] sm:$0xf] %v1163_v24  ;;  %v10547_v55 = vor.u32 %v12048_v5, %v10546_v59  ;;  %v1375_v54 = vmul.f32 %v13559_v46, %v1195_v45  ;;  %v10648_v5 = vld [vmem:[#allocation3 + $0x384] sm:$0xf0]  ;;  %v12053_v59 = vld [vmem:[#allocation3 + $0x2dc] sm:$0xf] }
 0x206   : > { %1442 = vst [vmem:[#allocation3 + $0x33c] sm:$0xf] %v1082_v36  ;;  %v1197_v45 = vld [vmem:[#allocation2 + $0xf9] sm:$0xff] }
 0x207   : > { %1443 = vst [vmem:[#allocation3 + $0x360] sm:$0xf] %v1083_v40  ;;  %v13561_v56 = vpop.f32.mrf.mxu0 }
 0x208   : > { %1505 = vst [vmem:[#allocation3 + $0x320] sm:$0xf] %v1405_v8  ;;  %3410 = vmatmul.bf16.gmra.mxu3 %v10547_v55  ;;  %v3368_v55 = vpop.f32.mrf.mxu3 }
 0x209   : > { %1506 = vst [vmem:[#allocation3 + $0x344] sm:$0xf] %v1406_v60  ;;  %v13563_v17 = vpop.f32.mrf.mxu2 }
 0x20a   : > { %1536 = vst [vmem:[#allocation3 + $0x300] sm:$0xf] %v1082_v36 }
 0x20b   : > { %1537 = vst [vmem:[#allocation3 + $0x324] sm:$0xf] %v1083_v40  ;;  %v13570_v38 = vpop.f32.mrf.mxu1  ;;  %v1198_v1 = vld [vmem:[#allocation2 + $0x101] sm:$0xff] }
 0x20c   : > { %17633 = vst [vmem:[#allocation105_spill] sm:$0xff] %v13559_v46 }
 0x20d   : > { %1599 = vst [vmem:[#allocation3 + $0x2e4] sm:$0xf] %v1405_v8  ;;  %v12065_v22 = vld [vmem:[#allocation3 + $0x338] sm:$0xf0] }
 0x20e   : > { %1600 = vst [vmem:[#allocation3 + $0x308] sm:$0xf] %v1406_v60  ;;  %v10611_v53 = vor.u32 %v12065_v22, %v10610_v48  ;;  %v1376_v22 = vmul.f32 %v13566_v25, %v1196_v28  ;;  %v1411_v48 = vpack.c.bf16 %v1375_v54, %v1375_v54  ;;  %v13582_v54 = vpop.permute.xlu2 %1005 }
 0x20f   : > { %1630 = vst [vmem:[#allocation3 + $0x2c4] sm:$0xf] %v1082_v36  ;;  %v13578_v46 = vpop.f32.mrf.mxu0 }
 0x210   : > { %17634 = vst [vmem:[#allocation106_spill] sm:$0xff] %v13566_v25  ;;  %3242 = vmatmul.bf16.gmra.mxu1 %v10611_v53  ;;  %v13576_v53 = vpop.permute.xlu1 %1328  ;;  %v1412_v28 = vpack.c.bf16 %v1376_v22, %v1376_v22  ;;  %v12153_v25 = vld [vmem:[#allocation4 + $0x178] sm:$0xff] }
 0x211   : > { %1631 = vst [vmem:[#allocation3 + $0x2e8] sm:$0xf] %v1083_v40  ;;  %v10584_v36 = vld [vmem:[#allocation3 + $0x2fc] sm:$0xf0]  ;;  %v3302_v11 = vpop.f32.mrf.mxu2  ;;  %3624 = vmatpush.bf16.msrb.mxu2 %v12153_v25 }
 0x212   : > { %1693 = vst [vmem:[#allocation3 + $0x2a8] sm:$0xf] %v1405_v8  ;;  %v10587_v40 = vor.u32 %v12053_v59, %v10584_v36  ;;  %v10651_v8 = vor.u32 %v12070_v14, %v10648_v5  ;;  %v1378_v14 = vmul.f32 %v13576_v53, %v1198_v1  ;;  %v12057_v36 = vld [vmem:[#allocation3 + $0x2f8] sm:$0xf0] }
 0x213   : > { %17635 = vst [vmem:[#allocation107_spill] sm:$0xff] %v13572_v19  ;;  %v3213_v5 = vpop.f32.mrf.mxu1 }
 0x214   : > { %1694 = vst [vmem:[#allocation3 + $0x2cc] sm:$0xf] %v1406_v60  ;;  %3504 = vmatmul.bf16.gmra.mxu0 %v10587_v40  ;;  %v1377_v60 = vmul.f32 %v13572_v19, %v1197_v45  ;;  %3336 = vmatmul.bf16.gmra.mxu2 %v10651_v8  ;;  %v13584_v40 = vadd.f32 %v3302_v11, %v3213_v5  ;;  %v13586_v45 = vpop.permute.xlu0 %1010 }
 0x215   : > { %1671 = vst [vmem:[#allocation3 + $0x40c] sm:$0xf] %v1163_v24  ;;  %v839_v24 = vld [vmem:[#allocation2 + $0x107] sm:$0xff]  ;;  %v1414_v25 = vpack.c.bf16 %v1378_v14, %v1378_v14  ;;  %v12079_v14 = vld [vmem:[#allocation3 + $0x3ac] sm:$0xf] }
 0x216   : > { %806 = vst [vmem:[#allocation2 + $0x110] sm:$0xff] %v13543_v33  ;;  %v1413_v59 = vpack.c.bf16 %v1377_v60, %v1377_v60  ;;  %v1055_v22 = vmul.f32 %v13582_v54, %v839_v24  ;;  %v10582_v33 = vld [vmem:[#allocation3 + $0x2d8] sm:$0xf]  ;;  %v13592_v60 = vadd.f32 %v13515_v39, %v13557_v20  ;;  %v3280_v24 = vadd.f32 %v13479_v35, %v13477_v41  ;;  %v10684_v20 = vld [vmem:[#allocation3 + $0x3cc] sm:$0xf0] }
 0x217   : > { %17636 = vst [vmem:[#allocation108_spill] sm:$0xff] %v13576_v53  ;;  %v10646_v53 = vld [vmem:[#allocation3 + $0x360] sm:$0xf]  ;;  %v13594_v11 = vpop.f32.mrf.mxu0 }
 0x218   : > { %1578 = vst [vmem:[#allocation3 + $0x46c] sm:$0xf] %v1164_v23  ;;  %v3369_v39 = vadd.f32 %v3368_v55, %v3280_v24  ;;  %v12066_v24 = vld [vmem:[#allocation3 + $0x340] sm:$0xf0] }
 0x219   : > { %1672 = vst [vmem:[#allocation3 + $0x430] sm:$0xf] %v1164_v23  ;;  %v3371_v23 = vpop.f32.mrf.mxu3  ;;  %v13596_v5 = vpop.f32.mrf.mxu2 }
 0x21a   : > { %1511 = vst [vmem:[#allocation3 + $0x3f8] sm:$0xf] %v1411_v48  ;;  %v3372_v1 = vadd.f32 %v3371_v23, %v13493_v47  ;;  %v12074_v47 = vld [vmem:[#allocation3 + $0x380] sm:$0xf0]  ;;  %v13604_v55 = vadd.f32 %v13526_v3, %v3369_v39  ;;  %v12149_v3 = vld [vmem:[#allocation4 + $0x158] sm:$0xff] }
 0x21b   : > { %1605 = vst [vmem:[#allocation3 + $0x3bc] sm:$0xf] %v1411_v48  ;;  %v13601_v23 = vpop.f32.mrf.mxu1 }
 0x21c   : > { %17637 = vst [vmem:[#allocation109_spill] sm:$0xff] %v13582_v54 }
 0x21d   : > { %1699 = vst [vmem:[#allocation3 + $0x380] sm:$0xf] %v1411_v48  ;;  %v840_v8 = vld [vmem:[#allocation2 + $0x10f] sm:$0xff]  ;;  %v10583_v48 = vor.u32 %v12057_v36, %v10582_v33  ;;  %v1091_v33 = vpack.c.bf16 %v1055_v22, %v1055_v22 }
 0x21e   : > { %1512 = vst [vmem:[#allocation3 + $0x41c] sm:$0xf] %v1412_v28  ;;  %v1056_v19 = vmul.f32 %v13586_v45, %v840_v8  ;;  %v12062_v36 = vld [vmem:[#allocation3 + $0x324] sm:$0xf] }
 0x21f   : > { %17638 = vst [vmem:[#allocation110_spill] sm:$0xff] %v13586_v45  ;;  %3415 = vmatmul.bf16.gmra.mxu3 %v10583_v48  ;;  %v12138_v8 = vld [vmem:[#allocation4 + $0x100] sm:$0xff]  ;;  %v12152_v45 = vld [vmem:[#allocation4 + $0x170] sm:$0xff]  ;;  %v10623_v35 = vor.u32 %v12062_v36, %v10620_v6  ;;  %v13606_v22 = vpop.f32.mrf.mxu0  ;;  %v13612_v36 = vadd.f32 %v13537_v51, %v3372_v1  ;;  %v12161_v1 = vld [vmem:[#allocation4 + $0x1b8] sm:$0xff] }
 0x220   : > { %1606 = vst [vmem:[#allocation3 + $0x3e0] sm:$0xf] %v1412_v28  ;;  %v1092_v54 = vpack.c.bf16 %v1056_v19, %v1056_v19  ;;  %3542 = vmatpush.bf16.msra.mxu1 %v12138_v8  ;;  %3625 = vmatpush.bf16.msrb.mxu2 %v12152_v45  ;;  %v10618_v6 = vld [vmem:[#allocation3 + $0x320] sm:$0xf]  ;;  %v10682_v8 = vld [vmem:[#allocation3 + $0x3a8] sm:$0xf] }
 0x221   : > { %1700 = vst [vmem:[#allocation3 + $0x3a4] sm:$0xf] %v1412_v28  ;;  %v10647_v28 = vor.u32 %v12074_v47, %v10646_v53  ;;  %v3373_v41 = vpop.f32.mrf.mxu3  ;;  %v12151_v53 = vld [vmem:[#allocation4 + $0x168] sm:$0xff]  ;;  %v3307_v19 = vpop.f32.mrf.mxu2  ;;  %v12148_v51 = vld [vmem:[#allocation4 + $0x150] sm:$0xff]  ;;  %3713 = vmatpush.bf16.msra.mxu3 %v12161_v1 }
 0x222   : > { %1513 = vst [vmem:[#allocation3 + $0x440] sm:$0xf] %v1413_v59  ;;  %v1200_v18 = vld [vmem:[#allocation2 + $0x111] sm:$0xff] }
 0x223   : > { %1607 = vst [vmem:[#allocation3 + $0x404] sm:$0xf] %v1413_v59  ;;  %3247 = vmatmul.bf16.gmra.mxu1 %v10647_v28  ;;  %v3218_v48 = vpop.f32.mrf.mxu1  ;;  %v10654_v1 = vld [vmem:[#allocation3 + $0x368] sm:$0xf] }
 0x224   : > { %1701 = vst [vmem:[#allocation3 + $0x3c8] sm:$0xf] %v1413_v59  ;;  %v10687_v59 = vor.u32 %v12079_v14, %v10684_v20  ;;  %3509 = vmatmul.bf16.gmra.mxu0 %v10623_v35  ;;  %3626 = vmatpush.bf16.msrb.mxu2 %v12151_v53  ;;  %v13608_v47 = vadd.f32 %v3307_v19, %v3218_v48  ;;  %v12088_v53 = vld [vmem:[#allocation3 + $0x3f4] sm:$0xf]  ;;  %v10720_v19 = vld [vmem:[#allocation3 + $0x414] sm:$0xf0]  ;;  %v13622_v48 = vpop.permute.xlu1 %1332 }
 0x225   : > { %1514 = vst [vmem:[#allocation3 + $0x464] sm:$0xf] %v1414_v25  ;;  %v10619_v14 = vor.u32 %v12066_v24, %v10618_v6  ;;  %v3285_v20 = vadd.f32 %v13502_v15, %v13504_v42  ;;  %v12071_v6 = vld [vmem:[#allocation3 + $0x36c] sm:$0xf]  ;;  %v13624_v42 = vpop.permute.xlu2 %1336 }
 0x226   : > { %1608 = vst [vmem:[#allocation3 + $0x428] sm:$0xf] %v1414_v25  ;;  %3341 = vmatmul.bf16.gmra.mxu2 %v10687_v59  ;;  %v10656_v59 = vld [vmem:[#allocation3 + $0x38c] sm:$0xf0] }
 0x227   : > { %1702 = vst [vmem:[#allocation3 + $0x3ec] sm:$0xf] %v1414_v25  ;;  %v12150_v25 = vld [vmem:[#allocation4 + $0x160] sm:$0xff]  ;;  %v13614_v39 = vpop.f32.mrf.mxu0  ;;  %v10659_v15 = vor.u32 %v12071_v6, %v10656_v59  ;;  %v10718_v6 = vld [vmem:[#allocation3 + $0x3f0] sm:$0xf] }
 0x228   : > { %1545 = vst [vmem:[#allocation3 + $0x444] sm:$0xf] %v1091_v33  ;;  %3627 = vmatpush.bf16.msrb.mxu2 %v12150_v25  ;;  %v512_v59 = vld [vmem:[%s17118_s11 + $0x110] sm:$0xff] }
 0x229   : > { %1639 = vst [vmem:[#allocation3 + $0x408] sm:$0xf] %v1091_v33  ;;  %v3376_v45 = vpop.f32.mrf.mxu3  ;;  %v12083_v33 = vld [vmem:[#allocation3 + $0x3c8] sm:$0xf0]  ;;  %1015 = vperm.xlu1 %12473, %v512_v59   ;;  %1340 = vperm.xlu0 %12475, %v512_v59  }
 0x22a   : > { %1546 = vst [vmem:[#allocation3 + $0x468] sm:$0xf] %v1092_v54  ;;  %v3377_v28 = vadd.f32 %v3376_v45, %v13513_v26  ;;  %v10683_v35 = vor.u32 %v12083_v33, %v10682_v8  ;;  %v3374_v26 = vadd.f32 %v3373_v41, %v3285_v20  ;;  %v1199_v45 = vld [vmem:[#allocation2 + $0x109] sm:$0xff]  ;;  %v1380_v33 = vmul.f32 %v13624_v42, %v1200_v18 }
 0x22b   : > { %1640 = vst [vmem:[#allocation3 + $0x42c] sm:$0xf] %v1092_v54  ;;  %v13616_v54 = vpop.f32.mrf.mxu2  ;;  %v13620_v25 = vpop.f32.mrf.mxu1  ;;  %v1379_v41 = vmul.f32 %v13622_v48, %v1199_v45  ;;  %v10723_v20 = vor.u32 %v12088_v53, %v10720_v19  ;;  %v12146_v18 = vld [vmem:[#allocation4 + $0x140] sm:$0xff]  ;;  %v12075_v53 = vld [vmem:[#allocation3 + $0x388] sm:$0xf0] }
 0x22c   : > { %3628 = vmatpush.bf16.msrb.mxu2 %v12149_v3  ;;  %17639 = vst [vmem:[#allocation111_spill] sm:$0xff] %v13622_v48  ;;  %v12147_v3 = vld [vmem:[#allocation4 + $0x148] sm:$0xff]  ;;  %v13629_v8 = vadd.f32 %v13551_v29, %v3374_v26  ;;  %v1416_v10 = vpack.c.bf16 %v1380_v33, %v1380_v33  ;;  %v10655_v45 = vor.u32 %v12075_v53, %v10654_v1 }
 0x22d   : > { %17640 = vst [vmem:[#allocation112_spill] sm:$0xff] %v13624_v42  ;;  %v1415_v31 = vpack.c.bf16 %v1379_v41, %v1379_v41  ;;  %v12092_v41 = vld [vmem:[#allocation3 + $0x410] sm:$0xf0] }
 0x22e   : > { %1610 = vst [vmem:[#allocation3 + $0x470] sm:$0xf] %v1416_v10 }
 0x22f   : > { %3420 = vmatmul.bf16.gmra.mxu3 %v10619_v14  ;;  %v12169_v14 = vld [vmem:[#allocation4 + $0x1f8] sm:$0xff]  ;;  %1609 = vst [vmem:[#allocation3 + $0x44c] sm:$0xf] %v1415_v31 }
 0x230   : > { %3629 = vmatpush.bf16.msrb.mxu2 %v12148_v51  ;;  %3802 = vmatpush.bf16.msra.mxu0 %v12169_v14  ;;  %1703 = vst [vmem:[#allocation3 + $0x410] sm:$0xf] %v1415_v31  ;;  %v3290_v31 = vadd.f32 %v13517_v50, %v13524_v13 }
 0x231   : > { %v3378_v24 = vpop.f32.mrf.mxu3  ;;  %1704 = vst [vmem:[#allocation3 + $0x434] sm:$0xf] %v1416_v10  ;;  %12476 = vset.pattern.permute.xlu1 %v17609_v30  ;;  %v12097_v10 = vld [vmem:[#allocation3 + $0x43c] sm:$0xf] }
 0x232   : > { %v3379_v14 = vadd.f32 %v3378_v24, %v3290_v31  ;;  %v12167_v24 = vld [vmem:[#allocation4 + $0x1e8] sm:$0xff] }
 0x233   : > { %3252 = vmatmul.bf16.gmra.mxu1 %v10683_v35  ;;  %v13631_v35 = vpop.f32.mrf.mxu0  ;;  %v3312_v0 = vpop.f32.mrf.mxu2 }
 0x234   : > { %3514 = vmatmul.bf16.gmra.mxu0 %v10659_v15  ;;  %3630 = vmatpush.bf16.msrb.mxu2 %v12147_v3  ;;  %v3223_v29 = vpop.f32.mrf.mxu1  ;;  %v13640_v15 = vadd.f32 %v13561_v56, %v3377_v28  ;;  %v12177_v56 = vld [vmem:[#allocation4 + $0x238] sm:$0xff]  ;;  %v12168_v28 = vld [vmem:[#allocation4 + $0x1f0] sm:$0xff]  ;;  %v13652_v13 = vadd.f32 %v13578_v46, %v3379_v14 }
 0x235   : > { %v13636_v26 = vadd.f32 %v3312_v0, %v3223_v29  ;;  %v10719_v0 = vor.u32 %v12092_v41, %v10718_v6  ;;  %3891 = vmatpush.bf16.msrb.mxu1 %v12177_v56  ;;  %3803 = vmatpush.bf16.msra.mxu0 %v12168_v28  ;;  %v12084_v6 = vld [vmem:[#allocation3 + $0x3d0] sm:$0xf0]  ;;  %v3295_v56 = vadd.f32 %v13539_v63, %v13541_v27 }
 0x236   : > { %3346 = vmatmul.bf16.gmra.mxu2 %v10723_v20  ;;  %v10756_v20 = vld [vmem:[#allocation3 + $0x45c] sm:$0xf0] }
 0x237   : > { %v10759_v50 = vor.u32 %v12097_v10, %v10756_v20  ;;  %v12101_v10 = vld [vmem:[#allocation3 + $0x458] sm:$0xf0] }
 0x238   : > { %3631 = vmatpush.bf16.msrb.mxu2 %v12146_v18  ;;  %v10692_v18 = vld [vmem:[#allocation3 + $0x3d4] sm:$0xf0] }
 0x239   : > { %v3381_v19 = vpop.f32.mrf.mxu3  ;;  %3804 = vmatpush.bf16.msra.mxu0 %v12167_v24  ;;  %v11964_v24 = vld [vmem:[#allocation3 + $0x14] sm:$0xf] }
 0x23a   : > { %v3382_v51 = vadd.f32 %v3381_v19, %v13534_v62  ;;  %v12080_v62 = vld [vmem:[#allocation3 + $0x3b4] sm:$0xf] }
 0x23b   : > { %v13642_v3 = vpop.f32.mrf.mxu0  ;;  %v13646_v33 = vpop.f32.mrf.mxu2  ;;  %v10695_v53 = vor.u32 %v12080_v62, %v10692_v18  ;;  %v10754_v62 = vld [vmem:[#allocation3 + $0x438] sm:$0xf]  ;;  %v12089_v18 = vld [vmem:[#allocation3 + $0x3fc] sm:$0xf] }
 0x23c   : > { %v13649_v59 = vpop.f32.mrf.mxu1  ;;  %v13660_v46 = vadd.f32 %v13594_v11, %v3382_v51  ;;  %v10755_v28 = vor.u32 %v12101_v10, %v10754_v62  ;;  %v513_v11 = vld [vmem:[%s17118_s11 + $0x118] sm:$0xff]  ;;  %v10232_v51 = vld [vmem:[#allocation3 + $0x34] sm:$0xf0]  ;;  %v12164_v62 = vld [vmem:[#allocation4 + $0x1d0] sm:$0xff] }
 0x23d   : > { %v10235_v63 = vor.u32 %v11964_v24, %v10232_v51  ;;  %1020 = vperm.xlu2 %12474, %v513_v11   ;;  %1344 = vperm.xlu1 %12476, %v513_v11   ;;  %v10726_v10 = vld [vmem:[#allocation3 + $0x3f8] sm:$0xf]  ;;  %v10230_v11 = vld [vmem:[#allocation3 + $0x10] sm:$0xf] }
 0x23f   : > { %3425 = vmatmul.bf16.gmra.mxu3 %v10655_v45 }
 0x241   : > { %v3383_v29 = vpop.f32.mrf.mxu3 }
 0x243   : > { %3257 = vmatmul.bf16.gmra.mxu1 %v10719_v0  ;;  %v13654_v30 = vpop.f32.mrf.mxu0  ;;  %v3317_v1 = vpop.f32.mrf.mxu2  ;;  %v10690_v0 = vld [vmem:[#allocation3 + $0x3b0] sm:$0xf] }
 0x244   : > { %3519 = vmatmul.bf16.gmra.mxu0 %v10695_v53  ;;  %v3228_v19 = vpop.f32.mrf.mxu1  ;;  %v10691_v20 = vor.u32 %v12084_v6, %v10690_v0  ;;  %v10728_v53 = vld [vmem:[#allocation3 + $0x41c] sm:$0xf0] }
 0x245   : > { %v13656_v45 = vadd.f32 %v3317_v1, %v3228_v19  ;;  %v12160_v19 = vld [vmem:[#allocation4 + $0x1b0] sm:$0xff]  ;;  %v10731_v6 = vor.u32 %v12089_v18, %v10728_v53  ;;  %v12163_v18 = vld [vmem:[#allocation4 + $0x1c8] sm:$0xff] }
 0x246   : > { %3351 = vmatmul.bf16.gmra.mxu2 %v10759_v50  ;;  %v3384_v50 = vadd.f32 %v3383_v29, %v3295_v56  ;;  %3714 = vmatpush.bf16.msra.mxu3 %v12160_v19  ;;  %v11968_v53 = vld [vmem:[#allocation3 + $0x30] sm:$0xf0]  ;;  %v3300_v19 = vadd.f32 %v13563_v17, %v13570_v38 }
 0x247   : > { %v10231_v51 = vor.u32 %v11968_v53, %v10230_v11  ;;  %v10762_v53 = vld [vmem:[#allocation3 + $0x440] sm:$0xf]  ;;  %v11977_v11 = vld [vmem:[#allocation3 + $0x78] sm:$0xf0] }
 0x248   : > { %v13670_v27 = vadd.f32 %v13606_v22, %v3384_v50 }
 0x249   : > { %v3386_v31 = vpop.f32.mrf.mxu3 }
 0x24a   : > { %v3387_v41 = vadd.f32 %v3386_v31, %v13554_v52  ;;  %v12166_v52 = vld [vmem:[#allocation4 + $0x1e0] sm:$0xff]  ;;  %v12165_v31 = vld [vmem:[#allocation4 + $0x1d8] sm:$0xff] }
 0x24b   : > { %v13662_v14 = vpop.f32.mrf.mxu0  ;;  %3805 = vmatpush.bf16.msra.mxu0 %v12166_v52  ;;  %v13674_v0 = vpop.f32.mrf.mxu2 }
 0x24c   : > { %v13677_v24 = vpop.f32.mrf.mxu1  ;;  %v13680_v50 = vadd.f32 %v13614_v39, %v3387_v41 }
 0x24f   : > { %3430 = vmatmul.bf16.gmra.mxu3 %v10691_v20  ;;  %3806 = vmatpush.bf16.msra.mxu0 %v12165_v31  ;;  %v12093_v20 = vld [vmem:[#allocation3 + $0x418] sm:$0xf0]  ;;  %v10764_v31 = vld [vmem:[#allocation3 + $0x464] sm:$0xf0] }
 0x250   : > { %v10727_v22 = vor.u32 %v12093_v20, %v10726_v10  ;;  %v12162_v10 = vld [vmem:[#allocation4 + $0x1c0] sm:$0xff] }
 0x251   : > { %v3388_v1 = vpop.f32.mrf.mxu3  ;;  %v10268_v20 = vld [vmem:[#allocation3 + $0x7c] sm:$0xf0] }
 0x253   : > { %3262 = vmatmul.bf16.gmra.mxu1 %v10755_v28  ;;  %v13672_v29 = vpop.f32.mrf.mxu0  ;;  %3807 = vmatpush.bf16.msra.mxu0 %v12164_v62 }
 0x254   : > { %3524 = vmatmul.bf16.gmra.mxu0 %v10731_v6  ;;  %v12098_v6 = vld [vmem:[#allocation3 + $0x444] sm:$0xf] }
 0x255   : > { %v10767_v39 = vor.u32 %v12098_v6, %v10764_v31 }
 0x256   : > { %3632 = vmatmul.bf16.vlgmr.msrb.gmra.mxu2 %v10235_v63  ;;  %v11973_v63 = vld [vmem:[#allocation3 + $0x5c] sm:$0xf] }
 0x257   : > { %3808 = vmatpush.bf16.msra.mxu0 %v12163_v18  ;;  %v10271_v41 = vor.u32 %v11973_v63, %v10268_v20  ;;  %v10240_v20 = vld [vmem:[#allocation3 + $0x3c] sm:$0xf0] }
 0x259   : > { %v3391_v56 = vpop.f32.mrf.mxu3 }
 0x25a   : > { %v3392_v28 = vadd.f32 %v3391_v56, %v13584_v40  ;;  %v3389_v40 = vadd.f32 %v3388_v1, %v3300_v19  ;;  %v12176_v56 = vld [vmem:[#allocation4 + $0x230] sm:$0xff] }
 0x25b   : > { %v13682_v52 = vpop.f32.mrf.mxu0  ;;  %3892 = vmatpush.bf16.msrb.mxu1 %v12176_v56  ;;  %3809 = vmatpush.bf16.msra.mxu0 %v12162_v10 }
 0x25c   : > { %v13687_v38 = vadd.f32 %v13631_v35, %v3389_v40  ;;  %v13696_v6 = vadd.f32 %v13642_v3, %v3392_v28  ;;  %v3305_v35 = vadd.f32 %v13596_v5, %v13601_v23  ;;  %v10266_v40 = vld [vmem:[#allocation3 + $0x58] sm:$0xf]  ;;  %v11965_v3 = vld [vmem:[#allocation3 + $0x1c] sm:$0xf]  ;;  %v11982_v28 = vld [vmem:[#allocation3 + $0xa4] sm:$0xf] }
 0x25d   : > { %v3322_v62 = vpop.f32.mrf.mxu2  ;;  %v10267_v56 = vor.u32 %v11977_v11, %v10266_v40 }
 0x25f   : > { %3435 = vmatmul.bf16.gmra.mxu3 %v10727_v22  ;;  %v12102_v22 = vld [vmem:[#allocation3 + $0x460] sm:$0xf0] }
 0x261   : > { %v3393_v42 = vpop.f32.mrf.mxu3 }
 0x262   : > { %v3233_v18 = vpop.f32.mrf.mxu1 }
 0x263   : > { %3543 = vmatmul.bf16.vlgmr.msra.gmra.mxu1 %v10231_v51  ;;  %v13689_v17 = vpop.f32.mrf.mxu0  ;;  %v13691_v1 = vadd.f32 %v3322_v62, %v3233_v18  ;;  %v10763_v51 = vor.u32 %v12102_v22, %v10762_v53  ;;  %v12159_v18 = vld [vmem:[#allocation4 + $0x1a8] sm:$0xff]  ;;  %v10243_v53 = vor.u32 %v11965_v3, %v10240_v20  ;;  %v10302_v20 = vld [vmem:[#allocation3 + $0xa0] sm:$0xf] }
 0x264   : > { %3529 = vmatmul.bf16.gmra.mxu0 %v10767_v39  ;;  %v3394_v39 = vadd.f32 %v3393_v42, %v3305_v35  ;;  %3715 = vmatpush.bf16.msra.mxu3 %v12159_v18  ;;  %v12157_v42 = vld [vmem:[#allocation4 + $0x198] sm:$0xff]  ;;  %v12156_v18 = vld [vmem:[#allocation4 + $0x190] sm:$0xff] }
 0x265   : > { %v13693_v19 = vpop.f32.mrf.mxu2 }
 0x266   : > { %3637 = vmatmul.bf16.gmra.mxu2 %v10271_v41  ;;  %v10304_v41 = vld [vmem:[#allocation3 + $0xc4] sm:$0xf0]  ;;  %v13706_v5 = vadd.f32 %v13654_v30, %v3394_v39  ;;  %v3310_v30 = vadd.f32 %v13616_v54, %v13620_v25  ;;  %v11991_v54 = vld [vmem:[#allocation3 + $0xec] sm:$0xf] }
 0x267   : > { %v10307_v22 = vor.u32 %v11982_v28, %v10304_v41 }
 0x269   : > { %v3396_v63 = vpop.f32.mrf.mxu3 }
 0x26a   : > { %v3397_v62 = vadd.f32 %v3396_v63, %v13608_v47  ;;  %v13703_v10 = vpop.f32.mrf.mxu1  ;;  %v11986_v63 = vld [vmem:[#allocation3 + $0xc0] sm:$0xf0] }
 0x26b   : > { %v13698_v31 = vpop.f32.mrf.mxu0  ;;  %v10303_v3 = vor.u32 %v11986_v63, %v10302_v20 }
 0x26f   : > { %3440 = vmatmul.bf16.gmra.mxu3 %v10763_v51  ;;  %v12158_v51 = vld [vmem:[#allocation4 + $0x1a0] sm:$0xff] }
 0x270   : > { %3716 = vmatpush.bf16.msra.mxu3 %v12158_v51  ;;  %v10340_v51 = vld [vmem:[#allocation3 + $0x10c] sm:$0xf0] }
 0x271   : > { %v3398_v47 = vpop.f32.mrf.mxu3  ;;  %v10343_v37 = vor.u32 %v11991_v54, %v10340_v51  ;;  %v10338_v51 = vld [vmem:[#allocation3 + $0xe8] sm:$0xf] }
 0x273   : > { %3548 = vmatmul.bf16.gmra.mxu1 %v10267_v56  ;;  %v3327_v23 = vpop.f32.mrf.mxu2  ;;  %v13708_v11 = vpop.f32.mrf.mxu0  ;;  %v13713_v56 = vadd.f32 %v13662_v14, %v3397_v62  ;;  %v12155_v14 = vld [vmem:[#allocation4 + $0x188] sm:$0xff] }
 0x274   : > { %3810 = vmatmul.bf16.vlgmr.msra.gmra.mxu0 %v10243_v53  ;;  %3717 = vmatpush.bf16.msra.mxu3 %v12157_v42  ;;  %v12175_v42 = vld [vmem:[#allocation4 + $0x228] sm:$0xff] }
 0x275   : > { %3893 = vmatpush.bf16.msrb.mxu1 %v12175_v42 }
 0x276   : > { %3642 = vmatmul.bf16.gmra.mxu2 %v10307_v22  ;;  %v10276_v22 = vld [vmem:[#allocation3 + $0x84] sm:$0xf0] }
 0x277   : > { %v3238_v35 = vpop.f32.mrf.mxu1 }
 0x278   : > { %v13710_v40 = vadd.f32 %v3327_v23, %v3238_v35  ;;  %v3399_v23 = vadd.f32 %v3398_v47, %v3310_v30  ;;  %3718 = vmatpush.bf16.msra.mxu3 %v12156_v18  ;;  %v11974_v35 = vld [vmem:[#allocation3 + $0x64] sm:$0xf]  ;;  %v11969_v30 = vld [vmem:[#allocation3 + $0x38] sm:$0xf0] }
 0x279   : > { %v3401_v41 = vpop.f32.mrf.mxu3  ;;  %v10279_v25 = vor.u32 %v11974_v35, %v10276_v22  ;;  %v12154_v47 = vld [vmem:[#allocation4 + $0x180] sm:$0xff]  ;;  %v10312_v35 = vld [vmem:[#allocation3 + $0xcc] sm:$0xf0] }
 0x27a   : > { %v3402_v53 = vadd.f32 %v3401_v41, %v13636_v26  ;;  %v13723_v63 = vadd.f32 %v13672_v29, %v3399_v23  ;;  %v10238_v41 = vld [vmem:[#allocation3 + $0x18] sm:$0xf]  ;;  %v3315_v29 = vadd.f32 %v13646_v33, %v13649_v59 }
 0x27b   : > { %v13717_v39 = vpop.f32.mrf.mxu0  ;;  %v3329_v28 = vpop.f32.mrf.mxu2 }
 0x27c   : > { %3719 = vmatpush.bf16.msra.mxu3 %v12155_v14  ;;  %v13728_v22 = vadd.f32 %v13682_v52, %v3402_v53  ;;  %v11983_v52 = vld [vmem:[#allocation3 + $0xac] sm:$0xf]  ;;  %v10376_v53 = vld [vmem:[#allocation3 + $0x154] sm:$0xf0] }
 0x27f   : > { %v3240_v62 = vpop.f32.mrf.mxu1 }
 0x280   : > { %v13720_v48 = vadd.f32 %v3329_v28, %v3240_v62  ;;  %3720 = vmatpush.bf16.msra.mxu3 %v12154_v47  ;;  %v11995_v28 = vld [vmem:[#allocation3 + $0x108] sm:$0xf0]  ;;  %v12000_v47 = vld [vmem:[#allocation3 + $0x134] sm:$0xf] }
 0x281   : > { %v3403_v26 = vpop.f32.mrf.mxu3  ;;  %v10339_v42 = vor.u32 %v11995_v28, %v10338_v51  ;;  %v11978_v28 = vld [vmem:[#allocation3 + $0x80] sm:$0xf0] }
 0x282   : > { %v3404_v54 = vadd.f32 %v3403_v26, %v3315_v29  ;;  %v10274_v26 = vld [vmem:[#allocation3 + $0x60] sm:$0xf] }
 0x283   : > { %3553 = vmatmul.bf16.gmra.mxu1 %v10303_v3  ;;  %v13725_v20 = vpop.f32.mrf.mxu0  ;;  %v10239_v3 = vor.u32 %v11969_v30, %v10238_v41  ;;  %v10315_v41 = vor.u32 %v11983_v52, %v10312_v35 }
 0x284   : > { %3815 = vmatmul.bf16.gmra.mxu0 %v10279_v25  ;;  %v13738_v33 = vadd.f32 %v13689_v17, %v3404_v54  ;;  %v3320_v17 = vadd.f32 %v13674_v0, %v13677_v24  ;;  %v10374_v54 = vld [vmem:[#allocation3 + $0x130] sm:$0xf] }
 0x285   : > { %3721 = vmatmul.bf16.vlgmr.msra.gmra.mxu3 %v10239_v3  ;;  %v10379_v3 = vor.u32 %v12000_v47, %v10376_v53 }
 0x286   : > { %3647 = vmatmul.bf16.gmra.mxu2 %v10343_v37 }
 0x287   : > { %v3332_v18 = vpop.f32.mrf.mxu2 }
 0x289   : > { %v3406_v37 = vpop.f32.mrf.mxu3 }
 0x28a   : > { %v3407_v62 = vadd.f32 %v3406_v37, %v13656_v45  ;;  %v12004_v37 = vld [vmem:[#allocation3 + $0x150] sm:$0xf0] }
 0x28b   : > { %v10375_v52 = vor.u32 %v12004_v37, %v10374_v54  ;;  %v11987_v37 = vld [vmem:[#allocation3 + $0xc8] sm:$0xf0]  ;;  %v10310_v54 = vld [vmem:[#allocation3 + $0xa8] sm:$0xf] }
 0x28d   : > { %v3243_v23 = vpop.f32.mrf.mxu1 }
 0x28e   : > { %v13732_v14 = vadd.f32 %v3332_v18, %v3243_v23  ;;  %v10275_v23 = vor.u32 %v11978_v28, %v10274_v26  ;;  %v10412_v28 = vld [vmem:[#allocation3 + $0x19c] sm:$0xf0] }
 0x28f   : > { %v3334_v25 = vpop.f32.mrf.mxu2  ;;  %v12174_v26 = vld [vmem:[#allocation4 + $0x220] sm:$0xff] }
 0x290   : > { %3894 = vmatpush.bf16.msrb.mxu1 %v12174_v26 }
 0x291   : > { %v13735_v30 = vpop.f32.mrf.mxu0  ;;  %v3408_v18 = vpop.f32.mrf.mxu3 }
 0x293   : > { %3558 = vmatmul.bf16.gmra.mxu1 %v10339_v42  ;;  %v13745_v42 = vadd.f32 %v13698_v31, %v3407_v62  ;;  %v11992_v31 = vld [vmem:[#allocation3 + $0xf4] sm:$0xf]  ;;  %v12009_v62 = vld [vmem:[#allocation3 + $0x17c] sm:$0xf] }
 0x294   : > { %3820 = vmatmul.bf16.gmra.mxu0 %v10315_v41  ;;  %v10348_v41 = vld [vmem:[#allocation3 + $0x114] sm:$0xf0]  ;;  %v10415_v0 = vor.u32 %v12009_v62, %v10412_v28  ;;  %v12013_v28 = vld [vmem:[#allocation3 + $0x198] sm:$0xf0] }
 0x295   : > { %v3245_v59 = vpop.f32.mrf.mxu1  ;;  %3726 = vmatmul.bf16.gmra.mxu3 %v10275_v23  ;;  %v10351_v12 = vor.u32 %v11992_v31, %v10348_v41  ;;  %v10384_v31 = vld [vmem:[#allocation3 + $0x15c] sm:$0xf0] }
 0x296   : > { %3652 = vmatmul.bf16.gmra.mxu2 %v10379_v3  ;;  %v13740_v45 = vadd.f32 %v3334_v25, %v3245_v59  ;;  %v3409_v3 = vadd.f32 %v3408_v18, %v3320_v17 }
 0x297   : > { %v3337_v29 = vpop.f32.mrf.mxu2 }
 0x298   : > { %v13755_v24 = vadd.f32 %v13708_v11, %v3409_v3 }
 0x299   : > { %v13742_v51 = vpop.f32.mrf.mxu0  ;;  %v3411_v47 = vpop.f32.mrf.mxu3 }
 0x29a   : > { %v3412_v25 = vadd.f32 %v3411_v47, %v13691_v1 }
 0x29c   : > { %v13764_v11 = vadd.f32 %v13717_v39, %v3412_v25  ;;  %v12001_v39 = vld [vmem:[#allocation3 + $0x13c] sm:$0xf] }
 0x29f   : > { %v3339_v59 = vpop.f32.mrf.mxu2 }
 0x2a0   : > { %v3248_v35 = vpop.f32.mrf.mxu1 }
 0x2a1   : > { %v13749_v53 = vadd.f32 %v3337_v29, %v3248_v35  ;;  %v13752_v23 = vpop.f32.mrf.mxu0  ;;  %v3325_v29 = vadd.f32 %v13693_v19, %v13703_v10  ;;  %v3413_v18 = vpop.f32.mrf.mxu3  ;;  %v10410_v19 = vld [vmem:[#allocation3 + $0x178] sm:$0xf] }
 0x2a2   : > { %v10411_v10 = vor.u32 %v12013_v28, %v10410_v19  ;;  %v10387_v28 = vor.u32 %v12001_v39, %v10384_v31 }
 0x2a3   : > { %3563 = vmatmul.bf16.gmra.mxu1 %v10375_v52  ;;  %v3414_v35 = vadd.f32 %v3413_v18, %v3325_v29  ;;  %v10311_v52 = vor.u32 %v11987_v37, %v10310_v54  ;;  %v841_v29 = vld [vmem:[#allocation2 + $0x117] sm:$0xff]  ;;  %v842_v18 = vld [vmem:[#allocation2 + $0x11f] sm:$0xff]  ;;  %v1021_v54 = vpop.permute.xlu2 %1020 }
 0x2a4   : > { %3825 = vmatmul.bf16.gmra.mxu0 %v10351_v12 }
 0x2a5   : > { %3731 = vmatmul.bf16.gmra.mxu3 %v10311_v52  ;;  %v12018_v52 = vld [vmem:[#allocation3 + $0x1c4] sm:$0xf] }
 0x2a6   : > { %3657 = vmatmul.bf16.gmra.mxu2 %v10415_v0  ;;  %v10448_v0 = vld [vmem:[#allocation3 + $0x1e4] sm:$0xf0] }
 0x2a8   : > { %v3250_v1 = vpop.f32.mrf.mxu1 }
 0x2a9   : > { %v13759_v17 = vadd.f32 %v3339_v59, %v3250_v1  ;;  %v3342_v47 = vpop.f32.mrf.mxu2  ;;  %v13761_v41 = vpop.f32.mrf.mxu0 }
 0x2aa   : > { %v3416_v12 = vpop.f32.mrf.mxu3  ;;  %v13769_v1 = vpop.permute.xlu1 %1015 }
 0x2ab   : > { %v3417_v59 = vadd.f32 %v3416_v12, %v13710_v40  ;;  %17641 = vst [vmem:[#allocation113_spill] sm:$0xff] %v13769_v1  ;;  %v1057_v25 = vmul.f32 %v13769_v1, %v841_v29  ;;  %v13775_v40 = vadd.f32 %v13725_v20, %v3414_v35  ;;  %v10346_v1 = vld [vmem:[#allocation3 + $0xf0] sm:$0xf]  ;;  %v12022_v20 = vld [vmem:[#allocation3 + $0x1e0] sm:$0xf0] }
 0x2ad   : > { %v1093_v19 = vpack.c.bf16 %v1057_v25, %v1057_v25  ;;  %v13783_v35 = vadd.f32 %v13735_v30, %v3417_v59  ;;  %v10446_v25 = vld [vmem:[#allocation3 + $0x1c0] sm:$0xf] }
 0x2af   : > { %1641 = vst [vmem:[#allocation3 + $0x450] sm:$0xf] %v1093_v19  ;;  %v12027_v19 = vld [vmem:[#allocation3 + $0x20c] sm:$0xf] }
 0x2b0   : > { %v3253_v3 = vpop.f32.mrf.mxu1 }
 0x2b1   : > { %v13766_v26 = vadd.f32 %v3342_v47, %v3253_v3  ;;  %v3344_v62 = vpop.f32.mrf.mxu2  ;;  %v13771_v37 = vpop.f32.mrf.mxu0  ;;  %v1058_v47 = vmul.f32 %v1021_v54, %v842_v18  ;;  %v10451_v3 = vor.u32 %v12018_v52, %v10448_v0  ;;  %v10347_v18 = vor.u32 %v11996_v4, %v10346_v1  ;;  %v12173_v4 = vld [vmem:[#allocation4 + $0x218] sm:$0xff] }
 0x2b2   : > { %v3418_v44 = vpop.f32.mrf.mxu3  ;;  %v10447_v52 = vor.u32 %v12022_v20, %v10446_v25  ;;  %3895 = vmatpush.bf16.msrb.mxu1 %v12173_v4  ;;  %v10382_v25 = vld [vmem:[#allocation3 + $0x138] sm:$0xf]  ;;  %v10482_v4 = vld [vmem:[#allocation3 + $0x208] sm:$0xf] }
 0x2b3   : > { %3568 = vmatmul.bf16.gmra.mxu1 %v10411_v10  ;;  %v1094_v12 = vpack.c.bf16 %v1058_v47, %v1058_v47  ;;  %v3419_v29 = vadd.f32 %v3418_v44, %v13720_v48  ;;  %v10420_v47 = vld [vmem:[#allocation3 + $0x1a4] sm:$0xf0]  ;;  %v10484_v48 = vld [vmem:[#allocation3 + $0x22c] sm:$0xf0] }
 0x2b4   : > { %3830 = vmatmul.bf16.gmra.mxu0 %v10387_v28  ;;  %v10487_v30 = vor.u32 %v12027_v19, %v10484_v48 }
 0x2b5   : > { %1642 = vst [vmem:[#allocation3 + $0x474] sm:$0xf] %v1094_v12  ;;  %3736 = vmatmul.bf16.gmra.mxu3 %v10347_v18  ;;  %v13791_v59 = vadd.f32 %v13742_v51, %v3419_v29  ;;  %v12031_v51 = vld [vmem:[#allocation3 + $0x228] sm:$0xf0] }
 0x2b6   : > { %3662 = vmatmul.bf16.gmra.mxu2 %v10451_v3  ;;  %v12010_v3 = vld [vmem:[#allocation3 + $0x184] sm:$0xf] }
 0x2b8   : > { %v3255_v10 = vpop.f32.mrf.mxu1 }
 0x2b9   : > { %v13777_v7 = vadd.f32 %v3344_v62, %v3255_v10  ;;  %v3347_v31 = vpop.f32.mrf.mxu2  ;;  %v13780_v0 = vpop.f32.mrf.mxu0  ;;  %v10423_v10 = vor.u32 %v12010_v3, %v10420_v47 }
 0x2ba   : > { %v3421_v54 = vpop.f32.mrf.mxu3 }
 0x2bb   : > { %v3422_v62 = vadd.f32 %v3421_v54, %v13732_v14  ;;  %v12005_v14 = vld [vmem:[#allocation3 + $0x158] sm:$0xf0] }
 0x2bc   : > { %v13796_v61 = vld [vmem:[#allocation3 + $0x470] sm:$0xf0] }
 0x2bd   : > { %6085 = vst [vmem:[#allocation3 + $0x474] sm:$0xf] %v1094_v12  ;;  %v13801_v29 = vadd.f32 %v13752_v23, %v3422_v62  ;;  %v12019_v12 = vld [vmem:[#allocation3 + $0x1cc] sm:$0xf] }
 0x2c0   : > { %v3258_v39 = vpop.f32.mrf.mxu1 }
 0x2c1   : > { %v13785_v28 = vadd.f32 %v3347_v31, %v3258_v39  ;;  %v3349_v44 = vpop.f32.mrf.mxu2  ;;  %v13788_v1 = vpop.f32.mrf.mxu0 }
 0x2c2   : > { %v3423_v18 = vpop.f32.mrf.mxu3 }
 0x2c3   : > { %3573 = vmatmul.bf16.gmra.mxu1 %v10447_v52  ;;  %v3424_v39 = vadd.f32 %v3423_v18, %v13740_v45  ;;  %v10383_v52 = vor.u32 %v12005_v14, %v10382_v25  ;;  %v12036_v14 = vld [vmem:[#allocation3 + $0x254] sm:$0xf] }
 0x2c4   : > { %3835 = vmatmul.bf16.gmra.mxu0 %v10423_v10  ;;  %v10456_v10 = vld [vmem:[#allocation3 + $0x1ec] sm:$0xf0] }
 0x2c5   : > { %3741 = vmatmul.bf16.gmra.mxu3 %v10383_v52  ;;  %v10459_v25 = vor.u32 %v12019_v12, %v10456_v10  ;;  %v13809_v23 = vadd.f32 %v13761_v41, %v3424_v39  ;;  %v12040_v10 = vld [vmem:[#allocation3 + $0x270] sm:$0xf0]  ;;  %v10518_v39 = vld [vmem:[#allocation3 + $0x250] sm:$0xf] }
 0x2c6   : > { %3667 = vmatmul.bf16.gmra.mxu2 %v10487_v30 }
 0x2c8   : > { %v3260_v31 = vpop.f32.mrf.mxu1 }
 0x2c9   : > { %v13793_v20 = vadd.f32 %v3349_v44, %v3260_v31  ;;  %v3352_v54 = vpop.f32.mrf.mxu2  ;;  %v13798_v47 = vpop.f32.mrf.mxu0  ;;  %v10483_v44 = vor.u32 %v12031_v51, %v10482_v4  ;;  %v10520_v31 = vld [vmem:[#allocation3 + $0x274] sm:$0xf0]  ;;  %v12014_v51 = vld [vmem:[#allocation3 + $0x1a0] sm:$0xf0]  ;;  %v10418_v4 = vld [vmem:[#allocation3 + $0x180] sm:$0xf] }
 0x2ca   : > { %v3426_v3 = vpop.f32.mrf.mxu3  ;;  %v10523_v52 = vor.u32 %v12036_v14, %v10520_v31 }
 0x2cb   : > { %v3427_v45 = vadd.f32 %v3426_v3, %v13749_v53 }
 0x2cd   : > { %v13817_v31 = vadd.f32 %v13771_v37, %v3427_v45  ;;  %v12045_v37 = vld [vmem:[#allocation3 + $0x29c] sm:$0xf] }
 0x2d0   : > { %v3263_v48 = vpop.f32.mrf.mxu1 }
 0x2d1   : > { %v13803_v19 = vadd.f32 %v3352_v54, %v3263_v48  ;;  %v3354_v30 = vpop.f32.mrf.mxu2  ;;  %v13806_v18 = vpop.f32.mrf.mxu0 }
 0x2d2   : > { %v3428_v54 = vpop.f32.mrf.mxu3 }
 0x2d3   : > { %3578 = vmatmul.bf16.gmra.mxu1 %v10483_v44  ;;  %v3429_v53 = vadd.f32 %v3428_v54, %v13759_v17  ;;  %v10419_v44 = vor.u32 %v12014_v51, %v10418_v4  ;;  %v10556_v54 = vld [vmem:[#allocation3 + $0x2bc] sm:$0xf0]  ;;  %v12172_v51 = vld [vmem:[#allocation4 + $0x210] sm:$0xff] }
 0x2d4   : > { %3840 = vmatmul.bf16.gmra.mxu0 %v10459_v25  ;;  %v10519_v25 = vor.u32 %v12040_v10, %v10518_v39  ;;  %3896 = vmatpush.bf16.msrb.mxu1 %v12172_v51  ;;  %v10559_v34 = vor.u32 %v12045_v37, %v10556_v54  ;;  %v12023_v10 = vld [vmem:[#allocation3 + $0x1e8] sm:$0xf0]  ;;  %v10454_v39 = vld [vmem:[#allocation3 + $0x1c8] sm:$0xf]  ;;  %v12049_v54 = vld [vmem:[#allocation3 + $0x2b8] sm:$0xf0] }
 0x2d5   : > { %3746 = vmatmul.bf16.gmra.mxu3 %v10419_v44  ;;  %v12028_v44 = vld [vmem:[#allocation3 + $0x214] sm:$0xf]  ;;  %v13826_v57 = vadd.f32 %v13780_v0, %v3429_v53  ;;  %v10528_v37 = vld [vmem:[#allocation3 + $0x27c] sm:$0xf0] }
 0x2d6   : > { %3672 = vmatmul.bf16.gmra.mxu2 %v10523_v52  ;;  %v10492_v52 = vld [vmem:[#allocation3 + $0x234] sm:$0xf0] }
 0x2d7   : > { %v10495_v45 = vor.u32 %v12028_v44, %v10492_v52 }
 0x2d8   : > { %v3265_v62 = vpop.f32.mrf.mxu1 }
 0x2d9   : > { %v13811_v48 = vadd.f32 %v3354_v30, %v3265_v62  ;;  %v3633_v3 = vpop.f32.mrf.mxu2  ;;  %v13814_v32 = vpop.f32.mrf.mxu0 }
 0x2da   : > { %v3431_v12 = vpop.f32.mrf.mxu3 }
 0x2db   : > { %v3432_v30 = vadd.f32 %v3431_v12, %v13766_v26 }
 0x2dd   : > { %v13835_v0 = vadd.f32 %v13788_v1, %v3432_v30 }
 0x2e0   : > { %v3544_v41 = vpop.f32.mrf.mxu1 }
 0x2e1   : > { %v3545_v14 = vadd.f32 %v3544_v41, %v13592_v60  ;;  %v3635_v62 = vpop.f32.mrf.mxu2  ;;  %v13823_v4 = vpop.f32.mrf.mxu0 }
 0x2e2   : > { %v3433_v26 = vpop.f32.mrf.mxu3 }
 0x2e3   : > { %3583 = vmatmul.bf16.gmra.mxu1 %v10519_v25  ;;  %v13821_v17 = vadd.f32 %v3633_v3, %v3545_v14  ;;  %v3434_v41 = vadd.f32 %v3433_v26, %v13777_v7  ;;  %v10455_v25 = vor.u32 %v12023_v10, %v10454_v39  ;;  %v10592_v26 = vld [vmem:[#allocation3 + $0x304] sm:$0xf0]  ;;  %v12037_v10 = vld [vmem:[#allocation3 + $0x25c] sm:$0xf] }
 0x2e4   : > { %3845 = vmatmul.bf16.gmra.mxu0 %v10495_v45  ;;  %v10531_v1 = vor.u32 %v12037_v10, %v10528_v37 }
 0x2e5   : > { %3751 = vmatmul.bf16.gmra.mxu3 %v10455_v25  ;;  %v13844_v39 = vadd.f32 %v13798_v47, %v3434_v41 }
 0x2e6   : > { %3677 = vmatmul.bf16.gmra.mxu2 %v10559_v34  ;;  %v10554_v34 = vld [vmem:[#allocation3 + $0x298] sm:$0xf] }
 0x2e8   : > { %v3546_v60 = vpop.f32.mrf.mxu1 }
 0x2e9   : > { %v3547_v3 = vadd.f32 %v3546_v60, %v13604_v55  ;;  %v3638_v14 = vpop.f32.mrf.mxu2  ;;  %v13832_v52 = vpop.f32.mrf.mxu0  ;;  %v10555_v55 = vor.u32 %v12049_v54, %v10554_v34  ;;  %v12054_v60 = vld [vmem:[#allocation3 + $0x2e4] sm:$0xf] }
 0x2ea   : > { %v3436_v51 = vpop.f32.mrf.mxu3  ;;  %v10595_v30 = vor.u32 %v12054_v60, %v10592_v26  ;;  %v10590_v60 = vld [vmem:[#allocation3 + $0x2e0] sm:$0xf] }
 0x2eb   : > { %v13830_v12 = vadd.f32 %v3635_v62, %v3547_v3  ;;  %v3437_v7 = vadd.f32 %v3436_v51, %v13785_v28  ;;  %v12032_v28 = vld [vmem:[#allocation3 + $0x230] sm:$0xf0] }
 0x2ed   : > { %v13851_v37 = vadd.f32 %v13806_v18, %v3437_v7  ;;  %v12063_v18 = vld [vmem:[#allocation3 + $0x32c] sm:$0xf] }
 0x2f0   : > { %v3549_v53 = vpop.f32.mrf.mxu1 }
 0x2f1   : > { %v3550_v44 = vadd.f32 %v3549_v53, %v13612_v36  ;;  %v3640_v45 = vpop.f32.mrf.mxu2  ;;  %v13841_v3 = vpop.f32.mrf.mxu0  ;;  %v10490_v53 = vld [vmem:[#allocation3 + $0x210] sm:$0xf] }
 0x2f2   : > { %v3438_v25 = vpop.f32.mrf.mxu3 }
 0x2f3   : > { %3588 = vmatmul.bf16.gmra.mxu1 %v10555_v55  ;;  %v13839_v62 = vadd.f32 %v3638_v14, %v3550_v44  ;;  %v3439_v14 = vadd.f32 %v3438_v25, %v13793_v20  ;;  %v10491_v44 = vor.u32 %v12032_v28, %v10490_v53  ;;  %v12058_v55 = vld [vmem:[#allocation3 + $0x300] sm:$0xf0]  ;;  %v12171_v25 = vld [vmem:[#allocation4 + $0x208] sm:$0xff] }
 0x2f4   : > { %3850 = vmatmul.bf16.gmra.mxu0 %v10531_v1  ;;  %v10564_v1 = vld [vmem:[#allocation3 + $0x2c4] sm:$0xf0]  ;;  %v12046_v28 = vld [vmem:[#allocation3 + $0x2a4] sm:$0xf]  ;;  %3897 = vmatpush.bf16.msrb.mxu1 %v12171_v25 }
 0x2f5   : > { %3756 = vmatmul.bf16.gmra.mxu3 %v10491_v44  ;;  %v10567_v7 = vor.u32 %v12046_v28, %v10564_v1  ;;  %v13860_v53 = vadd.f32 %v13814_v32, %v3439_v14  ;;  %v10626_v1 = vld [vmem:[#allocation3 + $0x328] sm:$0xf]  ;;  %v12067_v32 = vld [vmem:[#allocation3 + $0x348] sm:$0xf0] }
 0x2f6   : > { %3682 = vmatmul.bf16.gmra.mxu2 %v10595_v30  ;;  %v10627_v28 = vor.u32 %v12067_v32, %v10626_v1  ;;  %v10562_v1 = vld [vmem:[#allocation3 + $0x2a0] sm:$0xf] }
 0x2f8   : > { %v3551_v36 = vpop.f32.mrf.mxu1 }
 0x2f9   : > { %v3552_v54 = vadd.f32 %v3551_v36, %v13629_v8  ;;  %v3643_v51 = vpop.f32.mrf.mxu2  ;;  %v13853_v47 = vpop.f32.mrf.mxu0  ;;  %v10591_v8 = vor.u32 %v12058_v55, %v10590_v60  ;;  %v10628_v36 = vld [vmem:[#allocation3 + $0x34c] sm:$0xf0]  ;;  %v10526_v60 = vld [vmem:[#allocation3 + $0x258] sm:$0xf] }
 0x2fa   : > { %v3441_v26 = vpop.f32.mrf.mxu3 }
 0x2fb   : > { %v13848_v34 = vadd.f32 %v3640_v45, %v3552_v54  ;;  %v3442_v20 = vadd.f32 %v3441_v26, %v13803_v19  ;;  %v10631_v54 = vor.u32 %v12063_v18, %v10628_v36  ;;  %v12041_v19 = vld [vmem:[#allocation3 + $0x278] sm:$0xf0]  ;;  %v12055_v18 = vld [vmem:[#allocation3 + $0x2ec] sm:$0xf] }
 0x2fd   : > { %v13869_v14 = vadd.f32 %v13823_v4, %v3442_v20 }
 0x300   : > { %v3554_v41 = vpop.f32.mrf.mxu1 }
 0x301   : > { %v3555_v10 = vadd.f32 %v3554_v41, %v13640_v15  ;;  %v3645_v30 = vpop.f32.mrf.mxu2 }
 0x302   : > { %v3443_v44 = vpop.f32.mrf.mxu3 }
 0x303   : > { %3593 = vmatmul.bf16.gmra.mxu1 %v10591_v8  ;;  %v13857_v45 = vadd.f32 %v3643_v51, %v3555_v10  ;;  %v13863_v51 = vpop.f32.mrf.mxu0  ;;  %v3444_v41 = vadd.f32 %v3443_v44, %v13811_v48  ;;  %v10527_v8 = vor.u32 %v12041_v19, %v10526_v60  ;;  %v10664_v44 = vld [vmem:[#allocation3 + $0x394] sm:$0xf0]  ;;  %v12072_v19 = vld [vmem:[#allocation3 + $0x374] sm:$0xf]  ;;  %v12050_v60 = vld [vmem:[#allocation3 + $0x2c0] sm:$0xf0] }
 0x304   : > { %3855 = vmatmul.bf16.gmra.mxu0 %v10567_v7  ;;  %v10600_v7 = vld [vmem:[#allocation3 + $0x30c] sm:$0xf0]  ;;  %v10667_v4 = vor.u32 %v12072_v19, %v10664_v44  ;;  %v12064_v44 = vld [vmem:[#allocation3 + $0x334] sm:$0xf] }
 0x305   : > { %3761 = vmatmul.bf16.gmra.mxu3 %v10527_v8  ;;  %v13878_v20 = vadd.f32 %v13832_v52, %v3444_v41  ;;  %v10662_v52 = vld [vmem:[#allocation3 + $0x370] sm:$0xf]  ;;  %v12076_v41 = vld [vmem:[#allocation3 + $0x390] sm:$0xf0] }
 0x306   : > { %3687 = vmatmul.bf16.gmra.mxu2 %v10631_v54 }
 0x308   : > { %v3556_v15 = vpop.f32.mrf.mxu1 }
 0x309   : > { %v3557_v55 = vadd.f32 %v3556_v15, %v13652_v13  ;;  %v3648_v10 = vpop.f32.mrf.mxu2 }
 0x30a   : > { %v3722_v13 = vpop.f32.mrf.mxu3 }
 0x30b   : > { %v13866_v26 = vadd.f32 %v3645_v30, %v3557_v55  ;;  %v3723_v48 = vadd.f32 %v3722_v13, %v13821_v17  ;;  %v13875_v15 = vpop.f32.mrf.mxu0  ;;  %v10603_v55 = vor.u32 %v12055_v18, %v10600_v7  ;;  %v10663_v7 = vor.u32 %v12076_v41, %v10662_v52  ;;  %v12059_v41 = vld [vmem:[#allocation3 + $0x308] sm:$0xf0] }
 0x30d   : > { %v13889_v13 = vadd.f32 %v13841_v3, %v3723_v48 }
 0x310   : > { %v3559_v36 = vpop.f32.mrf.mxu1 }
 0x311   : > { %v3560_v25 = vadd.f32 %v3559_v36, %v13660_v46  ;;  %v3650_v54 = vpop.f32.mrf.mxu2 }
 0x312   : > { %v3724_v17 = vpop.f32.mrf.mxu3 }
 0x313   : > { %3598 = vmatmul.bf16.gmra.mxu1 %v10627_v28  ;;  %v13873_v30 = vadd.f32 %v3648_v10, %v3560_v25  ;;  %v3725_v10 = vadd.f32 %v3724_v17, %v13830_v12  ;;  %v10563_v25 = vor.u32 %v12050_v60, %v10562_v1  ;;  %v13886_v28 = vpop.f32.mrf.mxu0  ;;  %v12170_v60 = vld [vmem:[#allocation4 + $0x200] sm:$0xff]  ;;  %v10598_v1 = vld [vmem:[#allocation3 + $0x2e8] sm:$0xf] }
 0x314   : > { %3860 = vmatmul.bf16.gmra.mxu0 %v10603_v55  ;;  %3898 = vmatpush.bf16.msrb.mxu1 %v12170_v60  ;;  %v12073_v60 = vld [vmem:[#allocation3 + $0x37c] sm:$0xf] }
 0x315   : > { %3766 = vmatmul.bf16.gmra.mxu3 %v10563_v25  ;;  %v13898_v48 = vadd.f32 %v13853_v47, %v3725_v10 }
 0x316   : > { %3692 = vmatmul.bf16.gmra.mxu2 %v10667_v4  ;;  %v12081_v4 = vld [vmem:[#allocation3 + $0x3bc] sm:$0xf] }
 0x318   : > { %v3561_v46 = vpop.f32.mrf.mxu1 }
 0x319   : > { %v3562_v8 = vadd.f32 %v3561_v46, %v13670_v27  ;;  %v13884_v36 = vpop.f32.mrf.mxu2  ;;  %v10700_v46 = vld [vmem:[#allocation3 + $0x3dc] sm:$0xf0] }
 0x31a   : > { %v3727_v12 = vpop.f32.mrf.mxu3  ;;  %v10703_v3 = vor.u32 %v12081_v4, %v10700_v46 }
 0x31b   : > { %v13882_v32 = vadd.f32 %v3650_v54, %v3562_v8  ;;  %v10636_v54 = vld [vmem:[#allocation3 + $0x354] sm:$0xf0]  ;;  %v3728_v19 = vadd.f32 %v3727_v12, %v13839_v62 }
 0x31c   : > { %v10639_v8 = vor.u32 %v12064_v44, %v10636_v54  ;;  %v10698_v12 = vld [vmem:[#allocation3 + $0x3b8] sm:$0xf]  ;;  %v12085_v44 = vld [vmem:[#allocation3 + $0x3d8] sm:$0xf0] }
 0x31d   : > { %v13907_v47 = vadd.f32 %v13863_v51, %v3728_v19  ;;  %v10699_v4 = vor.u32 %v12085_v44, %v10698_v12  ;;  %v12068_v19 = vld [vmem:[#allocation3 + $0x350] sm:$0xf0]  ;;  %v10634_v44 = vld [vmem:[#allocation3 + $0x330] sm:$0xf] }
 0x320   : > { %v3564_v18 = vpop.f32.mrf.mxu1 }
 0x321   : > { %v13892_v27 = vadd.f32 %v3564_v18, %v13680_v50  ;;  %v13895_v55 = vpop.f32.mrf.mxu2  ;;  %v3823_v50 = vpop.f32.mrf.mxu0 }
 0x322   : > { %v3729_v62 = vpop.f32.mrf.mxu3 }
 0x323   : > { %3603 = vmatmul.bf16.gmra.mxu1 %v10663_v7  ;;  %v3730_v52 = vadd.f32 %v3729_v62, %v13848_v34  ;;  %v10599_v7 = vor.u32 %v12059_v41, %v10598_v1  ;;  %v10736_v1 = vld [vmem:[#allocation3 + $0x424] sm:$0xf0] }
 0x324   : > { %3865 = vmatmul.bf16.gmra.mxu0 %v10639_v8  ;;  %v10672_v8 = vld [vmem:[#allocation3 + $0x39c] sm:$0xf0] }
 0x325   : > { %3771 = vmatmul.bf16.gmra.mxu3 %v10599_v7  ;;  %v10675_v62 = vor.u32 %v12073_v60, %v10672_v8  ;;  %v13916_v51 = vadd.f32 %v13875_v15, %v3730_v52  ;;  %v10734_v60 = vld [vmem:[#allocation3 + $0x400] sm:$0xf]  ;;  %v12094_v8 = vld [vmem:[#allocation3 + $0x420] sm:$0xf0] }
 0x326   : > { %3697 = vmatmul.bf16.gmra.mxu2 %v10703_v3 }
 0x328   : > { %v3566_v17 = vpop.f32.mrf.mxu1 }
 0x329   : > { %v13901_v25 = vadd.f32 %v3566_v17, %v13687_v38  ;;  %v13904_v18 = vpop.f32.mrf.mxu2  ;;  %v3826_v38 = vpop.f32.mrf.mxu0  ;;  %v12090_v17 = vld [vmem:[#allocation3 + $0x404] sm:$0xf] }
 0x32a   : > { %v3732_v46 = vpop.f32.mrf.mxu3  ;;  %v10739_v41 = vor.u32 %v12090_v17, %v10736_v1 }
 0x32b   : > { %v3733_v34 = vadd.f32 %v3732_v46, %v13857_v45  ;;  %v10635_v46 = vor.u32 %v12068_v19, %v10634_v44  ;;  %v12099_v19 = vld [vmem:[#allocation3 + $0x44c] sm:$0xf] }
 0x32d   : > { %v13925_v15 = vadd.f32 %v13886_v28, %v3733_v34 }
 0x330   : > { %v3569_v10 = vpop.f32.mrf.mxu1 }
 0x331   : > { %v13910_v54 = vadd.f32 %v3569_v10, %v13696_v6  ;;  %v13913_v3 = vpop.f32.mrf.mxu2  ;;  %v3828_v10 = vpop.f32.mrf.mxu0 }
 0x332   : > { %v3734_v12 = vpop.f32.mrf.mxu3 }
 0x333   : > { %3608 = vmatmul.bf16.gmra.mxu1 %v10699_v4  ;;  %v3735_v45 = vadd.f32 %v3734_v12, %v13866_v26  ;;  %v10772_v12 = vld [vmem:[#allocation3 + $0x46c] sm:$0xf0] }
 0x334   : > { %3870 = vmatmul.bf16.gmra.mxu0 %v10675_v62  ;;  %v12082_v62 = vld [vmem:[#allocation3 + $0x3c4] sm:$0xf]  ;;  %v10775_v49 = vor.u32 %v12099_v19, %v10772_v12 }
 0x335   : > { %3776 = vmatmul.bf16.gmra.mxu3 %v10635_v46  ;;  %v13933_v28 = vadd.f32 %v3823_v50, %v3735_v45  ;;  %v12103_v50 = vld [vmem:[#allocation3 + $0x468] sm:$0xf0] }
 0x336   : > { %3702 = vmatmul.bf16.gmra.mxu2 %v10739_v41  ;;  %v10708_v41 = vld [vmem:[#allocation3 + $0x3e4] sm:$0xf0] }
 0x337   : > { %v10711_v46 = vor.u32 %v12082_v62, %v10708_v41  ;;  %v10770_v41 = vld [vmem:[#allocation3 + $0x448] sm:$0xf] }
 0x338   : > { %v3571_v6 = vpop.f32.mrf.mxu1  ;;  %v10771_v12 = vor.u32 %v12103_v50, %v10770_v41  ;;  %v3654_v41 = vadd.f32 %v13884_v36, %v13892_v27  ;;  %v11970_v27 = vld [vmem:[#allocation3 + $0x40] sm:$0xf0] }
 0x339   : > { %v13919_v7 = vadd.f32 %v3571_v6, %v13706_v5  ;;  %v13922_v4 = vpop.f32.mrf.mxu2  ;;  %v10735_v5 = vor.u32 %v12094_v8, %v10734_v60  ;;  %v3831_v44 = vpop.f32.mrf.mxu0 }
 0x33a   : > { %v3737_v1 = vpop.f32.mrf.mxu3 }
 0x33b   : > { %v3738_v26 = vadd.f32 %v3737_v1, %v13873_v30 }
 0x340   : > { %v3574_v52 = vpop.f32.mrf.mxu1 }
 0x341   : > { %v13928_v17 = vadd.f32 %v3574_v52, %v13713_v56  ;;  %v13931_v6 = vpop.f32.mrf.mxu2  ;;  %v10670_v56 = vld [vmem:[#allocation3 + $0x378] sm:$0xf]  ;;  %v3833_v45 = vpop.f32.mrf.mxu0 }
 0x342   : > { %v3739_v8 = vpop.f32.mrf.mxu3  ;;  %v12329_v52 = vld [vmem:[#allocation7 + $0x38] sm:$0xff] }
 0x343   : > { %3613 = vmatmul.bf16.gmra.mxu1 %v10735_v5  ;;  %v3740_v30 = vadd.f32 %v3739_v8, %v13882_v32  ;;  %v12077_v5 = vld [vmem:[#allocation3 + $0x398] sm:$0xf0]  ;;  %7622 = vmatpush.bf16.msrb.mxu0 %v12329_v52  ;;  %v12327_v32 = vld [vmem:[#allocation7 + $0x28] sm:$0xff]  ;;  %v10744_v8 = vld [vmem:[#allocation3 + $0x42c] sm:$0xf0] }
 0x344   : > { %3875 = vmatmul.bf16.gmra.mxu0 %v10711_v46  ;;  %v10671_v62 = vor.u32 %v12077_v5, %v10670_v56  ;;  %v12614_v56 = vld [vmem:[#allocation2] sm:$0xff] }
 0x345   : > { %v1165_v5 = vpack.c.bf16 %v12614_v56, %v12614_v56 }
 0x346   : > { %3707 = vmatmul.bf16.gmra.mxu2 %v10775_v49  ;;  %3781 = vmatmul.bf16.gmra.mxu3 %v10671_v62  ;;  %v13941_v49 = vadd.f32 %v3826_v38, %v3738_v26  ;;  %v12326_v62 = vld [vmem:[#allocation7 + $0x20] sm:$0xff] }
 0x347   : > { %7623 = vmatpush.bf16.msrb.mxu0 %v12328_v9  ;;  %1673 = vst [vmem:[#allocation3 + $0x454] sm:$0xf] %v1165_v5  ;;  %v13948_v9 = vadd.f32 %v3828_v10, %v3740_v30  ;;  %v10706_v38 = vld [vmem:[#allocation3 + $0x3c0] sm:$0xf]  ;;  %v12086_v26 = vld [vmem:[#allocation3 + $0x3e0] sm:$0xf0] }
 0x348   : > { %v3576_v34 = vpop.f32.mrf.mxu1  ;;  %1674 = vst [vmem:[#allocation3 + $0x478] sm:$0xf] %v1165_v5  ;;  %v12324_v10 = vld [vmem:[#allocation7 + $0x10] sm:$0xff] }
 0x349   : > { %v13936_v60 = vadd.f32 %v3576_v34, %v13723_v63  ;;  %v13939_v1 = vpop.f32.mrf.mxu2  ;;  %v12091_v34 = vld [vmem:[#allocation3 + $0x40c] sm:$0xf]  ;;  %v3836_v50 = vpop.f32.mrf.mxu0 }
 0x34a   : > { %v3742_v46 = vpop.f32.mrf.mxu3  ;;  %v10747_v2 = vor.u32 %v12091_v34, %v10744_v8  ;;  %v10707_v8 = vor.u32 %v12086_v26, %v10706_v38  ;;  %v12323_v26 = vld [vmem:[#allocation7 + $0x8] sm:$0xff] }
 0x34b   : > { %7624 = vmatpush.bf16.msrb.mxu0 %v12327_v32  ;;  %v12325_v32 = vld [vmem:[#allocation7 + $0x18] sm:$0xff]  ;;  %v3743_v34 = vadd.f32 %v3742_v46, %v3654_v41 }
 0x34d   : > { %v13957_v58 = vadd.f32 %v3831_v44, %v3743_v34  ;;  %v12322_v44 = vld [vmem:[#allocation7] sm:$0xff] }
 0x34f   : > { %7625 = vmatpush.bf16.msrb.mxu0 %v12326_v62  ;;  %v10780_v30 = vld [vmem:[#allocation3 + $0x474] sm:$0xf0]  ;;  %v10246_v62 = vld [vmem:[#allocation3 + $0x20] sm:$0xf] }
 0x350   : > { %v3579_v19 = vpop.f32.mrf.mxu1  ;;  %6117 = vst [vmem:[#allocation3 + $0x478] sm:$0xf] %v1165_v5  ;;  %v10247_v46 = vor.u32 %v11970_v27, %v10246_v62  ;;  %v11979_v27 = vld [vmem:[#allocation3 + $0x88] sm:$0xf0] }
 0x351   : > { %v13944_v63 = vadd.f32 %v3579_v19, %v13728_v22  ;;  %v13946_v52 = vpop.f32.mrf.mxu2  ;;  %v13964_v41 = vpop.f32.mrf.mxu0 }
 0x353   : > { %3618 = vmatmul.bf16.gmra.mxu1 %v10771_v12  ;;  %v3744_v12 = vpop.f32.mrf.mxu3  ;;  %7626 = vmatpush.bf16.msrb.mxu0 %v12325_v32 }
 0x354   : > { %3880 = vmatmul.bf16.gmra.mxu0 %v10747_v2  ;;  %v12100_v2 = vld [vmem:[#allocation3 + $0x454] sm:$0xf] }
 0x355   : > { %6116 = vst [vmem:[#allocation3 + $0x454] sm:$0xf] %v1165_v5  ;;  %v10783_v32 = vor.u32 %v12100_v2, %v10780_v30 }
 0x356   : > { %3786 = vmatmul.bf16.gmra.mxu3 %v10707_v8 }
 0x357   : > { %7627 = vmatpush.bf16.msrb.mxu0 %v12324_v10 }
 0x358   : > { %v3581_v22 = vpop.f32.mrf.mxu1 }
 0x359   : > { %v13953_v19 = vadd.f32 %v3581_v22, %v13738_v33  ;;  %v13955_v56 = vpop.f32.mrf.mxu2  ;;  %v3656_v33 = vadd.f32 %v13895_v55, %v13901_v25  ;;  %v10742_v55 = vld [vmem:[#allocation3 + $0x408] sm:$0xf]  ;;  %v3659_v25 = vadd.f32 %v13904_v18, %v13910_v54  ;;  %v3841_v30 = vpop.f32.mrf.mxu0  ;;  %v12182_v54 = vld [vmem:[#allocation3 + $0x20] sm:$0xf0] }
 0x35b   : > { %v3747_v38 = vpop.f32.mrf.mxu3  ;;  %v3745_v8 = vadd.f32 %v3744_v12, %v3656_v33  ;;  %7628 = vmatpush.bf16.msrb.mxu0 %v12323_v26  ;;  %v10282_v26 = vld [vmem:[#allocation3 + $0x68] sm:$0xf] }
 0x35c   : > { %v3748_v12 = vadd.f32 %v3747_v38, %v3659_v25 }
 0x35d   : > { %v13968_v34 = vadd.f32 %v3833_v45, %v3745_v8  ;;  %v10283_v8 = vor.u32 %v11979_v27, %v10282_v26  ;;  %v11988_v27 = vld [vmem:[#allocation3 + $0xd0] sm:$0xf0] }
 0x35e   : > { %v13979_v45 = vadd.f32 %v3836_v50, %v3748_v12  ;;  %v3664_v50 = vadd.f32 %v13922_v4, %v13928_v17 }
 0x35f   : > { %7629 = vmatpush.bf16.msrb.mxu0 %v12322_v44 }
 0x360   : > { %v3584_v36 = vpop.f32.mrf.mxu1 }
 0x361   : > { %v13962_v22 = vadd.f32 %v3584_v36, %v13745_v42  ;;  %v13966_v5 = vpop.f32.mrf.mxu2  ;;  %v12095_v42 = vld [vmem:[#allocation3 + $0x428] sm:$0xf0] }
 0x362   : > { %v10743_v2 = vor.u32 %v12095_v42, %v10742_v55  ;;  %v10778_v42 = vld [vmem:[#allocation3 + $0x450] sm:$0xf] }
 0x363   : > { %3899 = vmatmul.bf16.vlgmr.msrb.gmra.mxu1 %v10247_v46  ;;  %v13975_v36 = vpop.f32.mrf.mxu3 }
 0x364   : > { %3885 = vmatmul.bf16.gmra.mxu0 %v10783_v32 }
 0x366   : > { %3791 = vmatmul.bf16.gmra.mxu3 %v10743_v2  ;;  %v10779_v2 = vor.u32 %v13796_v61, %v10778_v42 }
 0x368   : > { %v3586_v10 = vpop.f32.mrf.mxu1 }
 0x369   : > { %v13973_v62 = vadd.f32 %v3586_v10, %v13755_v24  ;;  %v13977_v33 = vpop.f32.mrf.mxu2  ;;  %v11078_v24 = vld [vmem:[#allocation3] sm:$0xf]  ;;  %v13982_v10 = vpop.f32.mrf.mxu0 }
 0x36a   : > { %v11079_v44 = vor.u32 %v12182_v54, %v11078_v24 }
 0x36b   : > { %v3752_v18 = vpop.f32.mrf.mxu3 }
 0x36c   : > { %v3753_v12 = vadd.f32 %v3752_v18, %v3664_v50  ;;  %v3669_v18 = vadd.f32 %v13939_v1, %v13944_v63  ;;  %v10354_v50 = vld [vmem:[#allocation3 + $0xf8] sm:$0xf] }
 0x370   : > { %v3589_v46 = vpop.f32.mrf.mxu1 }
 0x371   : > { %v3590_v32 = vadd.f32 %v3589_v46, %v13764_v11  ;;  %v13984_v55 = vpop.f32.mrf.mxu2  ;;  %v13994_v46 = vadd.f32 %v3841_v30, %v3753_v12  ;;  %v3846_v43 = vpop.f32.mrf.mxu0 }
 0x373   : > { %3904 = vmatmul.bf16.gmra.mxu1 %v10283_v8  ;;  %v13991_v11 = vpop.f32.mrf.mxu3  ;;  %v10318_v8 = vld [vmem:[#allocation3 + $0xb0] sm:$0xf] }
 0x374   : > { %7630 = vmatmul.bf16.vlgmr.msrb.gmra.mxu0 %v11079_v44  ;;  %v10319_v24 = vor.u32 %v11988_v27, %v10318_v8 }
 0x376   : > { %3796 = vmatmul.bf16.gmra.mxu3 %v10779_v2  ;;  %v11997_v2 = vld [vmem:[#allocation3 + $0x118] sm:$0xf0] }
 0x378   : > { %v3591_v38 = vpop.f32.mrf.mxu1 }
 0x379   : > { %v13989_v25 = vadd.f32 %v3591_v38, %v13775_v40  ;;  %v3683_v4 = vpop.f32.mrf.mxu2  ;;  %v14004_v42 = vpop.f32.mrf.mxu0 }
 0x37b   : > { %v3757_v44 = vpop.f32.mrf.mxu3 }
 0x37c   : > { %v3758_v30 = vadd.f32 %v3757_v44, %v3669_v18  ;;  %v12006_v44 = vld [vmem:[#allocation3 + $0x160] sm:$0xf0]  ;;  %v10390_v18 = vld [vmem:[#allocation3 + $0x140] sm:$0xf] }
 0x380   : > { %v3594_v26 = vpop.f32.mrf.mxu1 }
 0x381   : > { %v3595_v54 = vadd.f32 %v3594_v26, %v13783_v35  ;;  %v14006_v35 = vadd.f32 %v3846_v43, %v3758_v30  ;;  %v10355_v26 = vor.u32 %v11997_v2, %v10354_v50  ;;  %v3851_v1 = vpop.f32.mrf.mxu0  ;;  %v10391_v50 = vor.u32 %v12006_v44, %v10390_v18 }
 0x383   : > { %3909 = vmatmul.bf16.gmra.mxu1 %v10319_v24  ;;  %v3684_v40 = vadd.f32 %v3683_v4, %v3595_v54  ;;  %v14002_v38 = vpop.f32.mrf.mxu3 }
 0x388   : > { %v3596_v17 = vpop.f32.mrf.mxu1 }
 0x389   : > { %v14000_v61 = vadd.f32 %v3596_v17, %v13791_v59  ;;  %v3674_v59 = vadd.f32 %v13955_v56, %v13962_v22  ;;  %v14020_v17 = vpop.f32.mrf.mxu0 }
 0x38b   : > { %v3762_v8 = vpop.f32.mrf.mxu3 }
 0x38c   : > { %v3763_v43 = vadd.f32 %v3762_v8, %v3674_v59 }
 0x38e   : > { %v14018_v4 = vadd.f32 %v3851_v1, %v3763_v43  ;;  %v12015_v1 = vld [vmem:[#allocation3 + $0x1a8] sm:$0xf0]  ;;  %v10426_v43 = vld [vmem:[#allocation3 + $0x188] sm:$0xf] }
 0x38f   : > { %v10427_v44 = vor.u32 %v12015_v1, %v10426_v43 }
 0x390   : > { %v3599_v12 = vpop.f32.mrf.mxu1 }
 0x391   : > { %v14009_v27 = vadd.f32 %v3599_v12, %v13801_v29 }
 0x393   : > { %3914 = vmatmul.bf16.gmra.mxu1 %v10355_v26  ;;  %v14016_v24 = vpop.f32.mrf.mxu3  ;;  %v3856_v26 = vpop.f32.mrf.mxu0 }
 0x398   : > { %v3601_v63 = vpop.f32.mrf.mxu1 }
 0x399   : > { %v14014_v54 = vadd.f32 %v3601_v63, %v13809_v23  ;;  %v3679_v23 = vadd.f32 %v13977_v33, %v3590_v32 }
 0x39b   : > { %17642 = vst [vmem:[#allocation114_spill] sm:$0xff] %v14014_v54  ;;  %v3767_v12 = vpop.f32.mrf.mxu3  ;;  %v14036_v33 = vpop.f32.mrf.mxu0 }
 0x39c   : > { %v3768_v8 = vadd.f32 %v3767_v12, %v3679_v23  ;;  %17646 = vst [vmem:[#allocation118_spill] sm:$0xff] %v14036_v33  ;;  %v12024_v12 = vld [vmem:[#allocation3 + $0x1f0] sm:$0xf0] }
 0x39e   : > { %v14031_v63 = vadd.f32 %v3856_v26, %v3768_v8  ;;  %v10462_v26 = vld [vmem:[#allocation3 + $0x1d0] sm:$0xf] }
 0x3a0   : > { %v3604_v29 = vpop.f32.mrf.mxu1 }
 0x3a1   : > { %v14023_v30 = vadd.f32 %v3604_v29, %v13817_v31 }
 0x3a3   : > { %17643 = vst [vmem:[#allocation115_spill] sm:$0xff] %v14023_v30  ;;  %3919 = vmatmul.bf16.gmra.mxu1 %v10391_v50  ;;  %v14029_v2 = vpop.f32.mrf.mxu3  ;;  %v3861_v50 = vpop.f32.mrf.mxu0 }
 0x3a8   : > { %v3606_v56 = vpop.f32.mrf.mxu1 }
 0x3a9   : > { %v14027_v22 = vadd.f32 %v3606_v56, %v13826_v57 }
 0x3ab   : > { %17644 = vst [vmem:[#allocation116_spill] sm:$0xff] %v14027_v22  ;;  %v3772_v29 = vpop.f32.mrf.mxu3 }
 0x3ac   : > { %v3773_v18 = vadd.f32 %v3772_v29, %v3684_v40 }
 0x3ae   : > { %v14041_v56 = vadd.f32 %v3861_v50, %v3773_v18  ;;  %v476_v18 = vld [vmem:[%s17115_s8 + $0x78] sm:$0xff] }
 0x3b0   : > { %v3609_v59 = vpop.f32.mrf.mxu1 }
 0x3b1   : > { %v14034_v31 = vadd.f32 %v3609_v59, %v13835_v0  ;;  %v10463_v0 = vor.u32 %v12024_v12, %v10462_v26  ;;  %v12033_v59 = vld [vmem:[#allocation3 + $0x238] sm:$0xf0]  ;;  %v12042_v26 = vld [vmem:[#allocation3 + $0x280] sm:$0xf0] }
 0x3b3   : > { %17645 = vst [vmem:[#allocation117_spill] sm:$0xff] %v14034_v31  ;;  %3924 = vmatmul.bf16.gmra.mxu1 %v10427_v44  ;;  %v10498_v44 = vld [vmem:[#allocation3 + $0x218] sm:$0xf]  ;;  %v12078_v31 = vld [vmem:[#allocation3 + $0x3a0] sm:$0xf0] }
 0x3b4   : > { %v10499_v29 = vor.u32 %v12033_v59, %v10498_v44 }
 0x3b8   : > { %v3611_v57 = vpop.f32.mrf.mxu1 }
 0x3b9   : > { %v14039_v32 = vadd.f32 %v3611_v57, %v13844_v39 }
 0x3bb   : > { %17647 = vst [vmem:[#allocation119_spill] sm:$0xff] %v14039_v32 }
 0x3c0   : > { %v3614_v23 = vpop.f32.mrf.mxu1 }
 0x3c1   : > { %v14044_v8 = vadd.f32 %v3614_v23, %v13851_v37  ;;  %v14055_v37 = vand.u32 4294901760, %v476_v18 }
 0x3c3   : > { %17648 = vst [vmem:[#allocation120_spill] sm:$0xff] %v14044_v8  ;;  %3929 = vmatmul.bf16.gmra.mxu1 %v10463_v0  ;;  %4018 = vmatpush.msra.mxu2 %v14055_v37  ;;  %v14059_v57 = vsub.f32 %v476_v18, %v14055_v37 }
 0x3c4   : > { %17651 = vst [vmem:[#allocation123_spill] sm:$0xff] %v14055_v37 }
 0x3c5   : > { %17652 = vst [vmem:[#allocation124_spill] sm:$0xff] %v14059_v57  ;;  %v14062_v50 = vand.u32 4294901760, %v14059_v57 }
 0x3c7   : > { %17653 = vst [vmem:[#allocation125_spill] sm:$0xff] %v14062_v50  ;;  %v4061_v12 = vsub.f32 %v14059_v57, %v14062_v50  ;;  %v10642_v50 = vld [vmem:[#allocation3 + $0x338] sm:$0xf] }
 0x3c8   : > { %v3616_v1 = vpop.f32.mrf.mxu1 }
 0x3c9   : > { %v14047_v40 = vadd.f32 %v3616_v1, %v13860_v53  ;;  %v14069_v23 = vand.u32 4294901760, %v4061_v12  ;;  %v10534_v1 = vld [vmem:[#allocation3 + $0x260] sm:$0xf] }
 0x3cb   : > { %17649 = vst [vmem:[#allocation121_spill] sm:$0xff] %v14047_v40  ;;  %4063 = vmatpush.msrb.mxu3 %v14069_v23 }
 0x3cc   : > { %17655 = vst [vmem:[#allocation127_spill] sm:$0xff] %v14069_v23  ;;  %v10606_v23 = vld [vmem:[#allocation3 + $0x2f0] sm:$0xf] }
 0x3d0   : > { %v3619_v43 = vpop.f32.mrf.mxu1 }
 0x3d1   : > { %v14050_v39 = vadd.f32 %v3619_v43, %v13869_v14  ;;  %v10535_v43 = vor.u32 %v12042_v26, %v10534_v1  ;;  %v12051_v1 = vld [vmem:[#allocation3 + $0x2c8] sm:$0xf0] }
 0x3d3   : > { %17650 = vst [vmem:[#allocation122_spill] sm:$0xff] %v14050_v39  ;;  %3934 = vmatmul.bf16.gmra.mxu1 %v10499_v29  ;;  %v1341_v39 = vpop.permute.xlu0 %1340 }
 0x3d8   : > { %v3621_v53 = vpop.f32.mrf.mxu1 }
 0x3d9   : > { %v14065_v14 = vadd.f32 %v3621_v53, %v13878_v20  ;;  %v475_v20 = vld [vmem:[%s17115_s8 + $0x70] sm:$0xff] }
 0x3da   : > { %v14078_v44 = vand.u32 4294901760, %v475_v20 }
 0x3db   : > { %17654 = vst [vmem:[#allocation126_spill] sm:$0xff] %v14065_v14 }
 0x3dc   : > { %17657 = vst [vmem:[#allocation129_spill] sm:$0xff] %v14078_v44  ;;  %4020 = vmatpush.msra.mxu2 %v14078_v44  ;;  %v14082_v29 = vsub.f32 %v475_v20, %v14078_v44 }
 0x3de   : > { %17658 = vst [vmem:[#allocation130_spill] sm:$0xff] %v14082_v29  ;;  %v14085_v53 = vand.u32 4294901760, %v14082_v29 }
 0x3e0   : > { %v3900_v0 = vpop.f32.mrf.mxu1  ;;  %17659 = vst [vmem:[#allocation131_spill] sm:$0xff] %v14085_v53  ;;  %v4067_v12 = vsub.f32 %v14082_v29, %v14085_v53 }
 0x3e1   : > { %v14073_v59 = vadd.f32 %v3900_v0, %v13889_v13  ;;  %v10570_v0 = vld [vmem:[#allocation3 + $0x2a8] sm:$0xf] }
 0x3e2   : > { %v14092_v26 = vand.u32 4294901760, %v4067_v12  ;;  %v10571_v21 = vor.u32 %v12051_v1, %v10570_v0  ;;  %v12060_v1 = vld [vmem:[#allocation3 + $0x310] sm:$0xf0] }
 0x3e3   : > { %17656 = vst [vmem:[#allocation128_spill] sm:$0xff] %v14073_v59  ;;  %3939 = vmatmul.bf16.gmra.mxu1 %v10535_v43  ;;  %v10607_v53 = vor.u32 %v12060_v1, %v10606_v23  ;;  %v12069_v1 = vld [vmem:[#allocation3 + $0x358] sm:$0xf0] }
 0x3e4   : > { %17661 = vst [vmem:[#allocation133_spill] sm:$0xff] %v14092_v26  ;;  %4069 = vmatpush.msrb.mxu3 %v14092_v26  ;;  %v10643_v14 = vor.u32 %v12069_v1, %v10642_v50  ;;  %v1345_v1 = vpop.permute.xlu1 %1344 }
 0x3e8   : > { %v3902_v18 = vpop.f32.mrf.mxu1 }
 0x3e9   : > { %v14088_v13 = vadd.f32 %v3902_v18, %v13898_v48  ;;  %v474_v48 = vld [vmem:[%s17115_s8 + $0x68] sm:$0xff] }
 0x3ea   : > { %v14101_v18 = vand.u32 4294901760, %v474_v48 }
 0x3eb   : > { %17660 = vst [vmem:[#allocation132_spill] sm:$0xff] %v14088_v13 }
 0x3ec   : > { %17663 = vst [vmem:[#allocation135_spill] sm:$0xff] %v14101_v18  ;;  %4022 = vmatpush.msra.mxu2 %v14101_v18  ;;  %v14105_v12 = vsub.f32 %v474_v48, %v14101_v18 }
 0x3ee   : > { %17664 = vst [vmem:[#allocation136_spill] sm:$0xff] %v14105_v12  ;;  %v14108_v26 = vand.u32 4294901760, %v14105_v12 }
 0x3f0   : > { %v3905_v43 = vpop.f32.mrf.mxu1  ;;  %17665 = vst [vmem:[#allocation137_spill] sm:$0xff] %v14108_v26 }
 0x3f1   : > { %v14096_v20 = vadd.f32 %v3905_v43, %v13907_v47 }
 0x3f3   : > { %17662 = vst [vmem:[#allocation134_spill] sm:$0xff] %v14096_v20  ;;  %3944 = vmatmul.bf16.gmra.mxu1 %v10571_v21  ;;  %v4073_v21 = vsub.f32 %v14105_v12, %v14108_v26 }
 0x3f5   : > { %v14115_v0 = vand.u32 4294901760, %v4073_v21 }
 0x3f7   : > { %17667 = vst [vmem:[#allocation139_spill] sm:$0xff] %v14115_v0  ;;  %4075 = vmatpush.msrb.mxu3 %v14115_v0 }
 0x3f8   : > { %v3907_v16 = vpop.f32.mrf.mxu1 }
 0x3f9   : > { %v14111_v47 = vadd.f32 %v3907_v16, %v13916_v51  ;;  %v473_v16 = vld [vmem:[%s17115_s8 + $0x60] sm:$0xff] }
 0x3fa   : > { %v14124_v51 = vand.u32 4294901760, %v473_v16 }
 0x3fb   : > { %17666 = vst [vmem:[#allocation138_spill] sm:$0xff] %v14111_v47 }
 0x3fc   : > { %17669 = vst [vmem:[#allocation141_spill] sm:$0xff] %v14124_v51  ;;  %4024 = vmatpush.msra.mxu2 %v14124_v51  ;;  %v14128_v21 = vsub.f32 %v473_v16, %v14124_v51 }
 0x3fe   : > { %17670 = vst [vmem:[#allocation142_spill] sm:$0xff] %v14128_v21  ;;  %v14131_v0 = vand.u32 4294901760, %v14128_v21 }
 0x400   : > { %v3910_v43 = vpop.f32.mrf.mxu1  ;;  %17671 = vst [vmem:[#allocation143_spill] sm:$0xff] %v14131_v0  ;;  %v4079_v23 = vsub.f32 %v14128_v21, %v14131_v0 }
 0x401   : > { %v14119_v48 = vadd.f32 %v3910_v43, %v13925_v15 }
 0x403   : > { %17668 = vst [vmem:[#allocation140_spill] sm:$0xff] %v14119_v48  ;;  %3949 = vmatmul.bf16.gmra.mxu1 %v10607_v53  ;;  %v14138_v53 = vand.u32 4294901760, %v4079_v23 }
 0x405   : > { %17673 = vst [vmem:[#allocation145_spill] sm:$0xff] %v14138_v53  ;;  %4081 = vmatpush.msrb.mxu3 %v14138_v53 }
 0x408   : > { %v3912_v26 = vpop.f32.mrf.mxu1 }
 0x409   : > { %v14134_v15 = vadd.f32 %v3912_v26, %v13933_v28  ;;  %v472_v28 = vld [vmem:[%s17115_s8 + $0x58] sm:$0xff] }
 0x40a   : > { %v14147_v26 = vand.u32 4294901760, %v472_v28 }
 0x40b   : > { %17672 = vst [vmem:[#allocation144_spill] sm:$0xff] %v14134_v15 }
 0x40c   : > { %17675 = vst [vmem:[#allocation147_spill] sm:$0xff] %v14147_v26  ;;  %4026 = vmatpush.msra.mxu2 %v14147_v26  ;;  %v14151_v23 = vsub.f32 %v472_v28, %v14147_v26  ;;  %v10678_v28 = vld [vmem:[#allocation3 + $0x380] sm:$0xf] }
 0x40e   : > { %17676 = vst [vmem:[#allocation148_spill] sm:$0xff] %v14151_v23  ;;  %v14154_v53 = vand.u32 4294901760, %v14151_v23 }
 0x410   : > { %v3915_v43 = vpop.f32.mrf.mxu1  ;;  %17677 = vst [vmem:[#allocation149_spill] sm:$0xff] %v14154_v53  ;;  %v4085_v50 = vsub.f32 %v14151_v23, %v14154_v53  ;;  %v470_v53 = vld [vmem:[%s17115_s8 + $0x48] sm:$0xff] }
 0x411   : > { %v14142_v16 = vadd.f32 %v3915_v43, %v13941_v49  ;;  %v1201_v43 = vld [vmem:[#allocation2 + $0x119] sm:$0xff] }
 0x412   : > { %v14161_v40 = vand.u32 4294901760, %v4085_v50  ;;  %v1381_v32 = vmul.f32 %v1341_v39, %v1201_v43  ;;  %v471_v50 = vld [vmem:[%s17115_s8 + $0x50] sm:$0xff] }
 0x413   : > { %17674 = vst [vmem:[#allocation146_spill] sm:$0xff] %v14142_v16  ;;  %3954 = vmatmul.bf16.gmra.mxu1 %v10643_v14  ;;  %v1202_v14 = vld [vmem:[#allocation2 + $0x121] sm:$0xff] }
 0x414   : > { %17679 = vst [vmem:[#allocation151_spill] sm:$0xff] %v14161_v40  ;;  %v1382_v8 = vmul.f32 %v1345_v1, %v1202_v14  ;;  %4087 = vmatpush.msrb.mxu3 %v14161_v40  ;;  %v1417_v30 = vpack.c.bf16 %v1381_v32, %v1381_v32  ;;  %v14170_v14 = vand.u32 4294901760, %v471_v50  ;;  %v12087_v1 = vld [vmem:[#allocation3 + $0x3e8] sm:$0xf0] }
 0x416   : > { %v1418_v22 = vpack.c.bf16 %v1382_v8, %v1382_v8  ;;  %1705 = vst [vmem:[#allocation3 + $0x458] sm:$0xf] %v1417_v30  ;;  %4028 = vmatpush.msra.mxu2 %v14170_v14  ;;  %v14174_v39 = vsub.f32 %v471_v50, %v14170_v14 }
 0x417   : > { %17681 = vst [vmem:[#allocation153_spill] sm:$0xff] %v14170_v14 }
 0x418   : > { %v3917_v0 = vpop.f32.mrf.mxu1  ;;  %1706 = vst [vmem:[#allocation3 + $0x47c] sm:$0xf] %v1418_v22  ;;  %v14179_v8 = vand.u32 4294901760, %v14174_v39 }
 0x419   : > { %v14157_v49 = vadd.f32 %v3917_v0, %v13948_v9  ;;  %v10679_v0 = vor.u32 %v12078_v31, %v10678_v28  ;;  %17682 = vst [vmem:[#allocation154_spill] sm:$0xff] %v14174_v39 }
 0x41a   : > { %17683 = vst [vmem:[#allocation155_spill] sm:$0xff] %v14179_v8 }
 0x41b   : > { %17678 = vst [vmem:[#allocation150_spill] sm:$0xff] %v14157_v49 }
 0x41d   : > { %v10786_v50 = vld [vmem:[#allocation3 + $0x458] sm:$0xf] }
 0x41e   : > { %6148 = vst [vmem:[#allocation3 + $0x458] sm:$0xf] %v1417_v30  ;;  %v12096_v30 = vld [vmem:[#allocation3 + $0x430] sm:$0xf0] }
 0x41f   : > { %v12105_v40 = vld [vmem:[#allocation3 + $0x478] sm:$0xf0] }
 0x420   : > { %v3920_v26 = vpop.f32.mrf.mxu1  ;;  %6149 = vst [vmem:[#allocation3 + $0x47c] sm:$0xf] %v1418_v22 }
 0x421   : > { %v14165_v9 = vadd.f32 %v3920_v26, %v13957_v58  ;;  %v4091_v58 = vsub.f32 %v14174_v39, %v14179_v8  ;;  %v10714_v26 = vld [vmem:[#allocation3 + $0x3c8] sm:$0xf]  ;;  %v14192_v8 = vand.u32 4294901760, %v470_v53 }
 0x423   : > { %17680 = vst [vmem:[#allocation152_spill] sm:$0xff] %v14165_v9  ;;  %3959 = vmatmul.bf16.gmra.mxu1 %v10679_v0  ;;  %v14183_v31 = vand.u32 4294901760, %v4091_v58  ;;  %v10715_v0 = vor.u32 %v12087_v1, %v10714_v26  ;;  %4030 = vmatpush.msra.mxu2 %v14192_v8  ;;  %v14196_v58 = vsub.f32 %v470_v53, %v14192_v8 }
 0x424   : > { %17686 = vst [vmem:[#allocation158_spill] sm:$0xff] %v14192_v8  ;;  %v469_v8 = vld [vmem:[%s17115_s8 + $0x40] sm:$0xff] }
 0x425   : > { %17684 = vst [vmem:[#allocation156_spill] sm:$0xff] %v14183_v31  ;;  %4093 = vmatpush.msrb.mxu3 %v14183_v31  ;;  %v14214_v14 = vand.u32 4294901760, %v469_v8 }
 0x426   : > { %17687 = vst [vmem:[#allocation159_spill] sm:$0xff] %v14196_v58 }
 0x427   : > { %17691 = vst [vmem:[#allocation163_spill] sm:$0xff] %v14214_v14  ;;  %4032 = vmatpush.msra.mxu2 %v14214_v14 }
 0x428   : > { %v14176_v32 = vpop.f32.mrf.mxu1 }
 0x430   : > { %v3925_v43 = vpop.f32.mrf.mxu1 }
 0x431   : > { %v14187_v28 = vadd.f32 %v3925_v43, %v13979_v45  ;;  %v14201_v45 = vand.u32 4294901760, %v14196_v58  ;;  %v10750_v43 = vld [vmem:[#allocation3 + $0x410] sm:$0xf] }
 0x432   : > { %v10751_v53 = vor.u32 %v12096_v30, %v10750_v43  ;;  %v10787_v30 = vor.u32 %v12105_v40, %v10786_v50 }
 0x433   : > { %17685 = vst [vmem:[#allocation157_spill] sm:$0xff] %v14187_v28  ;;  %3964 = vmatmul.bf16.gmra.mxu1 %v10715_v0  ;;  %v4097_v26 = vsub.f32 %v14196_v58, %v14201_v45 }
 0x434   : > { %17688 = vst [vmem:[#allocation160_spill] sm:$0xff] %v14201_v45 }
 0x435   : > { %v14205_v1 = vand.u32 4294901760, %v4097_v26  ;;  %v14218_v26 = vsub.f32 %v469_v8, %v14214_v14  ;;  %v468_v8 = vld [vmem:[%s17115_s8 + $0x38] sm:$0xff] }
 0x436   : > { %v14236_v14 = vand.u32 4294901760, %v468_v8 }
 0x437   : > { %17689 = vst [vmem:[#allocation161_spill] sm:$0xff] %v14205_v1  ;;  %4099 = vmatpush.msrb.mxu3 %v14205_v1  ;;  %v14223_v1 = vand.u32 4294901760, %v14218_v26 }
 0x438   : > { %v14198_v31 = vpop.f32.mrf.mxu1  ;;  %17692 = vst [vmem:[#allocation164_spill] sm:$0xff] %v14218_v26  ;;  %4034 = vmatpush.msra.mxu2 %v14236_v14 }
 0x439   : > { %17693 = vst [vmem:[#allocation165_spill] sm:$0xff] %v14223_v1 }
 0x43a   : > { %17696 = vst [vmem:[#allocation168_spill] sm:$0xff] %v14236_v14 }
 0x440   : > { %v3930_v22 = vpop.f32.mrf.mxu1 }
 0x441   : > { %v14209_v0 = vadd.f32 %v3930_v22, %v13994_v46  ;;  %v4103_v46 = vsub.f32 %v14218_v26, %v14223_v1  ;;  %v14240_v1 = vsub.f32 %v468_v8, %v14236_v14  ;;  %v467_v8 = vld [vmem:[%s17115_s8 + $0x30] sm:$0xff]  ;;  %v466_v26 = vld [vmem:[%s17115_s8 + $0x28] sm:$0xff] }
 0x442   : > { %v14286_v51 = vand.u32 4294901760, %v466_v26 }
 0x443   : > { %17690 = vst [vmem:[#allocation162_spill] sm:$0xff] %v14209_v0  ;;  %3969 = vmatmul.bf16.gmra.mxu1 %v10751_v53  ;;  %v14227_v43 = vand.u32 4294901760, %v4103_v46  ;;  %v14245_v40 = vand.u32 4294901760, %v14240_v1 }
 0x444   : > { %17697 = vst [vmem:[#allocation169_spill] sm:$0xff] %v14240_v1 }
 0x445   : > { %17694 = vst [vmem:[#allocation166_spill] sm:$0xff] %v14227_v43  ;;  %4105 = vmatpush.msrb.mxu3 %v14227_v43  ;;  %v14258_v43 = vand.u32 4294901760, %v467_v8 }
 0x446   : > { %17698 = vst [vmem:[#allocation170_spill] sm:$0xff] %v14245_v40 }
 0x447   : > { %17701 = vst [vmem:[#allocation173_spill] sm:$0xff] %v14258_v43  ;;  %4036 = vmatpush.msra.mxu2 %v14258_v43  ;;  %v14262_v14 = vsub.f32 %v467_v8, %v14258_v43  ;;  %v14281_v43 = vpop.f32.mrf.mxu0 }
 0x448   : > { %v14220_v45 = vpop.f32.mrf.mxu1  ;;  %17706 = vst [vmem:[#allocation178_spill] sm:$0xff] %v14281_v43 }
 0x449   : > { %17702 = vst [vmem:[#allocation174_spill] sm:$0xff] %v14262_v14  ;;  %4038 = vmatpush.msra.mxu2 %v14286_v51 }
 0x44a   : > { %17707 = vst [vmem:[#allocation179_spill] sm:$0xff] %v14286_v51 }
 0x44f   : > { %v14303_v43 = vpop.f32.mrf.mxu0 }
 0x450   : > { %v3935_v22 = vpop.f32.mrf.mxu1  ;;  %17712 = vst [vmem:[#allocation184_spill] sm:$0xff] %v14303_v43 }
 0x451   : > { %v14231_v53 = vadd.f32 %v3935_v22, %v14006_v35  ;;  %v4109_v35 = vsub.f32 %v14240_v1, %v14245_v40 }
 0x453   : > { %17695 = vst [vmem:[#allocation167_spill] sm:$0xff] %v14231_v53  ;;  %3974 = vmatmul.bf16.gmra.mxu1 %v10787_v30  ;;  %v14249_v50 = vand.u32 4294901760, %v4109_v35  ;;  %v14267_v35 = vand.u32 4294901760, %v14262_v14 }
 0x455   : > { %17699 = vst [vmem:[#allocation171_spill] sm:$0xff] %v14249_v50  ;;  %4111 = vmatpush.msrb.mxu3 %v14249_v50  ;;  %v14273_v50 = vpop.f32.mrf.mxu3 }
 0x456   : > { %17703 = vst [vmem:[#allocation175_spill] sm:$0xff] %v14267_v35 }
 0x458   : > { %v14242_v46 = vpop.f32.mrf.mxu1 }
 0x460   : > { %v3940_v30 = vpop.f32.mrf.mxu1 }
 0x461   : > { %v14253_v22 = vadd.f32 %v3940_v30, %v14018_v4  ;;  %v4115_v4 = vsub.f32 %v14262_v14, %v14267_v35  ;;  %v14271_v30 = vpop.f32.mrf.mxu2  ;;  %v14290_v14 = vpop.f32.mrf.mxu3 }
 0x462   : > { %17708 = vst [vmem:[#allocation180_spill] sm:$0xff] %v14290_v14 }
 0x463   : > { %17700 = vst [vmem:[#allocation172_spill] sm:$0xff] %v14253_v22  ;;  %v14275_v1 = vand.u32 4294901760, %v4115_v4  ;;  %v14294_v4 = vsub.f32 %v466_v26, %v14286_v51 }
 0x465   : > { %17704 = vst [vmem:[#allocation176_spill] sm:$0xff] %v14275_v1  ;;  %4117 = vmatpush.msrb.mxu3 %v14275_v1 }
 0x466   : > { %17709 = vst [vmem:[#allocation181_spill] sm:$0xff] %v14294_v4 }
 0x468   : > { %v14264_v40 = vpop.f32.mrf.mxu1 }
 0x469   : > { %v14288_v35 = vpop.f32.mrf.mxu2  ;;  %v14310_v33 = vpop.f32.mrf.mxu3 }
 0x46a   : > { %17714 = vst [vmem:[#allocation186_spill] sm:$0xff] %v14310_v33 }
 0x470   : > { %v3945_v54 = vpop.f32.mrf.mxu1 }
 0x471   : > { %v14279_v8 = vadd.f32 %v3945_v54, %v14031_v63  ;;  %v14299_v54 = vand.u32 4294901760, %v14294_v4  ;;  %v14308_v14 = vpop.f32.mrf.mxu2 }
 0x473   : > { %17705 = vst [vmem:[#allocation177_spill] sm:$0xff] %v14279_v8  ;;  %v4121_v63 = vsub.f32 %v14294_v4, %v14299_v54 }
 0x474   : > { %17711 = vst [vmem:[#allocation183_spill] sm:$0xff] %v14299_v54  ;;  %v14320_v54 = vpop.f32.mrf.mxu0 }
 0x475   : > { %v14305_v8 = vand.u32 4294901760, %v4121_v63  ;;  %17717 = vst [vmem:[#allocation189_spill] sm:$0xff] %v14320_v54 }
 0x477   : > { %17713 = vst [vmem:[#allocation185_spill] sm:$0xff] %v14305_v8  ;;  %4123 = vmatpush.msrb.mxu3 %v14305_v8 }
 0x478   : > { %v14296_v1 = vpop.f32.mrf.mxu1 }
 0x479   : > { %17710 = vst [vmem:[#allocation182_spill] sm:$0xff] %v14296_v1  ;;  %v465_v1 = vld [vmem:[%s17115_s8 + $0x20] sm:$0xff] }
 0x47a   : > { %v14318_v22 = vand.u32 4294901760, %v465_v1 }
 0x47c   : > { %17716 = vst [vmem:[#allocation188_spill] sm:$0xff] %v14318_v22  ;;  %4040 = vmatpush.msra.mxu2 %v14318_v22  ;;  %v14324_v63 = vsub.f32 %v465_v1, %v14318_v22  ;;  %v14340_v54 = vpop.f32.mrf.mxu0 }
 0x47d   : > { %17723 = vst [vmem:[#allocation195_spill] sm:$0xff] %v14340_v54 }
 0x47e   : > { %17718 = vst [vmem:[#allocation190_spill] sm:$0xff] %v14324_v63  ;;  %v14329_v4 = vand.u32 4294901760, %v14324_v63 }
 0x480   : > { %v3950_v26 = vpop.f32.mrf.mxu1  ;;  %17720 = vst [vmem:[#allocation192_spill] sm:$0xff] %v14329_v4 }
 0x481   : > { %v14313_v51 = vadd.f32 %v3950_v26, %v14041_v56  ;;  %v14331_v56 = vpop.f32.mrf.mxu2  ;;  %v14333_v26 = vpop.f32.mrf.mxu3 }
 0x482   : > { %17721 = vst [vmem:[#allocation193_spill] sm:$0xff] %v14333_v26 }
 0x483   : > { %17715 = vst [vmem:[#allocation187_spill] sm:$0xff] %v14313_v51  ;;  %v4127_v51 = vsub.f32 %v14324_v63, %v14329_v4 }
 0x484   : > { %v14362_v54 = vpop.f32.mrf.mxu0 }
 0x485   : > { %v14337_v43 = vand.u32 4294901760, %v4127_v51  ;;  %17731 = vst [vmem:[#allocation203_spill] sm:$0xff] %v14362_v54 }
 0x487   : > { %17722 = vst [vmem:[#allocation194_spill] sm:$0xff] %v14337_v43  ;;  %4129 = vmatpush.msrb.mxu3 %v14337_v43 }
 0x488   : > { %v14326_v8 = vpop.f32.mrf.mxu1 }
 0x489   : > { %17719 = vst [vmem:[#allocation191_spill] sm:$0xff] %v14326_v8  ;;  %v14344_v22 = vpop.f32.mrf.mxu2  ;;  %v464_v8 = vld [vmem:[%s17115_s8 + $0x18] sm:$0xff]  ;;  %v14349_v33 = vpop.f32.mrf.mxu3 }
 0x48a   : > { %17725 = vst [vmem:[#allocation197_spill] sm:$0xff] %v14344_v22  ;;  %v14351_v26 = vand.u32 4294901760, %v464_v8 }
 0x48b   : > { %17726 = vst [vmem:[#allocation198_spill] sm:$0xff] %v14349_v33 }
 0x48c   : > { %17727 = vst [vmem:[#allocation199_spill] sm:$0xff] %v14351_v26  ;;  %4042 = vmatpush.msra.mxu2 %v14351_v26  ;;  %v14355_v51 = vsub.f32 %v464_v8, %v14351_v26  ;;  %v3980_v8 = vadd.f32 %v14088_v13, %v14073_v59 }
 0x48e   : > { %17728 = vst [vmem:[#allocation200_spill] sm:$0xff] %v14355_v51  ;;  %v14360_v4 = vand.u32 4294901760, %v14355_v51 }
 0x490   : > { %v14342_v1 = vpop.f32.mrf.mxu1  ;;  %17730 = vst [vmem:[#allocation202_spill] sm:$0xff] %v14360_v4  ;;  %v4133_v63 = vsub.f32 %v14355_v51, %v14360_v4  ;;  %v14382_v4 = vpop.f32.mrf.mxu0 }
 0x491   : > { %17724 = vst [vmem:[#allocation196_spill] sm:$0xff] %v14342_v1  ;;  %v14368_v33 = vpop.f32.mrf.mxu2  ;;  %v14370_v22 = vpop.f32.mrf.mxu3 }
 0x492   : > { %v14366_v1 = vand.u32 4294901760, %v4133_v63  ;;  %17733 = vst [vmem:[#allocation205_spill] sm:$0xff] %v14370_v22  ;;  %v463_v63 = vld [vmem:[%s17115_s8 + $0x10] sm:$0xff] }
 0x493   : > { %v14384_v51 = vand.u32 4294901760, %v463_v63 }
 0x494   : > { %17732 = vst [vmem:[#allocation204_spill] sm:$0xff] %v14366_v1  ;;  %4135 = vmatpush.msrb.mxu3 %v14366_v1 }
 0x495   : > { %17734 = vst [vmem:[#allocation206_spill] sm:$0xff] %v14384_v51  ;;  %4044 = vmatpush.msra.mxu2 %v14384_v51  ;;  %v14389_v13 = vsub.f32 %v463_v63, %v14384_v51 }
 0x497   : > { %17735 = vst [vmem:[#allocation207_spill] sm:$0xff] %v14389_v13  ;;  %v14401_v1 = vand.u32 4294901760, %v14389_v13 }
 0x498   : > { %v14357_v43 = vpop.f32.mrf.mxu1 }
 0x499   : > { %17729 = vst [vmem:[#allocation201_spill] sm:$0xff] %v14357_v43  ;;  %v3981_v43 = vadd.f32 %v3980_v8, %v14096_v20  ;;  %v3661_v8 = vadd.f32 %v13913_v3, %v13919_v7  ;;  %v14393_v20 = vpop.f32.mrf.mxu2  ;;  %v4139_v63 = vsub.f32 %v14389_v13, %v14401_v1  ;;  %v462_v3 = vld [vmem:[%s17115_s8 + $0x8] sm:$0xff]  ;;  %v3666_v7 = vadd.f32 %v13931_v6, %v13936_v60 }
 0x49a   : > { %17736 = vst [vmem:[#allocation208_spill] sm:$0xff] %v14401_v1  ;;  %v14417_v51 = vand.u32 4294901760, %v462_v3 }
 0x49b   : > { %v3982_v54 = vadd.f32 %v3981_v43, %v14111_v47  ;;  %v14396_v47 = vpop.f32.mrf.mxu3 }
 0x49c   : > { %17738 = vst [vmem:[#allocation210_spill] sm:$0xff] %v14417_v51  ;;  %4046 = vmatpush.msra.mxu2 %v14417_v51 }
 0x49d   : > { %v3983_v22 = vadd.f32 %v3982_v54, %v14119_v48  ;;  %v3750_v54 = vadd.f32 %v13975_v36, %v3661_v8  ;;  %v461_v36 = vld [vmem:[%s17115_s8] sm:$0xff]  ;;  %v14422_v8 = vand.u32 4294901760, %v4139_v63  ;;  %v3671_v63 = vadd.f32 %v13946_v52, %v13953_v19 }
 0x49f   : > { %v3984_v43 = vadd.f32 %v3983_v22, %v14134_v15  ;;  %v14415_v15 = vadd.f32 %v14176_v32, %v13968_v34  ;;  %17739 = vst [vmem:[#allocation211_spill] sm:$0xff] %v14422_v8  ;;  %v3839_v60 = vadd.f32 %v13964_v41, %v3750_v54  ;;  %v14433_v34 = vpop.f32.mrf.mxu0  ;;  %4141 = vmatpush.msrb.mxu3 %v14422_v8 }
 0x4a0   : > { %v14375_v26 = vpop.f32.mrf.mxu1 }
 0x4a1   : > { %v3985_v48 = vadd.f32 %v3984_v43, %v14142_v16  ;;  %17737 = vst [vmem:[#allocation209_spill] sm:$0xff] %v14415_v15  ;;  %v14424_v43 = vand.u32 4294901760, %v461_v36  ;;  %v3755_v16 = vadd.f32 %v13991_v11, %v3666_v7  ;;  %v14443_v7 = vadd.f32 %v14198_v31, %v3839_v60  ;;  %v14456_v52 = vpop.f32.mrf.mxu2 }
 0x4a3   : > { %v3986_v22 = vadd.f32 %v3985_v48, %v14157_v49  ;;  %17740 = vst [vmem:[#allocation212_spill] sm:$0xff] %v14424_v43  ;;  %v14430_v48 = vsub.f32 %v462_v3, %v14417_v51  ;;  %v14437_v32 = vsub.f32 %v461_v36, %v14424_v43  ;;  %4048 = vmatpush.msra.mxu2 %v14424_v43  ;;  %v17770_v49 = vld [vmem:[#allocation191_spill] sm:$0xff] }
 0x4a4   : > { %17743 = vst [vmem:[#allocation215_spill] sm:$0xff] %v14443_v7  ;;  %v3844_v31 = vadd.f32 %v13982_v10, %v3755_v16 }
 0x4a5   : > { %v3987_v6 = vadd.f32 %v3986_v22, %v14165_v9  ;;  %17741 = vst [vmem:[#allocation213_spill] sm:$0xff] %v14430_v48  ;;  %v14446_v41 = vand.u32 4294901760, %v14430_v48  ;;  %v14452_v3 = vand.u32 4294901760, %v14437_v32  ;;  %4161 = vmatpush.msrb.mxu2 %v14059_v57  ;;  %v3760_v22 = vadd.f32 %v14002_v38, %v3671_v63 }
 0x4a6   : > { %17742 = vst [vmem:[#allocation214_spill] sm:$0xff] %v14437_v32  ;;  %v14471_v63 = vadd.f32 %v14220_v45, %v3844_v31  ;;  %v17751_v31 = vld [vmem:[#allocation172_spill] sm:$0xff] }
 0x4a7   : > { %v3988_v11 = vadd.f32 %v3987_v6, %v14415_v15  ;;  %17744 = vst [vmem:[#allocation216_spill] sm:$0xff] %v14446_v41  ;;  %v4145_v36 = vsub.f32 %v14430_v48, %v14446_v41  ;;  %v14462_v6 = vpop.f32.mrf.mxu3  ;;  %v4151_v60 = vsub.f32 %v14437_v32, %v14452_v3  ;;  %4164 = vmatpush.msrb.mxu2 %v14082_v29 }
 0x4a8   : > { %v14398_v59 = vpop.f32.mrf.mxu1  ;;  %17745 = vst [vmem:[#allocation217_spill] sm:$0xff] %v14452_v3  ;;  %v3676_v15 = vadd.f32 %v13966_v5, %v13973_v62  ;;  %v3849_v9 = vadd.f32 %v14004_v42, %v3760_v22  ;;  %v3681_v5 = vadd.f32 %v13984_v55, %v13989_v25  ;;  %v3686_v25 = vadd.f32 %v14271_v30, %v14000_v61  ;;  %v17752_v61 = vld [vmem:[#allocation118_spill] sm:$0xff] }
 0x4a9   : > { %v3989_v19 = vadd.f32 %v3988_v11, %v14187_v28  ;;  %17746 = vst [vmem:[#allocation218_spill] sm:$0xff] %v14471_v63  ;;  %v14473_v11 = vand.u32 4294901760, %v4145_v36  ;;  %v14475_v10 = vand.u32 4294901760, %v4151_v60  ;;  %4167 = vmatpush.msrb.mxu2 %v14105_v12  ;;  %v17753_v60 = vld [vmem:[#allocation141_spill] sm:$0xff] }
 0x4aa   : > { %v3765_v16 = vadd.f32 %v14016_v24, %v3676_v15  ;;  %v14487_v45 = vadd.f32 %v14242_v46, %v3849_v9  ;;  %v3770_v42 = vadd.f32 %v14029_v2, %v3681_v5  ;;  %v3705_v9 = vpop.f32.mrf.mxu2  ;;  %v3775_v2 = vadd.f32 %v14273_v50, %v3686_v25  ;;  %v17756_v5 = vld [vmem:[#allocation180_spill] sm:$0xff]  ;;  %v17759_v50 = vld [vmem:[#allocation147_spill] sm:$0xff] }
 0x4ab   : > { %v3990_v38 = vadd.f32 %v3989_v19, %v14443_v7  ;;  %17747 = vst [vmem:[#allocation219_spill] sm:$0xff] %v14473_v11  ;;  %4147 = vmatpush.msrb.mxu3 %v14473_v11  ;;  %4170 = vmatpush.msrb.mxu2 %v14128_v21  ;;  %v14490_v19 = vpop.f32.mrf.mxu0 }
 0x4ac   : > { %17748 = vst [vmem:[#allocation220_spill] sm:$0xff] %v14475_v10  ;;  %v3854_v55 = vadd.f32 %v14020_v17, %v3765_v16  ;;  %v3689_v17 = vadd.f32 %v14288_v35, %v14009_v27  ;;  %v3859_v30 = vadd.f32 %v17752_v61, %v3770_v42  ;;  %v17760_v35 = vld [vmem:[#allocation169_spill] sm:$0xff]  ;;  %v17761_v42 = vld [vmem:[#allocation115_spill] sm:$0xff] }
 0x4ad   : > { %v3991_v28 = vadd.f32 %v3990_v38, %v14209_v0  ;;  %17749 = vst [vmem:[#allocation221_spill] sm:$0xff] %v14487_v45  ;;  %4153 = vmatpush.msrb.mxu3 %v14475_v10  ;;  %4173 = vmatpush.msrb.mxu2 %v14151_v23  ;;  %v17754_v38 = vld [vmem:[#allocation164_spill] sm:$0xff]  ;;  %v3694_v25 = vadd.f32 %v14331_v56, %v17761_v42 }
 0x4ae   : > { %v14505_v46 = vadd.f32 %v14264_v40, %v3854_v55  ;;  %v17755_v40 = vld [vmem:[#allocation114_spill] sm:$0xff] }
 0x4af   : > { %v3992_v62 = vadd.f32 %v3991_v28, %v14471_v63  ;;  %4214 = vmatpush.msra.mxu3 %v14055_v37  ;;  %4176 = vmatpush.msrb.mxu2 %v14174_v39  ;;  %v14507_v22 = vpop.f32.mrf.mxu3  ;;  %v3691_v16 = vadd.f32 %v14308_v14, %v17755_v40  ;;  %v17757_v55 = vld [vmem:[#allocation182_spill] sm:$0xff]  ;;  %v17769_v63 = vld [vmem:[#allocation193_spill] sm:$0xff] }
 0x4b0   : > { %v14449_v54 = vpop.f32.mrf.mxu1  ;;  %17750 = vst [vmem:[#allocation222_spill] sm:$0xff] %v14505_v46  ;;  %v17764_v40 = vld [vmem:[#allocation178_spill] sm:$0xff]  ;;  %v3783_v0 = vadd.f32 %v17769_v63, %v3694_v25  ;;  %v17777_v63 = vld [vmem:[#allocation196_spill] sm:$0xff] }
 0x4b1   : > { %v3993_v15 = vadd.f32 %v3992_v62, %v14231_v53  ;;  %4216 = vmatpush.msra.mxu3 %v14078_v44  ;;  %4179 = vmatpush.msrb.mxu2 %v14196_v58  ;;  %v3778_v62 = vadd.f32 %v17756_v5, %v3689_v17  ;;  %v3864_v17 = vadd.f32 %v17764_v40, %v3775_v2  ;;  %v17765_v5 = vld [vmem:[#allocation116_spill] sm:$0xff]  ;;  %v17768_v53 = vld [vmem:[#allocation174_spill] sm:$0xff]  ;;  %v17774_v40 = vld [vmem:[#allocation181_spill] sm:$0xff] }
 0x4b3   : > { %v3994_v28 = vadd.f32 %v3993_v15, %v14487_v45  ;;  %4218 = vmatpush.msra.mxu3 %v14101_v18  ;;  %4182 = vmatpush.msrb.mxu2 %v17754_v38  ;;  %v14523_v45 = vadd.f32 %v17757_v55, %v3859_v30  ;;  %v3883_v30 = vpop.f32.mrf.mxu0  ;;  %v17767_v55 = vld [vmem:[#allocation153_spill] sm:$0xff]  ;;  %v14541_v56 = vadd.f32 %v17770_v49, %v3864_v17  ;;  %v17779_v17 = vld [vmem:[#allocation119_spill] sm:$0xff] }
 0x4b5   : > { %v3995_v36 = vadd.f32 %v3994_v28, %v17751_v31  ;;  %4220 = vmatpush.msra.mxu3 %v17753_v60  ;;  %17758 = vst [vmem:[#allocation118_spill] sm:$0xff] %v14523_v45  ;;  %4185 = vmatpush.msrb.mxu2 %v17760_v35  ;;  %v17762_v28 = vld [vmem:[#allocation186_spill] sm:$0xff]  ;;  %v17763_v31 = vld [vmem:[#allocation177_spill] sm:$0xff] }
 0x4b6   : > { %v3780_v61 = vadd.f32 %v17762_v28, %v3691_v16  ;;  %v17771_v16 = vld [vmem:[#allocation184_spill] sm:$0xff]  ;;  %v17773_v28 = vld [vmem:[#allocation158_spill] sm:$0xff] }
 0x4b7   : > { %v3996_v15 = vadd.f32 %v3995_v36, %v14505_v46  ;;  %4222 = vmatpush.msra.mxu3 %v17759_v50  ;;  %v17766_v36 = vld [vmem:[#allocation197_spill] sm:$0xff]  ;;  %4188 = vmatpush.msrb.mxu2 %v17768_v53  ;;  %v3867_v42 = vadd.f32 %v17771_v16, %v3778_v62  ;;  %v17776_v53 = vld [vmem:[#allocation187_spill] sm:$0xff]  ;;  %v3701_v62 = vadd.f32 %v14393_v20, %v17779_v17  ;;  %v3797_v16 = vpop.f32.mrf.mxu3  ;;  %v17787_v20 = vld [vmem:[#allocation200_spill] sm:$0xff] }
 0x4b8   : > { %v14492_v24 = vpop.f32.mrf.mxu1  ;;  %v3696_v46 = vadd.f32 %v17766_v36, %v17765_v5  ;;  %v3708_v5 = vpop.f32.mrf.mxu2  ;;  %v17775_v36 = vld [vmem:[#allocation198_spill] sm:$0xff] }
 0x4b9   : > { %v3997_v14 = vadd.f32 %v3996_v15, %v17763_v31  ;;  %4224 = vmatpush.msra.mxu3 %v17767_v55  ;;  %v17772_v15 = vld [vmem:[#allocation117_spill] sm:$0xff]  ;;  %4191 = vmatpush.msrb.mxu2 %v17774_v40  ;;  %v14551_v25 = vadd.f32 %v17777_v63, %v3867_v42  ;;  %v17785_v63 = vld [vmem:[#allocation120_spill] sm:$0xff]  ;;  %v3790_v17 = vadd.f32 %v14396_v47, %v3701_v62 }
 0x4ba   : > { %v3699_v2 = vadd.f32 %v14368_v33, %v17772_v15  ;;  %v3785_v31 = vadd.f32 %v17775_v36, %v3696_v46  ;;  %v17781_v33 = vld [vmem:[#allocation190_spill] sm:$0xff]  ;;  %v17782_v15 = vld [vmem:[#allocation205_spill] sm:$0xff] }
 0x4bb   : > { %v3998_v7 = vadd.f32 %v3997_v14, %v14523_v45  ;;  %4226 = vmatpush.msra.mxu3 %v17773_v28  ;;  %v17778_v14 = vld [vmem:[#allocation189_spill] sm:$0xff]  ;;  %v17780_v45 = vld [vmem:[#allocation163_spill] sm:$0xff]  ;;  %4194 = vmatpush.msrb.mxu2 %v17781_v33  ;;  %v3886_v62 = vpop.f32.mrf.mxu0 }
 0x4bc   : > { %v3869_v49 = vadd.f32 %v17778_v14, %v3780_v61  ;;  %v3788_v40 = vadd.f32 %v17782_v15, %v3699_v2  ;;  %v17783_v46 = vld [vmem:[#allocation201_spill] sm:$0xff]  ;;  %v3704_v61 = vadd.f32 %v14456_v52, %v17785_v63 }
 0x4bd   : > { %v3999_v35 = vadd.f32 %v3998_v7, %v17776_v53  ;;  %4228 = vmatpush.msra.mxu3 %v17780_v45  ;;  %v17784_v7 = vld [vmem:[#allocation195_spill] sm:$0xff]  ;;  %v17786_v53 = vld [vmem:[#allocation168_spill] sm:$0xff]  ;;  %4197 = vmatpush.msrb.mxu2 %v17787_v20  ;;  %v17789_v15 = vld [vmem:[#allocation121_spill] sm:$0xff] }
 0x4be   : > { %v14561_v36 = vadd.f32 %v17783_v46, %v3869_v49  ;;  %v3872_v42 = vadd.f32 %v17784_v7, %v3783_v0  ;;  %v3706_v46 = vadd.f32 %v3705_v9, %v17789_v15  ;;  %v17790_v0 = vld [vmem:[#allocation173_spill] sm:$0xff]  ;;  %v3793_v52 = vadd.f32 %v14462_v6, %v3704_v61  ;;  %v17794_v15 = vld [vmem:[#allocation199_spill] sm:$0xff] }
 0x4bf   : > { %v4000_v38 = vadd.f32 %v3999_v35, %v14541_v56  ;;  %4230 = vmatpush.msra.mxu3 %v17786_v53  ;;  %v17788_v35 = vld [vmem:[#allocation203_spill] sm:$0xff]  ;;  %4200 = vmatpush.msrb.mxu2 %v14389_v13  ;;  %v3877_v47 = vadd.f32 %v14382_v4, %v3788_v40 }
 0x4c0   : > { %v14525_v27 = vpop.f32.mrf.mxu1  ;;  %v14571_v2 = vadd.f32 %v14375_v26, %v3872_v42  ;;  %v3874_v49 = vadd.f32 %v17788_v35, %v3785_v31  ;;  %v17792_v42 = vld [vmem:[#allocation179_spill] sm:$0xff]  ;;  %v3795_v9 = vadd.f32 %v14507_v22, %v3706_v46  ;;  %v3710_v4 = vpop.f32.mrf.mxu2  ;;  %v3882_v22 = vadd.f32 %v14490_v19, %v3793_v52 }
 0x4c1   : > { %v4001_v33 = vadd.f32 %v4000_v38, %v14551_v25  ;;  %4232 = vmatpush.msra.mxu3 %v17790_v0  ;;  %v17791_v38 = vld [vmem:[#allocation122_spill] sm:$0xff]  ;;  %4203 = vmatpush.msrb.mxu2 %v14430_v48  ;;  %v14589_v6 = vadd.f32 %v14449_v54, %v3877_v47  ;;  %v3799_v35 = vpop.f32.mrf.mxu3 }
 0x4c2   : > { %v14580_v63 = vadd.f32 %v14398_v59, %v3874_v49  ;;  %v3709_v26 = vadd.f32 %v3708_v5, %v17791_v38  ;;  %v17793_v59 = vld [vmem:[#allocation188_spill] sm:$0xff]  ;;  %v17795_v54 = vld [vmem:[#allocation126_spill] sm:$0xff] }
 0x4c3   : > { %v4002_v7 = vadd.f32 %v4001_v33, %v14561_v36  ;;  %4234 = vmatpush.msra.mxu3 %v17792_v42  ;;  %v3879_v33 = vadd.f32 %v14433_v34, %v3790_v17  ;;  %4206 = vmatpush.msrb.mxu2 %v14437_v32  ;;  %v3711_v46 = vadd.f32 %v3710_v4, %v17795_v54 }
 0x4c4   : > { %v3798_v40 = vadd.f32 %v3797_v16, %v3709_v26  ;;  %v14603_v17 = vadd.f32 %v14525_v27, %v3882_v22  ;;  %v17796_v16 = vld [vmem:[#allocation206_spill] sm:$0xff] }
 0x4c5   : > { %v4003_v31 = vadd.f32 %v4002_v7, %v14571_v2  ;;  %4236 = vmatpush.msra.mxu3 %v17793_v59  ;;  %v14596_v61 = vadd.f32 %v14492_v24, %v3879_v33  ;;  %v3884_v7 = vadd.f32 %v3883_v30, %v3795_v9  ;;  %v3800_v47 = vadd.f32 %v3799_v35, %v3711_v46 }
 0x4c6   : > { %v3887_v19 = vadd.f32 %v3886_v62, %v3798_v40 }
 0x4c7   : > { %v4004_v5 = vadd.f32 %v4003_v31, %v14580_v63  ;;  %4238 = vmatpush.msra.mxu3 %v17794_v15  ;;  %v3888_v31 = vpop.f32.mrf.mxu0 }
 0x4c8   : > { %v3972_v14 = vpop.f32.mrf.mxu1  ;;  %v3889_v30 = vadd.f32 %v3888_v31, %v3800_v47  ;;  %v17800_v31 = vld [vmem:[#allocation143_spill] sm:$0xff] }
 0x4c9   : > { %v4005_v34 = vadd.f32 %v4004_v5, %v14589_v6  ;;  %4240 = vmatpush.msra.mxu3 %v17796_v16  ;;  %v14607_v38 = vadd.f32 %v3972_v14, %v3884_v7 }
 0x4cb   : > { %v4006_v24 = vadd.f32 %v4005_v34, %v14596_v61  ;;  %4242 = vmatpush.msra.mxu3 %v14417_v51 }
 0x4cd   : > { %v4007_v52 = vadd.f32 %v4006_v24, %v14603_v17  ;;  %4244 = vmatpush.msra.mxu3 %v14424_v43  ;;  %v17797_v24 = vld [vmem:[#allocation125_spill] sm:$0xff] }
 0x4cf   : > { %v4008_v27 = vadd.f32 %v4007_v52, %v14607_v38  ;;  %v17799_v52 = vld [vmem:[#allocation137_spill] sm:$0xff] }
 0x4d0   : > { %v3975_v49 = vpop.f32.mrf.mxu1 }
 0x4d1   : > { %v14611_v26 = vadd.f32 %v3975_v49, %v3887_v19  ;;  %v17798_v19 = vld [vmem:[#allocation131_spill] sm:$0xff] }
 0x4d3   : > { %v4009_v33 = vadd.f32 %v4008_v27, %v14611_v26  ;;  %v17801_v27 = vld [vmem:[#allocation149_spill] sm:$0xff] }
 0x4d8   : > { %v3977_v9 = vpop.f32.mrf.mxu1 }
 0x4d9   : > { %v14616_v4 = vadd.f32 %v3977_v9, %v3889_v30  ;;  %v17802_v30 = vld [vmem:[#allocation155_spill] sm:$0xff]  ;;  %v17803_v9 = vld [vmem:[#allocation160_spill] sm:$0xff] }
 0x4db   : > { %v4010_v14 = vadd.f32 %v4009_v33, %v14616_v4  ;;  %v17804_v33 = vld [vmem:[#allocation165_spill] sm:$0xff] }
 0x4dd   : > { %v4011_v62 = vrot.slane %v4010_v14, 4 }
 0x4df   : > { %v4012_v40 = vadd.f32 %v4011_v62, %v4010_v14  ;;  %v17805_v14 = vld [vmem:[#allocation170_spill] sm:$0xff]  ;;  %v17806_v62 = vld [vmem:[#allocation175_spill] sm:$0xff] }
 0x4e1   : > { %v4013_v5 = vrot.slane %v4012_v40, 2 }
 0x4e3   : > { %v4014_v22 = vadd.f32 %v4013_v5, %v4012_v40  ;;  %v17807_v40 = vld [vmem:[#allocation183_spill] sm:$0xff]  ;;  %v17808_v5 = vld [vmem:[#allocation192_spill] sm:$0xff] }
 0x4e5   : > { %v4015_v35 = vrot.slane %v4014_v22, 1 }
 0x4e7   : > { %v4016_v49 = vadd.f32 %v4015_v35, %v4014_v22  ;;  %v17809_v22 = vld [vmem:[#allocation202_spill] sm:$0xff] }
 0x4e8   : > { %v477_v35 = vld [vmem:[%s17116_s9] sm:$0xff] }
 0x4e9   : > { %v4049_v54 = vand.u32 4294901760, %v4016_v49 }
 0x4eb   : > { %v4050_v46 = vsub.f32 %v4016_v49, %v4049_v54  ;;  %4155 = vmatmul.f32.vlgmr.msrb.gmra.mxu3 %v4049_v54  ;;  %v14654_v49 = vand.u32 4294901760, %v477_v35 }
 0x4ec   : > { %4322 = vmatpush.msrb.mxu3 %v14055_v37 }
 0x4ed   : > { %v4051_v34 = vand.u32 4294901760, %v4050_v46  ;;  %17810 = vst [vmem:[#allocation114_spill] sm:$0xff] %v14654_v49 }
 0x4ee   : > { %4324 = vmatpush.msrb.mxu3 %v14078_v44 }
 0x4ef   : > { %v4052_v7 = vsub.f32 %v4050_v46, %v4051_v34 }
 0x4f0   : > { %4326 = vmatpush.msrb.mxu3 %v14101_v18 }
 0x4f1   : > { %v4053_v47 = vand.u32 4294901760, %v4052_v7 }
 0x4f2   : > { %4328 = vmatpush.msrb.mxu3 %v17753_v60 }
 0x4f3   : > { %4054 = vmatmul.f32.vlgmr.msra.gmra.mxu2 %v4053_v47  ;;  %4248 = vmatmul.f32.vlgmr.msra.gmra.mxu3 %v4051_v34 }
 0x4f4   : > { %4255 = vmatpush.msra.mxu2 %v17797_v24  ;;  %4330 = vmatpush.msrb.mxu3 %v17759_v50 }
 0x4f6   : > { %4259 = vmatpush.msra.mxu2 %v17798_v19  ;;  %4332 = vmatpush.msrb.mxu3 %v17767_v55 }
 0x4f8   : > { %4263 = vmatpush.msra.mxu2 %v17799_v52  ;;  %4334 = vmatpush.msrb.mxu3 %v17773_v28 }
 0x4fa   : > { %4267 = vmatpush.msra.mxu2 %v17800_v31  ;;  %4336 = vmatpush.msrb.mxu3 %v17780_v45 }
 0x4fb   : > { %4209 = vmatmul.f32.vlgmr.msrb.gmra.mxu2 %v4050_v46  ;;  %v14657_v46 = vsub.f32 %v477_v35, %v14654_v49 }
 0x4fc   : > { %4271 = vmatpush.msra.mxu2 %v17801_v27  ;;  %4338 = vmatpush.msrb.mxu3 %v17786_v53 }
 0x4fd   : > { %17811 = vst [vmem:[#allocation180_spill] sm:$0xff] %v14657_v46  ;;  %v14661_v7 = vand.u32 4294901760, %v14657_v46 }
 0x4fe   : > { %4275 = vmatpush.msra.mxu2 %v17802_v30  ;;  %4340 = vmatpush.msrb.mxu3 %v17790_v0 }
 0x4ff   : > { %17812 = vst [vmem:[#allocation182_spill] sm:$0xff] %v14661_v7 }
 0x500   : > { %4279 = vmatpush.msra.mxu2 %v17803_v9  ;;  %4342 = vmatpush.msrb.mxu3 %v17792_v42 }
 0x502   : > { %4283 = vmatpush.msra.mxu2 %v17804_v33  ;;  %4344 = vmatpush.msrb.mxu3 %v17793_v59 }
 0x504   : > { %4287 = vmatpush.msra.mxu2 %v17805_v14  ;;  %4346 = vmatpush.msrb.mxu3 %v17794_v15 }
 0x506   : > { %4291 = vmatpush.msra.mxu2 %v17806_v62  ;;  %4348 = vmatpush.msrb.mxu3 %v17796_v16 }
 0x508   : > { %4295 = vmatpush.msra.mxu2 %v17807_v40  ;;  %4350 = vmatpush.msrb.mxu3 %v14417_v51 }
 0x50a   : > { %4299 = vmatpush.msra.mxu2 %v17808_v5  ;;  %4352 = vmatpush.msrb.mxu3 %v14424_v43 }
 0x50b   : > { %4354 = vmatmul.f32.vlgmr.msrb.gmra.mxu3 %v4049_v54 }
 0x50c   : > { %4303 = vmatpush.msra.mxu2 %v17809_v22 }
 0x50e   : > { %4307 = vmatpush.msra.mxu2 %v14401_v1 }
 0x510   : > { %4311 = vmatpush.msra.mxu2 %v14446_v41 }
 0x512   : > { %4315 = vmatpush.msra.mxu2 %v14452_v3 }
 0x513   : > { %4317 = vmatmul.f32.vlgmr.msra.gmra.mxu2 %v4049_v54  ;;  %v4407_v54 = vsub.f32 %v14657_v46, %v14661_v7 }
 0x514   : > { %4379 = vmatpush.msrb.mxu2 %v14654_v49 }
 0x515   : > { %v14666_v3 = vand.u32 4294901760, %v4407_v54 }
 0x516   : > { %4432 = vmatpush.msra.mxu2 %v14657_v46 }
 0x517   : > { %17813 = vst [vmem:[#allocation115_spill] sm:$0xff] %v14666_v3  ;;  %4409 = vmatpush.msra.mxu3 %v14666_v3 }
 0x519   : > { %4455 = vmatpush.msrb.mxu3 %v14654_v49 }
 0x56e   : > { %v4156_v47 = vpop.f32.mrf.mxu3 }
 0x576   : > { %v4055_v34 = vpop.f32.mrf.mxu2  ;;  %v4249_v1 = vpop.f32.mrf.mxu3 }
 0x577   : > { %v4157_v41 = vadd.f32 %v4156_v47, %v4055_v34  ;;  %v17828_v34 = vld [vmem:[#allocation169_spill] sm:$0xff]  ;;  %v17829_v47 = vld [vmem:[#allocation174_spill] sm:$0xff] }
 0x57e   : > { %v4210_v35 = vpop.f32.mrf.mxu2 }
 0x57f   : > { %v4211_v22 = vadd.f32 %v4210_v35, %v4157_v41  ;;  %v17815_v41 = vld [vmem:[#allocation133_spill] sm:$0xff] }
 0x580   : > { %v17830_v35 = vld [vmem:[#allocation181_spill] sm:$0xff] }
 0x581   : > { %v4250_v5 = vadd.f32 %v4249_v1, %v4211_v22  ;;  %v17814_v1 = vld [vmem:[#allocation127_spill] sm:$0xff]  ;;  %v17826_v22 = vld [vmem:[#allocation204_spill] sm:$0xff] }
 0x58e   : > { %v4355_v14 = vpop.f32.mrf.mxu3 }
 0x596   : > { %v4318_v40 = vpop.f32.mrf.mxu2 }
 0x597   : > { %v4319_v62 = vadd.f32 %v4318_v40, %v4250_v5  ;;  %v17824_v40 = vld [vmem:[#allocation185_spill] sm:$0xff]  ;;  %v17825_v5 = vld [vmem:[#allocation194_spill] sm:$0xff] }
 0x599   : > { %v4356_v33 = vadd.f32 %v4355_v14, %v4319_v62  ;;  %v17816_v14 = vld [vmem:[#allocation139_spill] sm:$0xff]  ;;  %v17823_v62 = vld [vmem:[#allocation176_spill] sm:$0xff] }
 0x59b   : > { %v4358_v9 = vmul.f32 0.00390625, %v4356_v33  ;;  %v17817_v33 = vld [vmem:[#allocation145_spill] sm:$0xff] }
 0x59d   : > { %v4361_v30 = vsel %vm4359_vm2, %v4358_v9, 0  ;;  %v17822_v9 = vld [vmem:[#allocation171_spill] sm:$0xff] }
 0x59e   : > { %v4380_v46 = vand.u32 4294901760, %v4361_v30 }
 0x5a0   : > { %v4381_v54 = vsub.f32 %v4361_v30, %v4380_v46  ;;  %4411 = vmatmul.f32.vlgmr.msra.gmra.mxu3 %v4380_v46  ;;  %v17818_v30 = vld [vmem:[#allocation151_spill] sm:$0xff] }
 0x5a1   : > { %4503 = vmatpush.msra.mxu3 %v14654_v49 }
 0x5a2   : > { %v4382_v3 = vand.u32 4294901760, %v4381_v54 }
 0x5a4   : > { %v4383_v27 = vsub.f32 %v4381_v54, %v4382_v3 }
 0x5a6   : > { %v4384_v31 = vand.u32 4294901760, %v4383_v27  ;;  %v17821_v27 = vld [vmem:[#allocation166_spill] sm:$0xff] }
 0x5a8   : > { %4385 = vmatmul.f32.vlgmr.msrb.gmra.mxu2 %v4384_v31  ;;  %4459 = vmatmul.f32.vlgmr.msrb.gmra.mxu3 %v4382_v3  ;;  %v17819_v31 = vld [vmem:[#allocation156_spill] sm:$0xff]  ;;  %v17820_v3 = vld [vmem:[#allocation161_spill] sm:$0xff] }
 0x5a9   : > { %4481 = vmatpush.msrb.mxu2 %v14661_v7  ;;  %4657 = vmatpush.msrb.mxu3 %v17814_v1 }
 0x5ab   : > { %4663 = vmatpush.msrb.mxu3 %v17815_v41 }
 0x5ad   : > { %4669 = vmatpush.msrb.mxu3 %v17816_v14 }
 0x5af   : > { %4675 = vmatpush.msrb.mxu3 %v17817_v33 }
 0x5b0   : > { %4435 = vmatmul.f32.vlgmr.msra.gmra.mxu2 %v4381_v54  ;;  %4505 = vmatmul.f32.vlgmr.msra.gmra.mxu3 %v4380_v46  ;;  %v17831_v54 = vld [vmem:[#allocation190_spill] sm:$0xff] }
 0x5b1   : > { %4612 = vmatpush.msra.mxu2 %v14055_v37  ;;  %4681 = vmatpush.msrb.mxu3 %v17818_v30 }
 0x5b3   : > { %4614 = vmatpush.msra.mxu2 %v14078_v44  ;;  %4687 = vmatpush.msrb.mxu3 %v17819_v31 }
 0x5b5   : > { %4616 = vmatpush.msra.mxu2 %v14101_v18  ;;  %4693 = vmatpush.msrb.mxu3 %v17820_v3 }
 0x5b7   : > { %4618 = vmatpush.msra.mxu2 %v17753_v60  ;;  %4699 = vmatpush.msrb.mxu3 %v17821_v27 }
 0x5b8   : > { %4483 = vmatmul.f32.vlgmr.msrb.gmra.mxu2 %v4380_v46  ;;  %v17827_v46 = vld [vmem:[#allocation164_spill] sm:$0xff] }
 0x5b9   : > { %4620 = vmatpush.msra.mxu2 %v17759_v50  ;;  %4705 = vmatpush.msrb.mxu3 %v17822_v9 }
 0x5bb   : > { %4622 = vmatpush.msra.mxu2 %v17767_v55  ;;  %4711 = vmatpush.msrb.mxu3 %v17823_v62 }
 0x5bd   : > { %4624 = vmatpush.msra.mxu2 %v17773_v28  ;;  %4717 = vmatpush.msrb.mxu3 %v17824_v40 }
 0x5bf   : > { %4626 = vmatpush.msra.mxu2 %v17780_v45  ;;  %4723 = vmatpush.msrb.mxu3 %v17825_v5 }
 0x5c1   : > { %4628 = vmatpush.msra.mxu2 %v17786_v53  ;;  %4729 = vmatpush.msrb.mxu3 %v17826_v22 }
 0x5c3   : > { %4630 = vmatpush.msra.mxu2 %v17790_v0  ;;  %4735 = vmatpush.msrb.mxu3 %v14422_v8 }
 0x5c5   : > { %4632 = vmatpush.msra.mxu2 %v17792_v42  ;;  %4741 = vmatpush.msrb.mxu3 %v14473_v11 }
 0x5c7   : > { %4634 = vmatpush.msra.mxu2 %v17793_v59  ;;  %4747 = vmatpush.msrb.mxu3 %v14475_v10 }
 0x5c9   : > { %4808 = vmatpush.msra.mxu3 %v14055_v37  ;;  %4636 = vmatpush.msra.mxu2 %v17794_v15 }
 0x5cb   : > { %4810 = vmatpush.msra.mxu3 %v14078_v44  ;;  %4638 = vmatpush.msra.mxu2 %v17796_v16 }
 0x5cd   : > { %4812 = vmatpush.msra.mxu3 %v14101_v18  ;;  %4640 = vmatpush.msra.mxu2 %v14417_v51 }
 0x5cf   : > { %4814 = vmatpush.msra.mxu3 %v17753_v60  ;;  %4642 = vmatpush.msra.mxu2 %v14424_v43 }
 0x5d1   : > { %4755 = vmatpush.msrb.mxu2 %v14059_v57  ;;  %4816 = vmatpush.msra.mxu3 %v17759_v50 }
 0x5d3   : > { %4758 = vmatpush.msrb.mxu2 %v14082_v29  ;;  %4818 = vmatpush.msra.mxu3 %v17767_v55 }
 0x5d5   : > { %4761 = vmatpush.msrb.mxu2 %v14105_v12  ;;  %4820 = vmatpush.msra.mxu3 %v17773_v28 }
 0x5d7   : > { %4764 = vmatpush.msrb.mxu2 %v14128_v21  ;;  %4822 = vmatpush.msra.mxu3 %v17780_v45 }
 0x5d9   : > { %4767 = vmatpush.msrb.mxu2 %v14151_v23  ;;  %4824 = vmatpush.msra.mxu3 %v17786_v53 }
 0x5db   : > { %4770 = vmatpush.msrb.mxu2 %v14174_v39  ;;  %4826 = vmatpush.msra.mxu3 %v17790_v0 }
 0x5dd   : > { %4773 = vmatpush.msrb.mxu2 %v14196_v58  ;;  %4828 = vmatpush.msra.mxu3 %v17792_v42  ;;  %v17839_v58 = vld [vmem:[#allocation150_spill] sm:$0xff] }
 0x5df   : > { %4776 = vmatpush.msrb.mxu2 %v17827_v46  ;;  %4830 = vmatpush.msra.mxu3 %v17793_v59  ;;  %v17834_v46 = vld [vmem:[#allocation134_spill] sm:$0xff] }
 0x5e1   : > { %4779 = vmatpush.msrb.mxu2 %v17828_v34  ;;  %4832 = vmatpush.msra.mxu3 %v17794_v15 }
 0x5e3   : > { %4782 = vmatpush.msrb.mxu2 %v17829_v47  ;;  %4834 = vmatpush.msra.mxu3 %v17796_v16 }
 0x5e5   : > { %4785 = vmatpush.msrb.mxu2 %v17830_v35  ;;  %4836 = vmatpush.msra.mxu3 %v14417_v51 }
 0x5e7   : > { %4788 = vmatpush.msrb.mxu2 %v17831_v54  ;;  %4838 = vmatpush.msra.mxu3 %v14424_v43 }
 0x5e9   : > { %4791 = vmatpush.msrb.mxu2 %v17787_v20  ;;  %v17832_v20 = vld [vmem:[#allocation128_spill] sm:$0xff] }
 0x5eb   : > { %4794 = vmatpush.msrb.mxu2 %v14389_v13 }
 0x5ed   : > { %4797 = vmatpush.msrb.mxu2 %v14430_v48  ;;  %v17833_v48 = vld [vmem:[#allocation132_spill] sm:$0xff] }
 0x5ef   : > { %4800 = vmatpush.msrb.mxu2 %v14437_v32 }
 0x623   : > { %v4412_v11 = vpop.f32.mrf.mxu3 }
 0x62b   : > { %v4386_v10 = vpop.f32.mrf.mxu2  ;;  %v4460_v5 = vpop.f32.mrf.mxu3 }
 0x62c   : > { %v4413_v22 = vadd.f32 %v4412_v11, %v4386_v10 }
 0x633   : > { %v4436_v8 = vpop.f32.mrf.mxu2  ;;  %v4506_v54 = vpop.f32.mrf.mxu3 }
 0x634   : > { %v4437_v35 = vadd.f32 %v4436_v8, %v4413_v22 }
 0x636   : > { %v4461_v47 = vadd.f32 %v4460_v5, %v4437_v35 }
 0x63b   : > { %v4484_v40 = vpop.f32.mrf.mxu2 }
 0x63c   : > { %v4485_v62 = vadd.f32 %v4484_v40, %v4461_v47 }
 0x63e   : > { %v4507_v34 = vadd.f32 %v4506_v54, %v4485_v62  ;;  %v17835_v62 = vld [vmem:[#allocation138_spill] sm:$0xff] }
 0x63f   : > { %v17838_v54 = vld [vmem:[#allocation146_spill] sm:$0xff] }
 0x640   : > { %v14737_v9 = vperm.slane %v4507_v34, 0 }
 0x642   : > { %v14741_v13 = vsub.f32 %v17832_v20, %v14737_v9  ;;  %v14745_v32 = vsub.f32 %v17833_v48, %v14737_v9  ;;  %v14749_v11 = vsub.f32 %v17834_v46, %v14737_v9  ;;  %v14757_v40 = vsub.f32 %v17835_v62, %v14737_v9  ;;  %v17836_v20 = vld [vmem:[#allocation140_spill] sm:$0xff] }
 0x643   : > { %v14761_v5 = vsub.f32 %v17836_v20, %v14737_v9  ;;  %v17837_v46 = vld [vmem:[#allocation144_spill] sm:$0xff]  ;;  %v14773_v62 = vsub.f32 %v17838_v54, %v14737_v9  ;;  %v14779_v3 = vsub.f32 %v17839_v58, %v14737_v9  ;;  %v17841_v54 = vld [vmem:[#allocation209_spill] sm:$0xff] }
 0x644   : > { %v4542_v8 = vmul.f32 %v14741_v13, %v14741_v13  ;;  %v4543_v10 = vmul.f32 %v14745_v32, %v14745_v32  ;;  %v4544_v48 = vmul.f32 %v14749_v11, %v14749_v11  ;;  %v14767_v34 = vsub.f32 %v17837_v46, %v14737_v9  ;;  %v17840_v46 = vld [vmem:[#allocation152_spill] sm:$0xff] }
 0x645   : > { %v4545_v47 = vmul.f32 %v14757_v40, %v14757_v40  ;;  %v4546_v20 = vmul.f32 %v14761_v5, %v14761_v5  ;;  %v14785_v31 = vsub.f32 %v17840_v46, %v14737_v9  ;;  %v14791_v39 = vsub.f32 %v17841_v54, %v14737_v9  ;;  %v17843_v46 = vld [vmem:[#allocation215_spill] sm:$0xff]  ;;  %v17844_v54 = vld [vmem:[#allocation162_spill] sm:$0xff] }
 0x646   : > { %v4574_v22 = vadd.f32 %v4543_v10, %v4542_v8  ;;  %v4547_v8 = vmul.f32 %v14767_v34, %v14767_v34  ;;  %v4549_v58 = vmul.f32 %v14779_v3, %v14779_v3  ;;  %v14803_v23 = vsub.f32 %v17843_v46, %v14737_v9  ;;  %v17846_v46 = vld [vmem:[#allocation167_spill] sm:$0xff] }
 0x647   : > { %v14809_v33 = vsub.f32 %v17844_v54, %v14737_v9  ;;  %v14821_v14 = vsub.f32 %v17846_v46, %v14737_v9  ;;  %v17847_v54 = vld [vmem:[#allocation221_spill] sm:$0xff]  ;;  %v17850_v46 = vld [vmem:[#allocation222_spill] sm:$0xff] }
 0x648   : > { %v4575_v35 = vadd.f32 %v4574_v22, %v4544_v48  ;;  %v4548_v48 = vmul.f32 %v14773_v62, %v14773_v62  ;;  %v14827_v12 = vsub.f32 %v17847_v54, %v14737_v9  ;;  %v14839_v29 = vsub.f32 %v17850_v46, %v14737_v9  ;;  %v17851_v54 = vld [vmem:[#allocation177_spill] sm:$0xff]  ;;  %v17853_v46 = vld [vmem:[#allocation187_spill] sm:$0xff] }
 0x649   : > { %v14845_v1 = vsub.f32 %v17851_v54, %v14737_v9  ;;  %v14863_v54 = vsub.f32 %v14541_v56, %v14737_v9 }
 0x64a   : > { %v4576_v27 = vadd.f32 %v4575_v35, %v4545_v47  ;;  %v17842_v35 = vld [vmem:[#allocation157_spill] sm:$0xff]  ;;  %17848 = vst [vmem:[#allocation186_spill] sm:$0xff] %v14827_v12 }
 0x64b   : > { %v14797_v30 = vsub.f32 %v17842_v35, %v14737_v9  ;;  %v17845_v35 = vld [vmem:[#allocation218_spill] sm:$0xff]  ;;  %v4563_v56 = vmul.f32 %v14863_v54, %v14863_v54 }
 0x64c   : > { %v4577_v10 = vadd.f32 %v4576_v27, %v4546_v20  ;;  %v4550_v27 = vmul.f32 %v14785_v31, %v14785_v31  ;;  %v14815_v21 = vsub.f32 %v17845_v35, %v14737_v9  ;;  %v17849_v35 = vld [vmem:[#allocation172_spill] sm:$0xff] }
 0x64d   : > { %v14833_v41 = vsub.f32 %v17849_v35, %v14737_v9  ;;  %v17852_v35 = vld [vmem:[#allocation118_spill] sm:$0xff] }
 0x64e   : > { %v4578_v22 = vadd.f32 %v4577_v10, %v4547_v8  ;;  %v4551_v8 = vmul.f32 %v14791_v39, %v14791_v39  ;;  %v14851_v57 = vsub.f32 %v17852_v35, %v14737_v9  ;;  %v14869_v35 = vsub.f32 %v14551_v25, %v14737_v9 }
 0x650   : > { %v4579_v47 = vadd.f32 %v4578_v22, %v4548_v48  ;;  %v4552_v48 = vmul.f32 %v14797_v30, %v14797_v30  ;;  %v4564_v25 = vmul.f32 %v14869_v35, %v14869_v35 }
 0x652   : > { %v4580_v20 = vadd.f32 %v4579_v47, %v4549_v58  ;;  %v4553_v58 = vmul.f32 %v14803_v23, %v14803_v23 }
 0x654   : > { %v4581_v10 = vadd.f32 %v4580_v20, %v4550_v27  ;;  %v4554_v27 = vmul.f32 %v14809_v33, %v14809_v33 }
 0x656   : > { %v4582_v22 = vadd.f32 %v4581_v10, %v4551_v8  ;;  %v4555_v8 = vmul.f32 %v14815_v21, %v14815_v21 }
 0x658   : > { %v4583_v47 = vadd.f32 %v4582_v22, %v4552_v48  ;;  %v4556_v48 = vmul.f32 %v14821_v14, %v14821_v14 }
 0x65a   : > { %v4584_v20 = vadd.f32 %v4583_v47, %v4553_v58  ;;  %v4557_v58 = vmul.f32 %v14827_v12, %v14827_v12  ;;  %v14857_v12 = vsub.f32 %v17853_v46, %v14737_v9  ;;  %v14875_v46 = vsub.f32 %v14561_v36, %v14737_v9 }
 0x65c   : > { %v4585_v10 = vadd.f32 %v4584_v20, %v4554_v27  ;;  %v4558_v27 = vmul.f32 %v14833_v41, %v14833_v41  ;;  %v4565_v36 = vmul.f32 %v14875_v46, %v14875_v46 }
 0x65e   : > { %v4586_v22 = vadd.f32 %v4585_v10, %v4555_v8  ;;  %v4559_v8 = vmul.f32 %v14839_v29, %v14839_v29 }
 0x660   : > { %v4587_v47 = vadd.f32 %v4586_v22, %v4556_v48  ;;  %v4560_v48 = vmul.f32 %v14845_v1, %v14845_v1 }
 0x662   : > { %v4588_v20 = vadd.f32 %v4587_v47, %v4557_v58  ;;  %v4561_v58 = vmul.f32 %v14851_v57, %v14851_v57 }
 0x664   : > { %v4589_v10 = vadd.f32 %v4588_v20, %v4558_v27  ;;  %v4562_v27 = vmul.f32 %v14857_v12, %v14857_v12 }
 0x666   : > { %v4590_v22 = vadd.f32 %v4589_v10, %v4559_v8  ;;  %v14881_v10 = vsub.f32 %v14571_v2, %v14737_v9 }
 0x668   : > { %v4591_v47 = vadd.f32 %v4590_v22, %v4560_v48  ;;  %17854 = vst [vmem:[#allocation178_spill] sm:$0xff] %v14881_v10  ;;  %v14887_v22 = vsub.f32 %v14580_v63, %v14737_v9  ;;  %v4566_v2 = vmul.f32 %v14881_v10, %v14881_v10 }
 0x66a   : > { %v4592_v20 = vadd.f32 %v4591_v47, %v4561_v58  ;;  %17855 = vst [vmem:[#allocation116_spill] sm:$0xff] %v14887_v22  ;;  %v14893_v47 = vsub.f32 %v14589_v6, %v14737_v9  ;;  %v4567_v63 = vmul.f32 %v14887_v22, %v14887_v22 }
 0x66c   : > { %v4593_v8 = vadd.f32 %v4592_v20, %v4562_v27  ;;  %17856 = vst [vmem:[#allocation197_spill] sm:$0xff] %v14893_v47  ;;  %v14899_v20 = vsub.f32 %v14596_v61, %v14737_v9  ;;  %v4568_v6 = vmul.f32 %v14893_v47, %v14893_v47 }
 0x66e   : > { %v4594_v48 = vadd.f32 %v4593_v8, %v4563_v56  ;;  %17857 = vst [vmem:[#allocation193_spill] sm:$0xff] %v14899_v20  ;;  %v14905_v8 = vsub.f32 %v14603_v17, %v14737_v9  ;;  %v4569_v61 = vmul.f32 %v14899_v20, %v14899_v20 }
 0x670   : > { %v4595_v58 = vadd.f32 %v4594_v48, %v4564_v25  ;;  %17858 = vst [vmem:[#allocation191_spill] sm:$0xff] %v14905_v8  ;;  %v14911_v48 = vsub.f32 %v14607_v38, %v14737_v9  ;;  %v4570_v17 = vmul.f32 %v14905_v8, %v14905_v8 }
 0x672   : > { %v4596_v27 = vadd.f32 %v4595_v58, %v4565_v36  ;;  %v14917_v58 = vsub.f32 %v14611_v26, %v14737_v9  ;;  %v4571_v38 = vmul.f32 %v14911_v48, %v14911_v48 }
 0x674   : > { %v4597_v56 = vadd.f32 %v4596_v27, %v4566_v2  ;;  %v14923_v27 = vsub.f32 %v14616_v4, %v14737_v9 }
 0x676   : > { %v4598_v25 = vadd.f32 %v4597_v56, %v4567_v63  ;;  %v4572_v56 = vmul.f32 %v14917_v58, %v14917_v58  ;;  %v4573_v26 = vmul.f32 %v14923_v27, %v14923_v27 }
 0x678   : > { %v4599_v36 = vadd.f32 %v4598_v25, %v4568_v6 }
 0x67a   : > { %v4600_v2 = vadd.f32 %v4599_v36, %v4569_v61 }
 0x67c   : > { %v4601_v63 = vadd.f32 %v4600_v2, %v4570_v17 }
 0x67e   : > { %v4602_v6 = vadd.f32 %v4601_v63, %v4571_v38  ;;  %v17863_v63 = vld [vmem:[#allocation165_spill] sm:$0xff] }
 0x680   : > { %v4603_v25 = vadd.f32 %v4602_v6, %v4572_v56  ;;  %v17864_v56 = vld [vmem:[#allocation170_spill] sm:$0xff]  ;;  %v17866_v6 = vld [vmem:[#allocation183_spill] sm:$0xff] }
 0x682   : > { %v4604_v20 = vadd.f32 %v4603_v25, %v4573_v26  ;;  %v17867_v26 = vld [vmem:[#allocation192_spill] sm:$0xff]  ;;  %v17868_v25 = vld [vmem:[#allocation202_spill] sm:$0xff] }
 0x684   : > { %v4605_v47 = vrot.slane %v4604_v20, 4 }
 0x686   : > { %v4606_v8 = vadd.f32 %v4605_v47, %v4604_v20  ;;  %v17860_v47 = vld [vmem:[#allocation149_spill] sm:$0xff]  ;;  %v17861_v20 = vld [vmem:[#allocation155_spill] sm:$0xff] }
 0x688   : > { %v4607_v61 = vrot.slane %v4606_v8, 2 }
 0x68a   : > { %v4608_v36 = vadd.f32 %v4607_v61, %v4606_v8  ;;  %v17862_v8 = vld [vmem:[#allocation160_spill] sm:$0xff]  ;;  %v17869_v61 = vld [vmem:[#allocation115_spill] sm:$0xff] }
 0x68c   : > { %v4609_v22 = vrot.slane %v4608_v36, 1 }
 0x68e   : > { %v4610_v4 = vadd.f32 %v4609_v22, %v4608_v36  ;;  %v17859_v22 = vld [vmem:[#allocation143_spill] sm:$0xff]  ;;  %v17870_v36 = vld [vmem:[#allocation208_spill] sm:$0xff] }
 0x690   : > { %v4643_v9 = vand.u32 4294901760, %v4610_v4 }
 0x692   : > { %4749 = vmatmul.f32.vlgmr.msrb.gmra.mxu3 %v4643_v9  ;;  %v4644_v10 = vsub.f32 %v4610_v4, %v4643_v9  ;;  %v17871_v4 = vld [vmem:[#allocation216_spill] sm:$0xff] }
 0x693   : > { %4916 = vmatpush.msrb.mxu3 %v14055_v37 }
 0x694   : > { %v4645_v17 = vand.u32 4294901760, %v4644_v10 }
 0x695   : > { %4918 = vmatpush.msrb.mxu3 %v14078_v44 }
 0x696   : > { %v4646_v2 = vsub.f32 %v4644_v10, %v4645_v17 }
 0x697   : > { %4920 = vmatpush.msrb.mxu3 %v14101_v18  ;;  %v12343_v18 = vld [vmem:[#allocation7 + $0xa8] sm:$0xff] }
 0x698   : > { %v4647_v38 = vand.u32 4294901760, %v4646_v2  ;;  %v17873_v2 = vld [vmem:[#allocation180_spill] sm:$0xff] }
 0x699   : > { %4922 = vmatpush.msrb.mxu3 %v17753_v60 }
 0x69a   : > { %4648 = vmatmul.f32.vlgmr.msra.gmra.mxu2 %v4647_v38  ;;  %4842 = vmatmul.f32.vlgmr.msra.gmra.mxu3 %v4645_v17  ;;  %v17872_v17 = vld [vmem:[#allocation217_spill] sm:$0xff] }
 0x69b   : > { %4849 = vmatpush.msra.mxu2 %v17797_v24  ;;  %4924 = vmatpush.msrb.mxu3 %v17759_v50 }
 0x69d   : > { %4853 = vmatpush.msra.mxu2 %v17798_v19  ;;  %4926 = vmatpush.msrb.mxu3 %v17767_v55 }
 0x69f   : > { %4857 = vmatpush.msra.mxu2 %v17799_v52  ;;  %4928 = vmatpush.msrb.mxu3 %v17773_v28 }
 0x6a1   : > { %4861 = vmatpush.msra.mxu2 %v17859_v22  ;;  %4930 = vmatpush.msrb.mxu3 %v17780_v45 }
 0x6a2   : > { %4803 = vmatmul.f32.vlgmr.msrb.gmra.mxu2 %v4644_v10  ;;  %v17865_v10 = vld [vmem:[#allocation175_spill] sm:$0xff] }
 0x6a3   : > { %4865 = vmatpush.msra.mxu2 %v17860_v47  ;;  %4932 = vmatpush.msrb.mxu3 %v17786_v53 }
 0x6a5   : > { %4869 = vmatpush.msra.mxu2 %v17861_v20  ;;  %4934 = vmatpush.msrb.mxu3 %v17790_v0 }
 0x6a7   : > { %4873 = vmatpush.msra.mxu2 %v17862_v8  ;;  %4936 = vmatpush.msrb.mxu3 %v17792_v42 }
 0x6a9   : > { %4877 = vmatpush.msra.mxu2 %v17863_v63  ;;  %4938 = vmatpush.msrb.mxu3 %v17793_v59 }
 0x6ab   : > { %4881 = vmatpush.msra.mxu2 %v17864_v56  ;;  %4940 = vmatpush.msrb.mxu3 %v17794_v15 }
 0x6ad   : > { %4885 = vmatpush.msra.mxu2 %v17865_v10  ;;  %4942 = vmatpush.msrb.mxu3 %v17796_v16 }
 0x6af   : > { %4889 = vmatpush.msra.mxu2 %v17866_v6  ;;  %4944 = vmatpush.msrb.mxu3 %v14417_v51 }
 0x6b1   : > { %4893 = vmatpush.msra.mxu2 %v17867_v26  ;;  %4946 = vmatpush.msrb.mxu3 %v14424_v43 }
 0x6b2   : > { %4948 = vmatmul.f32.vlgmr.msrb.gmra.mxu3 %v4643_v9 }
 0x6b3   : > { %4897 = vmatpush.msra.mxu2 %v17868_v25  ;;  %5013 = vmatpush.msra.mxu3 %v17869_v61 }
 0x6b5   : > { %5059 = vmatpush.msrb.mxu3 %v14654_v49  ;;  %4901 = vmatpush.msra.mxu2 %v17870_v36 }
 0x6b7   : > { %4905 = vmatpush.msra.mxu2 %v17871_v4 }
 0x6b9   : > { %4909 = vmatpush.msra.mxu2 %v17872_v17 }
 0x6ba   : > { %4911 = vmatmul.f32.vlgmr.msra.gmra.mxu2 %v4643_v9 }
 0x6bb   : > { %4983 = vmatpush.msrb.mxu2 %v14654_v49 }
 0x6bd   : > { %5036 = vmatpush.msra.mxu2 %v17873_v2 }
 0x715   : > { %v4750_v26 = vpop.f32.mrf.mxu3 }
 0x71d   : > { %v4649_v38 = vpop.f32.mrf.mxu2  ;;  %v4843_v25 = vpop.f32.mrf.mxu3 }
 0x71e   : > { %v4751_v10 = vadd.f32 %v4750_v26, %v4649_v38 }
 0x725   : > { %v4804_v6 = vpop.f32.mrf.mxu2 }
 0x726   : > { %v4805_v56 = vadd.f32 %v4804_v6, %v4751_v10  ;;  %v12334_v6 = vld [vmem:[#allocation7 + $0x60] sm:$0xff] }
 0x728   : > { %v4844_v61 = vadd.f32 %v4843_v25, %v4805_v56  ;;  %v12333_v25 = vld [vmem:[#allocation7 + $0x58] sm:$0xff] }
 0x735   : > { %v4949_v20 = vpop.f32.mrf.mxu3 }
 0x73d   : > { %v4912_v63 = vpop.f32.mrf.mxu2 }
 0x73e   : > { %v4913_v8 = vadd.f32 %v4912_v63, %v4844_v61  ;;  %v12332_v61 = vld [vmem:[#allocation7 + $0x50] sm:$0xff] }
 0x740   : > { %v4950_v36 = vadd.f32 %v4949_v20, %v4913_v8 }
 0x742   : > { %v4952_v47 = vmul.f32 0.00390625, %v4950_v36  ;;  %v12331_v36 = vld [vmem:[#allocation7 + $0x48] sm:$0xff] }
 0x744   : > { %v4953_v4 = vadd.f32 1e-05, %v4952_v47 }
 0x746   : > { %12482 = vrsqrt.f32 %v4953_v4  ;;  %vm4960_vm4 = vweird.f32 %v4953_v4 }
 0x74c   : > { %v12483_v17 = vpop.eup %12482 }
 0x74d   : > { %v4955_v9 = vmul.f32 %v12483_v17, %v4953_v4  ;;  %vm4961_vm3 = vweird.f32 %v12483_v17  ;;  %v12330_v4 = vld [vmem:[#allocation7 + $0x40] sm:$0xff] }
 0x74e   : > { %vm4962_vm5 = vmor %vm4960_vm4, %vm4961_vm3 }
 0x74f   : > { %v4956_v22 = vmul.f32 %v12483_v17, %v4955_v9 }
 0x751   : > { %v4957_v52 = vmul.f32 0.5, %v4956_v22  ;;  %v12335_v22 = vld [vmem:[#allocation7 + $0x68] sm:$0xff] }
 0x753   : > { %v4958_v19 = vsub.f32 1.5, %v4957_v52  ;;  %v12337_v52 = vld [vmem:[#allocation7 + $0x78] sm:$0xff] }
 0x755   : > { %v4959_v2 = vmul.f32 %v12483_v17, %v4958_v19  ;;  %v12336_v19 = vld [vmem:[#allocation7 + $0x70] sm:$0xff] }
 0x757   : > { %v4963_v26 = vsel %vm4962_vm5, %v12483_v17, %v4959_v2  ;;  %v12178_v17 = vld [vmem:[#allocation3 + $0x4] sm:$0xf]  ;;  %v11080_v2 = vld [vmem:[#allocation3 + $0x24] sm:$0xf0] }
 0x758   : > { %v4965_v10 = vsel %vm4359_vm2, %v4963_v26, 0  ;;  %v11083_v38 = vor.u32 %v12178_v17, %v11080_v2 }
 0x759   : > { %v4984_v56 = vand.u32 4294901760, %v4965_v10 }
 0x75b   : > { %5015 = vmatmul.f32.vlgmr.msra.gmra.mxu3 %v4984_v56  ;;  %v4985_v63 = vsub.f32 %v4965_v10, %v4984_v56 }
 0x75c   : > { %5107 = vmatpush.msra.mxu3 %v14654_v49 }
 0x75d   : > { %v4986_v20 = vand.u32 4294901760, %v4985_v63 }
 0x75f   : > { %v4987_v47 = vsub.f32 %v4985_v63, %v4986_v20 }
 0x761   : > { %v4988_v8 = vand.u32 4294901760, %v4987_v47 }
 0x763   : > { %4989 = vmatmul.f32.vlgmr.msrb.gmra.mxu2 %v4988_v8  ;;  %5063 = vmatmul.f32.vlgmr.msrb.gmra.mxu3 %v4986_v20  ;;  %v12345_v20 = vld [vmem:[#allocation7 + $0xb8] sm:$0xff] }
 0x764   : > { %5085 = vmatpush.msrb.mxu2 %v14661_v7  ;;  %7800 = vmatpush.bf16.msrb.mxu3 %v12345_v20 }
 0x76b   : > { %5039 = vmatmul.f32.vlgmr.msra.gmra.mxu2 %v4985_v63  ;;  %5109 = vmatmul.f32.vlgmr.msra.gmra.mxu3 %v4984_v56 }
 0x76c   : > { %7711 = vmatpush.bf16.msra.mxu2 %v12337_v52  ;;  %v12353_v52 = vld [vmem:[#allocation7 + $0xf8] sm:$0xff] }
 0x76d   : > { %7889 = vmatpush.bf16.msra.mxu1 %v12353_v52  ;;  %v17876_v52 = vld [vmem:[#allocation116_spill] sm:$0xff] }
 0x770   : > { %7712 = vmatpush.bf16.msra.mxu2 %v12336_v19 }
 0x773   : > { %5087 = vmatmul.f32.vlgmr.msrb.gmra.mxu2 %v4984_v56 }
 0x774   : > { %7713 = vmatpush.bf16.msra.mxu2 %v12335_v22 }
 0x778   : > { %7714 = vmatpush.bf16.msra.mxu2 %v12334_v6 }
 0x77c   : > { %7715 = vmatpush.bf16.msra.mxu2 %v12333_v25 }
 0x780   : > { %7716 = vmatpush.bf16.msra.mxu2 %v12332_v61 }
 0x784   : > { %7717 = vmatpush.bf16.msra.mxu2 %v12331_v36 }
 0x788   : > { %7718 = vmatpush.bf16.msra.mxu2 %v12330_v4 }
 0x78b   : > { %7719 = vmatmul.bf16.vlgmr.msra.gmra.mxu2 %v11083_v38 }
 0x7de   : > { %v5016_v9 = vpop.f32.mrf.mxu3 }
 0x7e6   : > { %v4990_v26 = vpop.f32.mrf.mxu2  ;;  %v5064_v10 = vpop.f32.mrf.mxu3 }
 0x7e7   : > { %v5017_v56 = vadd.f32 %v5016_v9, %v4990_v26 }
 0x7ee   : > { %v5040_v63 = vpop.f32.mrf.mxu2  ;;  %v5110_v6 = vpop.f32.mrf.mxu3 }
 0x7ef   : > { %v5041_v47 = vadd.f32 %v5040_v63, %v5017_v56 }
 0x7f1   : > { %v5065_v8 = vadd.f32 %v5064_v10, %v5041_v47 }
 0x7f6   : > { %v5088_v19 = vpop.f32.mrf.mxu2 }
 0x7f7   : > { %v5089_v22 = vadd.f32 %v5088_v19, %v5065_v8  ;;  %v17875_v8 = vld [vmem:[#allocation178_spill] sm:$0xff] }
 0x7f9   : > { %v5111_v25 = vadd.f32 %v5110_v6, %v5089_v22  ;;  %v17877_v22 = vld [vmem:[#allocation197_spill] sm:$0xff] }
 0x7fa   : > { %v17878_v6 = vld [vmem:[#allocation193_spill] sm:$0xff] }
 0x7fb   : > { %v5113_v61 = vperm.slane %v5111_v25, 0  ;;  %v17879_v25 = vld [vmem:[#allocation191_spill] sm:$0xff] }
 0x7fd   : > { %v5114_v36 = vmul.f32 %v5113_v61, %v14741_v13  ;;  %v5115_v4 = vmul.f32 %v5113_v61, %v14745_v32  ;;  %v5116_v17 = vmul.f32 %v5113_v61, %v14749_v11  ;;  %v5117_v2 = vmul.f32 %v5113_v61, %v14757_v40 }
 0x7fe   : > { %v5118_v38 = vmul.f32 %v5113_v61, %v14761_v5  ;;  %v5119_v9 = vmul.f32 %v5113_v61, %v14767_v34  ;;  %v5120_v26 = vmul.f32 %v5113_v61, %v14773_v62  ;;  %v5121_v10 = vmul.f32 %v5113_v61, %v14779_v3  ;;  %v12478_v5 = vld [vmem:[%s17111_s4] ss:$0 sm:$0xff] }
 0x7ff   : > { %v5122_v63 = vmul.f32 %v5113_v61, %v14785_v31  ;;  %v5123_v56 = vmul.f32 %v5113_v61, %v14791_v39  ;;  %v5124_v13 = vmul.f32 %v5113_v61, %v14797_v30  ;;  %v5125_v32 = vmul.f32 %v5113_v61, %v14803_v23  ;;  %v17874_v62 = vld [vmem:[#allocation186_spill] sm:$0xff] }
 0x800   : > { %v5126_v11 = vmul.f32 %v5113_v61, %v14809_v33  ;;  %v5127_v40 = vmul.f32 %v5113_v61, %v14815_v21  ;;  %v5128_v34 = vmul.f32 %v5113_v61, %v14821_v14  ;;  %v5129_v3 = vmul.f32 %v5113_v61, %v17874_v62 }
 0x801   : > { %v5130_v31 = vmul.f32 %v5113_v61, %v14833_v41  ;;  %v5131_v39 = vmul.f32 %v5113_v61, %v14839_v29  ;;  %v5132_v30 = vmul.f32 %v5113_v61, %v14845_v1  ;;  %v5133_v23 = vmul.f32 %v5113_v61, %v14851_v57 }
 0x802   : > { %v5134_v33 = vmul.f32 %v5113_v61, %v14857_v12  ;;  %v5135_v21 = vmul.f32 %v5113_v61, %v14863_v54  ;;  %v5136_v20 = vmul.f32 %v5113_v61, %v14869_v35  ;;  %v5137_v47 = vmul.f32 %v5113_v61, %v14875_v46 }
 0x803   : > { %v5138_v14 = vmul.f32 %v5113_v61, %v17875_v8  ;;  %v5139_v19 = vmul.f32 %v5113_v61, %v17876_v52  ;;  %v5140_v41 = vmul.f32 %v5113_v61, %v17877_v22  ;;  %v5141_v29 = vmul.f32 %v5113_v61, %v17878_v6 }
 0x804   : > { %v5142_v1 = vmul.f32 %v5113_v61, %v17879_v25  ;;  %v5143_v57 = vmul.f32 %v5113_v61, %v14911_v48  ;;  %v5144_v12 = vmul.f32 %v5113_v61, %v14917_v58  ;;  %v5145_v54 = vmul.f32 %v5113_v61, %v14923_v27  ;;  %v15008_v48 = vld [vmem:[%s17112_s5] ss:$0 sm:$0xff] }
 0x805   : > { %v5150_v62 = vmul.f32 %v12478_v5, %v5114_v36  ;;  %v5151_v35 = vmul.f32 %v12478_v5, %v5115_v4  ;;  %v5152_v49 = vmul.f32 %v12478_v5, %v5116_v17  ;;  %v5153_v46 = vmul.f32 %v12478_v5, %v5117_v2 }
 0x806   : > { %v5154_v7 = vmul.f32 %v12478_v5, %v5118_v38  ;;  %v5155_v8 = vmul.f32 %v12478_v5, %v5119_v9  ;;  %v5156_v24 = vmul.f32 %v12478_v5, %v5120_v26  ;;  %v5157_v52 = vmul.f32 %v12478_v5, %v5121_v10 }
 0x807   : > { %v5158_v43 = vmul.f32 %v12478_v5, %v5122_v63  ;;  %v5159_v22 = vmul.f32 %v12478_v5, %v5123_v56  ;;  %v5160_v51 = vmul.f32 %v12478_v5, %v5124_v13  ;;  %v5161_v6 = vmul.f32 %v12478_v5, %v5125_v32  ;;  %v12344_v56 = vld [vmem:[#allocation7 + $0xb0] sm:$0xff] }
 0x808   : > { %v5162_v16 = vmul.f32 %v12478_v5, %v5126_v11  ;;  %v5163_v25 = vmul.f32 %v12478_v5, %v5127_v40  ;;  %v5164_v58 = vmul.f32 %v12478_v5, %v5128_v34  ;;  %v5165_v27 = vmul.f32 %v12478_v5, %v5129_v3  ;;  %7801 = vmatpush.bf16.msrb.mxu3 %v12344_v56 }
 0x809   : > { %v5166_v61 = vmul.f32 %v12478_v5, %v5130_v31  ;;  %v5167_v36 = vmul.f32 %v12478_v5, %v5131_v39  ;;  %v5168_v4 = vmul.f32 %v12478_v5, %v5132_v30  ;;  %v5169_v17 = vmul.f32 %v12478_v5, %v5133_v23 }
 0x80a   : > { %v5170_v2 = vmul.f32 %v12478_v5, %v5134_v33  ;;  %v5171_v38 = vmul.f32 %v12478_v5, %v5135_v21  ;;  %v5172_v9 = vmul.f32 %v12478_v5, %v5136_v20  ;;  %v5173_v26 = vmul.f32 %v12478_v5, %v5137_v47 }
 0x80b   : > { %v5174_v10 = vmul.f32 %v12478_v5, %v5138_v14  ;;  %v5175_v63 = vmul.f32 %v12478_v5, %v5139_v19  ;;  %v5176_v13 = vmul.f32 %v12478_v5, %v5140_v41  ;;  %v5177_v32 = vmul.f32 %v12478_v5, %v5141_v29 }
 0x80c   : > { %v5178_v11 = vmul.f32 %v12478_v5, %v5142_v1  ;;  %v5179_v40 = vmul.f32 %v12478_v5, %v5143_v57  ;;  %v5180_v15 = vmul.f32 %v12478_v5, %v5144_v12  ;;  %v15010_v59 = vmul.f32 %v12478_v5, %v5145_v54  ;;  %7802 = vmatpush.bf16.msrb.mxu3 %v12343_v18 }
 0x80d   : > { %v15013_v34 = vadd.f32 %v15008_v48, %v5150_v62  ;;  %v15016_v3 = vadd.f32 %v15008_v48, %v5151_v35  ;;  %v15019_v31 = vadd.f32 %v15008_v48, %v5152_v49  ;;  %v15022_v39 = vadd.f32 %v15008_v48, %v5153_v46  ;;  %v12352_v35 = vld [vmem:[#allocation7 + $0xf0] sm:$0xff] }
 0x80e   : > { %v15025_v30 = vadd.f32 %v15008_v48, %v5154_v7  ;;  %v15028_v23 = vadd.f32 %v15008_v48, %v5155_v8  ;;  %v15031_v5 = vadd.f32 %v15008_v48, %v5156_v24  ;;  %v15034_v33 = vadd.f32 %v15008_v48, %v5157_v52  ;;  %7890 = vmatpush.bf16.msra.mxu1 %v12352_v35 }
 0x80f   : > { %17880 = vst [vmem:[#allocation184_spill] sm:$0xff] %v15013_v34  ;;  %v15037_v21 = vadd.f32 %v15008_v48, %v5158_v43  ;;  %v15040_v49 = vadd.f32 %v15008_v48, %v5159_v22  ;;  %v15043_v20 = vadd.f32 %v15008_v48, %v5160_v51  ;;  %v15046_v7 = vadd.f32 %v15008_v48, %v5161_v6 }
 0x810   : > { %17881 = vst [vmem:[#allocation117_spill] sm:$0xff] %v15016_v3  ;;  %v15049_v47 = vadd.f32 %v15008_v48, %v5162_v16  ;;  %v15052_v24 = vadd.f32 %v15008_v48, %v5163_v25  ;;  %v15055_v14 = vadd.f32 %v15008_v48, %v5164_v58  ;;  %v15058_v43 = vadd.f32 %v15008_v48, %v5165_v27 }
 0x811   : > { %17882 = vst [vmem:[#allocation198_spill] sm:$0xff] %v15019_v31  ;;  %v15061_v19 = vadd.f32 %v15008_v48, %v5166_v61  ;;  %v15064_v51 = vadd.f32 %v15008_v48, %v5167_v36  ;;  %v15067_v41 = vadd.f32 %v15008_v48, %v5168_v4  ;;  %v15070_v16 = vadd.f32 %v15008_v48, %v5169_v17 }
 0x812   : > { %17883 = vst [vmem:[#allocation196_spill] sm:$0xff] %v15022_v39  ;;  %v15073_v29 = vadd.f32 %v15008_v48, %v5170_v2  ;;  %v15076_v1 = vadd.f32 %v15008_v48, %v5171_v38  ;;  %v15079_v57 = vadd.f32 %v15008_v48, %v5172_v9  ;;  %v15082_v12 = vadd.f32 %v15008_v48, %v5173_v26 }
 0x813   : > { %17884 = vst [vmem:[#allocation189_spill] sm:$0xff] %v15025_v30  ;;  %v15085_v54 = vadd.f32 %v15008_v48, %v5174_v10  ;;  %v15088_v62 = vadd.f32 %v15008_v48, %v5175_v63  ;;  %v15091_v46 = vadd.f32 %v15008_v48, %v5176_v13  ;;  %v15094_v8 = vadd.f32 %v15008_v48, %v5177_v32 }
 0x814   : > { %17885 = vst [vmem:[#allocation119_spill] sm:$0xff] %v15028_v23  ;;  %v15097_v52 = vadd.f32 %v15008_v48, %v5178_v11  ;;  %v15100_v22 = vadd.f32 %v15008_v48, %v5179_v40  ;;  %v15103_v6 = vmul.f32 0.5, %v15013_v34  ;;  %v15106_v25 = vmul.f32 0.5, %v15016_v3 }
 0x815   : > { %17886 = vst [vmem:[#allocation205_spill] sm:$0xff] %v15031_v5  ;;  %v15109_v58 = vmul.f32 0.5, %v15019_v31  ;;  %v15112_v27 = vmul.f32 0.5, %v15022_v39  ;;  %v15115_v61 = vmul.f32 0.5, %v15025_v30  ;;  %v15118_v36 = vmul.f32 0.5, %v15028_v23 }
 0x816   : > { %17887 = vst [vmem:[#allocation201_spill] sm:$0xff] %v15034_v33  ;;  %v15121_v4 = vmul.f32 0.5, %v15031_v5  ;;  %v15124_v17 = vmul.f32 0.5, %v15034_v33  ;;  %v15127_v2 = vmul.f32 0.5, %v15037_v21  ;;  %v15130_v38 = vmul.f32 0.5, %v15040_v49 }
 0x817   : > { %17888 = vst [vmem:[#allocation195_spill] sm:$0xff] %v15037_v21  ;;  %v15133_v9 = vmul.f32 0.5, %v15043_v20  ;;  %v15136_v26 = vmul.f32 0.5, %v15046_v7  ;;  %v15139_v10 = vmul.f32 0.5, %v15049_v47  ;;  %v15142_v63 = vmul.f32 0.5, %v15052_v24 }
 0x818   : > { %17889 = vst [vmem:[#allocation120_spill] sm:$0xff] %v15043_v20  ;;  %v15145_v56 = vmul.f32 0.5, %v15055_v14  ;;  %v15148_v13 = vmul.f32 0.5, %v15058_v43  ;;  %v15151_v32 = vmul.f32 0.5, %v15061_v19  ;;  %v15154_v11 = vmul.f32 0.5, %v15064_v51 }
 0x819   : > { %17890 = vst [vmem:[#allocation203_spill] sm:$0xff] %v15046_v7  ;;  %v15157_v40 = vmul.f32 0.5, %v15067_v41  ;;  %v15160_v35 = vmul.f32 0.5, %v15070_v16  ;;  %v15163_v42 = vmul.f32 0.5, %v15073_v29  ;;  %v15166_v0 = vmul.f32 0.5, %v15076_v1 }
 0x81a   : > { %17891 = vst [vmem:[#allocation121_spill] sm:$0xff] %v15049_v47  ;;  %v15169_v53 = vmul.f32 0.5, %v15079_v57  ;;  %v15172_v45 = vmul.f32 0.5, %v15082_v12  ;;  %v15175_v28 = vadd.f32 %v15008_v48, %v5180_v15  ;;  %v15178_v55 = vmul.f32 0.5, %v15085_v54 }
 0x81b   : > { %17892 = vst [vmem:[#allocation122_spill] sm:$0xff] %v15052_v24  ;;  %v5250_v50 = vmul.f32 0.044715, %v15013_v34  ;;  %v5251_v60 = vmul.f32 0.044715, %v15016_v3  ;;  %v15183_v44 = vmul.f32 0.5, %v15088_v62  ;;  %v15192_v15 = vadd.f32 %v15008_v48, %v15010_v59 }
 0x81c   : > { %17893 = vst [vmem:[#allocation126_spill] sm:$0xff] %v15055_v14  ;;  %v15186_v37 = vmul.f32 0.5, %v15091_v46  ;;  %v5261_v59 = vmul.f32 0.044715, %v15046_v7  ;;  %v5262_v48 = vmul.f32 0.044715, %v15049_v47 }
 0x81d   : > { %17894 = vst [vmem:[#allocation128_spill] sm:$0xff] %v15058_v43  ;;  %v5264_v18 = vmul.f32 0.044715, %v15055_v14 }
 0x81e   : > { %17895 = vst [vmem:[#allocation132_spill] sm:$0xff] %v15061_v19 }
 0x81f   : > { %17896 = vst [vmem:[#allocation134_spill] sm:$0xff] %v15064_v51 }
 0x820   : > { %17897 = vst [vmem:[#allocation138_spill] sm:$0xff] %v15070_v16 }
 0x821   : > { %17898 = vst [vmem:[#allocation140_spill] sm:$0xff] %v15076_v1 }
 0x822   : > { %17899 = vst [vmem:[#allocation144_spill] sm:$0xff] %v15079_v57 }
 0x823   : > { %17900 = vst [vmem:[#allocation146_spill] sm:$0xff] %v15082_v12 }
 0x824   : > { %17901 = vst [vmem:[#allocation150_spill] sm:$0xff] %v15085_v54 }
 0x825   : > { %17902 = vst [vmem:[#allocation152_spill] sm:$0xff] %v15088_v62 }
 0x826   : > { %17903 = vst [vmem:[#allocation209_spill] sm:$0xff] %v15091_v46 }
 0x827   : > { %17904 = vst [vmem:[#allocation157_spill] sm:$0xff] %v15094_v8 }
 0x828   : > { %17905 = vst [vmem:[#allocation215_spill] sm:$0xff] %v15097_v52 }
 0x829   : > { %17906 = vst [vmem:[#allocation162_spill] sm:$0xff] %v15100_v22 }
 0x82a   : > { %17907 = vst [vmem:[#allocation218_spill] sm:$0xff] %v15103_v6  ;;  %v5278_v6 = vmul.f32 0.044715, %v15097_v52 }
 0x82b   : > { %17908 = vst [vmem:[#allocation167_spill] sm:$0xff] %v15106_v25 }
 0x82c   : > { %17909 = vst [vmem:[#allocation221_spill] sm:$0xff] %v15109_v58  ;;  %v5277_v58 = vmul.f32 0.044715, %v15094_v8  ;;  %v5293_v8 = vmul.f32 %v5261_v59, %v15046_v7 }
 0x82d   : > { %17910 = vst [vmem:[#allocation172_spill] sm:$0xff] %v15112_v27  ;;  %v5275_v27 = vmul.f32 0.044715, %v15088_v62 }
 0x82e   : > { %17911 = vst [vmem:[#allocation222_spill] sm:$0xff] %v15115_v61 }
 0x82f   : > { %17912 = vst [vmem:[#allocation177_spill] sm:$0xff] %v15118_v36  ;;  %v5274_v36 = vmul.f32 0.044715, %v15085_v54 }
 0x830   : > { %17913 = vst [vmem:[#allocation118_spill] sm:$0xff] %v15121_v4  ;;  %v5272_v4 = vmul.f32 0.044715, %v15079_v57 }
 0x831   : > { %17914 = vst [vmem:[#allocation187_spill] sm:$0xff] %v15124_v17 }
 0x832   : > { %17915 = vst [vmem:[#allocation186_spill] sm:$0xff] %v15127_v2  ;;  %v5271_v2 = vmul.f32 0.044715, %v15076_v1 }
 0x833   : > { %17916 = vst [vmem:[#allocation178_spill] sm:$0xff] %v15130_v38  ;;  %v5269_v38 = vmul.f32 0.044715, %v15070_v16 }
 0x834   : > { %17917 = vst [vmem:[#allocation116_spill] sm:$0xff] %v15133_v9  ;;  %v5303_v59 = vmul.f32 %v5271_v2, %v15076_v1  ;;  %v17939_v1 = vld [vmem:[#allocation184_spill] sm:$0xff] }
 0x835   : > { %17918 = vst [vmem:[#allocation197_spill] sm:$0xff] %v15136_v26  ;;  %v5268_v26 = vmul.f32 0.044715, %v15067_v41 }
 0x836   : > { %17919 = vst [vmem:[#allocation193_spill] sm:$0xff] %v15139_v10  ;;  %v5266_v10 = vmul.f32 0.044715, %v15061_v19 }
 0x837   : > { %17920 = vst [vmem:[#allocation191_spill] sm:$0xff] %v15142_v63 }
 0x838   : > { %17921 = vst [vmem:[#allocation223_spill] sm:$0xff] %v15145_v56  ;;  %v5265_v56 = vmul.f32 0.044715, %v15058_v43 }
 0x839   : > { %17922 = vst [vmem:[#allocation224_spill] sm:$0xff] %v15148_v13  ;;  %v5263_v13 = vmul.f32 0.044715, %v15052_v24 }
 0x83a   : > { %17923 = vst [vmem:[#allocation225_spill] sm:$0xff] %v15151_v32  ;;  %v5283_v32 = vmul.f32 %v5251_v60, %v15016_v3  ;;  %v5270_v60 = vmul.f32 0.044715, %v15073_v29 }
 0x83b   : > { %17924 = vst [vmem:[#allocation226_spill] sm:$0xff] %v15154_v11  ;;  %v5260_v11 = vmul.f32 0.044715, %v15043_v20 }
 0x83c   : > { %17925 = vst [vmem:[#allocation227_spill] sm:$0xff] %v15157_v40  ;;  %v5282_v40 = vmul.f32 %v5250_v50, %v15013_v34  ;;  %v5267_v50 = vmul.f32 0.044715, %v15064_v51  ;;  %v12351_v34 = vld [vmem:[#allocation7 + $0xe8] sm:$0xff] }
 0x83d   : > { %17926 = vst [vmem:[#allocation228_spill] sm:$0xff] %v15160_v35  ;;  %v5258_v35 = vmul.f32 0.044715, %v15037_v21  ;;  %v5292_v3 = vmul.f32 %v5260_v11, %v15043_v20  ;;  %7891 = vmatpush.bf16.msra.mxu1 %v12351_v34  ;;  %v5302_v11 = vmul.f32 %v5270_v60, %v15073_v29  ;;  %v5310_v34 = vmul.f32 %v5278_v6, %v15097_v52  ;;  %v17946_v52 = vld [vmem:[#allocation201_spill] sm:$0xff] }
 0x83e   : > { %17927 = vst [vmem:[#allocation229_spill] sm:$0xff] %v15163_v42  ;;  %v5256_v42 = vmul.f32 0.044715, %v15031_v5 }
 0x83f   : > { %17928 = vst [vmem:[#allocation230_spill] sm:$0xff] %v15166_v0  ;;  %v5255_v0 = vmul.f32 0.044715, %v15028_v23 }
 0x840   : > { %17929 = vst [vmem:[#allocation231_spill] sm:$0xff] %v15169_v53  ;;  %v5252_v53 = vmul.f32 0.044715, %v15019_v31  ;;  %v5288_v25 = vmul.f32 %v5256_v42, %v15031_v5  ;;  %v5294_v42 = vmul.f32 %v5262_v48, %v15049_v47  ;;  %v5295_v5 = vmul.f32 %v5263_v13, %v15052_v24 }
 0x841   : > { %17930 = vst [vmem:[#allocation232_spill] sm:$0xff] %v15172_v45  ;;  %v5253_v45 = vmul.f32 0.044715, %v15022_v39  ;;  %v5287_v61 = vmul.f32 %v5255_v0, %v15028_v23  ;;  %v5290_v0 = vmul.f32 %v5258_v35, %v15037_v21  ;;  %v5300_v35 = vmul.f32 %v5268_v26, %v15067_v41  ;;  %v17937_v26 = vld [vmem:[#allocation162_spill] sm:$0xff] }
 0x842   : > { %17931 = vst [vmem:[#allocation233_spill] sm:$0xff] %v15175_v28  ;;  %v5284_v63 = vmul.f32 %v5252_v53, %v15019_v31  ;;  %v5273_v53 = vmul.f32 0.044715, %v15082_v12  ;;  %v5281_v31 = vmul.f32 0.044715, %v15192_v15  ;;  %v5304_v48 = vmul.f32 %v5272_v4, %v15079_v57  ;;  %v17940_v57 = vld [vmem:[#allocation117_spill] sm:$0xff] }
 0x843   : > { %17932 = vst [vmem:[#allocation234_spill] sm:$0xff] %v15178_v55  ;;  %v5254_v55 = vmul.f32 0.044715, %v15025_v30  ;;  %v5285_v9 = vmul.f32 %v5253_v45, %v15022_v39  ;;  %v5276_v45 = vmul.f32 0.044715, %v15091_v46  ;;  %v5314_v4 = vmul.f32 %v5282_v40, %v17939_v1 }
 0x844   : > { %17933 = vst [vmem:[#allocation235_spill] sm:$0xff] %v15183_v44  ;;  %v5257_v44 = vmul.f32 0.044715, %v15034_v33  ;;  %v5305_v13 = vmul.f32 %v5273_v53, %v15082_v12  ;;  %v5313_v2 = vmul.f32 %v5281_v31, %v15192_v15  ;;  %v5315_v53 = vmul.f32 %v5283_v32, %v17940_v57  ;;  %v17941_v12 = vld [vmem:[#allocation198_spill] sm:$0xff] }
 0x845   : > { %17934 = vst [vmem:[#allocation236_spill] sm:$0xff] %v15186_v37  ;;  %v5259_v37 = vmul.f32 0.044715, %v15040_v49  ;;  %v5286_v17 = vmul.f32 %v5254_v55, %v15025_v30  ;;  %v5279_v55 = vmul.f32 0.044715, %v15100_v22  ;;  %v5296_v22 = vmul.f32 %v5264_v18, %v15055_v14 }
 0x846   : > { %17935 = vst [vmem:[#allocation237_spill] sm:$0xff] %v15192_v15  ;;  %v5280_v30 = vmul.f32 0.044715, %v15175_v28  ;;  %v5289_v39 = vmul.f32 %v5257_v44, %v15034_v33  ;;  %v5297_v28 = vmul.f32 %v5265_v56, %v15058_v43  ;;  %v5298_v44 = vmul.f32 %v5266_v10, %v15061_v19 }
 0x847   : > { %v5291_v23 = vmul.f32 %v5259_v37, %v15040_v49  ;;  %v5299_v33 = vmul.f32 %v5267_v50, %v15064_v51  ;;  %v5301_v37 = vmul.f32 %v5269_v38, %v15070_v16  ;;  %v5306_v18 = vmul.f32 %v5274_v36, %v15085_v54  ;;  %v17936_v50 = vld [vmem:[#allocation157_spill] sm:$0xff]  ;;  %v17942_v54 = vld [vmem:[#allocation196_spill] sm:$0xff] }
 0x848   : > { %v5307_v56 = vmul.f32 %v5275_v27, %v15088_v62  ;;  %v5308_v10 = vmul.f32 %v5276_v45, %v15091_v46  ;;  %v5309_v51 = vmul.f32 %v5277_v58, %v17936_v50  ;;  %v5311_v38 = vmul.f32 %v5279_v55, %v17937_v26  ;;  %v17943_v62 = vld [vmem:[#allocation189_spill] sm:$0xff]  ;;  %v17944_v46 = vld [vmem:[#allocation119_spill] sm:$0xff] }
 0x849   : > { %v17938_v16 = vld [vmem:[#allocation233_spill] sm:$0xff]  ;;  %v5316_v36 = vmul.f32 %v5284_v63, %v17941_v12  ;;  %v5317_v27 = vmul.f32 %v5285_v9, %v17942_v54  ;;  %v5318_v45 = vmul.f32 %v5286_v17, %v17943_v62  ;;  %v5319_v58 = vmul.f32 %v5287_v61, %v17944_v46 }
 0x84a   : > { %v5312_v60 = vmul.f32 %v5280_v30, %v17938_v16  ;;  %v17945_v50 = vld [vmem:[#allocation205_spill] sm:$0xff]  ;;  %v5321_v55 = vmul.f32 %v5289_v39, %v17946_v52  ;;  %v5322_v30 = vmul.f32 %v5290_v0, %v15037_v21  ;;  %v5323_v31 = vmul.f32 %v5291_v23, %v15040_v49  ;;  %v17948_v21 = vld [vmem:[#allocation138_spill] sm:$0xff] }
 0x84b   : > { %v5320_v6 = vmul.f32 %v5288_v25, %v17945_v50  ;;  %v5324_v40 = vmul.f32 %v5292_v3, %v15043_v20  ;;  %v5325_v32 = vmul.f32 %v5293_v8, %v15046_v7  ;;  %v5326_v63 = vmul.f32 %v5294_v42, %v15049_v47  ;;  %v17947_v50 = vld [vmem:[#allocation134_spill] sm:$0xff]  ;;  %v17949_v20 = vld [vmem:[#allocation140_spill] sm:$0xff] }
 0x84c   : > { %v5327_v9 = vmul.f32 %v5295_v5, %v15052_v24  ;;  %v5328_v17 = vmul.f32 %v5296_v22, %v15055_v14  ;;  %v5329_v61 = vmul.f32 %v5297_v28, %v15058_v43  ;;  %v5330_v25 = vmul.f32 %v5298_v44, %v15061_v19  ;;  %v17950_v7 = vld [vmem:[#allocation144_spill] sm:$0xff]  ;;  %v17951_v47 = vld [vmem:[#allocation146_spill] sm:$0xff]  ;;  %v17954_v43 = vld [vmem:[#allocation209_spill] sm:$0xff] }
 0x84d   : > { %v5331_v39 = vmul.f32 %v5299_v33, %v17947_v50  ;;  %v5332_v0 = vmul.f32 %v5300_v35, %v15067_v41  ;;  %v5333_v23 = vmul.f32 %v5301_v37, %v17948_v21  ;;  %v5334_v3 = vmul.f32 %v5302_v11, %v15073_v29  ;;  %v17952_v24 = vld [vmem:[#allocation150_spill] sm:$0xff]  ;;  %v17953_v14 = vld [vmem:[#allocation152_spill] sm:$0xff]  ;;  %v17955_v19 = vld [vmem:[#allocation157_spill] sm:$0xff] }
 0x84e   : > { %v5335_v8 = vmul.f32 %v5303_v59, %v17949_v20  ;;  %v5336_v42 = vmul.f32 %v5304_v48, %v17950_v7  ;;  %v5337_v5 = vmul.f32 %v5305_v13, %v17951_v47  ;;  %v5338_v22 = vmul.f32 %v5306_v18, %v17952_v24  ;;  %v17956_v50 = vld [vmem:[#allocation215_spill] sm:$0xff] }
 0x84f   : > { %v5339_v28 = vmul.f32 %v5307_v56, %v17953_v14  ;;  %v5340_v44 = vmul.f32 %v5308_v10, %v17954_v43  ;;  %v5341_v33 = vmul.f32 %v5309_v51, %v17955_v19  ;;  %v5342_v35 = vmul.f32 %v5310_v34, %v17956_v50  ;;  %v17957_v19 = vld [vmem:[#allocation205_spill] sm:$0xff] }
 0x850   : > { %v5343_v37 = vmul.f32 %v5311_v38, %v17937_v26  ;;  %v5344_v11 = vmul.f32 %v5312_v60, %v17938_v16  ;;  %v5345_v59 = vmul.f32 %v5313_v2, %v15192_v15  ;;  %v5346_v48 = vadd.f32 %v5314_v4, %v17939_v1  ;;  %v17958_v26 = vld [vmem:[#allocation195_spill] sm:$0xff]  ;;  %v17959_v15 = vld [vmem:[#allocation120_spill] sm:$0xff] }
 0x851   : > { %v5347_v13 = vadd.f32 %v5315_v53, %v17940_v57  ;;  %v5348_v18 = vadd.f32 %v5316_v36, %v17941_v12  ;;  %v5349_v56 = vadd.f32 %v5317_v27, %v17942_v54  ;;  %v5350_v10 = vadd.f32 %v5318_v45, %v17943_v62  ;;  %v17960_v4 = vld [vmem:[#allocation203_spill] sm:$0xff]  ;;  %v17961_v53 = vld [vmem:[#allocation121_spill] sm:$0xff]  ;;  %v17962_v36 = vld [vmem:[#allocation122_spill] sm:$0xff] }
 0x852   : > { %v5351_v51 = vadd.f32 %v5319_v58, %v17944_v46  ;;  %v5352_v34 = vadd.f32 %v5320_v6, %v17957_v19  ;;  %v5353_v38 = vadd.f32 %v5321_v55, %v17946_v52  ;;  %v5354_v60 = vadd.f32 %v5322_v30, %v17958_v26  ;;  %v17963_v27 = vld [vmem:[#allocation126_spill] sm:$0xff]  ;;  %v17964_v45 = vld [vmem:[#allocation128_spill] sm:$0xff] }
 0x853   : > { %v5355_v2 = vadd.f32 %v5323_v31, %v15040_v49  ;;  %v5356_v1 = vadd.f32 %v5324_v40, %v17959_v15  ;;  %v5357_v57 = vadd.f32 %v5325_v32, %v17960_v4  ;;  %v5358_v12 = vadd.f32 %v5326_v63, %v17961_v53  ;;  %v17965_v58 = vld [vmem:[#allocation132_spill] sm:$0xff]  ;;  %v17966_v6 = vld [vmem:[#allocation134_spill] sm:$0xff] }
 0x854   : > { %v5359_v54 = vadd.f32 %v5327_v9, %v17962_v36  ;;  %v5360_v62 = vadd.f32 %v5328_v17, %v17963_v27  ;;  %v5361_v46 = vadd.f32 %v5329_v61, %v17964_v45  ;;  %v5362_v19 = vadd.f32 %v5330_v25, %v17965_v58  ;;  %v17967_v9 = vld [vmem:[#allocation157_spill] sm:$0xff]  ;;  %v17968_v61 = vld [vmem:[#allocation162_spill] sm:$0xff]  ;;  %v12350_v45 = vld [vmem:[#allocation7 + $0xe0] sm:$0xff] }
 0x855   : > { %v5363_v52 = vadd.f32 %v5331_v39, %v17966_v6  ;;  %v5364_v26 = vadd.f32 %v5332_v0, %v15067_v41  ;;  %v5365_v49 = vadd.f32 %v5333_v23, %v17948_v21  ;;  %v5366_v15 = vadd.f32 %v5334_v3, %v15073_v29  ;;  %v17969_v0 = vld [vmem:[#allocation237_spill] sm:$0xff]  ;;  %7892 = vmatpush.bf16.msra.mxu1 %v12350_v45 }
 0x856   : > { %v5367_v55 = vadd.f32 %v5335_v8, %v17949_v20  ;;  %v5368_v30 = vadd.f32 %v5336_v42, %v17950_v7  ;;  %v5369_v31 = vadd.f32 %v5337_v5, %v17951_v47  ;;  %v5370_v40 = vadd.f32 %v5338_v22, %v17952_v24 }
 0x857   : > { %v5371_v32 = vadd.f32 %v5339_v28, %v17953_v14  ;;  %v5372_v63 = vadd.f32 %v5340_v44, %v17954_v43  ;;  %v5373_v17 = vadd.f32 %v5341_v33, %v17967_v9  ;;  %v5374_v41 = vadd.f32 %v5342_v35, %v17956_v50 }
 0x858   : > { %v5375_v21 = vadd.f32 %v5343_v37, %v17968_v61  ;;  %v5378_v25 = vmul.f32 0.7978846, %v5346_v48  ;;  %v5376_v29 = vadd.f32 %v5344_v11, %v17938_v16  ;;  %v5379_v20 = vmul.f32 0.7978846, %v5347_v13 }
 0x859   : > { %v5380_v39 = vmul.f32 0.7978846, %v5348_v18  ;;  %v5381_v7 = vmul.f32 0.7978846, %v5349_v56  ;;  %v5377_v47 = vadd.f32 %v5345_v59, %v17969_v0  ;;  %v5382_v23 = vmul.f32 0.7978846, %v5350_v10 }
 0x85a   : > { %v5383_v24 = vmul.f32 0.7978846, %v5351_v51  ;;  %12484 = vtanh.f32 %v5378_v25  ;;  %v5384_v14 = vmul.f32 0.7978846, %v5352_v34  ;;  %v5385_v3 = vmul.f32 0.7978846, %v5353_v38 }
 0x85b   : > { %v5386_v43 = vmul.f32 0.7978846, %v5354_v60  ;;  %12486 = vtanh.f32 %v5379_v20  ;;  %v5387_v8 = vmul.f32 0.7978846, %v5355_v2  ;;  %v5388_v42 = vmul.f32 0.7978846, %v5356_v1 }
 0x85c   : > { %v5389_v5 = vmul.f32 0.7978846, %v5357_v57  ;;  %12488 = vtanh.f32 %v5380_v39  ;;  %v5390_v22 = vmul.f32 0.7978846, %v5358_v12  ;;  %v5391_v28 = vmul.f32 0.7978846, %v5359_v54 }
 0x85d   : > { %v5392_v44 = vmul.f32 0.7978846, %v5360_v62  ;;  %12490 = vtanh.f32 %v5381_v7  ;;  %v5393_v33 = vmul.f32 0.7978846, %v5361_v46  ;;  %v15318_v35 = vmul.f32 0.7978846, %v5362_v19 }
 0x85e   : > { %v15320_v37 = vmul.f32 0.7978846, %v5363_v52  ;;  %12492 = vtanh.f32 %v5382_v23  ;;  %v15322_v11 = vmul.f32 0.7978846, %v5364_v26  ;;  %v15324_v59 = vmul.f32 0.7978846, %v5365_v49 }
 0x85f   : > { %v15326_v48 = vmul.f32 0.7978846, %v5366_v15  ;;  %12494 = vtanh.f32 %v5383_v24  ;;  %v15328_v18 = vmul.f32 0.7978846, %v5367_v55  ;;  %v15330_v56 = vmul.f32 0.7978846, %v5368_v30 }
 0x860   : > { %v12485_v13 = vpop.eup %12484  ;;  %v15332_v10 = vmul.f32 0.7978846, %v5369_v31  ;;  %12496 = vtanh.f32 %v5384_v14  ;;  %v15339_v34 = vld [vmem:[%s459_s30] ss:$0 sm:$0xff]  ;;  %v15341_v38 = vmul.f32 0.7978846, %v5370_v40 }
 0x861   : > { %v12487_v51 = vpop.eup %12486  ;;  %v15343_v60 = vmul.f32 0.7978846, %v5371_v32  ;;  %v15345_v2 = vmul.f32 0.7978846, %v5372_v63  ;;  %12498 = vtanh.f32 %v5385_v3  ;;  %v15347_v4 = vmul.f32 0.7978846, %v5373_v17 }
 0x862   : > { %v12489_v1 = vpop.eup %12488  ;;  %v15349_v57 = vmul.f32 0.7978846, %v5374_v41  ;;  %v15351_v53 = vmul.f32 0.7978846, %v5375_v21  ;;  %12500 = vtanh.f32 %v5386_v43  ;;  %v15353_v36 = vmul.f32 0.7978846, %v5376_v29 }
 0x863   : > { %v12491_v12 = vpop.eup %12490  ;;  %12502 = vtanh.f32 %v5387_v8  ;;  %v12342_v54 = vld [vmem:[#allocation7 + $0xa0] sm:$0xff]  ;;  %v5442_v27 = vadd.f32 1.0, %v12485_v13  ;;  %v5443_v62 = vadd.f32 1.0, %v12487_v51  ;;  %v15355_v58 = vmul.f32 0.7978846, %v5377_v47  ;;  %v12361_v52 = vld [vmem:[#allocation7 + $0x138] sm:$0xff] }
 0x864   : > { %v12493_v46 = vpop.eup %12492  ;;  %12504 = vtanh.f32 %v5388_v42  ;;  %v5444_v19 = vadd.f32 1.0, %v12489_v1  ;;  %v5445_v6 = vadd.f32 1.0, %v12491_v12  ;;  %7803 = vmatpush.bf16.msrb.mxu3 %v12342_v54  ;;  %v17970_v15 = vld [vmem:[#allocation218_spill] sm:$0xff]  ;;  %v17971_v30 = vld [vmem:[#allocation167_spill] sm:$0xff]  ;;  %v17972_v17 = vld [vmem:[#allocation221_spill] sm:$0xff]  ;;  %7978 = vmatpush.bf16.msra.mxu0 %v12361_v52  ;;  %s12689_s30 = sshra.s32 %s10028_s20, 4  ;;  %s12690_s30 = int_to_ptr.hbm [resolvable:$true] %s12689_s30 }
 0x865   : > { %v12495_v26 = vpop.eup %12494  ;;  %12506 = vtanh.f32 %v5389_v5  ;;  %v5446_v49 = vadd.f32 1.0, %v12493_v46  ;;  %v5474_v55 = vmul.f32 %v5442_v27, %v17970_v15  ;;  %v5475_v31 = vmul.f32 %v5443_v62, %v17971_v30  ;;  %v12341_v40 = vld [vmem:[#allocation7 + $0x98] sm:$0xff]  ;;  %v17973_v21 = vld [vmem:[#allocation172_spill] sm:$0xff]  ;;  %v17974_v39 = vld [vmem:[#allocation222_spill] sm:$0xff]  ;;  %s12691_s26 = scalar_lea.hbm %s12690_s30, 256  ;;  %p12696_p3 = scmp.lt.s32.totalorder %s12690_s30, %s17119_s12 }
 0x866   : > { %v12497_v32 = vpop.eup %12496  ;;  %12508 = vtanh.f32 %v5390_v22  ;;  %v5447_v63 = vadd.f32 1.0, %v12495_v26  ;;  %v5476_v41 = vmul.f32 %v5444_v19, %v17972_v17  ;;  %v5477_v25 = vmul.f32 %v5445_v6, %v17973_v21  ;;  %v17975_v14 = vld [vmem:[#allocation177_spill] sm:$0xff]  ;;  %v12349_v8 = vld [vmem:[#allocation7 + $0xd8] sm:$0xff]  ;;  %v17976_v22 = vld [vmem:[#allocation118_spill] sm:$0xff]  ;;  %p12692_p0 = scmp.ne.s32.totalorder %s12690_s30, %s12691_s26  ;;  %p12697_p4 = scmp.lt.s32.totalorder %s12695_s27, %s12691_s26 }
 0x867   : > { %v12499_v29 = vpop.eup %12498  ;;  %12510 = vtanh.f32 %v5391_v28  ;;  %v5448_v20 = vadd.f32 1.0, %v12497_v32  ;;  %v5478_v7 = vmul.f32 %v5446_v49, %v17974_v39  ;;  %v15363_v47 = vadd.f32 %v15339_v34, %v5474_v55  ;;  %v12340_v51 = vld [vmem:[#allocation7 + $0x90] sm:$0xff]  ;;  %v17977_v12 = vld [vmem:[#allocation187_spill] sm:$0xff]  ;;  %7893 = vmatpush.bf16.msra.mxu1 %v12349_v8  ;;  %v17980_v30 = vld [vmem:[#allocation116_spill] sm:$0xff] }
 0x868   : > { %v12501_v23 = vpop.eup %12500  ;;  %12512 = vtanh.f32 %v5392_v44  ;;  %v5449_v24 = vadd.f32 1.0, %v12499_v29  ;;  %v5479_v3 = vmul.f32 %v5447_v63, %v17975_v14  ;;  %v15367_v43 = vadd.f32 %v15339_v34, %v5475_v31  ;;  %7804 = vmatpush.bf16.msrb.mxu3 %v12341_v40  ;;  %v17978_v46 = vld [vmem:[#allocation186_spill] sm:$0xff]  ;;  %v17981_v17 = vld [vmem:[#allocation197_spill] sm:$0xff]  ;;  %p12693_p1 = pnand %p12692_p0, %p12860_p5  ;;  %p12698_p7 = por %p12697_p4, %p12696_p3 }
 0x869   : > { %v12503_v42 = vpop.eup %12502  ;;  %12514 = vtanh.f32 %v5393_v33  ;;  %v5450_v5 = vadd.f32 1.0, %v12501_v23  ;;  %v5480_v28 = vmul.f32 %v5448_v20, %v17976_v22  ;;  %v15371_v13 = vadd.f32 %v15339_v34, %v5476_v41  ;;  %5542 = vst [vmem:[#allocation2 + $0x18] sm:$0xff] %v15363_v47  ;;  %v12348_v33 = vld [vmem:[#allocation7 + $0xd0] sm:$0xff]  ;;  %v17982_v20 = vld [vmem:[#allocation193_spill] sm:$0xff] }
 0x86a   : > { %v12505_v44 = vpop.eup %12504  ;;  %12516 = vtanh.f32 %v15318_v35  ;;  %v5451_v1 = vadd.f32 1.0, %v12503_v42  ;;  %v5481_v54 = vmul.f32 %v5449_v24, %v17977_v12  ;;  %v15377_v27 = vadd.f32 %v15339_v34, %v5477_v25  ;;  %5543 = vst [vmem:[#allocation2 + $0x20] sm:$0xff] %v15367_v43  ;;  %v17979_v26 = vld [vmem:[#allocation178_spill] sm:$0xff]  ;;  %v17983_v24 = vld [vmem:[#allocation191_spill] sm:$0xff]  ;;  %p12694_p2 = pneg %p12693_p1 }
 0x86b   : > { %v12507_v62 = vpop.eup %12506  ;;  %12518 = vtanh.f32 %v15320_v37  ;;  %v5452_v45 = vadd.f32 1.0, %v12505_v44  ;;  %v5482_v19 = vmul.f32 %v5450_v5, %v17978_v46  ;;  %v15383_v6 = vadd.f32 %v15339_v34, %v5478_v7  ;;  %5544 = vst [vmem:[#allocation2 + $0x28] sm:$0xff] %v15371_v13  ;;  %7894 = vmatpush.bf16.msra.mxu1 %v12348_v33  ;;  %v17984_v42 = vld [vmem:[#allocation223_spill] sm:$0xff]  ;;  %v17985_v44 = vld [vmem:[#allocation224_spill] sm:$0xff] }
 0x86c   : > { %v12509_v35 = vpop.eup %12508  ;;  %12520 = vtanh.f32 %v15322_v11  ;;  %v5453_v52 = vadd.f32 1.0, %v12507_v62  ;;  %v5483_v49 = vmul.f32 %v5451_v1, %v17979_v26  ;;  %v15389_v15 = vadd.f32 %v15339_v34, %v5479_v3  ;;  %5545 = vst [vmem:[#allocation2 + $0x30] sm:$0xff] %v15377_v27  ;;  %7805 = vmatpush.bf16.msrb.mxu3 %v12340_v51  ;;  %v12339_v11 = vld [vmem:[#allocation7 + $0x88] sm:$0xff]  ;;  %p12699_p8 = pnand %p12698_p7, %p12694_p2 }
 0x86d   : > { %v12511_v37 = vpop.eup %12510  ;;  %12522 = vtanh.f32 %v15324_v59  ;;  %v5454_v55 = vadd.f32 1.0, %v12509_v35  ;;  %v5484_v31 = vmul.f32 %v5452_v45, %v17980_v30  ;;  %v15395_v40 = vadd.f32 %v15339_v34, %v5480_v28  ;;  %5546 = vst [vmem:[#allocation2 + $0x38] sm:$0xff] %v15383_v6  ;;  %v12347_v59 = vld [vmem:[#allocation7 + $0xc8] sm:$0xff]  ;;  %v17987_v35 = vld [vmem:[#allocation226_spill] sm:$0xff] }
 0x86e   : > { %v12513_v32 = vpop.eup %12512  ;;  %12524 = vtanh.f32 %v15326_v48  ;;  %v5455_v63 = vadd.f32 1.0, %v12511_v37  ;;  %v5485_v41 = vmul.f32 %v5453_v52, %v17981_v17  ;;  %v15401_v21 = vadd.f32 %v15339_v34, %v5481_v54  ;;  %5547 = vst [vmem:[#allocation2 + $0x40] sm:$0xff] %v15389_v15  ;;  %v17986_v62 = vld [vmem:[#allocation225_spill] sm:$0xff]  ;;  %v17988_v37 = vld [vmem:[#allocation227_spill] sm:$0xff] }
 0x86f   : > { %v12515_v25 = vpop.eup %12514  ;;  %12526 = vtanh.f32 %v15328_v18  ;;  %v5456_v29 = vadd.f32 1.0, %v12513_v32  ;;  %v5486_v39 = vmul.f32 %v5454_v55, %v17982_v20  ;;  %v15407_v7 = vadd.f32 %v15339_v34, %v5482_v19  ;;  %5548 = vst [vmem:[#allocation2 + $0x48] sm:$0xff] %v15395_v40  ;;  %7895 = vmatpush.bf16.msra.mxu1 %v12347_v59  ;;  %v17991_v20 = vld [vmem:[#allocation230_spill] sm:$0xff] }
 0x870   : > { %v12517_v48 = vpop.eup %12516  ;;  %12528 = vtanh.f32 %v15330_v56  ;;  %v5457_v23 = vadd.f32 1.0, %v12515_v25  ;;  %v5487_v14 = vmul.f32 %v5455_v63, %v17983_v24  ;;  %v15413_v3 = vadd.f32 %v15339_v34, %v5483_v49  ;;  %5549 = vst [vmem:[#allocation2 + $0x50] sm:$0xff] %v15401_v21  ;;  %7806 = vmatpush.bf16.msrb.mxu3 %v12339_v11  ;;  %v12338_v56 = vld [vmem:[#allocation7 + $0x80] sm:$0xff]  ;;  %v17992_v24 = vld [vmem:[#allocation231_spill] sm:$0xff] }
 0x871   : > { %v12519_v18 = vpop.eup %12518  ;;  %12530 = vtanh.f32 %v15332_v10  ;;  %v5458_v8 = vadd.f32 1.0, %v12517_v48  ;;  %v5488_v5 = vmul.f32 %v5456_v29, %v17984_v42  ;;  %v15419_v22 = vadd.f32 %v15339_v34, %v5484_v31  ;;  %5550 = vst [vmem:[#allocation2 + $0x58] sm:$0xff] %v15407_v7  ;;  %v12346_v10 = vld [vmem:[#allocation7 + $0xc0] sm:$0xff] }
 0x872   : > { %v12521_v28 = vpop.eup %12520  ;;  %12532 = vtanh.f32 %v15341_v38  ;;  %v5459_v51 = vadd.f32 1.0, %v12519_v18  ;;  %v5489_v1 = vmul.f32 %v5457_v23, %v17985_v44  ;;  %v15425_v12 = vadd.f32 %v15339_v34, %v5485_v41  ;;  %5551 = vst [vmem:[#allocation2 + $0x60] sm:$0xff] %v15413_v3  ;;  %v17989_v11 = vld [vmem:[#allocation228_spill] sm:$0xff]  ;;  %v17990_v41 = vld [vmem:[#allocation229_spill] sm:$0xff]  ;;  %v17994_v44 = vld [vmem:[#allocation234_spill] sm:$0xff] }
 0x873   : > { %v12523_v54 = vpop.eup %12522  ;;  %12534 = vtanh.f32 %v15343_v60  ;;  %v5460_v33 = vadd.f32 1.0, %v12521_v28  ;;  %v5490_v45 = vmul.f32 %v5458_v8, %v17986_v62  ;;  %v15431_v46 = vadd.f32 %v15339_v34, %v5486_v39  ;;  %5552 = vst [vmem:[#allocation2 + $0x68] sm:$0xff] %v15419_v22  ;;  %7896 = vmatpush.bf16.msra.mxu1 %v12346_v10  ;;  %v17993_v42 = vld [vmem:[#allocation232_spill] sm:$0xff] }
 0x874   : > { %v12525_v38 = vpop.eup %12524  ;;  %12536 = vtanh.f32 %v15345_v2  ;;  %v5461_v19 = vadd.f32 1.0, %v12523_v54  ;;  %v5491_v52 = vmul.f32 %v5459_v51, %v17987_v35  ;;  %v15437_v26 = vadd.f32 %v15339_v34, %v5487_v14  ;;  %5553 = vst [vmem:[#allocation2 + $0x70] sm:$0xff] %v15425_v12  ;;  %7807 = vmatpush.bf16.msrb.mxu3 %v12338_v56 }
 0x875   : > { %v12527_v60 = vpop.eup %12526  ;;  %12538 = vtanh.f32 %v15347_v4  ;;  %v5462_v49 = vadd.f32 1.0, %v12525_v38  ;;  %v5492_v55 = vmul.f32 %v5460_v33, %v17988_v37  ;;  %v15443_v30 = vadd.f32 %v15339_v34, %v5488_v5  ;;  %5554 = vst [vmem:[#allocation2 + $0x78] sm:$0xff] %v15431_v46  ;;  %v17995_v38 = vld [vmem:[#allocation235_spill] sm:$0xff]  ;;  %v17996_v37 = vld [vmem:[#allocation236_spill] sm:$0xff] }
 0x876   : > { %v12529_v2 = vpop.eup %12528  ;;  %12540 = vtanh.f32 %v15349_v57  ;;  %v5463_v31 = vadd.f32 1.0, %v12527_v60  ;;  %v5493_v32 = vmul.f32 %v5461_v19, %v17989_v11  ;;  %v15449_v63 = vadd.f32 %v15339_v34, %v5489_v1  ;;  %5555 = vst [vmem:[#allocation2 + $0x80] sm:$0xff] %v15437_v26 }
 0x877   : > { %v12531_v4 = vpop.eup %12530  ;;  %12542 = vtanh.f32 %v15351_v53  ;;  %v5464_v17 = vadd.f32 1.0, %v12529_v2  ;;  %v5494_v59 = vmul.f32 %v5462_v49, %v17990_v41  ;;  %v15455_v25 = vadd.f32 %v15339_v34, %v5490_v45  ;;  %5556 = vst [vmem:[#allocation2 + $0x88] sm:$0xff] %v15443_v30 }
 0x878   : > { %v12533_v57 = vpop.eup %12532  ;;  %12544 = vtanh.f32 %v15353_v36  ;;  %v5465_v29 = vadd.f32 1.0, %v12531_v4  ;;  %v5495_v39 = vmul.f32 %v5463_v31, %v17991_v20  ;;  %v15461_v48 = vadd.f32 %v15339_v34, %v5491_v52  ;;  %5557 = vst [vmem:[#allocation2 + $0x90] sm:$0xff] %v15449_v63 }
 0x879   : > { %v12535_v53 = vpop.eup %12534  ;;  %12546 = vtanh.f32 %v15355_v58  ;;  %v5466_v23 = vadd.f32 1.0, %v12533_v57  ;;  %v5496_v14 = vmul.f32 %v5464_v17, %v17992_v24  ;;  %v15467_v18 = vadd.f32 %v15339_v34, %v5492_v55  ;;  %5558 = vst [vmem:[#allocation2 + $0x98] sm:$0xff] %v15455_v25 }
 0x87a   : > { %v12537_v36 = vpop.eup %12536  ;;  %v5467_v8 = vadd.f32 1.0, %v12535_v53  ;;  %v5497_v5 = vmul.f32 %v5465_v29, %v17993_v42  ;;  %v15472_v56 = vadd.f32 %v15339_v34, %v5493_v32  ;;  %v5530_v28 = vadd.f32 %v15339_v34, %v5494_v59  ;;  %5559 = vst [vmem:[#allocation2 + $0xa0] sm:$0xff] %v15461_v48 }
 0x87b   : > { %v12539_v58 = vpop.eup %12538  ;;  %v5468_v51 = vadd.f32 1.0, %v12537_v36  ;;  %v5498_v1 = vmul.f32 %v5466_v23, %v17994_v44  ;;  %v5531_v10 = vadd.f32 %v15339_v34, %v5495_v39  ;;  %v5532_v54 = vadd.f32 %v15339_v34, %v5496_v14  ;;  %5560 = vst [vmem:[#allocation2 + $0xa8] sm:$0xff] %v15467_v18 }
 0x87c   : > { %v12541_v33 = vpop.eup %12540  ;;  %v5245_v62 = vmul.f32 0.5, %v17967_v9  ;;  %v5469_v45 = vadd.f32 1.0, %v12539_v58  ;;  %v5499_v19 = vmul.f32 %v5467_v8, %v17995_v38  ;;  %v5533_v35 = vadd.f32 %v15339_v34, %v5497_v5  ;;  %5561 = vst [vmem:[#allocation2 + $0xb0] sm:$0xff] %v15472_v56  ;;  %v5577_v8 = vld [vmem:[#allocation2 + $0x1f] sm:$0xff]  ;;  %v17997_v5 = vld [vmem:[#allocation20_spill] sm:$0xff] }
 0x87d   : > { %v12543_v52 = vpop.eup %12542  ;;  %v5246_v60 = vmul.f32 0.5, %v17956_v50  ;;  %v5470_v49 = vadd.f32 1.0, %v12541_v33  ;;  %v5500_v55 = vmul.f32 %v5468_v51, %v17996_v37  ;;  %v5534_v2 = vadd.f32 %v15339_v34, %v5498_v1  ;;  %5562 = vst [vmem:[#allocation2 + $0xb8] sm:$0xff] %v5530_v28  ;;  %v17998_v51 = vld [vmem:[#allocation24_spill] sm:$0xff]  ;;  %v18001_v37 = vld [vmem:[#allocation17_spill] sm:$0xff] }
 0x87e   : > { %v12545_v31 = vpop.eup %12544  ;;  %v5247_v11 = vmul.f32 0.5, %v17968_v61  ;;  %v5471_v9 = vadd.f32 1.0, %v12543_v52  ;;  %v5501_v32 = vmul.f32 %v5469_v45, %v5245_v62  ;;  %v5535_v4 = vadd.f32 %v15339_v34, %v5499_v19  ;;  %5563 = vst [vmem:[#allocation2 + $0xc0] sm:$0xff] %v5531_v10  ;;  %v5755_v1 = vld [vmem:[#allocation2 + $0x11] sm:$0xff]  ;;  %v12360_v62 = vld [vmem:[#allocation7 + $0x130] sm:$0xff] }
 0x87f   : > { %v12547_v17 = vpop.eup %12546  ;;  %v5248_v41 = vmul.f32 0.5, %v17938_v16  ;;  %v5472_v59 = vadd.f32 1.0, %v12545_v31  ;;  %v5502_v57 = vmul.f32 %v5470_v49, %v5246_v60  ;;  %v5536_v50 = vadd.f32 %v15339_v34, %v5500_v55  ;;  %5564 = vst [vmem:[#allocation2 + $0xc8] sm:$0xff] %v5532_v54  ;;  %v5576_v16 = vld [vmem:[#allocation2 + $0x17] sm:$0xff]  ;;  %v5578_v45 = vld [vmem:[#allocation2 + $0x27] sm:$0xff]  ;;  %7979 = vmatpush.bf16.msra.mxu0 %v12360_v62  ;;  %v5579_v38 = vld [vmem:[#allocation2 + $0x2f] sm:$0xff] }
 0x880   : > { %v5249_v29 = vmul.f32 0.5, %v17969_v0  ;;  %v5473_v20 = vadd.f32 1.0, %v12547_v17  ;;  %v5503_v39 = vmul.f32 %v5471_v9, %v5247_v11  ;;  %v5537_v53 = vadd.f32 %v15339_v34, %v5501_v32  ;;  %5565 = vst [vmem:[#allocation2 + $0xd0] sm:$0xff] %v5533_v35  ;;  %v17999_v54 = vld [vmem:[#allocation68_spill] sm:$0xff]  ;;  %v5756_v31 = vld [vmem:[#allocation2 + $0x19] sm:$0xff]  ;;  %v5757_v9 = vld [vmem:[#allocation2 + $0x21] sm:$0xff] }
 0x881   : > { %v5504_v61 = vmul.f32 %v5472_v59, %v5248_v41  ;;  %v5538_v23 = vadd.f32 %v15339_v34, %v5502_v57  ;;  %5566 = vst [vmem:[#allocation2 + $0xd8] sm:$0xff] %v5534_v2  ;;  %v5720_v42 = vpack.c.bf16 %v15363_v47, %v15363_v47  ;;  %v5612_v28 = vmul.f32 %v5576_v16, %v17997_v5  ;;  %v18000_v52 = vld [vmem:[#allocation16_spill] sm:$0xff]  ;;  %v18002_v41 = vld [vmem:[#allocation66_spill] sm:$0xff]  ;;  %v18004_v5 = vld [vmem:[#allocation33_spill] sm:$0xff] }
 0x882   : > { %v5505_v24 = vmul.f32 %v5473_v20, %v5249_v29  ;;  %v5539_v14 = vadd.f32 %v15339_v34, %v5503_v39  ;;  %5567 = vst [vmem:[#allocation2 + $0xe0] sm:$0xff] %v5535_v4  ;;  %v5721_v58 = vpack.c.bf16 %v15367_v43, %v15367_v43  ;;  %v5613_v44 = vmul.f32 %v5577_v8, %v17998_v51  ;;  %v11086_v20 = vld [vmem:[#allocation3 + $0x8] sm:$0xf] }
 0x883   : > { %v5540_v36 = vadd.f32 %v15339_v34, %v5504_v61  ;;  %5568 = vst [vmem:[#allocation2 + $0xe8] sm:$0xff] %v5536_v50  ;;  %v5648_v10 = vpack.c.bf16 %v5612_v28, %v5612_v28  ;;  %v5722_v43 = vpack.c.bf16 %v15371_v13, %v15371_v13  ;;  %v5723_v19 = vpack.c.bf16 %v15377_v27, %v15377_v27  ;;  %v18003_v50 = vld [vmem:[#allocation55_spill] sm:$0xff] }
 0x884   : > { %v5541_v0 = vadd.f32 %v15339_v34, %v5505_v24  ;;  %5569 = vst [vmem:[#allocation2 + $0xf0] sm:$0xff] %v5537_v53  ;;  %v5791_v34 = vmul.f32 %v5755_v1, %v17999_v54  ;;  %v5649_v33 = vpack.c.bf16 %v5613_v44, %v5613_v44  ;;  %v5614_v60 = vmul.f32 %v5578_v45, %v18000_v52  ;;  %v5758_v1 = vld [vmem:[#allocation2 + $0x29] sm:$0xff] }
 0x885   : > { %5570 = vst [vmem:[#allocation2 + $0xf8] sm:$0xff] %v5538_v23  ;;  %v5615_v55 = vmul.f32 %v5579_v38, %v18001_v37  ;;  %v5792_v59 = vmul.f32 %v5756_v31, %v18002_v41  ;;  %v5793_v29 = vmul.f32 %v5757_v9, %v18003_v50  ;;  %v5724_v16 = vpack.c.bf16 %v15383_v6, %v15383_v6  ;;  %v18006_v38 = vld [vmem:[#allocation69_spill] sm:$0xff]  ;;  %v5582_v31 = vld [vmem:[#allocation2 + $0x47] sm:$0xff] }
 0x886   : > { %5571 = vst [vmem:[#allocation2 + $0x100] sm:$0xff] %v5539_v14  ;;  %v5827_v47 = vpack.c.bf16 %v5791_v34, %v5791_v34  ;;  %v5650_v13 = vpack.c.bf16 %v5614_v60, %v5614_v60  ;;  %v5580_v14 = vld [vmem:[#allocation2 + $0x37] sm:$0xff]  ;;  %v5726_v9 = vpack.c.bf16 %v15395_v40, %v15395_v40  ;;  %v18009_v50 = vld [vmem:[#allocation38_spill] sm:$0xff] }
 0x887   : > { %5572 = vst [vmem:[#allocation2 + $0x108] sm:$0xff] %v5540_v36  ;;  %v5651_v27 = vpack.c.bf16 %v5615_v55, %v5615_v55  ;;  %v5828_v23 = vpack.c.bf16 %v5792_v59, %v5792_v59  ;;  %v5829_v24 = vpack.c.bf16 %v5793_v29, %v5793_v29  ;;  %v5581_v36 = vld [vmem:[#allocation2 + $0x3f] sm:$0xff]  ;;  %v5616_v28 = vmul.f32 %v5580_v14, %v18004_v5  ;;  %v5759_v34 = vld [vmem:[#allocation2 + $0x31] sm:$0xff] }
 0x888   : > { %5573 = vst [vmem:[#allocation2 + $0x110] sm:$0xff] %v5541_v0 }
 0x889   : > { %5896 = vst [vmem:[#allocation3 + $0x4c] sm:$0xf] %v5720_v42  ;;  %v5652_v6 = vpack.c.bf16 %v5616_v28, %v5616_v28 }
 0x88a   : > { %5897 = vst [vmem:[#allocation3 + $0x70] sm:$0xf] %v5721_v58 }
 0x88b   : > { %5990 = vst [vmem:[#allocation3 + $0x10] sm:$0xf] %v5720_v42  ;;  %v5725_v42 = vpack.c.bf16 %v15389_v15, %v15389_v15 }
 0x88c   : > { %5991 = vst [vmem:[#allocation3 + $0x34] sm:$0xf] %v5721_v58  ;;  %v18005_v58 = vld [vmem:[#allocation29_spill] sm:$0xff] }
 0x88d   : > { %5864 = vst [vmem:[#allocation3 + $0x48] sm:$0xf] %v5648_v10  ;;  %v5617_v51 = vmul.f32 %v5581_v36, %v18005_v58  ;;  %v18010_v36 = vld [vmem:[#allocation71_spill] sm:$0xff] }
 0x88e   : > { %5865 = vst [vmem:[#allocation3 + $0x6c] sm:$0xf] %v5649_v33 }
 0x88f   : > { %5958 = vst [vmem:[#allocation3 + $0xc] sm:$0xf] %v5648_v10  ;;  %v5653_v15 = vpack.c.bf16 %v5617_v51, %v5617_v51 }
 0x890   : > { %v12187_v35 = vld [vmem:[#allocation3 + $0x4c] sm:$0xf]  ;;  %5959 = vst [vmem:[#allocation3 + $0x30] sm:$0xf] %v5649_v33 }
 0x891   : > { %v11116_v49 = vld [vmem:[#allocation3 + $0x6c] sm:$0xf0]  ;;  %5927 = vst [vmem:[#allocation3 + $0x2c] sm:$0xf] %v5827_v47 }
 0x892   : > { %v11119_v2 = vor.u32 %v12187_v35, %v11116_v49  ;;  %5898 = vst [vmem:[#allocation3 + $0x94] sm:$0xf] %v5722_v43  ;;  %v18007_v35 = vld [vmem:[#allocation61_spill] sm:$0xff] }
 0x893   : > { %5899 = vst [vmem:[#allocation3 + $0xb8] sm:$0xf] %v5723_v19  ;;  %v5795_v52 = vmul.f32 %v5759_v34, %v18007_v35 }
 0x894   : > { %7724 = vmatmul.bf16.gmra.mxu2 %v11119_v2  ;;  %v11114_v11 = vld [vmem:[#allocation3 + $0x48] sm:$0xf]  ;;  %5992 = vst [vmem:[#allocation3 + $0x58] sm:$0xf] %v5722_v43 }
 0x895   : > { %v12191_v32 = vld [vmem:[#allocation3 + $0x68] sm:$0xf0]  ;;  %5993 = vst [vmem:[#allocation3 + $0x7c] sm:$0xf] %v5723_v19  ;;  %v5831_v55 = vpack.c.bf16 %v5795_v52, %v5795_v52 }
 0x896   : > { %v11115_v4 = vor.u32 %v12191_v32, %v11114_v11  ;;  %v12179_v17 = vld [vmem:[#allocation3 + $0xc] sm:$0xf]  ;;  %6086 = vst [vmem:[#allocation3 + $0x1c] sm:$0xf] %v5722_v43  ;;  %v5583_v32 = vld [vmem:[#allocation2 + $0x4f] sm:$0xff] }
 0x897   : > { %v11088_v57 = vld [vmem:[#allocation3 + $0x2c] sm:$0xf0]  ;;  %6087 = vst [vmem:[#allocation3 + $0x40] sm:$0xf] %v5723_v19  ;;  %v5794_v19 = vmul.f32 %v5758_v1, %v18006_v38  ;;  %v12359_v2 = vld [vmem:[#allocation7 + $0x128] sm:$0xff]  ;;  %v5619_v29 = vmul.f32 %v5583_v32, %v18009_v50  ;;  %v18013_v38 = vld [vmem:[#allocation19_spill] sm:$0xff] }
 0x898   : > { %7635 = vmatmul.bf16.gmra.mxu0 %v11115_v4  ;;  %v12183_v39 = vld [vmem:[#allocation3 + $0x28] sm:$0xf0]  ;;  %v11091_v53 = vor.u32 %v12179_v17, %v11088_v57  ;;  %5866 = vst [vmem:[#allocation3 + $0x90] sm:$0xf] %v5650_v13  ;;  %v18008_v17 = vld [vmem:[#allocation18_spill] sm:$0xff] }
 0x899   : > { %v11087_v61 = vor.u32 %v12183_v39, %v11086_v20  ;;  %5867 = vst [vmem:[#allocation3 + $0xb4] sm:$0xf] %v5651_v27  ;;  %v12196_v8 = vld [vmem:[#allocation3 + $0x94] sm:$0xf]  ;;  %v5830_v37 = vpack.c.bf16 %v5794_v19, %v5794_v19  ;;  %7980 = vmatpush.bf16.msra.mxu0 %v12359_v2  ;;  %v5618_v41 = vmul.f32 %v5582_v31, %v18008_v17  ;;  %v5760_v20 = vld [vmem:[#allocation2 + $0x39] sm:$0xff] }
 0x89a   : > { %7897 = vmatmul.bf16.vlgmr.msra.gmra.mxu1 %v11091_v53  ;;  %5960 = vst [vmem:[#allocation3 + $0x54] sm:$0xf] %v5650_v13  ;;  %v11152_v0 = vld [vmem:[#allocation3 + $0xb4] sm:$0xf0]  ;;  %v5655_v14 = vpack.c.bf16 %v5619_v29, %v5619_v29  ;;  %v5584_v1 = vld [vmem:[#allocation2 + $0x57] sm:$0xff] }
 0x89b   : > { %7808 = vmatmul.bf16.vlgmr.msrb.gmra.mxu3 %v11087_v61  ;;  %5961 = vst [vmem:[#allocation3 + $0x78] sm:$0xf] %v5651_v27  ;;  %v11155_v44 = vor.u32 %v12196_v8, %v11152_v0  ;;  %v5761_v39 = vld [vmem:[#allocation2 + $0x41] sm:$0xff]  ;;  %v5796_v8 = vmul.f32 %v5760_v20, %v18010_v36  ;;  %v18014_v31 = vld [vmem:[#allocation65_spill] sm:$0xff]  ;;  %v5730_v20 = vpack.c.bf16 %v15419_v22, %v15419_v22 }
 0x89c   : > { %6054 = vst [vmem:[#allocation3 + $0x18] sm:$0xf] %v5650_v13  ;;  %v5586_v50 = vld [vmem:[#allocation2 + $0x67] sm:$0xff]  ;;  %v5764_v22 = vld [vmem:[#allocation2 + $0x59] sm:$0xff] }
 0x89d   : > { %6055 = vst [vmem:[#allocation3 + $0x3c] sm:$0xf] %v5651_v27  ;;  %v5727_v27 = vpack.c.bf16 %v15401_v21, %v15401_v21  ;;  %v5654_v21 = vpack.c.bf16 %v5618_v41, %v5618_v41  ;;  %v5832_v28 = vpack.c.bf16 %v5796_v8, %v5796_v8  ;;  %v12358_v41 = vld [vmem:[#allocation7 + $0x120] sm:$0xff] }
 0x89e   : > { %5928 = vst [vmem:[#allocation3 + $0x50] sm:$0xf] %v5828_v23  ;;  %7981 = vmatpush.bf16.msra.mxu0 %v12358_v41 }
 0x89f   : > { %5929 = vst [vmem:[#allocation3 + $0x74] sm:$0xf] %v5829_v24  ;;  %v11150_v10 = vld [vmem:[#allocation3 + $0x90] sm:$0xf] }
 0x8a0   : > { %6022 = vst [vmem:[#allocation3 + $0x14] sm:$0xf] %v5828_v23  ;;  %v12200_v54 = vld [vmem:[#allocation3 + $0xb0] sm:$0xf0] }
 0x8a1   : > { %6023 = vst [vmem:[#allocation3 + $0x38] sm:$0xf] %v5829_v24  ;;  %v12188_v33 = vld [vmem:[#allocation3 + $0x54] sm:$0xf]  ;;  %v11151_v47 = vor.u32 %v12200_v54, %v11150_v10  ;;  %v5728_v54 = vpack.c.bf16 %v15407_v7, %v15407_v7  ;;  %v5762_v7 = vld [vmem:[#allocation2 + $0x49] sm:$0xff] }
 0x8a2   : > { %5900 = vst [vmem:[#allocation3 + $0xdc] sm:$0xf] %v5724_v16  ;;  %v11124_v62 = vld [vmem:[#allocation3 + $0x74] sm:$0xf0] }
 0x8a3   : > { %5901 = vst [vmem:[#allocation3 + $0x100] sm:$0xf] %v5725_v42  ;;  %v11127_v60 = vor.u32 %v12188_v33, %v11124_v62  ;;  %v5729_v62 = vpack.c.bf16 %v15413_v3, %v15413_v3  ;;  %v5763_v3 = vld [vmem:[#allocation2 + $0x51] sm:$0xff] }
 0x8a4   : > { %7729 = vmatmul.bf16.gmra.mxu2 %v11155_v44  ;;  %5994 = vst [vmem:[#allocation3 + $0xa0] sm:$0xf] %v5724_v16 }
 0x8a5   : > { %5995 = vst [vmem:[#allocation3 + $0xc4] sm:$0xf] %v5725_v42  ;;  %v11122_v45 = vld [vmem:[#allocation3 + $0x50] sm:$0xf] }
 0x8a6   : > { %v12192_v43 = vld [vmem:[#allocation3 + $0x70] sm:$0xf0]  ;;  %6088 = vst [vmem:[#allocation3 + $0x64] sm:$0xf] %v5724_v16 }
 0x8a7   : > { %6089 = vst [vmem:[#allocation3 + $0x88] sm:$0xf] %v5725_v42  ;;  %v11123_v49 = vor.u32 %v12192_v43, %v11122_v45  ;;  %v18011_v42 = vld [vmem:[#allocation74_spill] sm:$0xff] }
 0x8a8   : > { %7640 = vmatmul.bf16.gmra.mxu0 %v11151_v47  ;;  %5868 = vst [vmem:[#allocation3 + $0xd8] sm:$0xf] %v5652_v6  ;;  %v5797_v5 = vmul.f32 %v5761_v39, %v18011_v42  ;;  %v5587_v39 = vld [vmem:[#allocation2 + $0x6f] sm:$0xff] }
 0x8a9   : > { %5869 = vst [vmem:[#allocation3 + $0xfc] sm:$0xf] %v5653_v15  ;;  %v12205_v11 = vld [vmem:[#allocation3 + $0xdc] sm:$0xf] }
 0x8aa   : > { %7902 = vmatmul.bf16.gmra.mxu1 %v11127_v60  ;;  %5962 = vst [vmem:[#allocation3 + $0x9c] sm:$0xf] %v5652_v6  ;;  %v11188_v13 = vld [vmem:[#allocation3 + $0xfc] sm:$0xf0]  ;;  %v5833_v58 = vpack.c.bf16 %v5797_v5, %v5797_v5  ;;  %v5765_v5 = vld [vmem:[#allocation2 + $0x61] sm:$0xff] }
 0x8ab   : > { %7813 = vmatmul.bf16.gmra.mxu3 %v11123_v49  ;;  %5963 = vst [vmem:[#allocation3 + $0xc0] sm:$0xf] %v5653_v15  ;;  %v11191_v4 = vor.u32 %v12205_v11, %v11188_v13  ;;  %v5798_v11 = vmul.f32 %v5762_v7, %v18014_v31  ;;  %v18015_v13 = vld [vmem:[#allocation75_spill] sm:$0xff]  ;;  %v18020_v7 = vld [vmem:[#allocation21_spill] sm:$0xff] }
 0x8ac   : > { %6056 = vst [vmem:[#allocation3 + $0x60] sm:$0xf] %v5652_v6  ;;  %v5585_v6 = vld [vmem:[#allocation2 + $0x5f] sm:$0xff] }
 0x8ad   : > { %6057 = vst [vmem:[#allocation3 + $0x84] sm:$0xf] %v5653_v15  ;;  %v18012_v15 = vld [vmem:[#allocation35_spill] sm:$0xff]  ;;  %v5621_v19 = vmul.f32 %v5585_v6, %v18013_v38 }
 0x8ae   : > { %5930 = vst [vmem:[#allocation3 + $0x98] sm:$0xf] %v5830_v37  ;;  %v5620_v47 = vmul.f32 %v5584_v1, %v18012_v15  ;;  %v5588_v15 = vld [vmem:[#allocation2 + $0x77] sm:$0xff] }
 0x8af   : > { %5931 = vst [vmem:[#allocation3 + $0xbc] sm:$0xf] %v5831_v55  ;;  %v11186_v59 = vld [vmem:[#allocation3 + $0xd8] sm:$0xf]  ;;  %v5657_v2 = vpack.c.bf16 %v5621_v19, %v5621_v19 }
 0x8b0   : > { %6024 = vst [vmem:[#allocation3 + $0x5c] sm:$0xf] %v5830_v37  ;;  %v12209_v57 = vld [vmem:[#allocation3 + $0xf8] sm:$0xf0] }
 0x8b1   : > { %6025 = vst [vmem:[#allocation3 + $0x80] sm:$0xf] %v5831_v55  ;;  %v12197_v53 = vld [vmem:[#allocation3 + $0x9c] sm:$0xf]  ;;  %v11187_v61 = vor.u32 %v12209_v57, %v11186_v59 }
 0x8b2   : > { %6118 = vst [vmem:[#allocation3 + $0x20] sm:$0xf] %v5830_v37  ;;  %v11160_v40 = vld [vmem:[#allocation3 + $0xbc] sm:$0xf0]  ;;  %v5656_v37 = vpack.c.bf16 %v5620_v47, %v5620_v47 }
 0x8b3   : > { %6119 = vst [vmem:[#allocation3 + $0x44] sm:$0xf] %v5831_v55  ;;  %v11163_v16 = vor.u32 %v12197_v53, %v11160_v40  ;;  %v5731_v40 = vpack.c.bf16 %v15425_v12, %v15425_v12 }
 0x8b4   : > { %7734 = vmatmul.bf16.gmra.mxu2 %v11191_v4  ;;  %5902 = vst [vmem:[#allocation3 + $0x124] sm:$0xf] %v5726_v9 }
 0x8b5   : > { %5903 = vst [vmem:[#allocation3 + $0x148] sm:$0xf] %v5727_v27  ;;  %v11158_v23 = vld [vmem:[#allocation3 + $0x98] sm:$0xf] }
 0x8b6   : > { %v12201_v24 = vld [vmem:[#allocation3 + $0xb8] sm:$0xf0]  ;;  %5996 = vst [vmem:[#allocation3 + $0xe8] sm:$0xf] %v5726_v9 }
 0x8b7   : > { %5997 = vst [vmem:[#allocation3 + $0x10c] sm:$0xf] %v5727_v27  ;;  %v11159_v0 = vor.u32 %v12201_v24, %v11158_v23  ;;  %v18016_v24 = vld [vmem:[#allocation42_spill] sm:$0xff] }
 0x8b8   : > { %7645 = vmatmul.bf16.gmra.mxu0 %v11187_v61  ;;  %6090 = vst [vmem:[#allocation3 + $0xac] sm:$0xf] %v5726_v9  ;;  %v5799_v9 = vmul.f32 %v5763_v3, %v18015_v13 }
 0x8b9   : > { %6091 = vst [vmem:[#allocation3 + $0xd0] sm:$0xf] %v5727_v27  ;;  %v5834_v27 = vpack.c.bf16 %v5798_v11, %v5798_v11  ;;  %v5767_v11 = vld [vmem:[#allocation2 + $0x71] sm:$0xff] }
 0x8ba   : > { %7907 = vmatmul.bf16.gmra.mxu1 %v11163_v16  ;;  %5870 = vst [vmem:[#allocation3 + $0x120] sm:$0xf] %v5654_v21  ;;  %v5835_v17 = vpack.c.bf16 %v5799_v9, %v5799_v9  ;;  %v18022_v9 = vld [vmem:[#allocation78_spill] sm:$0xff] }
 0x8bb   : > { %7818 = vmatmul.bf16.gmra.mxu3 %v11159_v0  ;;  %5871 = vst [vmem:[#allocation3 + $0x144] sm:$0xf] %v5655_v14  ;;  %v12214_v51 = vld [vmem:[#allocation3 + $0x124] sm:$0xf] }
 0x8bc   : > { %5964 = vst [vmem:[#allocation3 + $0xe4] sm:$0xf] %v5654_v21  ;;  %v11224_v44 = vld [vmem:[#allocation3 + $0x144] sm:$0xf0] }
 0x8bd   : > { %5965 = vst [vmem:[#allocation3 + $0x108] sm:$0xf] %v5655_v14  ;;  %v11227_v10 = vor.u32 %v12214_v51, %v11224_v44  ;;  %v18019_v44 = vld [vmem:[#allocation72_spill] sm:$0xff] }
 0x8be   : > { %6058 = vst [vmem:[#allocation3 + $0xa8] sm:$0xf] %v5654_v21  ;;  %v5622_v21 = vmul.f32 %v5586_v50, %v18016_v24  ;;  %v5801_v1 = vmul.f32 %v5765_v5, %v18019_v44 }
 0x8bf   : > { %6059 = vst [vmem:[#allocation3 + $0xcc] sm:$0xf] %v5655_v14  ;;  %v18017_v14 = vld [vmem:[#allocation39_spill] sm:$0xff] }
 0x8c0   : > { %5932 = vst [vmem:[#allocation3 + $0xe0] sm:$0xf] %v5832_v28  ;;  %v5623_v16 = vmul.f32 %v5587_v39, %v18017_v14  ;;  %v5658_v42 = vpack.c.bf16 %v5622_v21, %v5622_v21  ;;  %v5590_v39 = vld [vmem:[#allocation2 + $0x87] sm:$0xff]  ;;  %v5735_v21 = vpack.c.bf16 %v15449_v63, %v15449_v63 }
 0x8c1   : > { %5933 = vst [vmem:[#allocation3 + $0x104] sm:$0xf] %v5833_v58  ;;  %v11222_v34 = vld [vmem:[#allocation3 + $0x120] sm:$0xf] }
 0x8c2   : > { %6026 = vst [vmem:[#allocation3 + $0xa4] sm:$0xf] %v5832_v28  ;;  %v12218_v33 = vld [vmem:[#allocation3 + $0x140] sm:$0xf0] }
 0x8c3   : > { %6027 = vst [vmem:[#allocation3 + $0xc8] sm:$0xf] %v5833_v58  ;;  %v12206_v45 = vld [vmem:[#allocation3 + $0xe4] sm:$0xf]  ;;  %v11223_v35 = vor.u32 %v12218_v33, %v11222_v34  ;;  %v5837_v34 = vpack.c.bf16 %v5801_v1, %v5801_v1  ;;  %v18027_v1 = vld [vmem:[#allocation83_spill] sm:$0xff] }
 0x8c4   : > { %7739 = vmatmul.bf16.gmra.mxu2 %v11227_v10  ;;  %6120 = vst [vmem:[#allocation3 + $0x68] sm:$0xf] %v5832_v28  ;;  %v11196_v43 = vld [vmem:[#allocation3 + $0x104] sm:$0xf0]  ;;  %v5659_v28 = vpack.c.bf16 %v5623_v16, %v5623_v16  ;;  %v18024_v16 = vld [vmem:[#allocation44_spill] sm:$0xff] }
 0x8c5   : > { %6121 = vst [vmem:[#allocation3 + $0x8c] sm:$0xf] %v5833_v58  ;;  %v11199_v49 = vor.u32 %v12206_v45, %v11196_v43  ;;  %v18018_v58 = vld [vmem:[#allocation77_spill] sm:$0xff]  ;;  %v5732_v45 = vpack.c.bf16 %v15431_v46, %v15431_v46  ;;  %v5766_v46 = vld [vmem:[#allocation2 + $0x69] sm:$0xff] }
 0x8c6   : > { %5904 = vst [vmem:[#allocation3 + $0x16c] sm:$0xf] %v5728_v54  ;;  %v5800_v51 = vmul.f32 %v5764_v22, %v18018_v58  ;;  %v5589_v43 = vld [vmem:[#allocation2 + $0x7f] sm:$0xff] }
 0x8c7   : > { %v11194_v52 = vld [vmem:[#allocation3 + $0xe0] sm:$0xf]  ;;  %5905 = vst [vmem:[#allocation3 + $0x190] sm:$0xf] %v5729_v62  ;;  %v18025_v22 = vld [vmem:[#allocation25_spill] sm:$0xff] }
 0x8c8   : > { %7650 = vmatmul.bf16.gmra.mxu0 %v11223_v35  ;;  %v12210_v60 = vld [vmem:[#allocation3 + $0x100] sm:$0xf0]  ;;  %5998 = vst [vmem:[#allocation3 + $0x130] sm:$0xf] %v5728_v54  ;;  %v5836_v6 = vpack.c.bf16 %v5800_v51, %v5800_v51  ;;  %v5733_v35 = vpack.c.bf16 %v15437_v26, %v15437_v26  ;;  %v18026_v51 = vld [vmem:[#allocation81_spill] sm:$0xff] }
 0x8c9   : > { %v11195_v55 = vor.u32 %v12210_v60, %v11194_v52  ;;  %5999 = vst [vmem:[#allocation3 + $0x154] sm:$0xf] %v5729_v62  ;;  %v5624_v60 = vmul.f32 %v5588_v15, %v18020_v7 }
 0x8ca   : > { %7912 = vmatmul.bf16.gmra.mxu1 %v11199_v49  ;;  %6092 = vst [vmem:[#allocation3 + $0xf4] sm:$0xf] %v5728_v54 }
 0x8cb   : > { %7823 = vmatmul.bf16.gmra.mxu3 %v11195_v55  ;;  %6093 = vst [vmem:[#allocation3 + $0x118] sm:$0xf] %v5729_v62  ;;  %v5660_v31 = vpack.c.bf16 %v5624_v60, %v5624_v60  ;;  %v5737_v60 = vpack.c.bf16 %v15461_v48, %v15461_v48 }
 0x8cc   : > { %5872 = vst [vmem:[#allocation3 + $0x168] sm:$0xf] %v5656_v37 }
 0x8cd   : > { %5873 = vst [vmem:[#allocation3 + $0x18c] sm:$0xf] %v5657_v2  ;;  %v12223_v32 = vld [vmem:[#allocation3 + $0x16c] sm:$0xf] }
 0x8ce   : > { %5966 = vst [vmem:[#allocation3 + $0x12c] sm:$0xf] %v5656_v37  ;;  %v11260_v4 = vld [vmem:[#allocation3 + $0x18c] sm:$0xf0] }
 0x8cf   : > { %5967 = vst [vmem:[#allocation3 + $0x150] sm:$0xf] %v5657_v2  ;;  %v11263_v59 = vor.u32 %v12223_v32, %v11260_v4  ;;  %v5802_v32 = vmul.f32 %v5766_v46, %v18022_v9  ;;  %v5771_v9 = vld [vmem:[#allocation2 + $0x91] sm:$0xff] }
 0x8d0   : > { %6060 = vst [vmem:[#allocation3 + $0xf0] sm:$0xf] %v5656_v37  ;;  %v18021_v37 = vld [vmem:[#allocation45_spill] sm:$0xff] }
 0x8d1   : > { %6061 = vst [vmem:[#allocation3 + $0x114] sm:$0xf] %v5657_v2  ;;  %v5625_v3 = vmul.f32 %v5589_v43, %v18021_v37  ;;  %v5592_v43 = vld [vmem:[#allocation2 + $0x97] sm:$0xff] }
 0x8d2   : > { %5934 = vst [vmem:[#allocation3 + $0x128] sm:$0xf] %v5834_v27  ;;  %v18028_v37 = vld [vmem:[#allocation48_spill] sm:$0xff] }
 0x8d3   : > { %v11258_v57 = vld [vmem:[#allocation3 + $0x168] sm:$0xf]  ;;  %5935 = vst [vmem:[#allocation3 + $0x14c] sm:$0xf] %v5835_v17  ;;  %v5661_v26 = vpack.c.bf16 %v5625_v3, %v5625_v3  ;;  %v5628_v3 = vmul.f32 %v5592_v43, %v18028_v37 }
 0x8d4   : > { %7744 = vmatmul.bf16.gmra.mxu2 %v11263_v59  ;;  %v12227_v29 = vld [vmem:[#allocation3 + $0x188] sm:$0xf0]  ;;  %6028 = vst [vmem:[#allocation3 + $0xec] sm:$0xf] %v5834_v27  ;;  %v5838_v59 = vpack.c.bf16 %v5802_v32, %v5802_v32 }
 0x8d5   : > { %6029 = vst [vmem:[#allocation3 + $0x110] sm:$0xf] %v5835_v17  ;;  %v12215_v53 = vld [vmem:[#allocation3 + $0x12c] sm:$0xf]  ;;  %v11259_v61 = vor.u32 %v12227_v29, %v11258_v57  ;;  %v12357_v29 = vld [vmem:[#allocation7 + $0x118] sm:$0xff]  ;;  %v5664_v48 = vpack.c.bf16 %v5628_v3, %v5628_v3 }
 0x8d6   : > { %6122 = vst [vmem:[#allocation3 + $0xb0] sm:$0xf] %v5834_v27  ;;  %v11232_v23 = vld [vmem:[#allocation3 + $0x14c] sm:$0xf0]  ;;  %v18023_v27 = vld [vmem:[#allocation80_spill] sm:$0xff]  ;;  %7982 = vmatpush.bf16.msra.mxu0 %v12357_v29 }
 0x8d7   : > { %6123 = vst [vmem:[#allocation3 + $0xd4] sm:$0xf] %v5835_v17  ;;  %v11235_v36 = vor.u32 %v12215_v53, %v11232_v23  ;;  %v5803_v4 = vmul.f32 %v5767_v11, %v18023_v27 }
 0x8d8   : > { %7655 = vmatmul.bf16.gmra.mxu0 %v11259_v61  ;;  %5906 = vst [vmem:[#allocation3 + $0x1b4] sm:$0xf] %v5730_v20  ;;  %v5591_v61 = vld [vmem:[#allocation2 + $0x8f] sm:$0xff] }
 0x8d9   : > { %v11230_v8 = vld [vmem:[#allocation3 + $0x128] sm:$0xf]  ;;  %5907 = vst [vmem:[#allocation3 + $0x1d8] sm:$0xf] %v5731_v40  ;;  %v5839_v50 = vpack.c.bf16 %v5803_v4, %v5803_v4  ;;  %v18030_v4 = vld [vmem:[#allocation87_spill] sm:$0xff] }
 0x8da   : > { %v12219_v0 = vld [vmem:[#allocation3 + $0x148] sm:$0xf0]  ;;  %7917 = vmatmul.bf16.gmra.mxu1 %v11235_v36  ;;  %6000 = vst [vmem:[#allocation3 + $0x178] sm:$0xf] %v5730_v20  ;;  %v5626_v36 = vmul.f32 %v5590_v39, %v18024_v16 }
 0x8db   : > { %v11231_v12 = vor.u32 %v12219_v0, %v11230_v8  ;;  %6001 = vst [vmem:[#allocation3 + $0x19c] sm:$0xf] %v5731_v40  ;;  %v5627_v0 = vmul.f32 %v5591_v61, %v18025_v22 }
 0x8dc   : > { %6094 = vst [vmem:[#allocation3 + $0x13c] sm:$0xf] %v5730_v20 }
 0x8dd   : > { %7828 = vmatmul.bf16.gmra.mxu3 %v11231_v12  ;;  %6095 = vst [vmem:[#allocation3 + $0x160] sm:$0xf] %v5731_v40  ;;  %v5734_v40 = vpack.c.bf16 %v15443_v30, %v15443_v30  ;;  %v5768_v30 = vld [vmem:[#allocation2 + $0x79] sm:$0xff]  ;;  %v5662_v12 = vpack.c.bf16 %v5626_v36, %v5626_v36  ;;  %v5663_v63 = vpack.c.bf16 %v5627_v0, %v5627_v0 }
 0x8de   : > { %5874 = vst [vmem:[#allocation3 + $0x1b0] sm:$0xf] %v5658_v42  ;;  %v5804_v44 = vmul.f32 %v5768_v30, %v18026_v51  ;;  %v5738_v36 = vpack.c.bf16 %v15467_v18, %v15467_v18 }
 0x8df   : > { %v12232_v10 = vld [vmem:[#allocation3 + $0x1b4] sm:$0xf]  ;;  %5875 = vst [vmem:[#allocation3 + $0x1d4] sm:$0xf] %v5659_v28 }
 0x8e0   : > { %v11296_v54 = vld [vmem:[#allocation3 + $0x1d4] sm:$0xf0]  ;;  %5968 = vst [vmem:[#allocation3 + $0x174] sm:$0xf] %v5658_v42 }
 0x8e1   : > { %5969 = vst [vmem:[#allocation3 + $0x198] sm:$0xf] %v5659_v28  ;;  %v11299_v33 = vor.u32 %v12232_v10, %v11296_v54  ;;  %v15560_v54 = vpop.f32.mrf.mxu0 }
 0x8e2   : > { %6062 = vst [vmem:[#allocation3 + $0x138] sm:$0xf] %v5658_v42 }
 0x8e3   : > { %6063 = vst [vmem:[#allocation3 + $0x15c] sm:$0xf] %v5659_v28  ;;  %v5769_v28 = vld [vmem:[#allocation2 + $0x81] sm:$0xff] }
 0x8e4   : > { %7749 = vmatmul.bf16.gmra.mxu2 %v11299_v33  ;;  %5936 = vst [vmem:[#allocation3 + $0x170] sm:$0xf] %v5836_v6  ;;  %v5805_v10 = vmul.f32 %v5769_v28, %v18027_v1  ;;  %v5840_v33 = vpack.c.bf16 %v5804_v44, %v5804_v44  ;;  %v18033_v1 = vld [vmem:[#allocation51_spill] sm:$0xff] }
 0x8e5   : > { %v11294_v62 = vld [vmem:[#allocation3 + $0x1b0] sm:$0xf]  ;;  %5937 = vst [vmem:[#allocation3 + $0x194] sm:$0xf] %v5837_v34 }
 0x8e6   : > { %v12236_v47 = vld [vmem:[#allocation3 + $0x1d0] sm:$0xf0]  ;;  %6030 = vst [vmem:[#allocation3 + $0x134] sm:$0xf] %v5836_v6 }
 0x8e7   : > { %v11295_v38 = vor.u32 %v12236_v47, %v11294_v62  ;;  %6031 = vst [vmem:[#allocation3 + $0x158] sm:$0xf] %v5837_v34  ;;  %v12224_v19 = vld [vmem:[#allocation3 + $0x174] sm:$0xf]  ;;  %v15562_v62 = vpop.f32.mrf.mxu2  ;;  %v5841_v47 = vpack.c.bf16 %v5805_v10, %v5805_v10 }
 0x8e8   : > { %6124 = vst [vmem:[#allocation3 + $0xf8] sm:$0xf] %v5836_v6  ;;  %v11268_v52 = vld [vmem:[#allocation3 + $0x194] sm:$0xf0]  ;;  %v7721_v22 = vadd.f32 %v15562_v62, %v15560_v54 }
 0x8e9   : > { %7660 = vmatmul.bf16.gmra.mxu0 %v11295_v38  ;;  %6125 = vst [vmem:[#allocation3 + $0x11c] sm:$0xf] %v5837_v34  ;;  %v11271_v49 = vor.u32 %v12224_v19, %v11268_v52  ;;  %v5736_v19 = vpack.c.bf16 %v15455_v25, %v15455_v25  ;;  %v5773_v62 = vld [vmem:[#allocation2 + $0xa1] sm:$0xff] }
 0x8ea   : > { %5908 = vst [vmem:[#allocation3 + $0x1fc] sm:$0xf] %v5732_v45 }
 0x8eb   : > { %v11266_v55 = vld [vmem:[#allocation3 + $0x170] sm:$0xf]  ;;  %7922 = vmatmul.bf16.gmra.mxu1 %v11271_v49  ;;  %5909 = vst [vmem:[#allocation3 + $0x220] sm:$0xf] %v5733_v35 }
 0x8ec   : > { %v12228_v2 = vld [vmem:[#allocation3 + $0x190] sm:$0xf0]  ;;  %6002 = vst [vmem:[#allocation3 + $0x1c0] sm:$0xf] %v5732_v45 }
 0x8ed   : > { %v11267_v13 = vor.u32 %v12228_v2, %v11266_v55  ;;  %6003 = vst [vmem:[#allocation3 + $0x1e4] sm:$0xf] %v5733_v35  ;;  %v15569_v55 = vpop.f32.mrf.mxu0  ;;  %v18029_v2 = vld [vmem:[#allocation47_spill] sm:$0xff] }
 0x8ee   : > { %6096 = vst [vmem:[#allocation3 + $0x184] sm:$0xf] %v5732_v45 }
 0x8ef   : > { %7833 = vmatmul.bf16.gmra.mxu3 %v11267_v13  ;;  %6097 = vst [vmem:[#allocation3 + $0x1a8] sm:$0xf] %v5733_v35  ;;  %v5593_v35 = vld [vmem:[#allocation2 + $0x9f] sm:$0xff]  ;;  %v15572_v25 = vpop.f32.mrf.mxu2  ;;  %v5770_v13 = vld [vmem:[#allocation2 + $0x89] sm:$0xff] }
 0x8f0   : > { %5876 = vst [vmem:[#allocation3 + $0x1f8] sm:$0xf] %v5660_v31 }
 0x8f1   : > { %v12241_v17 = vld [vmem:[#allocation3 + $0x1fc] sm:$0xf]  ;;  %5877 = vst [vmem:[#allocation3 + $0x21c] sm:$0xf] %v5661_v26 }
 0x8f2   : > { %v11332_v41 = vld [vmem:[#allocation3 + $0x21c] sm:$0xf0]  ;;  %5970 = vst [vmem:[#allocation3 + $0x1bc] sm:$0xf] %v5660_v31 }
 0x8f3   : > { %v11335_v57 = vor.u32 %v12241_v17, %v11332_v41  ;;  %5971 = vst [vmem:[#allocation3 + $0x1e0] sm:$0xf] %v5661_v26  ;;  %v5806_v17 = vmul.f32 %v5770_v13, %v18030_v4  ;;  %v18031_v41 = vld [vmem:[#allocation84_spill] sm:$0xff]  ;;  %v5705_v13 = vld [vmem:[#allocation2 + $0xc0] sm:$0xff] }
 0x8f4   : > { %6064 = vst [vmem:[#allocation3 + $0x180] sm:$0xf] %v5660_v31  ;;  %v5629_v31 = vmul.f32 %v5593_v35, %v18029_v2 }
 0x8f5   : > { %7754 = vmatmul.bf16.gmra.mxu2 %v11335_v57  ;;  %6065 = vst [vmem:[#allocation3 + $0x1a4] sm:$0xf] %v5661_v26 }
 0x8f6   : > { %5938 = vst [vmem:[#allocation3 + $0x1b8] sm:$0xf] %v5838_v59  ;;  %v5665_v27 = vpack.c.bf16 %v5629_v31, %v5629_v31 }
 0x8f7   : > { %v11330_v20 = vld [vmem:[#allocation3 + $0x1f8] sm:$0xf]  ;;  %5939 = vst [vmem:[#allocation3 + $0x1dc] sm:$0xf] %v5839_v50 }
 0x8f8   : > { %v12245_v53 = vld [vmem:[#allocation3 + $0x218] sm:$0xf0]  ;;  %6032 = vst [vmem:[#allocation3 + $0x17c] sm:$0xf] %v5838_v59 }
 0x8f9   : > { %v11331_v23 = vor.u32 %v12245_v53, %v11330_v20  ;;  %6033 = vst [vmem:[#allocation3 + $0x1a0] sm:$0xf] %v5839_v50  ;;  %v12233_v24 = vld [vmem:[#allocation3 + $0x1bc] sm:$0xf]  ;;  %v5842_v20 = vpack.c.bf16 %v5806_v17, %v5806_v17  ;;  %v5597_v17 = vld [vmem:[#allocation2 + $0xbf] sm:$0xff] }
 0x8fa   : > { %6126 = vst [vmem:[#allocation3 + $0x140] sm:$0xf] %v5838_v59  ;;  %v11304_v14 = vld [vmem:[#allocation3 + $0x1dc] sm:$0xf0]  ;;  %v5807_v59 = vmul.f32 %v5771_v9, %v18031_v41  ;;  %v5596_v9 = vld [vmem:[#allocation2 + $0xb7] sm:$0xff] }
 0x8fb   : > { %7665 = vmatmul.bf16.gmra.mxu0 %v11331_v23  ;;  %6127 = vst [vmem:[#allocation3 + $0x164] sm:$0xf] %v5839_v50  ;;  %v11307_v8 = vor.u32 %v12233_v24, %v11304_v14  ;;  %v12356_v23 = vld [vmem:[#allocation7 + $0x110] sm:$0xff] }
 0x8fc   : > { %5910 = vst [vmem:[#allocation3 + $0x244] sm:$0xf] %v5734_v40  ;;  %7983 = vmatpush.bf16.msra.mxu0 %v12356_v23  ;;  %v5594_v14 = vld [vmem:[#allocation2 + $0xa7] sm:$0xff] }
 0x8fd   : > { %v11302_v42 = vld [vmem:[#allocation3 + $0x1b8] sm:$0xf]  ;;  %7927 = vmatmul.bf16.gmra.mxu1 %v11307_v8  ;;  %5911 = vst [vmem:[#allocation3 + $0x268] sm:$0xf] %v5735_v21  ;;  %v5595_v8 = vld [vmem:[#allocation2 + $0xaf] sm:$0xff]  ;;  %v18037_v23 = vld [vmem:[#allocation34_spill] sm:$0xff] }
 0x8fe   : > { %v12237_v5 = vld [vmem:[#allocation3 + $0x1d8] sm:$0xf0]  ;;  %6004 = vst [vmem:[#allocation3 + $0x208] sm:$0xf] %v5734_v40  ;;  %v5631_v10 = vmul.f32 %v5595_v8, %v18033_v1  ;;  %v5775_v8 = vld [vmem:[#allocation2 + $0xb1] sm:$0xff] }
 0x8ff   : > { %v11303_v58 = vor.u32 %v12237_v5, %v11302_v42  ;;  %6005 = vst [vmem:[#allocation3 + $0x22c] sm:$0xf] %v5735_v21  ;;  %v5739_v5 = vpack.c.bf16 %v15472_v56, %v15472_v56  ;;  %v5772_v56 = vld [vmem:[#allocation2 + $0x99] sm:$0xff] }
 0x900   : > { %6098 = vst [vmem:[#allocation3 + $0x1cc] sm:$0xf] %v5734_v40  ;;  %v5843_v40 = vpack.c.bf16 %v5807_v59, %v5807_v59 }
 0x901   : > { %7838 = vmatmul.bf16.gmra.mxu3 %v11303_v58  ;;  %6099 = vst [vmem:[#allocation3 + $0x1f0] sm:$0xf] %v5735_v21  ;;  %v18032_v58 = vld [vmem:[#allocation28_spill] sm:$0xff] }
 0x902   : > { %5878 = vst [vmem:[#allocation3 + $0x240] sm:$0xf] %v5662_v12 }
 0x903   : > { %v12250_v6 = vld [vmem:[#allocation3 + $0x244] sm:$0xf]  ;;  %5879 = vst [vmem:[#allocation3 + $0x264] sm:$0xf] %v5663_v63 }
 0x904   : > { %v11368_v34 = vld [vmem:[#allocation3 + $0x264] sm:$0xf0]  ;;  %5972 = vst [vmem:[#allocation3 + $0x204] sm:$0xf] %v5662_v12 }
 0x905   : > { %v11371_v15 = vor.u32 %v12250_v6, %v11368_v34  ;;  %5973 = vst [vmem:[#allocation3 + $0x228] sm:$0xf] %v5663_v63 }
 0x906   : > { %6066 = vst [vmem:[#allocation3 + $0x1c8] sm:$0xf] %v5662_v12 }
 0x907   : > { %7759 = vmatmul.bf16.gmra.mxu2 %v11371_v15  ;;  %6067 = vst [vmem:[#allocation3 + $0x1ec] sm:$0xf] %v5663_v63  ;;  %v5630_v63 = vmul.f32 %v5594_v14, %v18032_v58 }
 0x908   : > { %5940 = vst [vmem:[#allocation3 + $0x200] sm:$0xf] %v5840_v33 }
 0x909   : > { %v11366_v45 = vld [vmem:[#allocation3 + $0x240] sm:$0xf]  ;;  %5941 = vst [vmem:[#allocation3 + $0x224] sm:$0xf] %v5841_v47 }
 0x90a   : > { %v12254_v38 = vld [vmem:[#allocation3 + $0x260] sm:$0xf0]  ;;  %6034 = vst [vmem:[#allocation3 + $0x1c4] sm:$0xf] %v5840_v33 }
 0x90b   : > { %v11367_v52 = vor.u32 %v12254_v38, %v11366_v45  ;;  %6035 = vst [vmem:[#allocation3 + $0x1e8] sm:$0xf] %v5841_v47  ;;  %v12242_v7 = vld [vmem:[#allocation3 + $0x204] sm:$0xf]  ;;  %v18034_v45 = vld [vmem:[#allocation86_spill] sm:$0xff] }
 0x90c   : > { %6128 = vst [vmem:[#allocation3 + $0x188] sm:$0xf] %v5840_v33  ;;  %v11340_v49 = vld [vmem:[#allocation3 + $0x224] sm:$0xf0]  ;;  %v5666_v33 = vpack.c.bf16 %v5630_v63, %v5630_v63  ;;  %v5808_v43 = vmul.f32 %v5772_v56, %v18034_v45  ;;  %v18039_v63 = vld [vmem:[#allocation90_spill] sm:$0xff]  ;;  %v5706_v45 = vld [vmem:[#allocation2 + $0xc8] sm:$0xff] }
 0x90d   : > { %7670 = vmatmul.bf16.gmra.mxu0 %v11367_v52  ;;  %6129 = vst [vmem:[#allocation3 + $0x1ac] sm:$0xf] %v5841_v47  ;;  %v11343_v46 = vor.u32 %v12242_v7, %v11340_v49  ;;  %v5667_v47 = vpack.c.bf16 %v5631_v10, %v5631_v10 }
 0x90e   : > { %5912 = vst [vmem:[#allocation3 + $0x28c] sm:$0xf] %v5736_v19  ;;  %v5844_v37 = vpack.c.bf16 %v5808_v43, %v5808_v43 }
 0x90f   : > { %v11338_v11 = vld [vmem:[#allocation3 + $0x200] sm:$0xf]  ;;  %7932 = vmatmul.bf16.gmra.mxu1 %v11343_v46  ;;  %5913 = vst [vmem:[#allocation3 + $0x2b0] sm:$0xf] %v5737_v60 }
 0x910   : > { %v12246_v26 = vld [vmem:[#allocation3 + $0x220] sm:$0xf0]  ;;  %6006 = vst [vmem:[#allocation3 + $0x250] sm:$0xf] %v5736_v19 }
 0x911   : > { %v11339_v32 = vor.u32 %v12246_v26, %v11338_v11  ;;  %6007 = vst [vmem:[#allocation3 + $0x274] sm:$0xf] %v5737_v60  ;;  %v5704_v11 = vld [vmem:[#allocation2 + $0xb8] sm:$0xff] }
 0x912   : > { %6100 = vst [vmem:[#allocation3 + $0x214] sm:$0xf] %v5736_v19  ;;  %v18035_v19 = vld [vmem:[#allocation91_spill] sm:$0xff]  ;;  %v5740_v4 = vpack.c.bf16 %v5704_v11, %v5704_v11 }
 0x913   : > { %7843 = vmatmul.bf16.gmra.mxu3 %v11339_v32  ;;  %6101 = vst [vmem:[#allocation3 + $0x238] sm:$0xf] %v5737_v60  ;;  %v5809_v35 = vmul.f32 %v5773_v62, %v18035_v19 }
 0x914   : > { %5880 = vst [vmem:[#allocation3 + $0x288] sm:$0xf] %v5664_v48 }
 0x915   : > { %v7636_v57 = vpop.f32.mrf.mxu0  ;;  %v12259_v50 = vld [vmem:[#allocation3 + $0x28c] sm:$0xf]  ;;  %5881 = vst [vmem:[#allocation3 + $0x2ac] sm:$0xf] %v5665_v27  ;;  %v5845_v2 = vpack.c.bf16 %v5809_v35, %v5809_v35 }
 0x916   : > { %v11404_v29 = vld [vmem:[#allocation3 + $0x2ac] sm:$0xf0]  ;;  %5974 = vst [vmem:[#allocation3 + $0x24c] sm:$0xf] %v5664_v48 }
 0x917   : > { %v15576_v39 = vpop.f32.mrf.mxu1  ;;  %v11407_v53 = vor.u32 %v12259_v50, %v11404_v29  ;;  %5975 = vst [vmem:[#allocation3 + $0x270] sm:$0xf] %v5665_v27  ;;  %v7725_v61 = vpop.f32.mrf.mxu2  ;;  %v5741_v29 = vpack.c.bf16 %v5705_v13, %v5705_v13 }
 0x918   : > { %6068 = vst [vmem:[#allocation3 + $0x210] sm:$0xf] %v5664_v48  ;;  %v15578_v24 = vadd.f32 %v7725_v61, %v7636_v57 }
 0x919   : > { %7764 = vmatmul.bf16.gmra.mxu2 %v11407_v53  ;;  %6069 = vst [vmem:[#allocation3 + $0x234] sm:$0xf] %v5665_v27  ;;  %v18036_v53 = vld [vmem:[#allocation50_spill] sm:$0xff] }
 0x91a   : > { %5942 = vst [vmem:[#allocation3 + $0x248] sm:$0xf] %v5842_v20 }
 0x91b   : > { %v11402_v21 = vld [vmem:[#allocation3 + $0x288] sm:$0xf]  ;;  %5943 = vst [vmem:[#allocation3 + $0x26c] sm:$0xf] %v5843_v40 }
 0x91c   : > { %v12263_v16 = vld [vmem:[#allocation3 + $0x2a8] sm:$0xf0]  ;;  %6036 = vst [vmem:[#allocation3 + $0x20c] sm:$0xf] %v5842_v20 }
 0x91d   : > { %v11403_v0 = vor.u32 %v12263_v16, %v11402_v21  ;;  %6037 = vst [vmem:[#allocation3 + $0x230] sm:$0xf] %v5843_v40  ;;  %v12251_v42 = vld [vmem:[#allocation3 + $0x24c] sm:$0xf]  ;;  %v15584_v30 = vpop.f32.mrf.mxu0  ;;  %v5633_v21 = vmul.f32 %v5597_v17, %v18037_v23  ;;  %v5774_v16 = vld [vmem:[#allocation2 + $0xa9] sm:$0xff] }
 0x91e   : > { %6130 = vst [vmem:[#allocation3 + $0x1d0] sm:$0xf] %v5842_v20  ;;  %v11376_v12 = vld [vmem:[#allocation3 + $0x26c] sm:$0xf0]  ;;  %v7809_v28 = vpop.f32.mrf.mxu3 }
 0x91f   : > { %7675 = vmatmul.bf16.gmra.mxu0 %v11403_v0  ;;  %6131 = vst [vmem:[#allocation3 + $0x1f4] sm:$0xf] %v5843_v40  ;;  %v11379_v18 = vor.u32 %v12251_v42, %v11376_v12  ;;  %v15589_v51 = vadd.f32 %v7809_v28, %v7721_v22  ;;  %v15591_v44 = vpop.f32.mrf.mxu2  ;;  %v15594_v6 = vpop.f32.mrf.mxu1  ;;  %v5632_v40 = vmul.f32 %v5596_v9, %v18036_v53  ;;  %v18038_v28 = vld [vmem:[#allocation88_spill] sm:$0xff] }
 0x920   : > { %5914 = vst [vmem:[#allocation3 + $0x2d4] sm:$0xf] %v5738_v36  ;;  %v5810_v58 = vmul.f32 %v5774_v16, %v18038_v28  ;;  %v18042_v16 = vld [vmem:[#allocation95_spill] sm:$0xff] }
 0x921   : > { %v11374_v54 = vld [vmem:[#allocation3 + $0x248] sm:$0xf]  ;;  %7937 = vmatmul.bf16.gmra.mxu1 %v11379_v18  ;;  %5915 = vst [vmem:[#allocation3 + $0x2f8] sm:$0xf] %v5739_v5  ;;  %v5811_v18 = vmul.f32 %v5775_v8, %v18039_v63 }
 0x922   : > { %v12255_v34 = vld [vmem:[#allocation3 + $0x268] sm:$0xf0]  ;;  %6008 = vst [vmem:[#allocation3 + $0x298] sm:$0xf] %v5738_v36 }
 0x923   : > { %v11375_v15 = vor.u32 %v12255_v34, %v11374_v54  ;;  %6009 = vst [vmem:[#allocation3 + $0x2bc] sm:$0xf] %v5739_v5  ;;  %v5846_v34 = vpack.c.bf16 %v5810_v58, %v5810_v58  ;;  %v5847_v62 = vpack.c.bf16 %v5811_v18, %v5811_v18 }
 0x924   : > { %6102 = vst [vmem:[#allocation3 + $0x25c] sm:$0xf] %v5738_v36 }
 0x925   : > { %7848 = vmatmul.bf16.gmra.mxu3 %v11375_v15  ;;  %v7641_v38 = vpop.f32.mrf.mxu0  ;;  %6103 = vst [vmem:[#allocation3 + $0x280] sm:$0xf] %v5739_v5  ;;  %v5669_v5 = vpack.c.bf16 %v5633_v21, %v5633_v21  ;;  %v12355_v15 = vld [vmem:[#allocation7 + $0x108] sm:$0xff] }
 0x926   : > { %v15598_v52 = vpop.f32.mrf.mxu3  ;;  %5882 = vst [vmem:[#allocation3 + $0x2d0] sm:$0xf] %v5666_v33  ;;  %7984 = vmatpush.bf16.msra.mxu0 %v12355_v15 }
 0x927   : > { %v12268_v7 = vld [vmem:[#allocation3 + $0x2d4] sm:$0xf]  ;;  %5883 = vst [vmem:[#allocation3 + $0x2f4] sm:$0xf] %v5667_v47  ;;  %v7730_v60 = vpop.f32.mrf.mxu2  ;;  %v15602_v31 = vpop.f32.mrf.mxu1 }
 0x928   : > { %v11440_v49 = vld [vmem:[#allocation3 + $0x2f4] sm:$0xf0]  ;;  %5976 = vst [vmem:[#allocation3 + $0x294] sm:$0xf] %v5666_v33  ;;  %v15600_v3 = vadd.f32 %v7730_v60, %v7641_v38  ;;  %v5707_v38 = vld [vmem:[#allocation2 + $0xd0] sm:$0xff] }
 0x929   : > { %v11443_v46 = vor.u32 %v12268_v7, %v11440_v49  ;;  %5977 = vst [vmem:[#allocation3 + $0x2b8] sm:$0xf] %v5667_v47  ;;  %v5598_v49 = vld [vmem:[#allocation2 + $0xc7] sm:$0xff] }
 0x92a   : > { %6070 = vst [vmem:[#allocation3 + $0x258] sm:$0xf] %v5666_v33 }
 0x92b   : > { %7769 = vmatmul.bf16.gmra.mxu2 %v11443_v46  ;;  %6071 = vst [vmem:[#allocation3 + $0x27c] sm:$0xf] %v5667_v47  ;;  %v5742_v46 = vpack.c.bf16 %v5706_v45, %v5706_v45  ;;  %v5600_v45 = vld [vmem:[#allocation2 + $0xd7] sm:$0xff] }
 0x92c   : > { %5944 = vst [vmem:[#allocation3 + $0x290] sm:$0xf] %v5844_v37 }
 0x92d   : > { %v11438_v26 = vld [vmem:[#allocation3 + $0x2d0] sm:$0xf]  ;;  %5945 = vst [vmem:[#allocation3 + $0x2b4] sm:$0xf] %v5845_v2  ;;  %v15604_v48 = vpop.f32.mrf.mxu0 }
 0x92e   : > { %v12272_v32 = vld [vmem:[#allocation3 + $0x2f0] sm:$0xf0]  ;;  %6038 = vst [vmem:[#allocation3 + $0x254] sm:$0xf] %v5844_v37  ;;  %v7814_v27 = vpop.f32.mrf.mxu3 }
 0x92f   : > { %v11439_v41 = vor.u32 %v12272_v32, %v11438_v26  ;;  %6039 = vst [vmem:[#allocation3 + $0x278] sm:$0xf] %v5845_v2  ;;  %v12260_v59 = vld [vmem:[#allocation3 + $0x294] sm:$0xf]  ;;  %v15607_v57 = vadd.f32 %v7814_v27, %v15578_v24  ;;  %v15609_v50 = vpop.f32.mrf.mxu2  ;;  %v5668_v24 = vpack.c.bf16 %v5632_v40, %v5632_v40  ;;  %v15613_v0 = vpop.f32.mrf.mxu1  ;;  %v5743_v26 = vpack.c.bf16 %v5707_v38, %v5707_v38  ;;  %v18040_v32 = vld [vmem:[#allocation56_spill] sm:$0xff] }
 0x930   : > { %6132 = vst [vmem:[#allocation3 + $0x218] sm:$0xf] %v5844_v37  ;;  %v11412_v20 = vld [vmem:[#allocation3 + $0x2b4] sm:$0xf0]  ;;  %v5634_v27 = vmul.f32 %v5598_v49, %v18040_v32 }
 0x931   : > { %7680 = vmatmul.bf16.gmra.mxu0 %v11439_v41  ;;  %6133 = vst [vmem:[#allocation3 + $0x23c] sm:$0xf] %v5845_v2  ;;  %v11415_v61 = vor.u32 %v12260_v59, %v11412_v20  ;;  %v5599_v2 = vld [vmem:[#allocation2 + $0xcf] sm:$0xff] }
 0x932   : > { %5916 = vst [vmem:[#allocation3 + $0x31c] sm:$0xf] %v5740_v4  ;;  %v5670_v40 = vpack.c.bf16 %v5634_v27, %v5634_v27  ;;  %v18047_v27 = vld [vmem:[#allocation60_spill] sm:$0xff] }
 0x933   : > { %v11410_v14 = vld [vmem:[#allocation3 + $0x290] sm:$0xf]  ;;  %7942 = vmatmul.bf16.gmra.mxu1 %v11415_v61  ;;  %5917 = vst [vmem:[#allocation3 + $0x340] sm:$0xf] %v5741_v29 }
 0x934   : > { %v12264_v36 = vld [vmem:[#allocation3 + $0x2b0] sm:$0xf0]  ;;  %6010 = vst [vmem:[#allocation3 + $0x2e0] sm:$0xf] %v5740_v4 }
 0x935   : > { %v11411_v22 = vor.u32 %v12264_v36, %v11410_v14  ;;  %v7646_v42 = vpop.f32.mrf.mxu0  ;;  %6011 = vst [vmem:[#allocation3 + $0x304] sm:$0xf] %v5741_v29  ;;  %v5777_v61 = vld [vmem:[#allocation2 + $0xc1] sm:$0xff] }
 0x936   : > { %v15615_v12 = vpop.f32.mrf.mxu3  ;;  %6104 = vst [vmem:[#allocation3 + $0x2a4] sm:$0xf] %v5740_v4 }
 0x937   : > { %7853 = vmatmul.bf16.gmra.mxu3 %v11411_v22  ;;  %6105 = vst [vmem:[#allocation3 + $0x2c8] sm:$0xf] %v5741_v29  ;;  %v7735_v1 = vpop.f32.mrf.mxu2  ;;  %v15623_v19 = vpop.f32.mrf.mxu1  ;;  %v5776_v29 = vld [vmem:[#allocation2 + $0xb9] sm:$0xff]  ;;  %v18043_v22 = vld [vmem:[#allocation92_spill] sm:$0xff] }
 0x938   : > { %5884 = vst [vmem:[#allocation3 + $0x318] sm:$0xf] %v5668_v24  ;;  %v15619_v10 = vadd.f32 %v7735_v1, %v7646_v42  ;;  %v5812_v36 = vmul.f32 %v5776_v29, %v18042_v16  ;;  %v5813_v42 = vmul.f32 %v5777_v61, %v18043_v22 }
 0x939   : > { %v12277_v54 = vld [vmem:[#allocation3 + $0x31c] sm:$0xf]  ;;  %5885 = vst [vmem:[#allocation3 + $0x33c] sm:$0xf] %v5669_v5 }
 0x93a   : > { %v11476_v56 = vld [vmem:[#allocation3 + $0x33c] sm:$0xf0]  ;;  %5978 = vst [vmem:[#allocation3 + $0x2dc] sm:$0xf] %v5668_v24  ;;  %v5848_v58 = vpack.c.bf16 %v5812_v36, %v5812_v36  ;;  %v5849_v18 = vpack.c.bf16 %v5813_v42, %v5813_v42  ;;  %v18049_v36 = vld [vmem:[#allocation98_spill] sm:$0xff] }
 0x93b   : > { %v11479_v33 = vor.u32 %v12277_v54, %v11476_v56  ;;  %5979 = vst [vmem:[#allocation3 + $0x300] sm:$0xf] %v5669_v5 }
 0x93c   : > { %6072 = vst [vmem:[#allocation3 + $0x2a0] sm:$0xf] %v5668_v24 }
 0x93d   : > { %7774 = vmatmul.bf16.gmra.mxu2 %v11479_v33  ;;  %6073 = vst [vmem:[#allocation3 + $0x2c4] sm:$0xf] %v5669_v5  ;;  %v15621_v47 = vpop.f32.mrf.mxu0  ;;  %v5708_v33 = vld [vmem:[#allocation2 + $0xd8] sm:$0xff] }
 0x93e   : > { %5946 = vst [vmem:[#allocation3 + $0x2d8] sm:$0xf] %v5846_v34  ;;  %v7819_v43 = vpop.f32.mrf.mxu3  ;;  %v5744_v38 = vpack.c.bf16 %v5708_v33, %v5708_v33 }
 0x93f   : > { %v11474_v35 = vld [vmem:[#allocation3 + $0x318] sm:$0xf]  ;;  %5947 = vst [vmem:[#allocation3 + $0x2fc] sm:$0xf] %v5847_v62  ;;  %v15626_v7 = vadd.f32 %v7819_v43, %v15600_v3  ;;  %v15628_v60 = vpop.f32.mrf.mxu2  ;;  %v18041_v3 = vld [vmem:[#allocation53_spill] sm:$0xff]  ;;  %v15637_v8 = vpop.f32.mrf.mxu1 }
 0x940   : > { %v12281_v37 = vld [vmem:[#allocation3 + $0x338] sm:$0xf0]  ;;  %6040 = vst [vmem:[#allocation3 + $0x29c] sm:$0xf] %v5846_v34  ;;  %v5635_v17 = vmul.f32 %v5599_v2, %v18041_v3 }
 0x941   : > { %v11475_v11 = vor.u32 %v12281_v37, %v11474_v35  ;;  %6041 = vst [vmem:[#allocation3 + $0x2c0] sm:$0xf] %v5847_v62  ;;  %v12269_v13 = vld [vmem:[#allocation3 + $0x2dc] sm:$0xf]  ;;  %v5601_v35 = vld [vmem:[#allocation2 + $0xdf] sm:$0xff] }
 0x942   : > { %6134 = vst [vmem:[#allocation3 + $0x260] sm:$0xf] %v5846_v34  ;;  %v11448_v9 = vld [vmem:[#allocation3 + $0x2fc] sm:$0xf0]  ;;  %v5671_v21 = vpack.c.bf16 %v5635_v17, %v5635_v17 }
 0x943   : > { %7685 = vmatmul.bf16.gmra.mxu0 %v11475_v11  ;;  %6135 = vst [vmem:[#allocation3 + $0x284] sm:$0xf] %v5847_v62  ;;  %v11451_v4 = vor.u32 %v12269_v13, %v11448_v9  ;;  %v5709_v62 = vld [vmem:[#allocation2 + $0xe0] sm:$0xff]  ;;  %v18046_v13 = vld [vmem:[#allocation37_spill] sm:$0xff] }
 0x944   : > { %5918 = vst [vmem:[#allocation3 + $0x364] sm:$0xf] %v5742_v46  ;;  %v5745_v2 = vpack.c.bf16 %v5709_v62, %v5709_v62  ;;  %v12354_v62 = vld [vmem:[#allocation7 + $0x100] sm:$0xff] }
 0x945   : > { %v11446_v41 = vld [vmem:[#allocation3 + $0x2d8] sm:$0xf]  ;;  %7947 = vmatmul.bf16.gmra.mxu1 %v11451_v4  ;;  %v7651_v59 = vpop.f32.mrf.mxu0  ;;  %5919 = vst [vmem:[#allocation3 + $0x388] sm:$0xf] %v5743_v26  ;;  %v5637_v4 = vmul.f32 %v5601_v35, %v18047_v27  ;;  %7985 = vmatpush.bf16.msra.mxu0 %v12354_v62  ;;  %v5711_v35 = vld [vmem:[#allocation2 + $0xf0] sm:$0xff] }
 0x946   : > { %v12273_v20 = vld [vmem:[#allocation3 + $0x2f8] sm:$0xf0]  ;;  %v15632_v53 = vpop.f32.mrf.mxu3  ;;  %6012 = vst [vmem:[#allocation3 + $0x328] sm:$0xf] %v5742_v46  ;;  %v18057_v62 = vld [vmem:[#allocation96_spill] sm:$0xff] }
 0x947   : > { %v11447_v23 = vor.u32 %v12273_v20, %v11446_v41  ;;  %6013 = vst [vmem:[#allocation3 + $0x34c] sm:$0xf] %v5743_v26  ;;  %v7740_v14 = vpop.f32.mrf.mxu2  ;;  %v15647_v49 = vpop.f32.mrf.mxu1  ;;  %v5778_v41 = vld [vmem:[#allocation2 + $0xc9] sm:$0xff] }
 0x948   : > { %6106 = vst [vmem:[#allocation3 + $0x2ec] sm:$0xf] %v5742_v46  ;;  %v15635_v24 = vadd.f32 %v7740_v14, %v7651_v59  ;;  %v18048_v14 = vld [vmem:[#allocation94_spill] sm:$0xff] }
 0x949   : > { %7858 = vmatmul.bf16.gmra.mxu3 %v11447_v23  ;;  %6107 = vst [vmem:[#allocation3 + $0x310] sm:$0xf] %v5743_v26  ;;  %v5636_v26 = vmul.f32 %v5600_v45, %v18046_v13  ;;  %v5814_v16 = vmul.f32 %v5778_v41, %v18048_v14  ;;  %v5603_v13 = vld [vmem:[#allocation2 + $0xef] sm:$0xff] }
 0x94a   : > { %5886 = vst [vmem:[#allocation3 + $0x360] sm:$0xf] %v5670_v40  ;;  %v12366_v41 = vld [vmem:[#allocation7 + $0x160] sm:$0xff] }
 0x94b   : > { %v12286_v5 = vld [vmem:[#allocation3 + $0x364] sm:$0xf]  ;;  %5887 = vst [vmem:[#allocation3 + $0x384] sm:$0xf] %v5671_v21  ;;  %v5672_v20 = vpack.c.bf16 %v5636_v26, %v5636_v26 }
 0x94c   : > { %v11512_v28 = vld [vmem:[#allocation3 + $0x384] sm:$0xf0]  ;;  %5980 = vst [vmem:[#allocation3 + $0x324] sm:$0xf] %v5670_v40 }
 0x94d   : > { %v11515_v63 = vor.u32 %v12286_v5, %v11512_v28  ;;  %5981 = vst [vmem:[#allocation3 + $0x348] sm:$0xf] %v5671_v21  ;;  %v15640_v1 = vpop.f32.mrf.mxu0 }
 0x94e   : > { %18044 = vst [vmem:[#allocation233_spill] sm:$0xff] %v15640_v1  ;;  %v7824_v54 = vpop.f32.mrf.mxu3  ;;  %v18114_v1 = vld [vmem:[#allocation166_spill] sm:$0xff] }
 0x94f   : > { %6074 = vst [vmem:[#allocation3 + $0x2e8] sm:$0xf] %v5670_v40  ;;  %7779 = vmatmul.bf16.gmra.mxu2 %v11515_v63  ;;  %v15643_v56 = vadd.f32 %v7824_v54, %v15619_v10  ;;  %v15645_v34 = vpop.f32.mrf.mxu2  ;;  %v12369_v10 = vld [vmem:[#allocation7 + $0x178] sm:$0xff]  ;;  %v5779_v40 = vld [vmem:[#allocation2 + $0xd1] sm:$0xff]  ;;  %v15657_v42 = vpop.f32.mrf.mxu1  ;;  %v5850_v63 = vpack.c.bf16 %v5814_v16, %v5814_v16 }
 0x950   : > { %6075 = vst [vmem:[#allocation3 + $0x30c] sm:$0xf] %v5671_v21  ;;  %8067 = vmatpush.bf16.msrb.mxu2 %v12369_v10  ;;  %v5673_v21 = vpack.c.bf16 %v5637_v4, %v5637_v4  ;;  %v5815_v22 = vmul.f32 %v5779_v40, %v18049_v36  ;;  %v18053_v4 = vld [vmem:[#allocation58_spill] sm:$0xff] }
 0x951   : > { %18045 = vst [vmem:[#allocation184_spill] sm:$0xff] %v15645_v34  ;;  %v11510_v15 = vld [vmem:[#allocation3 + $0x360] sm:$0xf]  ;;  %v5780_v36 = vld [vmem:[#allocation2 + $0xd9] sm:$0xff] }
 0x952   : > { %5948 = vst [vmem:[#allocation3 + $0x320] sm:$0xf] %v5848_v58  ;;  %v12290_v43 = vld [vmem:[#allocation3 + $0x380] sm:$0xf0]  ;;  %v5851_v54 = vpack.c.bf16 %v5815_v22, %v5815_v22 }
 0x953   : > { %5949 = vst [vmem:[#allocation3 + $0x344] sm:$0xf] %v5849_v18  ;;  %v11511_v37 = vor.u32 %v12290_v43, %v11510_v15  ;;  %v12278_v46 = vld [vmem:[#allocation3 + $0x324] sm:$0xf]  ;;  %v12368_v15 = vld [vmem:[#allocation7 + $0x170] sm:$0xff] }
 0x954   : > { %6042 = vst [vmem:[#allocation3 + $0x2e4] sm:$0xf] %v5848_v58  ;;  %v11484_v11 = vld [vmem:[#allocation3 + $0x344] sm:$0xf0]  ;;  %8068 = vmatpush.bf16.msrb.mxu2 %v12368_v15  ;;  %v5816_v15 = vmul.f32 %v5780_v36, %v18057_v62  ;;  %v18108_v34 = vld [vmem:[#allocation156_spill] sm:$0xff] }
 0x955   : > { %6043 = vst [vmem:[#allocation3 + $0x308] sm:$0xf] %v5849_v18  ;;  %7690 = vmatmul.bf16.gmra.mxu0 %v11511_v37  ;;  %v11487_v9 = vor.u32 %v12278_v46, %v11484_v11  ;;  %v7656_v32 = vpop.f32.mrf.mxu0  ;;  %v12367_v37 = vld [vmem:[#allocation7 + $0x168] sm:$0xff] }
 0x956   : > { %6136 = vst [vmem:[#allocation3 + $0x2a8] sm:$0xf] %v5848_v58  ;;  %v15651_v3 = vpop.f32.mrf.mxu3 }
 0x957   : > { %6137 = vst [vmem:[#allocation3 + $0x2cc] sm:$0xf] %v5849_v18  ;;  %7952 = vmatmul.bf16.gmra.mxu1 %v11487_v9  ;;  %v7745_v59 = vpop.f32.mrf.mxu2 }
 0x958   : > { %5920 = vst [vmem:[#allocation3 + $0x3ac] sm:$0xf] %v5744_v38  ;;  %v15653_v61 = vadd.f32 %v7745_v59, %v7656_v32  ;;  %v5747_v32 = vpack.c.bf16 %v5711_v35, %v5711_v35  ;;  %8069 = vmatpush.bf16.msrb.mxu2 %v12367_v37  ;;  %v15667_v59 = vpop.f32.mrf.mxu1 }
 0x959   : > { %v11482_v17 = vld [vmem:[#allocation3 + $0x320] sm:$0xf]  ;;  %5921 = vst [vmem:[#allocation3 + $0x3d0] sm:$0xf] %v5745_v2 }
 0x95a   : > { %v12282_v29 = vld [vmem:[#allocation3 + $0x340] sm:$0xf0]  ;;  %6014 = vst [vmem:[#allocation3 + $0x370] sm:$0xf] %v5744_v38 }
 0x95b   : > { %v11483_v23 = vor.u32 %v12282_v29, %v11482_v17  ;;  %6015 = vst [vmem:[#allocation3 + $0x394] sm:$0xf] %v5745_v2 }
 0x95c   : > { %6108 = vst [vmem:[#allocation3 + $0x334] sm:$0xf] %v5744_v38  ;;  %v5710_v38 = vld [vmem:[#allocation2 + $0xe8] sm:$0xff]  ;;  %8070 = vmatpush.bf16.msrb.mxu2 %v12366_v41  ;;  %v12376_v41 = vld [vmem:[#allocation7 + $0x1b0] sm:$0xff] }
 0x95d   : > { %7863 = vmatmul.bf16.gmra.mxu3 %v11483_v23  ;;  %6109 = vst [vmem:[#allocation3 + $0x358] sm:$0xf] %v5745_v2  ;;  %v15659_v28 = vpop.f32.mrf.mxu0  ;;  %v5602_v2 = vld [vmem:[#allocation2 + $0xe7] sm:$0xff]  ;;  %v5746_v11 = vpack.c.bf16 %v5710_v38, %v5710_v38 }
 0x95e   : > { %5888 = vst [vmem:[#allocation3 + $0x3a8] sm:$0xf] %v5672_v20  ;;  %v5638_v17 = vmul.f32 %v5602_v2, %v18053_v4 }
 0x95f   : > { %v12295_v5 = vld [vmem:[#allocation3 + $0x3ac] sm:$0xf]  ;;  %5889 = vst [vmem:[#allocation3 + $0x3cc] sm:$0xf] %v5673_v21  ;;  %v15661_v33 = vpop.f32.mrf.mxu2 }
 0x960   : > { %18050 = vst [vmem:[#allocation117_spill] sm:$0xff] %v15659_v28  ;;  %v11548_v58 = vld [vmem:[#allocation3 + $0x3cc] sm:$0xf0]  ;;  %v7829_v45 = vpop.f32.mrf.mxu3  ;;  %v18105_v28 = vld [vmem:[#allocation151_spill] sm:$0xff] }
 0x961   : > { %5982 = vst [vmem:[#allocation3 + $0x36c] sm:$0xf] %v5672_v20  ;;  %v11551_v18 = vor.u32 %v12295_v5, %v11548_v58  ;;  %v15664_v43 = vadd.f32 %v7829_v45, %v15635_v24  ;;  %v5674_v5 = vpack.c.bf16 %v5638_v17, %v5638_v17  ;;  %v5781_v58 = vld [vmem:[#allocation2 + $0xe1] sm:$0xff]  ;;  %v5712_v17 = vld [vmem:[#allocation2 + $0xf8] sm:$0xff] }
 0x962   : > { %5983 = vst [vmem:[#allocation3 + $0x390] sm:$0xf] %v5673_v21  ;;  %v18058_v45 = vld [vmem:[#allocation99_spill] sm:$0xff] }
 0x963   : > { %18051 = vst [vmem:[#allocation198_spill] sm:$0xff] %v15661_v33  ;;  %7784 = vmatmul.bf16.gmra.mxu2 %v11551_v18  ;;  %v5817_v38 = vmul.f32 %v5781_v58, %v18058_v45  ;;  %v18083_v33 = vld [vmem:[#allocation158_spill] sm:$0xff] }
 0x964   : > { %6076 = vst [vmem:[#allocation3 + $0x330] sm:$0xf] %v5672_v20  ;;  %v18055_v20 = vld [vmem:[#allocation41_spill] sm:$0xff] }
 0x965   : > { %6077 = vst [vmem:[#allocation3 + $0x354] sm:$0xf] %v5673_v21  ;;  %v11546_v46 = vld [vmem:[#allocation3 + $0x3a8] sm:$0xf]  ;;  %v5639_v40 = vmul.f32 %v5603_v13, %v18055_v20  ;;  %v15680_v13 = vpop.f32.mrf.mxu1  ;;  %v12384_v20 = vld [vmem:[#allocation7 + $0x1f0] sm:$0xff] }
 0x966   : > { %18052 = vst [vmem:[#allocation196_spill] sm:$0xff] %v15664_v43  ;;  %v12299_v10 = vld [vmem:[#allocation3 + $0x3c8] sm:$0xf0]  ;;  %v7661_v27 = vpop.f32.mrf.mxu0 }
 0x967   : > { %5950 = vst [vmem:[#allocation3 + $0x368] sm:$0xf] %v5850_v63  ;;  %v11547_v26 = vor.u32 %v12299_v10, %v11546_v46  ;;  %v7750_v23 = vpop.f32.mrf.mxu2  ;;  %v5852_v10 = vpack.c.bf16 %v5816_v15, %v5816_v15  ;;  %v18063_v15 = vld [vmem:[#allocation64_spill] sm:$0xff] }
 0x968   : > { %5951 = vst [vmem:[#allocation3 + $0x38c] sm:$0xf] %v5851_v54  ;;  %v12287_v9 = vld [vmem:[#allocation3 + $0x36c] sm:$0xf]  ;;  %v15670_v21 = vpop.f32.mrf.mxu3  ;;  %v15672_v14 = vadd.f32 %v7750_v23, %v7661_v27 }
 0x969   : > { %6044 = vst [vmem:[#allocation3 + $0x32c] sm:$0xf] %v5850_v63  ;;  %v11520_v24 = vld [vmem:[#allocation3 + $0x38c] sm:$0xf0]  ;;  %7695 = vmatmul.bf16.gmra.mxu0 %v11547_v26  ;;  %v5853_v26 = vpack.c.bf16 %v5817_v38, %v5817_v38  ;;  %v5608_v43 = vld [vmem:[#allocation2 + $0x117] sm:$0xff] }
 0x96a   : > { %6045 = vst [vmem:[#allocation3 + $0x350] sm:$0xf] %v5851_v54  ;;  %v11523_v29 = vor.u32 %v12287_v9, %v11520_v24  ;;  %v12377_v9 = vld [vmem:[#allocation7 + $0x1b8] sm:$0xff]  ;;  %v12364_v24 = vld [vmem:[#allocation7 + $0x150] sm:$0xff] }
 0x96b   : > { %6138 = vst [vmem:[#allocation3 + $0x2f0] sm:$0xf] %v5850_v63  ;;  %v12365_v63 = vld [vmem:[#allocation7 + $0x158] sm:$0xff]  ;;  %8156 = vmatpush.bf16.msra.mxu3 %v12377_v9  ;;  %v18064_v9 = vld [vmem:[#allocation62_spill] sm:$0xff] }
 0x96c   : > { %18054 = vst [vmem:[#allocation189_spill] sm:$0xff] %v15667_v59  ;;  %7957 = vmatmul.bf16.gmra.mxu1 %v11523_v29  ;;  %8071 = vmatpush.bf16.msrb.mxu2 %v12365_v63  ;;  %v5713_v29 = vld [vmem:[#allocation2 + $0x100] sm:$0xff] }
 0x96d   : > { %6139 = vst [vmem:[#allocation3 + $0x314] sm:$0xf] %v5851_v54  ;;  %v5675_v54 = vpack.c.bf16 %v5639_v40, %v5639_v40  ;;  %v12363_v40 = vld [vmem:[#allocation7 + $0x148] sm:$0xff]  ;;  %v5749_v63 = vpack.c.bf16 %v5713_v29, %v5713_v29 }
 0x96e   : > { %18056 = vst [vmem:[#allocation119_spill] sm:$0xff] %v15670_v21  ;;  %v11518_v16 = vld [vmem:[#allocation3 + $0x368] sm:$0xf]  ;;  %v15676_v35 = vpop.f32.mrf.mxu0 }
 0x96f   : > { %5922 = vst [vmem:[#allocation3 + $0x3f4] sm:$0xf] %v5746_v11  ;;  %v12291_v22 = vld [vmem:[#allocation3 + $0x388] sm:$0xf0]  ;;  %v15678_v46 = vpop.f32.mrf.mxu2  ;;  %8157 = vmatpush.bf16.msra.mxu3 %v12376_v41  ;;  %v5782_v41 = vld [vmem:[#allocation2 + $0xe9] sm:$0xff]  ;;  %v5783_v29 = vld [vmem:[#allocation2 + $0xf1] sm:$0xff] }
 0x970   : > { %5923 = vst [vmem:[#allocation3 + $0x418] sm:$0xf] %v5747_v32  ;;  %v11519_v18 = vor.u32 %v12291_v22, %v11518_v16  ;;  %8072 = vmatpush.bf16.msrb.mxu2 %v12364_v24  ;;  %v5604_v16 = vld [vmem:[#allocation2 + $0xf7] sm:$0xff]  ;;  %v5748_v22 = vpack.c.bf16 %v5712_v17, %v5712_v17 }
 0x971   : > { %6016 = vst [vmem:[#allocation3 + $0x3b8] sm:$0xf] %v5746_v11  ;;  %v5640_v45 = vmul.f32 %v5604_v16, %v18063_v15 }
 0x972   : > { %6017 = vst [vmem:[#allocation3 + $0x3dc] sm:$0xf] %v5747_v32  ;;  %7868 = vmatmul.bf16.gmra.mxu3 %v11519_v18  ;;  %v7834_v27 = vpop.f32.mrf.mxu3  ;;  %v12375_v18 = vld [vmem:[#allocation7 + $0x1a8] sm:$0xff] }
 0x973   : > { %6110 = vst [vmem:[#allocation3 + $0x37c] sm:$0xf] %v5746_v11  ;;  %v15683_v4 = vadd.f32 %v7834_v27, %v15653_v61  ;;  %8158 = vmatpush.bf16.msra.mxu3 %v12375_v18  ;;  %v18070_v18 = vld [vmem:[#allocation129_spill] sm:$0xff] }
 0x974   : > { %6111 = vst [vmem:[#allocation3 + $0x3a0] sm:$0xf] %v5747_v32  ;;  %v12385_v32 = vld [vmem:[#allocation7 + $0x1f8] sm:$0xff]  ;;  %8073 = vmatpush.bf16.msrb.mxu2 %v12363_v40  ;;  %v5676_v40 = vpack.c.bf16 %v5640_v45, %v5640_v45 }
 0x975   : > { %5890 = vst [vmem:[#allocation3 + $0x3f0] sm:$0xf] %v5674_v5  ;;  %8245 = vmatpush.bf16.msrb.mxu1 %v12385_v32 }
 0x976   : > { %18059 = vst [vmem:[#allocation201_spill] sm:$0xff] %v15676_v35  ;;  %v12304_v37 = vld [vmem:[#allocation3 + $0x3f4] sm:$0xf] }
 0x977   : > { %5891 = vst [vmem:[#allocation3 + $0x414] sm:$0xf] %v5675_v54  ;;  %v11584_v2 = vld [vmem:[#allocation3 + $0x414] sm:$0xf0] }
 0x978   : > { %18060 = vst [vmem:[#allocation138_spill] sm:$0xff] %v15678_v46  ;;  %v11587_v11 = vor.u32 %v12304_v37, %v11584_v2  ;;  %v7666_v62 = vpop.f32.mrf.mxu0  ;;  %v7755_v38 = vpop.f32.mrf.mxu2  ;;  %v12383_v37 = vld [vmem:[#allocation7 + $0x1e8] sm:$0xff]  ;;  %v12362_v2 = vld [vmem:[#allocation7 + $0x140] sm:$0xff] }
 0x979   : > { %5984 = vst [vmem:[#allocation3 + $0x3b4] sm:$0xf] %v5674_v5  ;;  %8246 = vmatpush.bf16.msrb.mxu1 %v12384_v20  ;;  %v15687_v24 = vadd.f32 %v7755_v38, %v7666_v62  ;;  %8074 = vmatpush.bf16.msrb.mxu2 %v12362_v2  ;;  %v5784_v38 = vld [vmem:[#allocation2 + $0xf9] sm:$0xff]  ;;  %v12393_v2 = vld [vmem:[#allocation7 + $0x238] sm:$0xff] }
 0x97a   : > { %18061 = vst [vmem:[#allocation140_spill] sm:$0xff] %v15680_v13  ;;  %7789 = vmatmul.bf16.gmra.mxu2 %v11587_v11  ;;  %v15689_v27 = vpop.f32.mrf.mxu3  ;;  %8334 = vmatpush.bf16.msrb.mxu0 %v12393_v2  ;;  %v18079_v2 = vld [vmem:[#allocation147_spill] sm:$0xff]  ;;  %v18081_v46 = vld [vmem:[#allocation109_spill] sm:$0xff] }
 0x97b   : > { %5985 = vst [vmem:[#allocation3 + $0x3d8] sm:$0xf] %v5675_v54 }
 0x97c   : > { %6078 = vst [vmem:[#allocation3 + $0x378] sm:$0xf] %v5674_v5  ;;  %v11582_v23 = vld [vmem:[#allocation3 + $0x3f0] sm:$0xf] }
 0x97d   : > { %6079 = vst [vmem:[#allocation3 + $0x39c] sm:$0xf] %v5675_v54  ;;  %v5605_v5 = vld [vmem:[#allocation2 + $0xff] sm:$0xff]  ;;  %8247 = vmatpush.bf16.msrb.mxu1 %v12383_v37 }
 0x97e   : > { %18062 = vst [vmem:[#allocation144_spill] sm:$0xff] %v15683_v4  ;;  %v12308_v36 = vld [vmem:[#allocation3 + $0x410] sm:$0xf0]  ;;  %v5641_v32 = vmul.f32 %v5605_v5, %v18064_v9  ;;  %v18067_v5 = vld [vmem:[#allocation123_spill] sm:$0xff]  ;;  %v5715_v4 = vld [vmem:[#allocation2 + $0x110] sm:$0xff] }
 0x97f   : > { %5952 = vst [vmem:[#allocation3 + $0x3b0] sm:$0xf] %v5852_v10  ;;  %v11583_v58 = vor.u32 %v12308_v36, %v11582_v23  ;;  %v12382_v23 = vld [vmem:[#allocation7 + $0x1e0] sm:$0xff]  ;;  %8461 = vmatpush.msra.mxu2 %v18067_v5 }
 0x980   : > { %5953 = vst [vmem:[#allocation3 + $0x3d4] sm:$0xf] %v5853_v26  ;;  %v12296_v61 = vld [vmem:[#allocation3 + $0x3b4] sm:$0xf]  ;;  %v5677_v36 = vpack.c.bf16 %v5641_v32, %v5641_v32  ;;  %v15697_v15 = vpop.f32.mrf.mxu0  ;;  %v15699_v45 = vpop.f32.mrf.mxu2 }
 0x981   : > { %6046 = vst [vmem:[#allocation3 + $0x374] sm:$0xf] %v5852_v10  ;;  %7700 = vmatmul.bf16.gmra.mxu0 %v11583_v58  ;;  %v18068_v58 = vld [vmem:[#allocation105_spill] sm:$0xff]  ;;  %8463 = vmatpush.msra.mxu2 %v18070_v18  ;;  %v5785_v32 = vld [vmem:[#allocation2 + $0x101] sm:$0xff] }
 0x982   : > { %6047 = vst [vmem:[#allocation3 + $0x398] sm:$0xf] %v5853_v26  ;;  %v11556_v54 = vld [vmem:[#allocation3 + $0x3d4] sm:$0xf0]  ;;  %8248 = vmatpush.bf16.msrb.mxu1 %v12382_v23 }
 0x983   : > { %6140 = vst [vmem:[#allocation3 + $0x338] sm:$0xf] %v5852_v10  ;;  %v11559_v11 = vor.u32 %v12296_v61, %v11556_v54  ;;  %v15691_v10 = vpop.f32.mrf.mxu1  ;;  %v5818_v61 = vmul.f32 %v5782_v41, %v18068_v58  ;;  %v18069_v54 = vld [vmem:[#allocation106_spill] sm:$0xff]  ;;  %v18075_v23 = vld [vmem:[#allocation107_spill] sm:$0xff] }
 0x984   : > { %6141 = vst [vmem:[#allocation3 + $0x35c] sm:$0xf] %v5853_v26  ;;  %v12374_v26 = vld [vmem:[#allocation7 + $0x1a0] sm:$0xff]  ;;  %v5819_v62 = vmul.f32 %v5783_v29, %v18069_v54  ;;  %v12372_v58 = vld [vmem:[#allocation7 + $0x190] sm:$0xff] }
 0x985   : > { %18065 = vst [vmem:[#allocation146_spill] sm:$0xff] %v15689_v27  ;;  %7962 = vmatmul.bf16.gmra.mxu1 %v11559_v11  ;;  %8159 = vmatpush.bf16.msra.mxu3 %v12374_v26  ;;  %v18073_v11 = vld [vmem:[#allocation135_spill] sm:$0xff]  ;;  %v7839_v26 = vpop.f32.mrf.mxu3  ;;  %v12380_v54 = vld [vmem:[#allocation7 + $0x1d0] sm:$0xff] }
 0x986   : > { %5924 = vst [vmem:[#allocation3 + $0x43c] sm:$0xf] %v5748_v22  ;;  %v11554_v17 = vld [vmem:[#allocation3 + $0x3b0] sm:$0xf]  ;;  %8465 = vmatpush.msra.mxu2 %v18073_v11  ;;  %v5855_v29 = vpack.c.bf16 %v5819_v62, %v5819_v62 }
 0x987   : > { %18066 = vst [vmem:[#allocation150_spill] sm:$0xff] %v15691_v10  ;;  %v12300_v20 = vld [vmem:[#allocation3 + $0x3d0] sm:$0xf0]  ;;  %v11168_v10 = vld [vmem:[#allocation3 + $0xc4] sm:$0xf0] }
 0x988   : > { %5925 = vst [vmem:[#allocation3 + $0x460] sm:$0xf] %v5749_v63  ;;  %v11555_v16 = vor.u32 %v12300_v20, %v11554_v17  ;;  %v12381_v17 = vld [vmem:[#allocation7 + $0x1d8] sm:$0xff]  ;;  %v18074_v20 = vld [vmem:[#allocation141_spill] sm:$0xff] }
 0x989   : > { %6018 = vst [vmem:[#allocation3 + $0x400] sm:$0xf] %v5748_v22  ;;  %8467 = vmatpush.msra.mxu2 %v18074_v20  ;;  %8249 = vmatpush.bf16.msrb.mxu1 %v12381_v17 }
 0x98a   : > { %6019 = vst [vmem:[#allocation3 + $0x424] sm:$0xf] %v5749_v63  ;;  %7873 = vmatmul.bf16.gmra.mxu3 %v11555_v16  ;;  %v5820_v16 = vmul.f32 %v5784_v38, %v18075_v23  ;;  %v5607_v38 = vld [vmem:[#allocation2 + $0x10f] sm:$0xff]  ;;  %v12371_v23 = vld [vmem:[#allocation7 + $0x188] sm:$0xff] }
 0x98b   : > { %6112 = vst [vmem:[#allocation3 + $0x3c4] sm:$0xf] %v5748_v22  ;;  %v12373_v22 = vld [vmem:[#allocation7 + $0x198] sm:$0xff]  ;;  %8469 = vmatpush.msra.mxu2 %v18079_v2 }
 0x98c   : > { %6113 = vst [vmem:[#allocation3 + $0x3e8] sm:$0xf] %v5749_v63  ;;  %v5854_v63 = vpack.c.bf16 %v5818_v61, %v5818_v61  ;;  %8160 = vmatpush.bf16.msra.mxu3 %v12373_v22  ;;  %v15707_v61 = vadd.f32 %v7839_v26, %v15672_v14  ;;  %v5856_v17 = vpack.c.bf16 %v5820_v16, %v5820_v16  ;;  %v18082_v16 = vld [vmem:[#allocation110_spill] sm:$0xff] }
 0x98d   : > { %5892 = vst [vmem:[#allocation3 + $0x438] sm:$0xf] %v5676_v40  ;;  %v12313_v37 = vld [vmem:[#allocation3 + $0x43c] sm:$0xf]  ;;  %8250 = vmatpush.bf16.msrb.mxu1 %v12380_v54 }
 0x98e   : > { %18071 = vst [vmem:[#allocation152_spill] sm:$0xff] %v15697_v15  ;;  %v18080_v15 = vld [vmem:[#allocation153_spill] sm:$0xff] }
 0x98f   : > { %18072 = vst [vmem:[#allocation209_spill] sm:$0xff] %v15699_v45  ;;  %v11620_v9 = vld [vmem:[#allocation3 + $0x45c] sm:$0xf0]  ;;  %v15704_v45 = vpop.f32.mrf.mxu1  ;;  %8471 = vmatpush.msra.mxu2 %v18080_v15 }
 0x990   : > { %5893 = vst [vmem:[#allocation3 + $0x45c] sm:$0xf] %v5677_v36  ;;  %v11623_v41 = vor.u32 %v12313_v37, %v11620_v9  ;;  %v18078_v37 = vld [vmem:[#allocation108_spill] sm:$0xff]  ;;  %v5606_v9 = vld [vmem:[#allocation2 + $0x107] sm:$0xff]  ;;  %8161 = vmatpush.bf16.msra.mxu3 %v12372_v58  ;;  %v5643_v58 = vmul.f32 %v5607_v38, %v18082_v16  ;;  %v18092_v16 = vld [vmem:[#allocation173_spill] sm:$0xff] }
 0x991   : > { %5986 = vst [vmem:[#allocation3 + $0x3fc] sm:$0xf] %v5676_v40  ;;  %v5821_v62 = vmul.f32 %v5785_v32, %v18078_v37  ;;  %v7671_v37 = vpop.f32.mrf.mxu0  ;;  %v5642_v35 = vmul.f32 %v5606_v9, %v18081_v46  ;;  %8473 = vmatpush.msra.mxu2 %v18083_v33  ;;  %v18085_v46 = vld [vmem:[#allocation163_spill] sm:$0xff] }
 0x992   : > { %5987 = vst [vmem:[#allocation3 + $0x420] sm:$0xf] %v5677_v36  ;;  %7794 = vmatmul.bf16.gmra.mxu2 %v11623_v41  ;;  %v12379_v41 = vld [vmem:[#allocation7 + $0x1c8] sm:$0xff] }
 0x993   : > { %6080 = vst [vmem:[#allocation3 + $0x3c0] sm:$0xf] %v5676_v40  ;;  %v5857_v26 = vpack.c.bf16 %v5821_v62, %v5821_v62  ;;  %8251 = vmatpush.bf16.msrb.mxu1 %v12379_v41  ;;  %v12378_v62 = vld [vmem:[#allocation7 + $0x1c0] sm:$0xff]  ;;  %8475 = vmatpush.msra.mxu2 %v18085_v46  ;;  %v5678_v9 = vpack.c.bf16 %v5642_v35, %v5642_v35 }
 0x994   : > { %18076 = vst [vmem:[#allocation215_spill] sm:$0xff] %v15704_v45  ;;  %v11618_v40 = vld [vmem:[#allocation3 + $0x438] sm:$0xf]  ;;  %v7760_v45 = vpop.f32.mrf.mxu2  ;;  %8162 = vmatpush.bf16.msra.mxu3 %v12371_v23 }
 0x995   : > { %6081 = vst [vmem:[#allocation3 + $0x3e4] sm:$0xf] %v5677_v36  ;;  %v15714_v54 = vadd.f32 %v7760_v45, %v7671_v37  ;;  %v11096_v23 = vld [vmem:[#allocation3 + $0x34] sm:$0xf0] }
 0x996   : > { %18077 = vst [vmem:[#allocation205_spill] sm:$0xff] %v15707_v61  ;;  %v18091_v37 = vld [vmem:[#allocation127_spill] sm:$0xff] }
 0x997   : > { %5954 = vst [vmem:[#allocation3 + $0x3f8] sm:$0xf] %v5854_v63  ;;  %v12317_v22 = vld [vmem:[#allocation3 + $0x458] sm:$0xf0]  ;;  %v15720_v38 = vpop.f32.mrf.mxu1  ;;  %8252 = vmatpush.bf16.msrb.mxu1 %v12378_v62  ;;  %v11094_v62 = vld [vmem:[#allocation3 + $0x10] sm:$0xf] }
 0x998   : > { %5955 = vst [vmem:[#allocation3 + $0x41c] sm:$0xf] %v5855_v29  ;;  %v11619_v36 = vor.u32 %v12317_v22, %v11618_v40  ;;  %v12305_v14 = vld [vmem:[#allocation3 + $0x3fc] sm:$0xf]  ;;  %v15717_v40 = vpop.f32.mrf.mxu3 }
 0x999   : > { %6048 = vst [vmem:[#allocation3 + $0x3bc] sm:$0xf] %v5854_v63  ;;  %v11592_v32 = vld [vmem:[#allocation3 + $0x41c] sm:$0xf0]  ;;  %v15724_v41 = vpop.f32.mrf.mxu0 }
 0x99a   : > { %6049 = vst [vmem:[#allocation3 + $0x3e0] sm:$0xf] %v5855_v29  ;;  %7705 = vmatmul.bf16.gmra.mxu0 %v11619_v36  ;;  %v11595_v27 = vor.u32 %v12305_v14, %v11592_v32  ;;  %v5679_v36 = vpack.c.bf16 %v5643_v58, %v5643_v58  ;;  %v18087_v14 = vld [vmem:[#allocation168_spill] sm:$0xff]  ;;  %v12180_v32 = vld [vmem:[#allocation3 + $0x14] sm:$0xf] }
 0x99b   : > { %6142 = vst [vmem:[#allocation3 + $0x380] sm:$0xf] %v5854_v63  ;;  %v12370_v63 = vld [vmem:[#allocation7 + $0x180] sm:$0xff]  ;;  %8477 = vmatpush.msra.mxu2 %v18087_v14  ;;  %v11099_v58 = vor.u32 %v12180_v32, %v11096_v23  ;;  %v18100_v23 = vld [vmem:[#allocation142_spill] sm:$0xff] }
 0x99c   : > { %6143 = vst [vmem:[#allocation3 + $0x3a4] sm:$0xf] %v5855_v29  ;;  %7967 = vmatmul.bf16.gmra.mxu1 %v11595_v27  ;;  %8163 = vmatpush.bf16.msra.mxu3 %v12370_v63  ;;  %v18088_v27 = vld [vmem:[#allocation124_spill] sm:$0xff]  ;;  %v15726_v35 = vpop.f32.mrf.mxu2  ;;  %v18095_v63 = vld [vmem:[#allocation179_spill] sm:$0xff] }
 0x99d   : > { %18084 = vst [vmem:[#allocation195_spill] sm:$0xff] %v15717_v40  ;;  %8604 = vmatpush.msra.mxu1 %v18088_v27  ;;  %8479 = vmatpush.msra.mxu2 %v18092_v16  ;;  %v18097_v27 = vld [vmem:[#allocation139_spill] sm:$0xff] }
 0x99e   : > { %5956 = vst [vmem:[#allocation3 + $0x440] sm:$0xf] %v5856_v17  ;;  %v11590_v22 = vld [vmem:[#allocation3 + $0x3f8] sm:$0xf] }
 0x99f   : > { %5957 = vst [vmem:[#allocation3 + $0x464] sm:$0xf] %v5857_v26  ;;  %v12309_v29 = vld [vmem:[#allocation3 + $0x418] sm:$0xf0]  ;;  %8481 = vmatpush.msra.mxu2 %v18095_v63 }
 0x9a0   : > { %6050 = vst [vmem:[#allocation3 + $0x404] sm:$0xf] %v5856_v17  ;;  %v11591_v45 = vor.u32 %v12309_v29, %v11590_v22  ;;  %8506 = vmatpush.msrb.mxu3 %v18091_v37  ;;  %v18093_v22 = vld [vmem:[#allocation130_spill] sm:$0xff]  ;;  %v18098_v37 = vld [vmem:[#allocation188_spill] sm:$0xff] }
 0x9a1   : > { %18086 = vst [vmem:[#allocation120_spill] sm:$0xff] %v15720_v38  ;;  %8607 = vmatpush.msra.mxu1 %v18093_v22  ;;  %v12184_v29 = vld [vmem:[#allocation3 + $0x30] sm:$0xf0]  ;;  %8483 = vmatpush.msra.mxu2 %v18098_v37  ;;  %v18102_v22 = vld [vmem:[#allocation199_spill] sm:$0xff] }
 0x9a2   : > { %6051 = vst [vmem:[#allocation3 + $0x428] sm:$0xf] %v5857_v26  ;;  %7878 = vmatmul.bf16.gmra.mxu3 %v11591_v45  ;;  %8075 = vmatmul.bf16.vlgmr.msrb.gmra.mxu2 %v11099_v58  ;;  %v7844_v45 = vpop.f32.mrf.mxu3  ;;  %v15742_v58 = vpop.f32.mrf.mxu1  ;;  %v18128_v38 = vld [vmem:[#allocation211_spill] sm:$0xff] }
 0x9a3   : > { %6144 = vst [vmem:[#allocation3 + $0x3c8] sm:$0xf] %v5856_v17  ;;  %v18094_v17 = vld [vmem:[#allocation133_spill] sm:$0xff]  ;;  %v15737_v32 = vadd.f32 %v7844_v45, %v15687_v24  ;;  %8485 = vmatpush.msra.mxu2 %v18102_v22  ;;  %v18107_v24 = vld [vmem:[#allocation154_spill] sm:$0xff] }
 0x9a4   : > { %6145 = vst [vmem:[#allocation3 + $0x3ec] sm:$0xf] %v5857_v26  ;;  %8512 = vmatpush.msrb.mxu3 %v18094_v17  ;;  %v18096_v26 = vld [vmem:[#allocation136_spill] sm:$0xff]  ;;  %v7765_v21 = vpop.f32.mrf.mxu2 }
 0x9a5   : > { %5988 = vst [vmem:[#allocation3 + $0x444] sm:$0xf] %v5678_v9  ;;  %8610 = vmatpush.msra.mxu1 %v18096_v26  ;;  %v11095_v26 = vor.u32 %v12184_v29, %v11094_v62  ;;  %v18104_v17 = vld [vmem:[#allocation148_spill] sm:$0xff] }
 0x9a6   : > { %18089 = vst [vmem:[#allocation203_spill] sm:$0xff] %v15724_v41  ;;  %8518 = vmatpush.msrb.mxu3 %v18097_v27  ;;  %v18106_v27 = vld [vmem:[#allocation206_spill] sm:$0xff]  ;;  %v11626_v45 = vld [vmem:[#allocation3 + $0x440] sm:$0xf] }
 0x9a7   : > { %18090 = vst [vmem:[#allocation121_spill] sm:$0xff] %v15726_v35  ;;  %8613 = vmatpush.msra.mxu1 %v18100_v23  ;;  %8487 = vmatpush.msra.mxu2 %v18106_v27  ;;  %v12318_v23 = vld [vmem:[#allocation3 + $0x460] sm:$0xf0]  ;;  %v18124_v41 = vld [vmem:[#allocation190_spill] sm:$0xff] }
 0x9a8   : > { %5989 = vst [vmem:[#allocation3 + $0x468] sm:$0xf] %v5679_v36  ;;  %v18115_v35 = vld [vmem:[#allocation164_spill] sm:$0xff] }
 0x9a9   : > { %6082 = vst [vmem:[#allocation3 + $0x408] sm:$0xf] %v5678_v9  ;;  %v18101_v9 = vld [vmem:[#allocation145_spill] sm:$0xff]  ;;  %8616 = vmatpush.msra.mxu1 %v18104_v17 }
 0x9aa   : > { %6083 = vst [vmem:[#allocation3 + $0x42c] sm:$0xf] %v5679_v36  ;;  %8524 = vmatpush.msrb.mxu3 %v18101_v9  ;;  %7986 = vmatmul.bf16.vlgmr.msra.gmra.mxu0 %v11095_v26  ;;  %v7676_v9 = vpop.f32.mrf.mxu0  ;;  %v15752_v29 = vpop.f32.mrf.mxu3  ;;  %v18111_v17 = vld [vmem:[#allocation161_spill] sm:$0xff]  ;;  %v18113_v26 = vld [vmem:[#allocation212_spill] sm:$0xff] }
 0x9ab   : > { %18099 = vst [vmem:[#allocation122_spill] sm:$0xff] %v15737_v32  ;;  %8619 = vmatpush.msra.mxu1 %v18107_v24  ;;  %v15750_v62 = vadd.f32 %v7765_v21, %v7676_v9  ;;  %v11132_v24 = vld [vmem:[#allocation3 + $0x7c] sm:$0xf0]  ;;  %v18116_v21 = vld [vmem:[#allocation171_spill] sm:$0xff]  ;;  %v15762_v9 = vpop.f32.mrf.mxu1 }
 0x9ac   : > { %18103 = vst [vmem:[#allocation126_spill] sm:$0xff] %v15742_v58  ;;  %v12314_v36 = vld [vmem:[#allocation3 + $0x444] sm:$0xf]  ;;  %8530 = vmatpush.msrb.mxu3 %v18105_v28  ;;  %v18109_v58 = vld [vmem:[#allocation210_spill] sm:$0xff]  ;;  %v18112_v28 = vld [vmem:[#allocation159_spill] sm:$0xff] }
 0x9ad   : > { %8489 = vmatpush.msra.mxu2 %v18109_v58  ;;  %18110 = vst [vmem:[#allocation128_spill] sm:$0xff] %v15752_v29  ;;  %8622 = vmatpush.msra.mxu1 %v18112_v28  ;;  %v18123_v29 = vld [vmem:[#allocation194_spill] sm:$0xff]  ;;  %v12185_v32 = vld [vmem:[#allocation3 + $0x38] sm:$0xf0] }
 0x9ae   : > { %8536 = vmatpush.msrb.mxu3 %v18108_v34  ;;  %v12392_v34 = vld [vmem:[#allocation7 + $0x230] sm:$0xff]  ;;  %18118 = vst [vmem:[#allocation132_spill] sm:$0xff] %v15762_v9 }
 0x9af   : > { %v11628_v40 = vld [vmem:[#allocation3 + $0x464] sm:$0xf0]  ;;  %8491 = vmatpush.msra.mxu2 %v18113_v26  ;;  %8625 = vmatpush.msra.mxu1 %v18115_v35  ;;  %v11130_v35 = vld [vmem:[#allocation3 + $0x58] sm:$0xf] }
 0x9b0   : > { %v11631_v13 = vor.u32 %v12314_v36, %v11628_v40  ;;  %8542 = vmatpush.msrb.mxu3 %v18111_v17  ;;  %v11627_v40 = vor.u32 %v12318_v23, %v11626_v45  ;;  %v12189_v36 = vld [vmem:[#allocation3 + $0x5c] sm:$0xf]  ;;  %8335 = vmatpush.bf16.msrb.mxu0 %v12392_v34  ;;  %v15767_v45 = vpop.f32.mrf.mxu2 }
 0x9b1   : > { %8657 = vmatpush.msrb.mxu2 %v18067_v5  ;;  %v11135_v28 = vor.u32 %v12189_v36, %v11132_v24  ;;  %v12193_v17 = vld [vmem:[#allocation3 + $0x78] sm:$0xf0]  ;;  %v11104_v24 = vld [vmem:[#allocation3 + $0x3c] sm:$0xf0] }
 0x9b2   : > { %7972 = vmatmul.bf16.gmra.mxu1 %v11631_v13  ;;  %8548 = vmatpush.msrb.mxu3 %v18114_v1  ;;  %v18117_v13 = vld [vmem:[#allocation169_spill] sm:$0xff]  ;;  %v15765_v23 = vpop.f32.mrf.mxu0  ;;  %v18119_v1 = vld [vmem:[#allocation176_spill] sm:$0xff]  ;;  %v12181_v34 = vld [vmem:[#allocation3 + $0x1c] sm:$0xf]  ;;  %v7849_v36 = vpop.f32.mrf.mxu3  ;;  %v11131_v9 = vor.u32 %v12193_v17, %v11130_v35 }
 0x9b3   : > { %7883 = vmatmul.bf16.gmra.mxu3 %v11627_v40  ;;  %8628 = vmatpush.msra.mxu1 %v18117_v13  ;;  %v18120_v40 = vld [vmem:[#allocation174_spill] sm:$0xff]  ;;  %v18122_v13 = vld [vmem:[#allocation181_spill] sm:$0xff]  ;;  %v15785_v35 = vpop.f32.mrf.mxu1 }
 0x9b4   : > { %8554 = vmatpush.msrb.mxu3 %v18116_v21  ;;  %8659 = vmatpush.msrb.mxu2 %v18070_v18  ;;  %v18121_v21 = vld [vmem:[#allocation185_spill] sm:$0xff]  ;;  %18130 = vst [vmem:[#allocation157_spill] sm:$0xff] %v15785_v35  ;;  %v5714_v35 = vld [vmem:[#allocation2 + $0x108] sm:$0xff] }
 0x9b5   : > { %8631 = vmatpush.msra.mxu1 %v18120_v40  ;;  %8080 = vmatmul.bf16.gmra.mxu2 %v11135_v28  ;;  %v18126_v28 = vld [vmem:[#allocation204_spill] sm:$0xff]  ;;  %v5750_v59 = vpack.c.bf16 %v5714_v35, %v5714_v35  ;;  %v18139_v35 = vld [vmem:[#allocation131_spill] sm:$0xff] }
 0x9b6   : > { %8560 = vmatpush.msrb.mxu3 %v18119_v1  ;;  %8661 = vmatpush.msrb.mxu2 %v18073_v11  ;;  %v15777_v1 = vadd.f32 %v7849_v36, %v15714_v54  ;;  %v18127_v40 = vld [vmem:[#allocation200_spill] sm:$0xff] }
 0x9b7   : > { %8634 = vmatpush.msra.mxu1 %v18122_v13  ;;  %v11107_v13 = vor.u32 %v12181_v34, %v11104_v24  ;;  %v5786_v36 = vld [vmem:[#allocation2 + $0x109] sm:$0xff]  ;;  %v12198_v24 = vld [vmem:[#allocation3 + $0xa4] sm:$0xf]  ;;  %6020 = vst [vmem:[#allocation3 + $0x448] sm:$0xf] %v5750_v59 }
 0x9b8   : > { %8566 = vmatpush.msrb.mxu3 %v18121_v21  ;;  %18125 = vst [vmem:[#allocation134_spill] sm:$0xff] %v15777_v1  ;;  %8663 = vmatpush.msrb.mxu2 %v18074_v20  ;;  %v11102_v21 = vld [vmem:[#allocation3 + $0x18] sm:$0xf]  ;;  %v7770_v17 = vpop.f32.mrf.mxu2 }
 0x9b9   : > { %8637 = vmatpush.msra.mxu1 %v18124_v41  ;;  %v5787_v41 = vld [vmem:[#allocation2 + $0x111] sm:$0xff]  ;;  %v11103_v34 = vor.u32 %v12185_v32, %v11102_v21  ;;  %6114 = vst [vmem:[#allocation3 + $0x40c] sm:$0xf] %v5750_v59 }
 0x9ba   : > { %8572 = vmatpush.msrb.mxu3 %v18123_v29  ;;  %7991 = vmatmul.bf16.gmra.mxu0 %v11131_v9  ;;  %v18129_v29 = vld [vmem:[#allocation207_spill] sm:$0xff]  ;;  %v7681_v54 = vpop.f32.mrf.mxu0  ;;  %v18132_v9 = vld [vmem:[#allocation213_spill] sm:$0xff]  ;;  %v11138_v59 = vld [vmem:[#allocation3 + $0x60] sm:$0xf] }
 0x9bb   : > { %8640 = vmatpush.msra.mxu1 %v18127_v40  ;;  %8665 = vmatpush.msrb.mxu2 %v18079_v2  ;;  %v18131_v40 = vld [vmem:[#allocation219_spill] sm:$0xff] }
 0x9bc   : > { %8578 = vmatpush.msrb.mxu3 %v18126_v28  ;;  %v15790_v28 = vadd.f32 %v7770_v17, %v7681_v54  ;;  %v5751_v17 = vpack.c.bf16 %v5715_v4, %v5715_v4  ;;  %v15811_v4 = vpop.f32.mrf.mxu1 }
 0x9bd   : > { %8643 = vmatpush.msra.mxu1 %v18129_v29  ;;  %8667 = vmatpush.msrb.mxu2 %v18080_v15  ;;  %v18134_v29 = vld [vmem:[#allocation112_spill] sm:$0xff] }
 0x9be   : > { %8584 = vmatpush.msrb.mxu3 %v18128_v38  ;;  %v18133_v38 = vld [vmem:[#allocation111_spill] sm:$0xff]  ;;  %v5823_v61 = vmul.f32 %v5787_v41, %v18134_v29  ;;  %v18138_v41 = vld [vmem:[#allocation125_spill] sm:$0xff]  ;;  %v11171_v29 = vor.u32 %v12198_v24, %v11168_v10  ;;  %6021 = vst [vmem:[#allocation3 + $0x46c] sm:$0xf] %v5751_v17  ;;  %v12190_v24 = vld [vmem:[#allocation3 + $0x64] sm:$0xf] }
 0x9bf   : > { %8646 = vmatpush.msra.mxu1 %v18132_v9  ;;  %v5822_v1 = vmul.f32 %v5786_v36, %v18133_v38  ;;  %8669 = vmatpush.msrb.mxu2 %v18083_v33  ;;  %v18136_v9 = vld [vmem:[#allocation214_spill] sm:$0xff]  ;;  %v18137_v38 = vld [vmem:[#allocation113_spill] sm:$0xff]  ;;  %6115 = vst [vmem:[#allocation3 + $0x430] sm:$0xf] %v5751_v17  ;;  %v18144_v17 = vld [vmem:[#allocation160_spill] sm:$0xff] }
 0x9c0   : > { %8590 = vmatpush.msrb.mxu3 %v18131_v40  ;;  %v18135_v40 = vld [vmem:[#allocation220_spill] sm:$0xff]  ;;  %v5859_v21 = vpack.c.bf16 %v5823_v61, %v5823_v61  ;;  %v5644_v54 = vmul.f32 %v5608_v43, %v18137_v38  ;;  %v15807_v43 = vpop.f32.mrf.mxu2  ;;  %v18140_v10 = vld [vmem:[#allocation137_spill] sm:$0xff] }
 0x9c1   : > { %8649 = vmatpush.msra.mxu1 %v18136_v9  ;;  %v5858_v32 = vpack.c.bf16 %v5822_v1, %v5822_v1  ;;  %8671 = vmatpush.msrb.mxu2 %v18085_v46  ;;  %v11166_v1 = vld [vmem:[#allocation3 + $0xa0] sm:$0xf]  ;;  %v12202_v61 = vld [vmem:[#allocation3 + $0xc0] sm:$0xf0]  ;;  %v11140_v38 = vld [vmem:[#allocation3 + $0x84] sm:$0xf0] }
 0x9c2   : > { %8253 = vmatmul.bf16.vlgmr.msrb.gmra.mxu1 %v11107_v13  ;;  %v15795_v13 = vpop.f32.mrf.mxu3  ;;  %8596 = vmatpush.msrb.mxu3 %v18135_v40  ;;  %6053 = vst [vmem:[#allocation3 + $0x470] sm:$0xf] %v5859_v21  ;;  %v15805_v36 = vpop.f32.mrf.mxu0  ;;  %v11143_v9 = vor.u32 %v12190_v24, %v11140_v38  ;;  %v18145_v38 = vld [vmem:[#allocation165_spill] sm:$0xff]  ;;  %v11384_v40 = vld [vmem:[#allocation3 + $0x274] sm:$0xf0] }
 0x9c3   : > { %8164 = vmatmul.bf16.vlgmr.msra.gmra.mxu3 %v11103_v34  ;;  %8765 = vmatpush.msrb.mxu1 %v18067_v5  ;;  %6052 = vst [vmem:[#allocation3 + $0x44c] sm:$0xf] %v5858_v32  ;;  %v5680_v34 = vpack.c.bf16 %v5644_v54, %v5644_v54  ;;  %v18142_v54 = vld [vmem:[#allocation149_spill] sm:$0xff] }
 0x9c4   : > { %8698 = vmatpush.msra.mxu3 %v18138_v41  ;;  %6146 = vst [vmem:[#allocation3 + $0x410] sm:$0xf] %v5858_v32  ;;  %8673 = vmatpush.msrb.mxu2 %v18087_v14  ;;  %v18141_v32 = vld [vmem:[#allocation143_spill] sm:$0xff]  ;;  %v11348_v41 = vld [vmem:[#allocation3 + $0x22c] sm:$0xf0] }
 0x9c5   : > { %8767 = vmatpush.msrb.mxu1 %v18070_v18  ;;  %8085 = vmatmul.bf16.gmra.mxu2 %v11171_v29  ;;  %6147 = vst [vmem:[#allocation3 + $0x434] sm:$0xf] %v5859_v21  ;;  %v11167_v29 = vor.u32 %v12202_v61, %v11166_v1  ;;  %v12207_v61 = vld [vmem:[#allocation3 + $0xec] sm:$0xf] }
 0x9c6   : > { %8702 = vmatpush.msra.mxu3 %v18139_v35  ;;  %8675 = vmatpush.msrb.mxu2 %v18092_v16  ;;  %6084 = vst [vmem:[#allocation3 + $0x450] sm:$0xf] %v5680_v34  ;;  %v11204_v34 = vld [vmem:[#allocation3 + $0x10c] sm:$0xf0]  ;;  %v12226_v35 = vld [vmem:[#allocation3 + $0x184] sm:$0xf] }
 0x9c7   : > { %8769 = vmatpush.msrb.mxu1 %v18073_v11  ;;  %v12243_v18 = vld [vmem:[#allocation3 + $0x20c] sm:$0xf] }
 0x9c8   : > { %8706 = vmatpush.msra.mxu3 %v18140_v10  ;;  %8677 = vmatpush.msrb.mxu2 %v18095_v63  ;;  %v7775_v24 = vpop.f32.mrf.mxu2 }
 0x9c9   : > { %8771 = vmatpush.msrb.mxu1 %v18074_v20  ;;  %v18143_v20 = vld [vmem:[#allocation155_spill] sm:$0xff] }
 0x9ca   : > { %8710 = vmatpush.msra.mxu3 %v18141_v32  ;;  %v7854_v21 = vpop.f32.mrf.mxu3  ;;  %7996 = vmatmul.bf16.gmra.mxu0 %v11167_v29  ;;  %v12194_v32 = vld [vmem:[#allocation3 + $0x80] sm:$0xf0]  ;;  %v15831_v29 = vpop.f32.mrf.mxu1 }
 0x9cb   : > { %8773 = vmatpush.msrb.mxu1 %v18079_v2  ;;  %v15820_v10 = vadd.f32 %v7854_v21, %v15750_v62  ;;  %8679 = vmatpush.msrb.mxu2 %v18098_v37  ;;  %v11139_v1 = vor.u32 %v12194_v32, %v11138_v59  ;;  %v7686_v62 = vpop.f32.mrf.mxu0  ;;  %v18146_v59 = vld [vmem:[#allocation170_spill] sm:$0xff] }
 0x9cc   : > { %8714 = vmatpush.msra.mxu3 %v18142_v54  ;;  %v15835_v21 = vadd.f32 %v7775_v24, %v7686_v62  ;;  %v12199_v62 = vld [vmem:[#allocation3 + $0xac] sm:$0xf]  ;;  %v11176_v24 = vld [vmem:[#allocation3 + $0xcc] sm:$0xf0]  ;;  %v11246_v54 = vld [vmem:[#allocation3 + $0x138] sm:$0xf] }
 0x9cd   : > { %8775 = vmatpush.msrb.mxu1 %v18080_v15  ;;  %8681 = vmatpush.msrb.mxu2 %v18102_v22  ;;  %v11210_v15 = vld [vmem:[#allocation3 + $0xf0] sm:$0xf] }
 0x9ce   : > { %8718 = vmatpush.msra.mxu3 %v18143_v20 }
 0x9cf   : > { %8777 = vmatpush.msrb.mxu1 %v18083_v33  ;;  %8683 = vmatpush.msrb.mxu2 %v18106_v27 }
 0x9d0   : > { %8722 = vmatpush.msra.mxu3 %v18144_v17  ;;  %v12391_v17 = vld [vmem:[#allocation7 + $0x228] sm:$0xff] }
 0x9d1   : > { %8779 = vmatpush.msrb.mxu1 %v18085_v46  ;;  %8336 = vmatpush.bf16.msrb.mxu0 %v12391_v17  ;;  %v18147_v46 = vld [vmem:[#allocation175_spill] sm:$0xff]  ;;  %v18149_v17 = vld [vmem:[#allocation192_spill] sm:$0xff] }
 0x9d2   : > { %8258 = vmatmul.bf16.gmra.mxu1 %v11143_v9  ;;  %8726 = vmatpush.msra.mxu3 %v18145_v38  ;;  %v7768_v9 = vadd.f32 %v15767_v45, %v15765_v23  ;;  %v7856_v32 = vpop.f32.mrf.mxu3  ;;  %v11207_v38 = vor.u32 %v12207_v61, %v11204_v34  ;;  %v11202_v23 = vld [vmem:[#allocation3 + $0xe8] sm:$0xf]  ;;  %v12211_v45 = vld [vmem:[#allocation3 + $0x108] sm:$0xf0]  ;;  %v7777_v61 = vpop.f32.mrf.mxu2 }
 0x9d3   : > { %8169 = vmatmul.bf16.gmra.mxu3 %v11139_v1  ;;  %8781 = vmatpush.msrb.mxu1 %v18087_v14  ;;  %v18148_v1 = vld [vmem:[#allocation183_spill] sm:$0xff]  ;;  %v11203_v34 = vor.u32 %v12211_v45, %v11202_v23  ;;  %v18152_v23 = vld [vmem:[#allocation216_spill] sm:$0xff] }
 0x9d4   : > { %8730 = vmatpush.msra.mxu3 %v18146_v59  ;;  %v15840_v33 = vadd.f32 %v7856_v32, %v7768_v9  ;;  %8685 = vmatpush.msrb.mxu2 %v18109_v58  ;;  %v7688_v9 = vpop.f32.mrf.mxu0  ;;  %v18150_v32 = vld [vmem:[#allocation202_spill] sm:$0xff]  ;;  %v18151_v59 = vld [vmem:[#allocation208_spill] sm:$0xff] }
 0x9d5   : > { %8783 = vmatpush.msrb.mxu1 %v18092_v16  ;;  %8090 = vmatmul.bf16.gmra.mxu2 %v11207_v38  ;;  %v15852_v38 = vpop.f32.mrf.mxu1 }
 0x9d6   : > { %8734 = vmatpush.msra.mxu3 %v18147_v46  ;;  %8687 = vmatpush.msrb.mxu2 %v18113_v26  ;;  %v12203_v46 = vld [vmem:[#allocation3 + $0xc8] sm:$0xf0] }
 0x9d7   : > { %8785 = vmatpush.msrb.mxu1 %v18095_v63  ;;  %v11174_v63 = vld [vmem:[#allocation3 + $0xa8] sm:$0xf] }
 0x9d8   : > { %8738 = vmatpush.msra.mxu3 %v18148_v1  ;;  %v11179_v1 = vor.u32 %v12199_v62, %v11176_v24  ;;  %v11175_v45 = vor.u32 %v12203_v46, %v11174_v63  ;;  %v11238_v46 = vld [vmem:[#allocation3 + $0x130] sm:$0xf]  ;;  %v12220_v63 = vld [vmem:[#allocation3 + $0x150] sm:$0xf0] }
 0x9d9   : > { %8787 = vmatpush.msrb.mxu1 %v18098_v37  ;;  %v11239_v37 = vor.u32 %v12220_v63, %v11238_v46  ;;  %v12229_v63 = vld [vmem:[#allocation3 + $0x198] sm:$0xf0] }
 0x9da   : > { %8742 = vmatpush.msra.mxu3 %v18149_v17  ;;  %8001 = vmatmul.bf16.gmra.mxu0 %v11203_v34  ;;  %v7859_v16 = vpop.f32.mrf.mxu3  ;;  %v18153_v34 = vld [vmem:[#allocation217_spill] sm:$0xff]  ;;  %v7780_v24 = vpop.f32.mrf.mxu2 }
 0x9db   : > { %8789 = vmatpush.msrb.mxu1 %v18102_v22  ;;  %v15857_v17 = vadd.f32 %v7859_v16, %v15790_v28  ;;  %v11240_v22 = vld [vmem:[#allocation3 + $0x154] sm:$0xf0] }
 0x9dc   : > { %8746 = vmatpush.msra.mxu3 %v18150_v32  ;;  %v12216_v32 = vld [vmem:[#allocation3 + $0x134] sm:$0xf]  ;;  %v7691_v62 = vpop.f32.mrf.mxu0 }
 0x9dd   : > { %8791 = vmatpush.msrb.mxu1 %v18106_v27  ;;  %v7781_v16 = vadd.f32 %v7780_v24, %v7691_v62  ;;  %v15865_v27 = vpop.f32.mrf.mxu1  ;;  %v11276_v24 = vld [vmem:[#allocation3 + $0x19c] sm:$0xf0] }
 0x9de   : > { %8750 = vmatpush.msra.mxu3 %v18151_v59  ;;  %v11243_v59 = vor.u32 %v12216_v32, %v11240_v22 }
 0x9df   : > { %8793 = vmatpush.msrb.mxu1 %v18109_v58  ;;  %v12208_v58 = vld [vmem:[#allocation3 + $0xf4] sm:$0xf] }
 0x9e0   : > { %8754 = vmatpush.msra.mxu3 %v18152_v23 }
 0x9e1   : > { %8795 = vmatpush.msrb.mxu1 %v18113_v26 }
 0x9e2   : > { %8263 = vmatmul.bf16.gmra.mxu1 %v11179_v1  ;;  %8758 = vmatpush.msra.mxu3 %v18153_v34  ;;  %v7773_v1 = vadd.f32 %v15807_v43, %v15805_v36  ;;  %v7861_v28 = vpop.f32.mrf.mxu3  ;;  %v11212_v34 = vld [vmem:[#allocation3 + $0x114] sm:$0xf0]  ;;  %v12212_v36 = vld [vmem:[#allocation3 + $0x110] sm:$0xf0] }
 0x9e3   : > { %8174 = vmatmul.bf16.gmra.mxu3 %v11175_v45  ;;  %v7782_v45 = vpop.f32.mrf.mxu2  ;;  %v11215_v14 = vor.u32 %v12208_v58, %v11212_v34  ;;  %v11211_v32 = vor.u32 %v12212_v36, %v11210_v15  ;;  %v7778_v58 = vadd.f32 %v7777_v61, %v7688_v9  ;;  %v12217_v15 = vld [vmem:[#allocation3 + $0x13c] sm:$0xf]  ;;  %v11248_v36 = vld [vmem:[#allocation3 + $0x15c] sm:$0xf0] }
 0x9e4   : > { %v15867_v23 = vadd.f32 %v7861_v28, %v7773_v1  ;;  %v7693_v26 = vpop.f32.mrf.mxu0  ;;  %v12390_v1 = vld [vmem:[#allocation7 + $0x220] sm:$0xff] }
 0x9e5   : > { %8095 = vmatmul.bf16.gmra.mxu2 %v11243_v59  ;;  %v7783_v20 = vadd.f32 %v7782_v45, %v7693_v26  ;;  %v15869_v43 = vpop.f32.mrf.mxu1  ;;  %v12225_v59 = vld [vmem:[#allocation3 + $0x17c] sm:$0xf]  ;;  %8337 = vmatpush.bf16.msrb.mxu0 %v12390_v1 }
 0x9e6   : > { %v11279_v28 = vor.u32 %v12225_v59, %v11276_v24  ;;  %v12221_v59 = vld [vmem:[#allocation3 + $0x158] sm:$0xf0] }
 0x9e7   : > { %v11247_v61 = vor.u32 %v12221_v59, %v11246_v54 }
 0x9ea   : > { %8006 = vmatmul.bf16.gmra.mxu0 %v11239_v37  ;;  %v7864_v22 = vpop.f32.mrf.mxu3 }
 0x9eb   : > { %v15872_v62 = vadd.f32 %v7864_v22, %v15835_v21  ;;  %v7785_v37 = vpop.f32.mrf.mxu2 }
 0x9ec   : > { %v7696_v46 = vpop.f32.mrf.mxu0 }
 0x9ed   : > { %v7786_v26 = vadd.f32 %v7785_v37, %v7696_v46  ;;  %v15876_v21 = vpop.f32.mrf.mxu1  ;;  %v12234_v46 = vld [vmem:[#allocation3 + $0x1c4] sm:$0xf]  ;;  %v11312_v37 = vld [vmem:[#allocation3 + $0x1e4] sm:$0xf0] }
 0x9ee   : > { %v11315_v2 = vor.u32 %v12234_v46, %v11312_v37 }
 0x9f2   : > { %8268 = vmatmul.bf16.gmra.mxu1 %v11215_v14  ;;  %v7866_v34 = vpop.f32.mrf.mxu3  ;;  %v11274_v14 = vld [vmem:[#allocation3 + $0x178] sm:$0xf] }
 0x9f3   : > { %8179 = vmatmul.bf16.gmra.mxu3 %v11211_v32  ;;  %v15874_v45 = vadd.f32 %v7866_v34, %v7778_v58  ;;  %v11275_v22 = vor.u32 %v12229_v63, %v11274_v14  ;;  %v11251_v32 = vor.u32 %v12217_v15, %v11248_v36  ;;  %v7787_v1 = vpop.f32.mrf.mxu2  ;;  %v11310_v63 = vld [vmem:[#allocation3 + $0x1c0] sm:$0xf]  ;;  %v12238_v15 = vld [vmem:[#allocation3 + $0x1e0] sm:$0xf0] }
 0x9f4   : > { %v7698_v24 = vpop.f32.mrf.mxu0  ;;  %v11311_v54 = vor.u32 %v12238_v15, %v11310_v63 }
 0x9f5   : > { %8100 = vmatmul.bf16.gmra.mxu2 %v11279_v28  ;;  %v7788_v9 = vadd.f32 %v7787_v1, %v7698_v24  ;;  %v15880_v34 = vpop.f32.mrf.mxu1  ;;  %v11282_v1 = vld [vmem:[#allocation3 + $0x180] sm:$0xf] }
 0x9fa   : > { %8011 = vmatmul.bf16.gmra.mxu0 %v11275_v22  ;;  %v7869_v28 = vpop.f32.mrf.mxu3 }
 0x9fb   : > { %v15878_v58 = vadd.f32 %v7869_v28, %v7781_v16  ;;  %v12230_v16 = vld [vmem:[#allocation3 + $0x1a0] sm:$0xf0] }
 0x9fc   : > { %v11283_v46 = vor.u32 %v12230_v16, %v11282_v1 }
 0x9fd   : > { %v7790_v36 = vpop.f32.mrf.mxu2 }
 0x9fe   : > { %v7701_v14 = vpop.f32.mrf.mxu0 }
 0x9ff   : > { %v7791_v22 = vadd.f32 %v7790_v36, %v7701_v14  ;;  %v12389_v14 = vld [vmem:[#allocation7 + $0x218] sm:$0xff] }
 0xa00   : > { %8338 = vmatpush.bf16.msrb.mxu0 %v12389_v14 }
 0xa02   : > { %8273 = vmatmul.bf16.gmra.mxu1 %v11251_v32  ;;  %v7871_v11 = vpop.f32.mrf.mxu3  ;;  %v11284_v32 = vld [vmem:[#allocation3 + $0x1a4] sm:$0xf0] }
 0xa03   : > { %8184 = vmatmul.bf16.gmra.mxu3 %v11247_v61  ;;  %v15882_v24 = vadd.f32 %v7871_v11, %v7783_v20  ;;  %v11287_v59 = vor.u32 %v12226_v35, %v11284_v32  ;;  %v15884_v61 = vpop.f32.mrf.mxu1  ;;  %v11351_v11 = vor.u32 %v12243_v18, %v11348_v41  ;;  %v11346_v20 = vld [vmem:[#allocation3 + $0x208] sm:$0xf]  ;;  %v12247_v35 = vld [vmem:[#allocation3 + $0x228] sm:$0xf0] }
 0xa04   : > { %v12235_v32 = vld [vmem:[#allocation3 + $0x1cc] sm:$0xf]  ;;  %v11347_v1 = vor.u32 %v12247_v35, %v11346_v20 }
 0xa05   : > { %8105 = vmatmul.bf16.gmra.mxu2 %v11315_v2  ;;  %18154 = vst [vmem:[#allocation162_spill] sm:$0xff] %v15882_v24  ;;  %v7792_v2 = vpop.f32.mrf.mxu2 }
 0xa06   : > { %v7703_v28 = vpop.f32.mrf.mxu0 }
 0xa07   : > { %v7793_v37 = vadd.f32 %v7792_v2, %v7703_v28 }
 0xa0a   : > { %8016 = vmatmul.bf16.gmra.mxu0 %v11311_v54  ;;  %v11320_v54 = vld [vmem:[#allocation3 + $0x1ec] sm:$0xf0] }
 0xa0b   : > { %v15888_v63 = vpop.f32.mrf.mxu1 }
 0xa0c   : > { %18156 = vst [vmem:[#allocation218_spill] sm:$0xff] %v15888_v63 }
 0xa0d   : > { %v7874_v36 = vpop.f32.mrf.mxu3 }
 0xa0e   : > { %v15886_v5 = vadd.f32 %v7874_v36, %v7786_v26  ;;  %v11318_v26 = vld [vmem:[#allocation3 + $0x1c8] sm:$0xf]  ;;  %v12239_v36 = vld [vmem:[#allocation3 + $0x1e8] sm:$0xf0] }
 0xa0f   : > { %v11319_v18 = vor.u32 %v12239_v36, %v11318_v26 }
 0xa10   : > { %18155 = vst [vmem:[#allocation237_spill] sm:$0xff] %v15886_v5 }
 0xa12   : > { %8278 = vmatmul.bf16.gmra.mxu1 %v11287_v59 }
 0xa13   : > { %8189 = vmatmul.bf16.gmra.mxu3 %v11283_v46  ;;  %v11323_v46 = vor.u32 %v12235_v32, %v11320_v54  ;;  %v15892_v5 = vpop.f32.mrf.mxu1  ;;  %v7899_v32 = vadd.f32 %v15576_v39, %v15589_v51 }
 0xa15   : > { %8110 = vmatmul.bf16.gmra.mxu2 %v11351_v11  ;;  %v7795_v59 = vpop.f32.mrf.mxu2  ;;  %v7876_v28 = vpop.f32.mrf.mxu3  ;;  %v12252_v11 = vld [vmem:[#allocation3 + $0x254] sm:$0xf] }
 0xa16   : > { %v15890_v2 = vadd.f32 %v7876_v28, %v7788_v9  ;;  %v11387_v63 = vor.u32 %v12252_v11, %v11384_v40  ;;  %v11382_v9 = vld [vmem:[#allocation3 + $0x250] sm:$0xf]  ;;  %v12248_v11 = vld [vmem:[#allocation3 + $0x230] sm:$0xf0] }
 0xa17   : > { %v7706_v15 = vpop.f32.mrf.mxu0 }
 0xa18   : > { %v7796_v16 = vadd.f32 %v7795_v59, %v7706_v15  ;;  %v12256_v15 = vld [vmem:[#allocation3 + $0x270] sm:$0xf0] }
 0xa19   : > { %v12244_v59 = vld [vmem:[#allocation3 + $0x214] sm:$0xf]  ;;  %v11383_v36 = vor.u32 %v12256_v15, %v11382_v9  ;;  %v11420_v9 = vld [vmem:[#allocation3 + $0x2bc] sm:$0xf0] }
 0xa1a   : > { %8021 = vmatmul.bf16.gmra.mxu0 %v11347_v1  ;;  %v11356_v1 = vld [vmem:[#allocation3 + $0x234] sm:$0xf0]  ;;  %v12388_v15 = vld [vmem:[#allocation7 + $0x210] sm:$0xff] }
 0xa1b   : > { %8339 = vmatpush.bf16.msrb.mxu0 %v12388_v15 }
 0xa1d   : > { %v7797_v14 = vpop.f32.mrf.mxu2 }
 0xa1f   : > { %v7708_v41 = vpop.f32.mrf.mxu0 }
 0xa20   : > { %v7798_v24 = vadd.f32 %v7797_v14, %v7708_v41  ;;  %v11354_v14 = vld [vmem:[#allocation3 + $0x210] sm:$0xf] }
 0xa21   : > { %v11355_v51 = vor.u32 %v12248_v11, %v11354_v14 }
 0xa22   : > { %8283 = vmatmul.bf16.gmra.mxu1 %v11323_v46  ;;  %v7723_v46 = vadd.f32 %v15572_v25, %v15569_v55  ;;  %v12261_v25 = vld [vmem:[#allocation3 + $0x29c] sm:$0xf] }
 0xa23   : > { %8194 = vmatmul.bf16.gmra.mxu3 %v11319_v18  ;;  %v15901_v18 = vpop.f32.mrf.mxu1 }
 0xa24   : > { %v7812_v40 = vadd.f32 %v15598_v52, %v7723_v46  ;;  %v12265_v46 = vld [vmem:[#allocation3 + $0x2b8] sm:$0xf0] }
 0xa25   : > { %v7879_v20 = vpop.f32.mrf.mxu3  ;;  %8115 = vmatmul.bf16.gmra.mxu2 %v11387_v63  ;;  %v8076_v28 = vpop.f32.mrf.mxu2 }
 0xa26   : > { %v15894_v35 = vadd.f32 %v7879_v20, %v7791_v22  ;;  %v11359_v22 = vor.u32 %v12244_v59, %v11356_v1  ;;  %v7901_v20 = vadd.f32 %v15594_v6, %v7812_v40  ;;  %v7904_v6 = vadd.f32 %v15602_v31, %v15607_v57  ;;  %v11392_v40 = vld [vmem:[#allocation3 + $0x27c] sm:$0xf0] }
 0xa27   : > { %v7987_v54 = vpop.f32.mrf.mxu0 }
 0xa28   : > { %18157 = vst [vmem:[#allocation167_spill] sm:$0xff] %v15894_v35  ;;  %v7988_v26 = vadd.f32 %v7987_v54, %v7899_v32  ;;  %v11423_v54 = vor.u32 %v12261_v25, %v11420_v9  ;;  %v12257_v25 = vld [vmem:[#allocation3 + $0x278] sm:$0xf0] }
 0xa2a   : > { %8026 = vmatmul.bf16.gmra.mxu0 %v11383_v36  ;;  %v8077_v63 = vadd.f32 %v8076_v28, %v7988_v26  ;;  %v12253_v36 = vld [vmem:[#allocation3 + $0x25c] sm:$0xf] }
 0xa2b   : > { %v15906_v1 = vpop.f32.mrf.mxu1 }
 0xa2d   : > { %v7881_v41 = vpop.f32.mrf.mxu3  ;;  %v8078_v55 = vpop.f32.mrf.mxu2 }
 0xa2e   : > { %v15903_v39 = vadd.f32 %v7881_v41, %v7793_v37  ;;  %v11418_v37 = vld [vmem:[#allocation3 + $0x298] sm:$0xf] }
 0xa2f   : > { %v7989_v35 = vpop.f32.mrf.mxu0  ;;  %v11419_v14 = vor.u32 %v12265_v46, %v11418_v37 }
 0xa30   : > { %v7990_v52 = vadd.f32 %v7989_v35, %v7901_v20  ;;  %v7728_v35 = vadd.f32 %v15591_v44, %v15584_v30  ;;  %v12270_v44 = vld [vmem:[#allocation3 + $0x2e4] sm:$0xf] }
 0xa32   : > { %8288 = vmatmul.bf16.gmra.mxu1 %v11359_v22  ;;  %v8079_v32 = vadd.f32 %v8078_v55, %v7990_v52  ;;  %v7817_v11 = vadd.f32 %v15615_v12, %v7728_v35  ;;  %v11390_v55 = vld [vmem:[#allocation3 + $0x258] sm:$0xf] }
 0xa33   : > { %8199 = vmatmul.bf16.gmra.mxu3 %v11355_v51  ;;  %v15917_v31 = vpop.f32.mrf.mxu1  ;;  %v11391_v57 = vor.u32 %v12257_v25, %v11390_v55 }
 0xa34   : > { %v7906_v52 = vadd.f32 %v15613_v0, %v7817_v11  ;;  %v11428_v0 = vld [vmem:[#allocation3 + $0x2c4] sm:$0xf0] }
 0xa35   : > { %8120 = vmatmul.bf16.gmra.mxu2 %v11423_v54  ;;  %v11456_v54 = vld [vmem:[#allocation3 + $0x304] sm:$0xf0] }
 0xa36   : > { %v7884_v59 = vpop.f32.mrf.mxu3  ;;  %v11459_v37 = vor.u32 %v12270_v44, %v11456_v54  ;;  %v11492_v44 = vld [vmem:[#allocation3 + $0x34c] sm:$0xf0] }
 0xa37   : > { %v15908_v28 = vadd.f32 %v7884_v59, %v7796_v16  ;;  %v7992_v26 = vpop.f32.mrf.mxu0  ;;  %v11395_v16 = vor.u32 %v12253_v36, %v11392_v40  ;;  %v7909_v36 = vadd.f32 %v15623_v19, %v15626_v7 }
 0xa38   : > { %v8081_v22 = vpop.f32.mrf.mxu2  ;;  %v7993_v41 = vadd.f32 %v7992_v26, %v7904_v6  ;;  %v12274_v26 = vld [vmem:[#allocation3 + $0x300] sm:$0xf0] }
 0xa3a   : > { %8031 = vmatmul.bf16.gmra.mxu0 %v11419_v14  ;;  %v8082_v51 = vadd.f32 %v8081_v22, %v7993_v41  ;;  %v12262_v22 = vld [vmem:[#allocation3 + $0x2a4] sm:$0xf]  ;;  %v7733_v41 = vadd.f32 %v15609_v50, %v15604_v48  ;;  %v12279_v50 = vld [vmem:[#allocation3 + $0x32c] sm:$0xf] }
 0xa3b   : > { %v15926_v14 = vpop.f32.mrf.mxu1 }
 0xa3e   : > { %v7886_v20 = vpop.f32.mrf.mxu3 }
 0xa3f   : > { %v15915_v9 = vadd.f32 %v7886_v20, %v7798_v24  ;;  %v7994_v15 = vpop.f32.mrf.mxu0  ;;  %v11454_v24 = vld [vmem:[#allocation3 + $0x2e0] sm:$0xf]  ;;  %v11431_v20 = vor.u32 %v12262_v22, %v11428_v0  ;;  %v12271_v22 = vld [vmem:[#allocation3 + $0x2ec] sm:$0xf]  ;;  %v11464_v0 = vld [vmem:[#allocation3 + $0x30c] sm:$0xf0] }
 0xa40   : > { %v8083_v30 = vpop.f32.mrf.mxu2  ;;  %v7995_v12 = vadd.f32 %v7994_v15, %v7906_v52  ;;  %v12266_v52 = vld [vmem:[#allocation3 + $0x2c0] sm:$0xf0] }
 0xa42   : > { %8293 = vmatmul.bf16.gmra.mxu1 %v11395_v16  ;;  %v8084_v59 = vadd.f32 %v8083_v30, %v7995_v12  ;;  %v11455_v16 = vor.u32 %v12274_v26, %v11454_v24  ;;  %v12387_v12 = vld [vmem:[#allocation7 + $0x208] sm:$0xff] }
 0xa43   : > { %8204 = vmatmul.bf16.gmra.mxu3 %v11391_v57  ;;  %v11426_v57 = vld [vmem:[#allocation3 + $0x2a0] sm:$0xf]  ;;  %8340 = vmatpush.bf16.msrb.mxu0 %v12387_v12 }
 0xa44   : > { %v11427_v7 = vor.u32 %v12266_v52, %v11426_v57  ;;  %v11462_v57 = vld [vmem:[#allocation3 + $0x2e8] sm:$0xf]  ;;  %v12275_v52 = vld [vmem:[#allocation3 + $0x308] sm:$0xf0] }
 0xa45   : > { %8125 = vmatmul.bf16.gmra.mxu2 %v11459_v37 }
 0xa46   : > { %v8165_v46 = vpop.f32.mrf.mxu3 }
 0xa47   : > { %v15920_v6 = vadd.f32 %v8165_v46, %v8077_v63  ;;  %v7997_v40 = vpop.f32.mrf.mxu0  ;;  %v7822_v63 = vadd.f32 %v15632_v53, %v7733_v41  ;;  %v15932_v53 = vpop.f32.mrf.mxu1  ;;  %v11495_v46 = vor.u32 %v12279_v50, %v11492_v44  ;;  %v7738_v41 = vadd.f32 %v15628_v60, %v15621_v47  ;;  %v12288_v60 = vld [vmem:[#allocation3 + $0x374] sm:$0xf] }
 0xa48   : > { %v8086_v35 = vpop.f32.mrf.mxu2  ;;  %v7998_v11 = vadd.f32 %v7997_v40, %v7909_v36  ;;  %v12283_v36 = vld [vmem:[#allocation3 + $0x348] sm:$0xf0] }
 0xa49   : > { %v7911_v15 = vadd.f32 %v15637_v8, %v7822_v63  ;;  %v7914_v8 = vadd.f32 %v15647_v49, %v15643_v56  ;;  %v7827_v63 = vadd.f32 %v15651_v3, %v7738_v41  ;;  %v11463_v49 = vor.u32 %v12275_v52, %v11462_v57 }
 0xa4a   : > { %8036 = vmatmul.bf16.gmra.mxu0 %v11455_v16  ;;  %v8087_v55 = vadd.f32 %v8086_v35, %v7998_v11 }
 0xa4e   : > { %v8167_v25 = vpop.f32.mrf.mxu3 }
 0xa4f   : > { %v15929_v19 = vadd.f32 %v8167_v25, %v8079_v32  ;;  %v7999_v30 = vpop.f32.mrf.mxu0  ;;  %v11490_v32 = vld [vmem:[#allocation3 + $0x328] sm:$0xf] }
 0xa50   : > { %v8088_v48 = vpop.f32.mrf.mxu2  ;;  %v8000_v54 = vadd.f32 %v7999_v30, %v7911_v15  ;;  %v11491_v16 = vor.u32 %v12283_v36, %v11490_v32  ;;  %v7916_v15 = vadd.f32 %v15657_v42, %v7827_v63  ;;  %v18158_v32 = vld [vmem:[#allocation196_spill] sm:$0xff]  ;;  %v18159_v36 = vld [vmem:[#allocation189_spill] sm:$0xff]  ;;  %v12284_v63 = vld [vmem:[#allocation3 + $0x350] sm:$0xf0] }
 0xa52   : > { %8298 = vmatmul.bf16.gmra.mxu1 %v11431_v20  ;;  %v8089_v37 = vadd.f32 %v8088_v48, %v8000_v54  ;;  %v11528_v48 = vld [vmem:[#allocation3 + $0x394] sm:$0xf0] }
 0xa53   : > { %8209 = vmatmul.bf16.gmra.mxu3 %v11427_v7  ;;  %v15941_v7 = vpop.f32.mrf.mxu1  ;;  %v11531_v44 = vor.u32 %v12288_v60, %v11528_v48 }
 0xa55   : > { %8130 = vmatmul.bf16.gmra.mxu2 %v11495_v46  ;;  %v11526_v46 = vld [vmem:[#allocation3 + $0x370] sm:$0xf] }
 0xa56   : > { %v8170_v24 = vpop.f32.mrf.mxu3 }
 0xa57   : > { %v15934_v26 = vadd.f32 %v8170_v24, %v8082_v51  ;;  %v8002_v40 = vpop.f32.mrf.mxu0  ;;  %v11467_v51 = vor.u32 %v12271_v22, %v11464_v0  ;;  %v12292_v24 = vld [vmem:[#allocation3 + $0x390] sm:$0xf0]  ;;  %v11500_v22 = vld [vmem:[#allocation3 + $0x354] sm:$0xf0] }
 0xa58   : > { %v8091_v35 = vpop.f32.mrf.mxu2  ;;  %v8003_v11 = vadd.f32 %v8002_v40, %v7914_v8  ;;  %v7919_v8 = vadd.f32 %v18159_v36, %v18158_v32  ;;  %v12280_v40 = vld [vmem:[#allocation3 + $0x334] sm:$0xf]  ;;  %v11527_v41 = vor.u32 %v12292_v24, %v11526_v46  ;;  %v12289_v36 = vld [vmem:[#allocation3 + $0x37c] sm:$0xf] }
 0xa59   : > { %v18164_v46 = vld [vmem:[#allocation150_spill] sm:$0xff] }
 0xa5a   : > { %8041 = vmatmul.bf16.gmra.mxu0 %v11491_v16  ;;  %v8092_v20 = vadd.f32 %v8091_v35, %v8003_v11  ;;  %v11503_v11 = vor.u32 %v12280_v40, %v11500_v22  ;;  %v11498_v16 = vld [vmem:[#allocation3 + $0x330] sm:$0xf] }
 0xa5e   : > { %v8172_v25 = vpop.f32.mrf.mxu3 }
 0xa5f   : > { %v15943_v56 = vadd.f32 %v8172_v25, %v8084_v59  ;;  %v8004_v30 = vpop.f32.mrf.mxu0  ;;  %v15948_v59 = vpop.f32.mrf.mxu1  ;;  %v11499_v25 = vor.u32 %v12284_v63, %v11498_v16  ;;  %v12293_v16 = vld [vmem:[#allocation3 + $0x398] sm:$0xf0] }
 0xa60   : > { %v8093_v47 = vpop.f32.mrf.mxu2  ;;  %v8005_v3 = vadd.f32 %v8004_v30, %v7916_v15  ;;  %v11564_v15 = vld [vmem:[#allocation3 + $0x3dc] sm:$0xf0] }
 0xa62   : > { %8303 = vmatmul.bf16.gmra.mxu1 %v11467_v51  ;;  %v8094_v50 = vadd.f32 %v8093_v47, %v8005_v3  ;;  %v12386_v47 = vld [vmem:[#allocation7 + $0x200] sm:$0xff] }
 0xa63   : > { %8214 = vmatmul.bf16.gmra.mxu3 %v11463_v49  ;;  %v12297_v49 = vld [vmem:[#allocation3 + $0x3bc] sm:$0xf]  ;;  %8341 = vmatpush.bf16.msrb.mxu0 %v12386_v47  ;;  %v12306_v47 = vld [vmem:[#allocation3 + $0x404] sm:$0xf] }
 0xa64   : > { %v11567_v60 = vor.u32 %v12297_v49, %v11564_v15 }
 0xa65   : > { %8135 = vmatmul.bf16.gmra.mxu2 %v11531_v44  ;;  %v12301_v44 = vld [vmem:[#allocation3 + $0x3d8] sm:$0xf0] }
 0xa66   : > { %v8175_v54 = vpop.f32.mrf.mxu3 }
 0xa67   : > { %v15946_v12 = vadd.f32 %v8175_v54, %v8087_v55  ;;  %v8007_v42 = vpop.f32.mrf.mxu0  ;;  %v15962_v30 = vpop.f32.mrf.mxu1  ;;  %v18163_v54 = vld [vmem:[#allocation144_spill] sm:$0xff] }
 0xa68   : > { %v15952_v0 = vpop.f32.mrf.mxu2  ;;  %v15954_v35 = vadd.f32 %v8007_v42, %v7919_v8  ;;  %v7924_v24 = vadd.f32 %v18164_v46, %v18163_v54  ;;  %v11536_v8 = vld [vmem:[#allocation3 + $0x39c] sm:$0xf0]  ;;  %v12310_v46 = vld [vmem:[#allocation3 + $0x420] sm:$0xf0] }
 0xa69   : > { %18160 = vst [vmem:[#allocation221_spill] sm:$0xff] %v15952_v0  ;;  %v11598_v54 = vld [vmem:[#allocation3 + $0x400] sm:$0xf] }
 0xa6a   : > { %8046 = vmatmul.bf16.gmra.mxu0 %v11527_v41 }
 0xa6e   : > { %v8177_v55 = vpop.f32.mrf.mxu3 }
 0xa6f   : > { %v15956_v51 = vadd.f32 %v8177_v55, %v8089_v37  ;;  %v15958_v57 = vpop.f32.mrf.mxu0  ;;  %v11562_v37 = vld [vmem:[#allocation3 + $0x3b8] sm:$0xf]  ;;  %v15972_v41 = vpop.f32.mrf.mxu1 }
 0xa70   : > { %18161 = vst [vmem:[#allocation172_spill] sm:$0xff] %v15958_v57  ;;  %v15960_v52 = vpop.f32.mrf.mxu2  ;;  %v11563_v22 = vor.u32 %v12301_v44, %v11562_v37  ;;  %v11534_v55 = vld [vmem:[#allocation3 + $0x378] sm:$0xf]  ;;  %v12320_v57 = vld [vmem:[#allocation3 + $0x470] sm:$0xf0] }
 0xa71   : > { %18162 = vst [vmem:[#allocation222_spill] sm:$0xff] %v15960_v52 }
 0xa72   : > { %8308 = vmatmul.bf16.gmra.mxu1 %v11503_v11  ;;  %v11539_v11 = vor.u32 %v12289_v36, %v11536_v8  ;;  %v12298_v8 = vld [vmem:[#allocation3 + $0x3c4] sm:$0xf] }
 0xa73   : > { %8219 = vmatmul.bf16.gmra.mxu3 %v11499_v25  ;;  %v11535_v25 = vor.u32 %v12293_v16, %v11534_v55  ;;  %v11599_v55 = vor.u32 %v12310_v46, %v11598_v54  ;;  %v11634_v54 = vld [vmem:[#allocation3 + $0x448] sm:$0xf]  ;;  %v12319_v46 = vld [vmem:[#allocation3 + $0x468] sm:$0xf0] }
 0xa75   : > { %8140 = vmatmul.bf16.gmra.mxu2 %v11567_v60  ;;  %v11600_v60 = vld [vmem:[#allocation3 + $0x424] sm:$0xf0] }
 0xa76   : > { %v8180_v48 = vpop.f32.mrf.mxu3 }
 0xa77   : > { %v15964_v3 = vadd.f32 %v8180_v48, %v8092_v20  ;;  %v8012_v32 = vpop.f32.mrf.mxu0  ;;  %v11603_v48 = vor.u32 %v12306_v47, %v11600_v60  ;;  %v15982_v44 = vpop.f32.mrf.mxu1  ;;  %v11570_v47 = vld [vmem:[#allocation3 + $0x3c0] sm:$0xf]  ;;  %v12302_v60 = vld [vmem:[#allocation3 + $0x3e0] sm:$0xf0] }
 0xa78   : > { %v15968_v42 = vpop.f32.mrf.mxu2  ;;  %v15970_v40 = vadd.f32 %v8012_v32, %v7924_v24  ;;  %v18170_v24 = vld [vmem:[#allocation205_spill] sm:$0xff] }
 0xa79   : > { %18165 = vst [vmem:[#allocation177_spill] sm:$0xff] %v15968_v42  ;;  %v11636_v42 = vld [vmem:[#allocation3 + $0x46c] sm:$0xf0] }
 0xa7a   : > { %18166 = vst [vmem:[#allocation118_spill] sm:$0xff] %v15970_v40  ;;  %8051 = vmatmul.bf16.gmra.mxu0 %v11563_v22  ;;  %v11572_v22 = vld [vmem:[#allocation3 + $0x3e4] sm:$0xf0] }
 0xa7b   : > { %v11575_v16 = vor.u32 %v12298_v8, %v11572_v22  ;;  %v18178_v8 = vld [vmem:[#allocation122_spill] sm:$0xff]  ;;  %v18179_v22 = vld [vmem:[#allocation132_spill] sm:$0xff] }
 0xa7e   : > { %v8182_v20 = vpop.f32.mrf.mxu3 }
 0xa7f   : > { %v15974_v63 = vadd.f32 %v8182_v20, %v8094_v50  ;;  %v15976_v49 = vpop.f32.mrf.mxu0  ;;  %v18171_v50 = vld [vmem:[#allocation120_spill] sm:$0xff] }
 0xa80   : > { %18167 = vst [vmem:[#allocation187_spill] sm:$0xff] %v15976_v49  ;;  %v15978_v15 = vpop.f32.mrf.mxu2  ;;  %v7929_v32 = vadd.f32 %v18171_v50, %v18170_v24  ;;  %v12315_v50 = vld [vmem:[#allocation3 + $0x44c] sm:$0xf] }
 0xa81   : > { %18168 = vst [vmem:[#allocation186_spill] sm:$0xff] %v15978_v15  ;;  %v11571_v15 = vor.u32 %v12302_v60, %v11570_v47 }
 0xa82   : > { %8313 = vmatmul.bf16.gmra.mxu1 %v11539_v11 }
 0xa83   : > { %8224 = vmatmul.bf16.gmra.mxu3 %v11535_v25 }
 0xa85   : > { %8145 = vmatmul.bf16.gmra.mxu2 %v11603_v48  ;;  %v15992_v48 = vpop.f32.mrf.mxu1 }
 0xa86   : > { %v15980_v37 = vpop.f32.mrf.mxu3 }
 0xa87   : > { %18169 = vst [vmem:[#allocation178_spill] sm:$0xff] %v15980_v37  ;;  %v8017_v36 = vpop.f32.mrf.mxu0 }
 0xa88   : > { %v15986_v11 = vpop.f32.mrf.mxu2  ;;  %v15988_v20 = vadd.f32 %v8017_v36, %v7929_v32  ;;  %v11639_v32 = vor.u32 %v12315_v50, %v11636_v42  ;;  %v11606_v50 = vld [vmem:[#allocation3 + $0x408] sm:$0xf] }
 0xa89   : > { %18172 = vst [vmem:[#allocation116_spill] sm:$0xff] %v15986_v11  ;;  %v12307_v11 = vld [vmem:[#allocation3 + $0x40c] sm:$0xf] }
 0xa8a   : > { %18173 = vst [vmem:[#allocation197_spill] sm:$0xff] %v15988_v20  ;;  %8056 = vmatmul.bf16.gmra.mxu0 %v11599_v55  ;;  %v7934_v55 = vadd.f32 %v18179_v22, %v18178_v8  ;;  %v11608_v20 = vld [vmem:[#allocation3 + $0x42c] sm:$0xf0] }
 0xa8b   : > { %v11611_v42 = vor.u32 %v12307_v11, %v11608_v20  ;;  %v18186_v11 = vld [vmem:[#allocation134_spill] sm:$0xff] }
 0xa8c   : > { %v7939_v20 = vadd.f32 %v15811_v4, %v18186_v11 }
 0xa8d   : > { %v16004_v60 = vpop.f32.mrf.mxu1 }
 0xa8e   : > { %v15990_v25 = vpop.f32.mrf.mxu3 }
 0xa8f   : > { %18174 = vst [vmem:[#allocation193_spill] sm:$0xff] %v15990_v25  ;;  %v15994_v49 = vpop.f32.mrf.mxu0 }
 0xa90   : > { %18175 = vst [vmem:[#allocation191_spill] sm:$0xff] %v15994_v49  ;;  %v15996_v24 = vpop.f32.mrf.mxu2  ;;  %v11635_v49 = vor.u32 %v12319_v46, %v11634_v54  ;;  %v12316_v54 = vld [vmem:[#allocation3 + $0x454] sm:$0xf] }
 0xa91   : > { %18176 = vst [vmem:[#allocation223_spill] sm:$0xff] %v15996_v24 }
 0xa92   : > { %8318 = vmatmul.bf16.gmra.mxu1 %v11575_v16 }
 0xa93   : > { %8229 = vmatmul.bf16.gmra.mxu3 %v11571_v15 }
 0xa95   : > { %8150 = vmatmul.bf16.gmra.mxu2 %v11639_v32  ;;  %v12311_v32 = vld [vmem:[#allocation3 + $0x428] sm:$0xf0]  ;;  %v16014_v22 = vpop.f32.mrf.mxu1 }
 0xa96   : > { %v15998_v36 = vpop.f32.mrf.mxu3 }
 0xa97   : > { %18177 = vst [vmem:[#allocation224_spill] sm:$0xff] %v15998_v36  ;;  %v8022_v16 = vpop.f32.mrf.mxu0  ;;  %v11607_v36 = vor.u32 %v12311_v32, %v11606_v50  ;;  %v18188_v50 = vld [vmem:[#allocation121_spill] sm:$0xff] }
 0xa98   : > { %v16002_v47 = vpop.f32.mrf.mxu2  ;;  %v16006_v24 = vadd.f32 %v8022_v16, %v7934_v55  ;;  %v11110_v55 = vld [vmem:[#allocation3 + $0x20] sm:$0xf]  ;;  %v12186_v16 = vld [vmem:[#allocation3 + $0x40] sm:$0xf0] }
 0xa99   : > { %18180 = vst [vmem:[#allocation225_spill] sm:$0xff] %v16002_v47 }
 0xa9a   : > { %18181 = vst [vmem:[#allocation226_spill] sm:$0xff] %v16006_v24  ;;  %8061 = vmatmul.bf16.gmra.mxu0 %v11635_v49  ;;  %v11644_v49 = vld [vmem:[#allocation3 + $0x474] sm:$0xf0] }
 0xa9d   : > { %v16025_v52 = vpop.f32.mrf.mxu1 }
 0xa9e   : > { %v16008_v15 = vpop.f32.mrf.mxu3 }
 0xa9f   : > { %18182 = vst [vmem:[#allocation227_spill] sm:$0xff] %v16008_v15  ;;  %v16010_v40 = vpop.f32.mrf.mxu0  ;;  %v11111_v15 = vor.u32 %v12186_v16, %v11110_v55  ;;  %v11146_v16 = vld [vmem:[#allocation3 + $0x68] sm:$0xf] }
 0xaa0   : > { %18183 = vst [vmem:[#allocation228_spill] sm:$0xff] %v16010_v40  ;;  %v16012_v8 = vpop.f32.mrf.mxu2 }
 0xaa1   : > { %18184 = vst [vmem:[#allocation229_spill] sm:$0xff] %v16012_v8  ;;  %v11647_v8 = vor.u32 %v12316_v54, %v11644_v49 }
 0xaa2   : > { %8323 = vmatmul.bf16.gmra.mxu1 %v11611_v42  ;;  %v18187_v42 = vld [vmem:[#allocation203_spill] sm:$0xff] }
 0xaa3   : > { %8234 = vmatmul.bf16.gmra.mxu3 %v11607_v36  ;;  %v7763_v32 = vadd.f32 %v18188_v50, %v18187_v42 }
 0xaa5   : > { %v7852_v36 = vadd.f32 %v15795_v13, %v7763_v32  ;;  %v12195_v13 = vld [vmem:[#allocation3 + $0x88] sm:$0xf0] }
 0xaa6   : > { %v16016_v47 = vpop.f32.mrf.mxu3 }
 0xaa7   : > { %18185 = vst [vmem:[#allocation230_spill] sm:$0xff] %v16016_v47  ;;  %v8027_v46 = vpop.f32.mrf.mxu0  ;;  %v11642_v47 = vld [vmem:[#allocation3 + $0x450] sm:$0xf]  ;;  %v7941_v4 = vadd.f32 %v15831_v29, %v7852_v36  ;;  %v7946_v29 = vadd.f32 %v15865_v27, %v15840_v33 }
 0xaa8   : > { %v8116_v24 = vpop.f32.mrf.mxu2  ;;  %v8028_v40 = vadd.f32 %v8027_v46, %v7939_v20  ;;  %v11643_v37 = vor.u32 %v12320_v57, %v11642_v47 }
 0xaaa   : > { %8342 = vmatmul.bf16.vlgmr.msrb.gmra.mxu0 %v11111_v15  ;;  %v7944_v15 = vadd.f32 %v15852_v38, %v15820_v10  ;;  %v8117_v32 = vadd.f32 %v8116_v24, %v8028_v40  ;;  %v11182_v10 = vld [vmem:[#allocation3 + $0xb0] sm:$0xf]  ;;  %v12204_v38 = vld [vmem:[#allocation3 + $0xd0] sm:$0xf0]  ;;  %v7951_v40 = vadd.f32 %v15876_v21, %v15867_v23  ;;  %v7956_v23 = vadd.f32 %v15884_v61, %v15874_v45 }
 0xaae   : > { %v16023_v25 = vpop.f32.mrf.mxu3 }
 0xaaf   : > { %v8029_v11 = vpop.f32.mrf.mxu0 }
 0xab0   : > { %v8118_v0 = vpop.f32.mrf.mxu2  ;;  %v8030_v42 = vadd.f32 %v8029_v11, %v7941_v4 }
 0xab2   : > { %8328 = vmatmul.bf16.gmra.mxu1 %v11647_v8  ;;  %v8119_v20 = vadd.f32 %v8118_v0, %v8030_v42  ;;  %v11147_v8 = vor.u32 %v12195_v13, %v11146_v16  ;;  %v7949_v42 = vadd.f32 %v15869_v43, %v15857_v17  ;;  %v12213_v17 = vld [vmem:[#allocation3 + $0x118] sm:$0xf0]  ;;  %v7954_v43 = vadd.f32 %v15880_v34, %v15872_v62  ;;  %v18189_v62 = vld [vmem:[#allocation218_spill] sm:$0xff] }
 0xab3   : > { %8239 = vmatmul.bf16.gmra.mxu3 %v11643_v37  ;;  %v7959_v34 = vadd.f32 %v18189_v62, %v15878_v58 }
 0xab6   : > { %v16028_v55 = vpop.f32.mrf.mxu3 }
 0xab7   : > { %v8032_v54 = vpop.f32.mrf.mxu0 }
 0xab8   : > { %v8121_v49 = vpop.f32.mrf.mxu2  ;;  %v8033_v46 = vadd.f32 %v8032_v54, %v7944_v15  ;;  %v11183_v15 = vor.u32 %v12204_v38, %v11182_v10 }
 0xaba   : > { %8347 = vmatmul.bf16.gmra.mxu0 %v11147_v8  ;;  %v8122_v57 = vadd.f32 %v8121_v49, %v8033_v46 }
 0xabe   : > { %v16032_v47 = vpop.f32.mrf.mxu3 }
 0xabf   : > { %v8034_v37 = vpop.f32.mrf.mxu0 }
 0xac0   : > { %v8123_v0 = vpop.f32.mrf.mxu2  ;;  %v8035_v50 = vadd.f32 %v8034_v37, %v7946_v29  ;;  %v11218_v37 = vld [vmem:[#allocation3 + $0xf8] sm:$0xf] }
 0xac2   : > { %v8124_v36 = vadd.f32 %v8123_v0, %v8035_v50 }
 0xac6   : > { %v8205_v4 = vpop.f32.mrf.mxu3 }
 0xac7   : > { %v16036_v11 = vadd.f32 %v8205_v4, %v8117_v32  ;;  %v8037_v16 = vpop.f32.mrf.mxu0  ;;  %v11219_v32 = vor.u32 %v12213_v17, %v11218_v37 }
 0xac8   : > { %v8038_v13 = vadd.f32 %v8037_v16, %v7949_v42  ;;  %v8126_v54 = vpop.f32.mrf.mxu2  ;;  %v11254_v42 = vld [vmem:[#allocation3 + $0x140] sm:$0xf]  ;;  %v12222_v16 = vld [vmem:[#allocation3 + $0x160] sm:$0xf0] }
 0xaca   : > { %8352 = vmatmul.bf16.gmra.mxu0 %v11183_v15  ;;  %v8127_v49 = vadd.f32 %v8126_v54, %v8038_v13  ;;  %v11255_v54 = vor.u32 %v12222_v16, %v11254_v42  ;;  %v7971_v16 = vadd.f32 %v15926_v14, %v15903_v39  ;;  %v11398_v39 = vld [vmem:[#allocation3 + $0x260] sm:$0xf]  ;;  %v12258_v14 = vld [vmem:[#allocation3 + $0x280] sm:$0xf0] }
 0xace   : > { %v8207_v33 = vpop.f32.mrf.mxu3 }
 0xacf   : > { %v16040_v27 = vadd.f32 %v8207_v33, %v8119_v20  ;;  %v8039_v24 = vpop.f32.mrf.mxu0 }
 0xad0   : > { %v16044_v46 = vadd.f32 %v8039_v24, %v7951_v40  ;;  %v11290_v40 = vld [vmem:[#allocation3 + $0x188] sm:$0xf]  ;;  %v12231_v24 = vld [vmem:[#allocation3 + $0x1a8] sm:$0xf0] }
 0xad1   : > { %v11291_v58 = vor.u32 %v12231_v24, %v11290_v40  ;;  %v8255_v24 = vadd.f32 %v15948_v59, %v15920_v6 }
 0xad6   : > { %v8210_v8 = vpop.f32.mrf.mxu3 }
 0xad7   : > { %v16046_v29 = vadd.f32 %v8210_v8, %v8122_v57  ;;  %v8042_v0 = vpop.f32.mrf.mxu0 }
 0xad8   : > { %v16050_v50 = vadd.f32 %v8042_v0, %v7954_v43  ;;  %v7966_v43 = vadd.f32 %v15906_v1, %v15890_v2  ;;  %v11362_v2 = vld [vmem:[#allocation3 + $0x218] sm:$0xf]  ;;  %v12249_v1 = vld [vmem:[#allocation3 + $0x238] sm:$0xf0] }
 0xada   : > { %8357 = vmatmul.bf16.gmra.mxu0 %v11219_v32 }
 0xade   : > { %v8212_v20 = vpop.f32.mrf.mxu3 }
 0xadf   : > { %v16052_v4 = vadd.f32 %v8212_v20, %v8124_v36  ;;  %v8044_v21 = vpop.f32.mrf.mxu0  ;;  %v18190_v36 = vld [vmem:[#allocation162_spill] sm:$0xff] }
 0xae0   : > { %v16056_v10 = vadd.f32 %v8044_v21, %v7956_v23  ;;  %v7961_v33 = vadd.f32 %v15892_v5, %v18190_v36  ;;  %v11326_v5 = vld [vmem:[#allocation3 + $0x1d0] sm:$0xf]  ;;  %v12240_v20 = vld [vmem:[#allocation3 + $0x1f0] sm:$0xf0]  ;;  %v18192_v23 = vld [vmem:[#allocation167_spill] sm:$0xff] }
 0xae1   : > { %v7969_v21 = vadd.f32 %v15917_v31, %v18192_v23  ;;  %v11363_v31 = vor.u32 %v12249_v1, %v11362_v2  ;;  %v8267_v1 = vadd.f32 %v16004_v60, %v15956_v51  ;;  %v8272_v60 = vadd.f32 %v16025_v52, %v15974_v63 }
 0xae6   : > { %v8215_v57 = vpop.f32.mrf.mxu3 }
 0xae7   : > { %v16058_v38 = vadd.f32 %v8215_v57, %v8127_v49  ;;  %v8047_v13 = vpop.f32.mrf.mxu0  ;;  %v18191_v49 = vld [vmem:[#allocation237_spill] sm:$0xff] }
 0xae8   : > { %v16062_v15 = vadd.f32 %v8047_v13, %v7959_v34  ;;  %v7964_v8 = vadd.f32 %v15901_v18, %v18191_v49  ;;  %v11327_v18 = vor.u32 %v12240_v20, %v11326_v5  ;;  %v7974_v13 = vadd.f32 %v15932_v53, %v15908_v28  ;;  %v8274_v53 = vpop.f32.mrf.mxu1 }
 0xae9   : > { %v11399_v28 = vor.u32 %v12258_v14, %v11398_v39  ;;  %v8260_v5 = vadd.f32 %v15972_v41, %v15934_v26  ;;  %v18200_v14 = vld [vmem:[#allocation233_spill] sm:$0xff] }
 0xaea   : > { %8362 = vmatmul.bf16.gmra.mxu0 %v11255_v54 }
 0xaef   : > { %v8049_v45 = vpop.f32.mrf.mxu0 }
 0xaf0   : > { %v16066_v61 = vadd.f32 %v8049_v45, %v7961_v33  ;;  %v7976_v33 = vadd.f32 %v15941_v7, %v15915_v9  ;;  %v8276_v9 = vpop.f32.mrf.mxu1  ;;  %v11434_v7 = vld [vmem:[#allocation3 + $0x2a8] sm:$0xf] }
 0xaf7   : > { %v8052_v37 = vpop.f32.mrf.mxu0 }
 0xaf8   : > { %v16070_v17 = vadd.f32 %v8052_v37, %v7964_v8  ;;  %v8257_v37 = vadd.f32 %v15962_v30, %v15929_v19  ;;  %v8279_v23 = vpop.f32.mrf.mxu1  ;;  %v11470_v30 = vld [vmem:[#allocation3 + $0x2f0] sm:$0xf] }
 0xafa   : > { %8367 = vmatmul.bf16.gmra.mxu0 %v11291_v58 }
 0xaff   : > { %v8054_v0 = vpop.f32.mrf.mxu0 }
 0xb00   : > { %v16074_v32 = vadd.f32 %v8054_v0, %v7966_v43  ;;  %v12267_v0 = vld [vmem:[#allocation3 + $0x2c8] sm:$0xf0] }
 0xb01   : > { %v11435_v59 = vor.u32 %v12267_v0, %v11434_v7 }
 0xb07   : > { %v8057_v57 = vpop.f32.mrf.mxu0 }
 0xb08   : > { %v16078_v42 = vadd.f32 %v8057_v57, %v7969_v21  ;;  %v8262_v21 = vadd.f32 %v15982_v44, %v15943_v56  ;;  %v11506_v44 = vld [vmem:[#allocation3 + $0x338] sm:$0xf] }
 0xb0a   : > { %8372 = vmatmul.bf16.gmra.mxu0 %v11327_v18  ;;  %v12276_v18 = vld [vmem:[#allocation3 + $0x310] sm:$0xf0] }
 0xb0b   : > { %v11471_v41 = vor.u32 %v12276_v18, %v11470_v30  ;;  %v11542_v30 = vld [vmem:[#allocation3 + $0x380] sm:$0xf]  ;;  %v12294_v18 = vld [vmem:[#allocation3 + $0x3a0] sm:$0xf0] }
 0xb0c   : > { %v11543_v63 = vor.u32 %v12294_v18, %v11542_v30  ;;  %v18220_v18 = vld [vmem:[#allocation186_spill] sm:$0xff] }
 0xb0f   : > { %v8059_v62 = vpop.f32.mrf.mxu0 }
 0xb10   : > { %v16082_v34 = vadd.f32 %v8059_v62, %v7971_v16  ;;  %v8265_v16 = vadd.f32 %v15992_v48, %v15946_v12  ;;  %v8281_v62 = vpop.f32.mrf.mxu1 }
 0xb17   : > { %v8062_v54 = vpop.f32.mrf.mxu0 }
 0xb18   : > { %v16086_v36 = vadd.f32 %v8062_v54, %v7974_v13  ;;  %v8284_v56 = vpop.f32.mrf.mxu1 }
 0xb1a   : > { %8377 = vmatmul.bf16.gmra.mxu0 %v11363_v31  ;;  %v12285_v31 = vld [vmem:[#allocation3 + $0x358] sm:$0xf0] }
 0xb1b   : > { %v11507_v48 = vor.u32 %v12285_v31, %v11506_v44  ;;  %v18211_v44 = vld [vmem:[#allocation117_spill] sm:$0xff]  ;;  %v18212_v31 = vld [vmem:[#allocation198_spill] sm:$0xff] }
 0xb1f   : > { %v8064_v45 = vpop.f32.mrf.mxu0 }
 0xb20   : > { %v16090_v40 = vadd.f32 %v8064_v45, %v7976_v33  ;;  %v8270_v33 = vadd.f32 %v16014_v22, %v15964_v3  ;;  %v8286_v39 = vpop.f32.mrf.mxu1  ;;  %v18205_v3 = vld [vmem:[#allocation140_spill] sm:$0xff] }
 0xb22   : > { %18193 = vst [vmem:[#allocation231_spill] sm:$0xff] %v16090_v40 }
 0xb27   : > { %v8343_v49 = vpop.f32.mrf.mxu0 }
 0xb28   : > { %v16094_v8 = vadd.f32 %v8343_v49, %v8255_v24  ;;  %v18201_v24 = vld [vmem:[#allocation184_spill] sm:$0xff] }
 0xb29   : > { %v7743_v49 = vadd.f32 %v18201_v24, %v18200_v14 }
 0xb2a   : > { %18194 = vst [vmem:[#allocation232_spill] sm:$0xff] %v16094_v8  ;;  %8382 = vmatmul.bf16.gmra.mxu0 %v11399_v28  ;;  %v18202_v28 = vld [vmem:[#allocation119_spill] sm:$0xff] }
 0xb2b   : > { %v7832_v51 = vadd.f32 %v18202_v28, %v7743_v49  ;;  %v18214_v28 = vld [vmem:[#allocation118_spill] sm:$0xff] }
 0xb2d   : > { %v7921_v22 = vadd.f32 %v18205_v3, %v7832_v51  ;;  %v18215_v51 = vld [vmem:[#allocation177_spill] sm:$0xff] }
 0xb2f   : > { %v8345_v58 = vpop.f32.mrf.mxu0 }
 0xb30   : > { %v16098_v43 = vadd.f32 %v8345_v58, %v8257_v37  ;;  %v18203_v58 = vld [vmem:[#allocation221_spill] sm:$0xff] }
 0xb31   : > { %v8097_v7 = vadd.f32 %v18203_v58, %v15954_v35 }
 0xb32   : > { %18195 = vst [vmem:[#allocation234_spill] sm:$0xff] %v16098_v43 }
 0xb37   : > { %v8348_v20 = vpop.f32.mrf.mxu0 }
 0xb38   : > { %v16102_v6 = vadd.f32 %v8348_v20, %v8260_v5  ;;  %v18206_v5 = vld [vmem:[#allocation178_spill] sm:$0xff] }
 0xb39   : > { %v8186_v20 = vadd.f32 %v18206_v5, %v8097_v7  ;;  %v18218_v7 = vld [vmem:[#allocation224_spill] sm:$0xff] }
 0xb3a   : > { %18196 = vst [vmem:[#allocation235_spill] sm:$0xff] %v16102_v6  ;;  %8387 = vmatmul.bf16.gmra.mxu0 %v11435_v59  ;;  %v18207_v59 = vld [vmem:[#allocation172_spill] sm:$0xff] }
 0xb3f   : > { %v8350_v57 = vpop.f32.mrf.mxu0 }
 0xb40   : > { %v16106_v19 = vadd.f32 %v8350_v57, %v8262_v21  ;;  %v8010_v21 = vadd.f32 %v18207_v59, %v7921_v22  ;;  %v8289_v57 = vpop.f32.mrf.mxu1  ;;  %v18219_v22 = vld [vmem:[#allocation187_spill] sm:$0xff]  ;;  %v12303_v59 = vld [vmem:[#allocation3 + $0x3e8] sm:$0xf0] }
 0xb42   : > { %18197 = vst [vmem:[#allocation236_spill] sm:$0xff] %v16106_v19 }
 0xb47   : > { %v8353_v2 = vpop.f32.mrf.mxu0 }
 0xb48   : > { %v16110_v26 = vadd.f32 %v8353_v2, %v8265_v16  ;;  %v8275_v16 = vadd.f32 %v8274_v53, %v8186_v20  ;;  %v8291_v24 = vpop.f32.mrf.mxu1  ;;  %v8102_v53 = vadd.f32 %v18215_v51, %v18214_v28  ;;  %v11578_v20 = vld [vmem:[#allocation3 + $0x3c8] sm:$0xf]  ;;  %v18228_v51 = vld [vmem:[#allocation126_spill] sm:$0xff] }
 0xb4a   : > { %18198 = vst [vmem:[#allocation20_spill] sm:$0xff] %v16110_v26  ;;  %8392 = vmatmul.bf16.gmra.mxu0 %v11471_v41  ;;  %v18208_v41 = vld [vmem:[#allocation222_spill] sm:$0xff]  ;;  %v8191_v3 = vadd.f32 %v18218_v7, %v8102_v53 }
 0xb4f   : > { %v8355_v13 = vpop.f32.mrf.mxu0 }
 0xb50   : > { %v16114_v54 = vadd.f32 %v8355_v13, %v8267_v1  ;;  %v8099_v1 = vadd.f32 %v18208_v41, %v8010_v21  ;;  %v18210_v13 = vld [vmem:[#allocation193_spill] sm:$0xff]  ;;  %v8280_v21 = vadd.f32 %v8279_v23, %v8191_v3  ;;  %v8294_v41 = vpop.f32.mrf.mxu1  ;;  %v18230_v3 = vld [vmem:[#allocation191_spill] sm:$0xff] }
 0xb52   : > { %18199 = vst [vmem:[#allocation24_spill] sm:$0xff] %v16114_v54  ;;  %v8188_v35 = vadd.f32 %v18210_v13, %v8099_v1  ;;  %v18222_v1 = vld [vmem:[#allocation227_spill] sm:$0xff]  ;;  %v18223_v13 = vld [vmem:[#allocation201_spill] sm:$0xff] }
 0xb54   : > { %v8277_v14 = vadd.f32 %v8276_v9, %v8188_v35  ;;  %v18224_v35 = vld [vmem:[#allocation138_spill] sm:$0xff] }
 0xb57   : > { %v8358_v45 = vpop.f32.mrf.mxu0 }
 0xb58   : > { %v16118_v12 = vadd.f32 %v8358_v45, %v8270_v33  ;;  %v7748_v33 = vadd.f32 %v18212_v31, %v18211_v44  ;;  %v18213_v45 = vld [vmem:[#allocation146_spill] sm:$0xff]  ;;  %v7753_v44 = vadd.f32 %v18224_v35, %v18223_v13  ;;  %v18225_v31 = vld [vmem:[#allocation195_spill] sm:$0xff]  ;;  %v8296_v7 = vpop.f32.mrf.mxu1 }
 0xb5a   : > { %8397 = vmatmul.bf16.gmra.mxu0 %v11507_v48  ;;  %v7837_v48 = vadd.f32 %v18213_v45, %v7748_v33  ;;  %v7842_v33 = vadd.f32 %v18225_v31, %v7753_v44  ;;  %v18235_v44 = vld [vmem:[#allocation128_spill] sm:$0xff] }
 0xb5c   : > { %v7931_v53 = vadd.f32 %v18228_v51, %v7842_v33 }
 0xb5f   : > { %v8360_v37 = vpop.f32.mrf.mxu0 }
 0xb60   : > { %v16127_v0 = vadd.f32 %v8360_v37, %v8272_v60  ;;  %v18217_v37 = vld [vmem:[#allocation215_spill] sm:$0xff]  ;;  %v8299_v35 = vpop.f32.mrf.mxu1 }
 0xb61   : > { %v7926_v58 = vadd.f32 %v18217_v37, %v7837_v48  ;;  %v18229_v37 = vld [vmem:[#allocation230_spill] sm:$0xff] }
 0xb62   : > { %18204 = vst [vmem:[#allocation68_spill] sm:$0xff] %v16127_v0 }
 0xb63   : > { %v8015_v5 = vadd.f32 %v18219_v22, %v7926_v58  ;;  %v8020_v22 = vadd.f32 %v18230_v3, %v7931_v53  ;;  %v12321_v3 = vld [vmem:[#allocation3 + $0x478] sm:$0xf0] }
 0xb67   : > { %v8363_v2 = vpop.f32.mrf.mxu0 }
 0xb68   : > { %v16133_v52 = vadd.f32 %v8363_v2, %v8275_v16  ;;  %v8104_v16 = vadd.f32 %v18220_v18, %v8015_v5  ;;  %v11579_v2 = vor.u32 %v12303_v59, %v11578_v20  ;;  %v11614_v5 = vld [vmem:[#allocation3 + $0x410] sm:$0xf]  ;;  %v12312_v20 = vld [vmem:[#allocation3 + $0x430] sm:$0xf0] }
 0xb6a   : > { %18209 = vst [vmem:[#allocation16_spill] sm:$0xff] %v16133_v52  ;;  %8402 = vmatmul.bf16.gmra.mxu0 %v11543_v63  ;;  %v8193_v63 = vadd.f32 %v18222_v1, %v8104_v16  ;;  %v11615_v16 = vor.u32 %v12312_v20, %v11614_v5  ;;  %v18233_v1 = vld [vmem:[#allocation152_spill] sm:$0xff]  ;;  %v8301_v5 = vpop.f32.mrf.mxu1 }
 0xb6c   : > { %v8282_v45 = vadd.f32 %v8281_v62, %v8193_v63  ;;  %v18234_v63 = vld [vmem:[#allocation209_spill] sm:$0xff] }
 0xb6d   : > { %v7758_v13 = vadd.f32 %v18234_v63, %v18233_v1 }
 0xb6f   : > { %v8365_v49 = vpop.f32.mrf.mxu0  ;;  %v7847_v31 = vadd.f32 %v18235_v44, %v7758_v13  ;;  %v8295_v13 = vadd.f32 %v8294_v41, %v16036_v11  ;;  %v8302_v11 = vadd.f32 %v8301_v5, %v16052_v4 }
 0xb70   : > { %v16141_v60 = vadd.f32 %v8365_v49, %v8277_v14  ;;  %v18226_v14 = vld [vmem:[#allocation197_spill] sm:$0xff]  ;;  %v18227_v49 = vld [vmem:[#allocation116_spill] sm:$0xff] }
 0xb71   : > { %v8107_v23 = vadd.f32 %v18227_v49, %v18226_v14  ;;  %v18237_v14 = vld [vmem:[#allocation225_spill] sm:$0xff] }
 0xb72   : > { %18216 = vst [vmem:[#allocation17_spill] sm:$0xff] %v16141_v60 }
 0xb73   : > { %v8196_v58 = vadd.f32 %v18229_v37, %v8107_v23  ;;  %v18239_v23 = vld [vmem:[#allocation157_spill] sm:$0xff]  ;;  %v18240_v37 = vld [vmem:[#allocation228_spill] sm:$0xff] }
 0xb74   : > { %v7936_v51 = vadd.f32 %v18239_v23, %v7847_v31  ;;  %v8297_v31 = vadd.f32 %v8296_v7, %v16040_v27 }
 0xb75   : > { %v8285_v59 = vadd.f32 %v8284_v56, %v8196_v58  ;;  %v11650_v58 = vld [vmem:[#allocation3 + $0x458] sm:$0xf] }
 0xb77   : > { %v8368_v30 = vpop.f32.mrf.mxu0 }
 0xb78   : > { %v16147_v9 = vadd.f32 %v8368_v30, %v8280_v21  ;;  %v18231_v30 = vld [vmem:[#allocation223_spill] sm:$0xff] }
 0xb79   : > { %v8109_v18 = vadd.f32 %v18231_v30, %v8020_v22  ;;  %v11651_v30 = vor.u32 %v12321_v3, %v11650_v58 }
 0xb7a   : > { %18221 = vst [vmem:[#allocation66_spill] sm:$0xff] %v16147_v9  ;;  %8407 = vmatmul.bf16.gmra.mxu0 %v11579_v2 }
 0xb7b   : > { %v8198_v2 = vadd.f32 %v16023_v25, %v8109_v18  ;;  %v8025_v25 = vadd.f32 %v18240_v37, %v7936_v51 }
 0xb7d   : > { %v8287_v33 = vadd.f32 %v8286_v39, %v8198_v2 }
 0xb7f   : > { %v8370_v48 = vpop.f32.mrf.mxu0 }
 0xb80   : > { %v16155_v28 = vadd.f32 %v8370_v48, %v8282_v45  ;;  %v18236_v48 = vld [vmem:[#allocation226_spill] sm:$0xff] }
 0xb81   : > { %v8112_v56 = vadd.f32 %v18237_v14, %v18236_v48  ;;  %v8128_v48 = vpop.f32.mrf.mxu2 }
 0xb83   : > { %v8201_v53 = vadd.f32 %v16028_v55, %v8112_v56  ;;  %v8304_v55 = vpop.f32.mrf.mxu1 }
 0xb84   : > { %v8305_v63 = vadd.f32 %v8304_v55, %v16058_v38 }
 0xb85   : > { %v8290_v22 = vadd.f32 %v8289_v57, %v8201_v53 }
 0xb87   : > { %v8373_v21 = vpop.f32.mrf.mxu0 }
 0xb88   : > { %v16161_v62 = vadd.f32 %v8373_v21, %v8285_v59  ;;  %v18241_v59 = vld [vmem:[#allocation229_spill] sm:$0xff] }
 0xb89   : > { %v8114_v21 = vadd.f32 %v18241_v59, %v8025_v25  ;;  %v8131_v51 = vpop.f32.mrf.mxu2 }
 0xb8a   : > { %18232 = vst [vmem:[#allocation55_spill] sm:$0xff] %v16161_v62  ;;  %8412 = vmatmul.bf16.gmra.mxu0 %v11615_v16 }
 0xb8b   : > { %v8203_v18 = vadd.f32 %v16032_v47, %v8114_v21  ;;  %v8217_v47 = vpop.f32.mrf.mxu3  ;;  %v8306_v23 = vpop.f32.mrf.mxu1 }
 0xb8d   : > { %v8292_v16 = vadd.f32 %v8291_v24, %v8203_v18  ;;  %v8300_v24 = vadd.f32 %v8299_v35, %v16046_v29 }
 0xb8f   : > { %v8375_v45 = vpop.f32.mrf.mxu0 }
 0xb90   : > { %v16169_v49 = vadd.f32 %v8375_v45, %v8287_v33 }
 0xb91   : > { %v8133_v27 = vpop.f32.mrf.mxu2 }
 0xb92   : > { %18238 = vst [vmem:[#allocation33_spill] sm:$0xff] %v16169_v49 }
 0xb93   : > { %v8220_v38 = vpop.f32.mrf.mxu3  ;;  %v8309_v37 = vpop.f32.mrf.mxu1 }
 0xb97   : > { %v8378_v20 = vpop.f32.mrf.mxu0 }
 0xb98   : > { %v16175_v39 = vadd.f32 %v8378_v20, %v8290_v22 }
 0xb99   : > { %v8136_v35 = vpop.f32.mrf.mxu2 }
 0xb9a   : > { %18242 = vst [vmem:[#allocation29_spill] sm:$0xff] %v16175_v39  ;;  %8417 = vmatmul.bf16.gmra.mxu0 %v11651_v30 }
 0xb9b   : > { %v8222_v7 = vpop.f32.mrf.mxu3  ;;  %v16195_v3 = vpop.f32.mrf.mxu1 }
 0xb9f   : > { %v8380_v2 = vpop.f32.mrf.mxu0 }
 0xba0   : > { %v16178_v1 = vadd.f32 %v8380_v2, %v8292_v16  ;;  %v8423_v2 = vadd.f32 %v16098_v43, %v16094_v8 }
 0xba1   : > { %v8138_v21 = vpop.f32.mrf.mxu2 }
 0xba2   : > { %18243 = vst [vmem:[#allocation69_spill] sm:$0xff] %v16178_v1 }
 0xba3   : > { %v8225_v22 = vpop.f32.mrf.mxu3  ;;  %v16197_v20 = vpop.f32.mrf.mxu1 }
 0xba7   : > { %v8383_v57 = vpop.f32.mrf.mxu0 }
 0xba8   : > { %v16182_v44 = vadd.f32 %v8383_v57, %v8295_v13 }
 0xba9   : > { %v8141_v18 = vpop.f32.mrf.mxu2 }
 0xbab   : > { %v8227_v30 = vpop.f32.mrf.mxu3  ;;  %v16199_v5 = vpop.f32.mrf.mxu1 }
 0xbaf   : > { %v8385_v33 = vpop.f32.mrf.mxu0 }
 0xbb0   : > { %v16185_v45 = vadd.f32 %v8385_v33, %v8297_v31 }
 0xbb1   : > { %v8143_v33 = vpop.f32.mrf.mxu2 }
 0xbb3   : > { %v8230_v16 = vpop.f32.mrf.mxu3  ;;  %v16205_v57 = vpop.f32.mrf.mxu1 }
 0xbb7   : > { %v8388_v14 = vpop.f32.mrf.mxu0 }
 0xbb8   : > { %v16188_v56 = vadd.f32 %v8388_v14, %v8300_v24 }
 0xbbb   : > { %v8232_v14 = vpop.f32.mrf.mxu3  ;;  %v8321_v8 = vpop.f32.mrf.mxu1 }
 0xbbf   : > { %v8390_v41 = vpop.f32.mrf.mxu0 }
 0xbc0   : > { %v16191_v53 = vadd.f32 %v8390_v41, %v8302_v11 }
 0xbc3   : > { %v8235_v40 = vpop.f32.mrf.mxu3 }
 0xbc7   : > { %v8393_v25 = vpop.f32.mrf.mxu0 }
 0xbc8   : > { %v16193_v58 = vadd.f32 %v8393_v25, %v8305_v63  ;;  %v8424_v63 = vadd.f32 %v8423_v2, %v16102_v6 }
 0xbca   : > { %v8425_v13 = vadd.f32 %v8424_v63, %v16106_v19  ;;  %v8146_v63 = vpop.f32.mrf.mxu2 }
 0xbcc   : > { %v8426_v31 = vadd.f32 %v8425_v13, %v16110_v26  ;;  %v8324_v26 = vpop.f32.mrf.mxu1 }
 0xbce   : > { %v8427_v24 = vadd.f32 %v8426_v31, %v16114_v54 }
 0xbcf   : > { %v8395_v29 = vpop.f32.mrf.mxu0 }
 0xbd0   : > { %v8428_v41 = vadd.f32 %v8427_v24, %v16118_v12 }
 0xbd2   : > { %v8429_v25 = vadd.f32 %v8428_v41, %v16127_v0  ;;  %v8132_v0 = vadd.f32 %v8131_v51, %v16050_v50 }
 0xbd4   : > { %v8430_v43 = vadd.f32 %v8429_v25, %v16133_v52  ;;  %v8129_v25 = vadd.f32 %v8128_v48, %v16044_v46  ;;  %v8148_v52 = vpop.f32.mrf.mxu2 }
 0xbd6   : > { %v8431_v2 = vadd.f32 %v8430_v43, %v16141_v60  ;;  %v8237_v60 = vpop.f32.mrf.mxu3 }
 0xbd7   : > { %v8398_v59 = vpop.f32.mrf.mxu0 }
 0xbd8   : > { %v8432_v19 = vadd.f32 %v8431_v2, %v16147_v9  ;;  %v8218_v2 = vadd.f32 %v8217_v47, %v8129_v25 }
 0xbda   : > { %v8433_v13 = vadd.f32 %v8432_v19, %v16155_v28  ;;  %v8134_v19 = vadd.f32 %v8133_v27, %v16056_v10  ;;  %v8307_v48 = vadd.f32 %v8306_v23, %v8218_v2  ;;  %v8142_v10 = vadd.f32 %v8141_v18, %v16070_v17 }
 0xbdb   : > { %v8144_v23 = vadd.f32 %v8143_v33, %v16074_v32  ;;  %v8147_v17 = vadd.f32 %v8146_v63, %v16078_v42  ;;  %v8149_v32 = vadd.f32 %v8148_v52, %v16082_v34 }
 0xbdc   : > { %v8434_v31 = vadd.f32 %v8433_v13, %v16161_v62  ;;  %v8221_v13 = vadd.f32 %v8220_v38, %v8132_v0  ;;  %v8137_v62 = vadd.f32 %v8136_v35, %v16062_v15  ;;  %v16228_v47 = vadd.f32 %v8395_v29, %v8307_v48 }
 0xbdd   : > { %v8236_v18 = vadd.f32 %v8235_v40, %v8147_v17 }
 0xbde   : > { %v8435_v54 = vadd.f32 %v8434_v31, %v16169_v49  ;;  %v8310_v51 = vadd.f32 %v8309_v37, %v8221_v13 }
 0xbdf   : > { %v8400_v4 = vpop.f32.mrf.mxu0  ;;  %v8325_v40 = vadd.f32 %v8324_v26, %v8236_v18  ;;  %v18253_v18 = vld [vmem:[#allocation151_spill] sm:$0xff] }
 0xbe0   : > { %v8436_v41 = vadd.f32 %v8435_v54, %v16175_v39  ;;  %v8223_v54 = vadd.f32 %v8222_v7, %v8134_v19  ;;  %v8226_v39 = vadd.f32 %v8225_v22, %v8137_v62  ;;  %v16232_v15 = vadd.f32 %v8398_v59, %v8310_v51 }
 0xbe1   : > { %v8231_v7 = vadd.f32 %v8230_v16, %v8142_v10  ;;  %v8233_v22 = vadd.f32 %v8232_v14, %v8144_v23 }
 0xbe2   : > { %v8437_v43 = vadd.f32 %v8436_v41, %v16178_v1  ;;  %v8139_v41 = vadd.f32 %v8138_v21, %v16066_v61  ;;  %v8326_v1 = vpop.f32.mrf.mxu1  ;;  %v8312_v27 = vadd.f32 %v16195_v3, %v8223_v54  ;;  %v8240_v61 = vpop.f32.mrf.mxu3  ;;  %v8315_v37 = vadd.f32 %v16197_v20, %v8226_v39 }
 0xbe3   : > { %v8320_v39 = vadd.f32 %v16205_v57, %v8231_v7  ;;  %v8238_v20 = vadd.f32 %v8237_v60, %v8149_v32  ;;  %v18251_v32 = vld [vmem:[#allocation180_spill] sm:$0xff] }
 0xbe4   : > { %v8438_v9 = vadd.f32 %v8437_v43, %v16182_v44  ;;  %v8228_v0 = vadd.f32 %v8227_v30, %v8139_v41  ;;  %v16237_v35 = vadd.f32 %v8400_v4, %v8312_v27  ;;  %v18244_v43 = vld [vmem:[#allocation231_spill] sm:$0xff] }
 0xbe5   : > { %v8327_v60 = vadd.f32 %v8326_v1, %v8238_v20  ;;  %v18257_v20 = vld [vmem:[#allocation171_spill] sm:$0xff] }
 0xbe6   : > { %v8439_v31 = vadd.f32 %v8438_v9, %v16185_v45  ;;  %v8151_v9 = vpop.f32.mrf.mxu2  ;;  %v8317_v3 = vadd.f32 %v16199_v5, %v8228_v0 }
 0xbe7   : > { %v8403_v55 = vpop.f32.mrf.mxu0  ;;  %v8152_v42 = vadd.f32 %v8151_v9, %v16086_v36 }
 0xbe8   : > { %v8440_v46 = vadd.f32 %v8439_v31, %v16188_v56  ;;  %v16242_v59 = vadd.f32 %v8403_v55, %v8315_v37  ;;  %v8322_v55 = vadd.f32 %v8321_v8, %v8233_v22  ;;  %v18248_v22 = vld [vmem:[#allocation127_spill] sm:$0xff] }
 0xbe9   : > { %v8241_v5 = vadd.f32 %v8240_v61, %v8152_v42  ;;  %v18245_v61 = vld [vmem:[#allocation115_spill] sm:$0xff]  ;;  %v18256_v42 = vld [vmem:[#allocation166_spill] sm:$0xff] }
 0xbea   : > { %v8441_v50 = vadd.f32 %v8440_v46, %v16191_v53  ;;  %v8329_v30 = vpop.f32.mrf.mxu1  ;;  %v8242_v25 = vpop.f32.mrf.mxu3 }
 0xbeb   : > { %v8330_v19 = vadd.f32 %v8329_v30, %v8241_v5  ;;  %v18252_v30 = vld [vmem:[#allocation145_spill] sm:$0xff]  ;;  %v18261_v5 = vld [vmem:[#allocation204_spill] sm:$0xff] }
 0xbec   : > { %v8442_v38 = vadd.f32 %v8441_v50, %v16193_v58 }
 0xbee   : > { %v8443_v62 = vadd.f32 %v8442_v38, %v16228_v47  ;;  %v8153_v63 = vpop.f32.mrf.mxu2 }
 0xbef   : > { %v8405_v11 = vpop.f32.mrf.mxu0  ;;  %v8154_v2 = vadd.f32 %v8153_v63, %v18244_v43  ;;  %v18260_v63 = vld [vmem:[#allocation194_spill] sm:$0xff] }
 0xbf0   : > { %v8444_v21 = vadd.f32 %v8443_v62, %v16232_v15  ;;  %v16247_v4 = vadd.f32 %v8405_v11, %v8317_v3  ;;  %v18246_v62 = vld [vmem:[#allocation182_spill] sm:$0xff]  ;;  %v18250_v3 = vld [vmem:[#allocation139_spill] sm:$0xff] }
 0xbf2   : > { %v8445_v16 = vadd.f32 %v8444_v21, %v16237_v35  ;;  %v8331_v31 = vpop.f32.mrf.mxu1  ;;  %v18249_v21 = vld [vmem:[#allocation133_spill] sm:$0xff] }
 0xbf4   : > { %v8446_v33 = vadd.f32 %v8445_v16, %v16242_v59  ;;  %v18254_v16 = vld [vmem:[#allocation156_spill] sm:$0xff] }
 0xbf6   : > { %v8447_v34 = vadd.f32 %v8446_v33, %v16247_v4  ;;  %v18258_v33 = vld [vmem:[#allocation176_spill] sm:$0xff] }
 0xbf7   : > { %v8408_v6 = vpop.f32.mrf.mxu0 }
 0xbf8   : > { %v16252_v14 = vadd.f32 %v8408_v6, %v8320_v39  ;;  %v8243_v6 = vadd.f32 %v8242_v25, %v8154_v2  ;;  %v18255_v39 = vld [vmem:[#allocation161_spill] sm:$0xff]  ;;  %v18264_v25 = vld [vmem:[#allocation220_spill] sm:$0xff] }
 0xbfa   : > { %v8448_v57 = vadd.f32 %v8447_v34, %v16252_v14  ;;  %v8332_v26 = vadd.f32 %v8331_v31, %v8243_v6  ;;  %v18262_v34 = vld [vmem:[#allocation211_spill] sm:$0xff] }
 0xbff   : > { %v8410_v24 = vpop.f32.mrf.mxu0 }
 0xc00   : > { %v16255_v52 = vadd.f32 %v8410_v24, %v8322_v55  ;;  %v18259_v55 = vld [vmem:[#allocation185_spill] sm:$0xff] }
 0xc02   : > { %v8449_v8 = vadd.f32 %v8448_v57, %v16255_v52 }
 0xc07   : > { %v8413_v49 = vpop.f32.mrf.mxu0 }
 0xc08   : > { %v16259_v36 = vadd.f32 %v8413_v49, %v8325_v40  ;;  %v18263_v40 = vld [vmem:[#allocation219_spill] sm:$0xff] }
 0xc0a   : > { %v8450_v24 = vadd.f32 %v8449_v8, %v16259_v36 }
 0xc0f   : > { %v8415_v29 = vpop.f32.mrf.mxu0 }
 0xc10   : > { %v16262_v13 = vadd.f32 %v8415_v29, %v8327_v60  ;;  %v18247_v29 = vld [vmem:[#allocation114_spill] sm:$0xff] }
 0xc12   : > { %v8451_v46 = vadd.f32 %v8450_v24, %v16262_v13 }
 0xc17   : > { %v8418_v11 = vpop.f32.mrf.mxu0 }
 0xc18   : > { %v16265_v54 = vadd.f32 %v8418_v11, %v8330_v19 }
 0xc1a   : > { %v8452_v41 = vadd.f32 %v8451_v46, %v16265_v54 }
 0xc1f   : > { %v8420_v48 = vpop.f32.mrf.mxu0 }
 0xc20   : > { %v16269_v49 = vadd.f32 %v8420_v48, %v8332_v26 }
 0xc22   : > { %v8453_v1 = vadd.f32 %v8452_v41, %v16269_v49 }
 0xc24   : > { %v8454_v50 = vrot.slane %v8453_v1, 4 }
 0xc26   : > { %v8455_v51 = vadd.f32 %v8454_v50, %v8453_v1  ;;  %v18265_v50 = vld [vmem:[#allocation123_spill] sm:$0xff] }
 0xc28   : > { %v8456_v10 = vrot.slane %v8455_v51, 2 }
 0xc2a   : > { %v8457_v0 = vadd.f32 %v8456_v10, %v8455_v51  ;;  %v18266_v51 = vld [vmem:[#allocation125_spill] sm:$0xff] }
 0xc2c   : > { %v8458_v9 = vrot.slane %v8457_v0, 1 }
 0xc2e   : > { %v8459_v38 = vadd.f32 %v8458_v9, %v8457_v0  ;;  %v18267_v0 = vld [vmem:[#allocation129_spill] sm:$0xff]  ;;  %v18268_v9 = vld [vmem:[#allocation131_spill] sm:$0xff] }
 0xc30   : > { %v8492_v27 = vand.u32 4294901760, %v8459_v38 }
 0xc32   : > { %v8493_v23 = vsub.f32 %v8459_v38, %v8492_v27  ;;  %8598 = vmatmul.f32.vlgmr.msrb.gmra.mxu3 %v8492_v27 }
 0xc33   : > { %8851 = vmatpush.msrb.mxu3 %v18245_v61 }
 0xc34   : > { %8652 = vmatmul.f32.vlgmr.msra.gmra.mxu1 %v8493_v23  ;;  %v8494_v7 = vand.u32 4294901760, %v8493_v23 }
 0xc35   : > { %8923 = vmatpush.msra.mxu1 %v18246_v62 }
 0xc36   : > { %v8495_v37 = vsub.f32 %v8493_v23, %v8494_v7  ;;  %v18270_v23 = vld [vmem:[#allocation137_spill] sm:$0xff] }
 0xc38   : > { %v8496_v17 = vand.u32 4294901760, %v8495_v37  ;;  %v18271_v37 = vld [vmem:[#allocation141_spill] sm:$0xff] }
 0xc3a   : > { %8497 = vmatmul.f32.vlgmr.msra.gmra.mxu2 %v8496_v17  ;;  %8760 = vmatmul.f32.vlgmr.msra.gmra.mxu3 %v8492_v27  ;;  %v18272_v17 = vld [vmem:[#allocation143_spill] sm:$0xff] }
 0xc3b   : > { %8821 = vmatpush.msra.mxu2 %v18247_v29  ;;  %8897 = vmatpush.msra.mxu3 %v18247_v29 }
 0xc3c   : > { %8797 = vmatmul.f32.vlgmr.msrb.gmra.mxu1 %v8492_v27  ;;  %v18269_v27 = vld [vmem:[#allocation135_spill] sm:$0xff] }
 0xc3d   : > { %9099 = vmatpush.msrb.mxu1 %v18248_v22  ;;  %v18273_v22 = vld [vmem:[#allocation147_spill] sm:$0xff] }
 0xc3f   : > { %9105 = vmatpush.msrb.mxu1 %v18249_v21  ;;  %v18274_v21 = vld [vmem:[#allocation149_spill] sm:$0xff] }
 0xc41   : > { %9111 = vmatpush.msrb.mxu1 %v18250_v3  ;;  %v18275_v3 = vld [vmem:[#allocation153_spill] sm:$0xff] }
 0xc42   : > { %8691 = vmatmul.f32.vlgmr.msrb.gmra.mxu2 %v8494_v7 }
 0xc43   : > { %8874 = vmatpush.msrb.mxu2 %v18251_v32  ;;  %9117 = vmatpush.msrb.mxu1 %v18252_v30  ;;  %v18276_v30 = vld [vmem:[#allocation155_spill] sm:$0xff] }
 0xc45   : > { %9123 = vmatpush.msrb.mxu1 %v18253_v18  ;;  %v18277_v18 = vld [vmem:[#allocation158_spill] sm:$0xff] }
 0xc47   : > { %9129 = vmatpush.msrb.mxu1 %v18254_v16  ;;  %v18278_v16 = vld [vmem:[#allocation160_spill] sm:$0xff] }
 0xc49   : > { %9135 = vmatpush.msrb.mxu1 %v18255_v39  ;;  %v18279_v39 = vld [vmem:[#allocation163_spill] sm:$0xff] }
 0xc4b   : > { %9141 = vmatpush.msrb.mxu1 %v18256_v42  ;;  %v18280_v42 = vld [vmem:[#allocation165_spill] sm:$0xff] }
 0xc4d   : > { %9147 = vmatpush.msrb.mxu1 %v18257_v20  ;;  %v18281_v20 = vld [vmem:[#allocation124_spill] sm:$0xff] }
 0xc4f   : > { %9153 = vmatpush.msrb.mxu1 %v18258_v33  ;;  %v18282_v33 = vld [vmem:[#allocation168_spill] sm:$0xff] }
 0xc51   : > { %9159 = vmatpush.msrb.mxu1 %v18259_v55  ;;  %v18283_v55 = vld [vmem:[#allocation170_spill] sm:$0xff] }
 0xc53   : > { %9165 = vmatpush.msrb.mxu1 %v18260_v63  ;;  %v18284_v63 = vld [vmem:[#allocation130_spill] sm:$0xff] }
 0xc55   : > { %9171 = vmatpush.msrb.mxu1 %v18261_v5  ;;  %v18285_v5 = vld [vmem:[#allocation173_spill] sm:$0xff] }
 0xc57   : > { %9177 = vmatpush.msrb.mxu1 %v18262_v34  ;;  %v18286_v34 = vld [vmem:[#allocation175_spill] sm:$0xff] }
 0xc59   : > { %9183 = vmatpush.msrb.mxu1 %v18263_v40  ;;  %v18287_v40 = vld [vmem:[#allocation136_spill] sm:$0xff] }
 0xc5b   : > { %9189 = vmatpush.msrb.mxu1 %v18264_v25  ;;  %v18288_v25 = vld [vmem:[#allocation179_spill] sm:$0xff] }
 0xcb1   : > { %v8653_v2 = vpop.f32.mrf.mxu1 }
 0xcb5   : > { %v8599_v11 = vpop.f32.mrf.mxu3 }
 0xcb9   : > { %v8798_v24 = vpop.f32.mrf.mxu1 }
 0xcbd   : > { %v8498_v43 = vpop.f32.mrf.mxu2  ;;  %v8761_v8 = vpop.f32.mrf.mxu3 }
 0xcbe   : > { %v8600_v57 = vadd.f32 %v8599_v11, %v8498_v43  ;;  %v18289_v11 = vld [vmem:[#allocation183_spill] sm:$0xff]  ;;  %v18290_v43 = vld [vmem:[#allocation142_spill] sm:$0xff] }
 0xcc0   : > { %v8654_v60 = vadd.f32 %v8653_v2, %v8600_v57  ;;  %v18291_v2 = vld [vmem:[#allocation188_spill] sm:$0xff] }
 0xcc1   : > { %v18292_v57 = vld [vmem:[#allocation192_spill] sm:$0xff] }
 0xcc5   : > { %v8692_v19 = vpop.f32.mrf.mxu2 }
 0xcc6   : > { %v8693_v6 = vadd.f32 %v8692_v19, %v8654_v60  ;;  %v18293_v60 = vld [vmem:[#allocation148_spill] sm:$0xff]  ;;  %v18294_v19 = vld [vmem:[#allocation199_spill] sm:$0xff] }
 0xcc8   : > { %v8762_v31 = vadd.f32 %v8761_v8, %v8693_v6  ;;  %v18295_v6 = vld [vmem:[#allocation202_spill] sm:$0xff] }
 0xcc9   : > { %v18296_v8 = vld [vmem:[#allocation154_spill] sm:$0xff] }
 0xcca   : > { %v8799_v26 = vadd.f32 %v8798_v24, %v8762_v31  ;;  %v18297_v31 = vld [vmem:[#allocation206_spill] sm:$0xff]  ;;  %v18298_v24 = vld [vmem:[#allocation208_spill] sm:$0xff] }
 0xccc   : > { %v8801_v46 = vmul.f32 0.00390625, %v8799_v26  ;;  %v18299_v26 = vld [vmem:[#allocation159_spill] sm:$0xff] }
 0xcce   : > { %v8803_v48 = vsel %vm4359_vm2, %v8801_v46, 0  ;;  %v18300_v46 = vld [vmem:[#allocation210_spill] sm:$0xff] }
 0xccf   : > { %v8822_v41 = vand.u32 4294901760, %v8803_v48 }
 0xcd1   : > { %v8823_v1 = vsub.f32 %v8803_v48, %v8822_v41  ;;  %8853 = vmatmul.f32.vlgmr.msrb.gmra.mxu3 %v8822_v41  ;;  %8925 = vmatmul.f32.vlgmr.msra.gmra.mxu1 %v8822_v41  ;;  %v18301_v48 = vld [vmem:[#allocation216_spill] sm:$0xff] }
 0xcd2   : > { %9054 = vmatpush.msrb.mxu3 %v18265_v50  ;;  %9291 = vmatpush.msra.mxu1 %v18266_v51  ;;  %v18304_v51 = vld [vmem:[#allocation217_spill] sm:$0xff] }
 0xcd3   : > { %v8824_v10 = vand.u32 4294901760, %v8823_v1 }
 0xcd4   : > { %9056 = vmatpush.msrb.mxu3 %v18267_v0  ;;  %9295 = vmatpush.msra.mxu1 %v18268_v9  ;;  %v18306_v9 = vld [vmem:[#allocation174_spill] sm:$0xff] }
 0xcd5   : > { %v8825_v38 = vsub.f32 %v8823_v1, %v8824_v10 }
 0xcd6   : > { %9058 = vmatpush.msrb.mxu3 %v18269_v27  ;;  %9299 = vmatpush.msra.mxu1 %v18270_v23  ;;  %v18308_v23 = vld [vmem:[#allocation190_spill] sm:$0xff] }
 0xcd7   : > { %v8826_v7 = vand.u32 4294901760, %v8825_v38  ;;  %v18307_v38 = vld [vmem:[#allocation181_spill] sm:$0xff] }
 0xcd8   : > { %9060 = vmatpush.msrb.mxu3 %v18271_v37  ;;  %9303 = vmatpush.msra.mxu1 %v18272_v17  ;;  %v18310_v17 = vld [vmem:[#allocation207_spill] sm:$0xff] }
 0xcd9   : > { %8827 = vmatmul.f32.vlgmr.msra.gmra.mxu2 %v8826_v7  ;;  %8901 = vmatmul.f32.vlgmr.msra.gmra.mxu3 %v8824_v10  ;;  %v18305_v10 = vld [vmem:[#allocation169_spill] sm:$0xff]  ;;  %v18309_v7 = vld [vmem:[#allocation200_spill] sm:$0xff] }
 0xcda   : > { %8945 = vmatpush.msra.mxu2 %v18247_v29  ;;  %9062 = vmatpush.msrb.mxu3 %v18273_v22 }
 0xcdb   : > { %9307 = vmatpush.msra.mxu1 %v18274_v21  ;;  %v18311_v21 = vld [vmem:[#allocation213_spill] sm:$0xff] }
 0xcdc   : > { %9064 = vmatpush.msrb.mxu3 %v18275_v3 }
 0xcdd   : > { %9311 = vmatpush.msra.mxu1 %v18276_v30  ;;  %v18312_v30 = vld [vmem:[#allocation214_spill] sm:$0xff] }
 0xcde   : > { %9066 = vmatpush.msrb.mxu3 %v18277_v18 }
 0xcdf   : > { %9315 = vmatpush.msra.mxu1 %v18278_v16 }
 0xce0   : > { %9068 = vmatpush.msrb.mxu3 %v18279_v39 }
 0xce1   : > { %8877 = vmatmul.f32.vlgmr.msrb.gmra.mxu2 %v8823_v1  ;;  %9319 = vmatpush.msra.mxu1 %v18280_v42  ;;  %v18303_v1 = vld [vmem:[#allocation212_spill] sm:$0xff] }
 0xce2   : > { %9197 = vmatpush.msrb.mxu2 %v18281_v20  ;;  %9070 = vmatpush.msrb.mxu3 %v18282_v33 }
 0xce3   : > { %9323 = vmatpush.msra.mxu1 %v18283_v55  ;;  %v18313_v55 = vld [vmem:[#allocation232_spill] sm:$0xff] }
 0xce4   : > { %9200 = vmatpush.msrb.mxu2 %v18284_v63  ;;  %9072 = vmatpush.msrb.mxu3 %v18285_v5 }
 0xce5   : > { %9327 = vmatpush.msra.mxu1 %v18286_v34 }
 0xce6   : > { %9203 = vmatpush.msrb.mxu2 %v18287_v40  ;;  %9074 = vmatpush.msrb.mxu3 %v18288_v25  ;;  %v18315_v40 = vld [vmem:[#allocation235_spill] sm:$0xff] }
 0xce7   : > { %9331 = vmatpush.msra.mxu1 %v18289_v11 }
 0xce8   : > { %9206 = vmatpush.msrb.mxu2 %v18290_v43  ;;  %9076 = vmatpush.msrb.mxu3 %v18291_v2 }
 0xce9   : > { %8947 = vmatmul.f32.vlgmr.msra.gmra.mxu2 %v8822_v41  ;;  %9335 = vmatpush.msra.mxu1 %v18292_v57  ;;  %v18302_v41 = vld [vmem:[#allocation164_spill] sm:$0xff] }
 0xcea   : > { %9209 = vmatpush.msrb.mxu2 %v18293_v60  ;;  %9078 = vmatpush.msrb.mxu3 %v18294_v19  ;;  %v18317_v60 = vld [vmem:[#allocation20_spill] sm:$0xff] }
 0xceb   : > { %9339 = vmatpush.msra.mxu1 %v18295_v6 }
 0xcec   : > { %9212 = vmatpush.msrb.mxu2 %v18296_v8  ;;  %9080 = vmatpush.msrb.mxu3 %v18297_v31 }
 0xced   : > { %9343 = vmatpush.msra.mxu1 %v18298_v24 }
 0xcee   : > { %9215 = vmatpush.msrb.mxu2 %v18299_v26  ;;  %9082 = vmatpush.msrb.mxu3 %v18300_v46 }
 0xcef   : > { %9347 = vmatpush.msra.mxu1 %v18301_v48 }
 0xcf0   : > { %9218 = vmatpush.msrb.mxu2 %v18302_v41  ;;  %9084 = vmatpush.msrb.mxu3 %v18303_v1 }
 0xcf1   : > { %9351 = vmatpush.msra.mxu1 %v18304_v51  ;;  %v18319_v51 = vld [vmem:[#allocation68_spill] sm:$0xff] }
 0xcf2   : > { %9250 = vmatpush.msra.mxu3 %v18265_v50  ;;  %9221 = vmatpush.msrb.mxu2 %v18305_v10 }
 0xcf4   : > { %9252 = vmatpush.msra.mxu3 %v18267_v0  ;;  %9224 = vmatpush.msrb.mxu2 %v18306_v9 }
 0xcf6   : > { %9254 = vmatpush.msra.mxu3 %v18269_v27  ;;  %9227 = vmatpush.msrb.mxu2 %v18307_v38 }
 0xcf8   : > { %9256 = vmatpush.msra.mxu3 %v18271_v37  ;;  %9230 = vmatpush.msrb.mxu2 %v18308_v23  ;;  %v18320_v23 = vld [vmem:[#allocation16_spill] sm:$0xff] }
 0xcfa   : > { %9258 = vmatpush.msra.mxu3 %v18273_v22  ;;  %9233 = vmatpush.msrb.mxu2 %v18309_v7 }
 0xcfc   : > { %9260 = vmatpush.msra.mxu3 %v18275_v3  ;;  %9236 = vmatpush.msrb.mxu2 %v18310_v17 }
 0xcfe   : > { %9262 = vmatpush.msra.mxu3 %v18277_v18  ;;  %9239 = vmatpush.msrb.mxu2 %v18311_v21  ;;  %v18321_v21 = vld [vmem:[#allocation17_spill] sm:$0xff] }
 0xd00   : > { %9264 = vmatpush.msra.mxu3 %v18279_v39  ;;  %9242 = vmatpush.msrb.mxu2 %v18312_v30 }
 0xd02   : > { %9358 = vmatpush.msra.mxu2 %v18265_v50  ;;  %9266 = vmatpush.msra.mxu3 %v18282_v33 }
 0xd04   : > { %9360 = vmatpush.msra.mxu2 %v18267_v0  ;;  %9268 = vmatpush.msra.mxu3 %v18285_v5 }
 0xd06   : > { %9362 = vmatpush.msra.mxu2 %v18269_v27  ;;  %9270 = vmatpush.msra.mxu3 %v18288_v25 }
 0xd08   : > { %9364 = vmatpush.msra.mxu2 %v18271_v37  ;;  %9272 = vmatpush.msra.mxu3 %v18291_v2 }
 0xd0a   : > { %9366 = vmatpush.msra.mxu2 %v18273_v22  ;;  %9274 = vmatpush.msra.mxu3 %v18294_v19 }
 0xd0c   : > { %9368 = vmatpush.msra.mxu2 %v18275_v3  ;;  %9276 = vmatpush.msra.mxu3 %v18297_v31 }
 0xd0e   : > { %9370 = vmatpush.msra.mxu2 %v18277_v18  ;;  %9278 = vmatpush.msra.mxu3 %v18300_v46 }
 0xd10   : > { %9372 = vmatpush.msra.mxu2 %v18279_v39  ;;  %9280 = vmatpush.msra.mxu3 %v18303_v1 }
 0xd12   : > { %9374 = vmatpush.msra.mxu2 %v18282_v33 }
 0xd14   : > { %9376 = vmatpush.msra.mxu2 %v18285_v5  ;;  %v18314_v5 = vld [vmem:[#allocation234_spill] sm:$0xff] }
 0xd16   : > { %9378 = vmatpush.msra.mxu2 %v18288_v25 }
 0xd18   : > { %9380 = vmatpush.msra.mxu2 %v18291_v2  ;;  %v18316_v2 = vld [vmem:[#allocation236_spill] sm:$0xff] }
 0xd1a   : > { %9382 = vmatpush.msra.mxu2 %v18294_v19 }
 0xd1c   : > { %9384 = vmatpush.msra.mxu2 %v18297_v31  ;;  %v18318_v31 = vld [vmem:[#allocation24_spill] sm:$0xff] }
 0xd1e   : > { %9386 = vmatpush.msra.mxu2 %v18300_v46 }
 0xd20   : > { %9388 = vmatpush.msra.mxu2 %v18303_v1 }
 0xd4e   : > { %v8926_v16 = vpop.f32.mrf.mxu1 }
 0xd54   : > { %v8854_v0 = vpop.f32.mrf.mxu3 }
 0xd5c   : > { %v8828_v50 = vpop.f32.mrf.mxu2  ;;  %v8902_v3 = vpop.f32.mrf.mxu3 }
 0xd5d   : > { %v8855_v37 = vadd.f32 %v8854_v0, %v8828_v50 }
 0xd64   : > { %v8878_v27 = vpop.f32.mrf.mxu2 }
 0xd65   : > { %v8879_v22 = vadd.f32 %v8878_v27, %v8855_v37  ;;  %v18322_v27 = vld [vmem:[#allocation66_spill] sm:$0xff] }
 0xd67   : > { %v8903_v18 = vadd.f32 %v8902_v3, %v8879_v22 }
 0xd69   : > { %v8927_v42 = vadd.f32 %v8926_v16, %v8903_v18 }
 0xd6c   : > { %v8948_v39 = vpop.f32.mrf.mxu2 }
 0xd6d   : > { %v8949_v20 = vadd.f32 %v8948_v39, %v8927_v42  ;;  %v18323_v42 = vld [vmem:[#allocation55_spill] sm:$0xff] }
 0xd6f   : > { %v16375_v33 = vperm.slane %v8949_v20, 0 }
 0xd71   : > { %v16379_v63 = vsub.f32 %v18313_v55, %v16375_v33  ;;  %v16383_v34 = vsub.f32 %v18314_v5, %v16375_v33  ;;  %v16387_v25 = vsub.f32 %v18315_v40, %v16375_v33  ;;  %v16395_v57 = vsub.f32 %v18316_v2, %v16375_v33  ;;  %v18324_v40 = vld [vmem:[#allocation33_spill] sm:$0xff] }
 0xd72   : > { %v16399_v19 = vsub.f32 %v18317_v60, %v16375_v33  ;;  %v16405_v24 = vsub.f32 %v18318_v31, %v16375_v33  ;;  %v16411_v48 = vsub.f32 %v16118_v12, %v16375_v33  ;;  %v16417_v10 = vsub.f32 %v18319_v51, %v16375_v33  ;;  %v18325_v2 = vld [vmem:[#allocation29_spill] sm:$0xff] }
 0xd73   : > { %v8984_v11 = vmul.f32 %v16379_v63, %v16379_v63  ;;  %v8985_v43 = vmul.f32 %v16383_v34, %v16383_v34  ;;  %v8986_v6 = vmul.f32 %v16387_v25, %v16387_v25  ;;  %v8987_v26 = vmul.f32 %v16395_v57, %v16395_v57  ;;  %v18326_v31 = vld [vmem:[#allocation69_spill] sm:$0xff] }
 0xd74   : > { %v8988_v41 = vmul.f32 %v16399_v19, %v16399_v19  ;;  %v8989_v9 = vmul.f32 %v16405_v24, %v16405_v24  ;;  %v16423_v7 = vsub.f32 %v18320_v23, %v16375_v33  ;;  %v8990_v12 = vmul.f32 %v16411_v48, %v16411_v48 }
 0xd75   : > { %v9016_v8 = vadd.f32 %v8985_v43, %v8984_v11  ;;  %v16429_v30 = vsub.f32 %v18321_v21, %v16375_v33  ;;  %v8991_v50 = vmul.f32 %v16417_v10, %v16417_v10  ;;  %v16435_v37 = vsub.f32 %v18322_v27, %v16375_v33 }
 0xd76   : > { %v8992_v22 = vmul.f32 %v16423_v7, %v16423_v7  ;;  %v16441_v18 = vsub.f32 %v16155_v28, %v16375_v33  ;;  %v16447_v20 = vsub.f32 %v18323_v42, %v16375_v33  ;;  %v16453_v11 = vsub.f32 %v18324_v40, %v16375_v33 }
 0xd77   : > { %v9017_v46 = vadd.f32 %v9016_v8, %v8986_v6  ;;  %v8993_v16 = vmul.f32 %v16429_v30, %v16429_v30  ;;  %v8994_v55 = vmul.f32 %v16435_v37, %v16435_v37  ;;  %v16459_v60 = vsub.f32 %v18325_v2, %v16375_v33 }
 0xd78   : > { %v8995_v28 = vmul.f32 %v16441_v18, %v16441_v18  ;;  %v8996_v6 = vmul.f32 %v16447_v20, %v16447_v20  ;;  %v16495_v27 = vsub.f32 %v16193_v58, %v16375_v33  ;;  %v16519_v40 = vsub.f32 %v16242_v59, %v16375_v33 }
 0xd79   : > { %v9018_v1 = vadd.f32 %v9017_v46, %v8987_v26  ;;  %v16465_v26 = vsub.f32 %v18326_v31, %v16375_v33  ;;  %v8997_v46 = vmul.f32 %v16453_v11, %v16453_v11  ;;  %v8998_v51 = vmul.f32 %v16459_v60, %v16459_v60 }
 0xd7a   : > { %v9004_v58 = vmul.f32 %v16495_v27, %v16495_v27  ;;  %v9008_v59 = vmul.f32 %v16519_v40, %v16519_v40  ;;  %v16537_v31 = vsub.f32 %v16255_v52, %v16375_v33 }
 0xd7b   : > { %v9019_v38 = vadd.f32 %v9018_v1, %v8988_v41  ;;  %v16471_v1 = vsub.f32 %v16182_v44, %v16375_v33  ;;  %v8999_v23 = vmul.f32 %v16465_v26, %v16465_v26 }
 0xd7c   : > { %v9011_v52 = vmul.f32 %v16537_v31, %v16537_v31 }
 0xd7d   : > { %v9020_v17 = vadd.f32 %v9019_v38, %v8989_v9  ;;  %v16477_v38 = vsub.f32 %v16185_v45, %v16375_v33  ;;  %v9000_v44 = vmul.f32 %v16471_v1, %v16471_v1 }
 0xd7f   : > { %v9021_v0 = vadd.f32 %v9020_v17, %v8990_v12  ;;  %v16483_v17 = vsub.f32 %v16188_v56, %v16375_v33  ;;  %v9001_v45 = vmul.f32 %v16477_v38, %v16477_v38 }
 0xd81   : > { %v9022_v3 = vadd.f32 %v9021_v0, %v8991_v50  ;;  %v16489_v50 = vsub.f32 %v16191_v53, %v16375_v33  ;;  %v9002_v56 = vmul.f32 %v16483_v17, %v16483_v17 }
 0xd83   : > { %v9023_v39 = vadd.f32 %v9022_v3, %v8992_v22  ;;  %v16501_v3 = vsub.f32 %v16228_v47, %v16375_v33  ;;  %v9003_v53 = vmul.f32 %v16489_v50, %v16489_v50 }
 0xd85   : > { %v9024_v5 = vadd.f32 %v9023_v39, %v8993_v16  ;;  %v16507_v39 = vsub.f32 %v16232_v15, %v16375_v33  ;;  %v9005_v47 = vmul.f32 %v16501_v3, %v16501_v3 }
 0xd87   : > { %v9025_v43 = vadd.f32 %v9024_v5, %v8994_v55  ;;  %v16513_v55 = vsub.f32 %v16237_v35, %v16375_v33  ;;  %v9006_v15 = vmul.f32 %v16507_v39, %v16507_v39 }
 0xd89   : > { %v9026_v8 = vadd.f32 %v9025_v43, %v8995_v28  ;;  %v16525_v43 = vsub.f32 %v16247_v4, %v16375_v33  ;;  %v9007_v35 = vmul.f32 %v16513_v55, %v16513_v55 }
 0xd8b   : > { %v9027_v41 = vadd.f32 %v9026_v8, %v8996_v6  ;;  %v16531_v6 = vsub.f32 %v16252_v14, %v16375_v33  ;;  %v9009_v4 = vmul.f32 %v16525_v43, %v16525_v43 }
 0xd8d   : > { %v9028_v9 = vadd.f32 %v9027_v41, %v8997_v46  ;;  %v16543_v41 = vsub.f32 %v16259_v36, %v16375_v33  ;;  %v9010_v14 = vmul.f32 %v16531_v6, %v16531_v6 }
 0xd8f   : > { %v9029_v12 = vadd.f32 %v9028_v9, %v8998_v51  ;;  %v16549_v9 = vsub.f32 %v16262_v13, %v16375_v33  ;;  %v9012_v36 = vmul.f32 %v16543_v41, %v16543_v41 }
 0xd91   : > { %v9030_v21 = vadd.f32 %v9029_v12, %v8999_v23  ;;  %v16555_v12 = vsub.f32 %v16265_v54, %v16375_v33  ;;  %v9013_v13 = vmul.f32 %v16549_v9, %v16549_v9 }
 0xd93   : > { %v9031_v0 = vadd.f32 %v9030_v21, %v9000_v44  ;;  %v16561_v21 = vsub.f32 %v16269_v49, %v16375_v33 }
 0xd95   : > { %v9032_v22 = vadd.f32 %v9031_v0, %v9001_v45  ;;  %v9014_v0 = vmul.f32 %v16555_v12, %v16555_v12  ;;  %v9015_v54 = vmul.f32 %v16561_v21, %v16561_v21 }
 0xd97   : > { %v9033_v16 = vadd.f32 %v9032_v22, %v9002_v56 }
 0xd99   : > { %v9034_v42 = vadd.f32 %v9033_v16, %v9003_v53 }
 0xd9b   : > { %v9035_v5 = vadd.f32 %v9034_v42, %v9004_v58 }
 0xd9d   : > { %v9036_v28 = vadd.f32 %v9035_v5, %v9005_v47 }
 0xd9f   : > { %v9037_v2 = vadd.f32 %v9036_v28, %v9006_v15 }
 0xda1   : > { %v9038_v8 = vadd.f32 %v9037_v2, %v9007_v35 }
 0xda3   : > { %v9039_v46 = vadd.f32 %v9038_v8, %v9008_v59 }
 0xda5   : > { %v9040_v51 = vadd.f32 %v9039_v46, %v9009_v4 }
 0xda7   : > { %v9041_v23 = vadd.f32 %v9040_v51, %v9010_v14 }
 0xda9   : > { %v9042_v44 = vadd.f32 %v9041_v23, %v9011_v52 }
 0xdab   : > { %v9043_v45 = vadd.f32 %v9042_v44, %v9012_v36 }
 0xdad   : > { %v9044_v56 = vadd.f32 %v9043_v45, %v9013_v13 }
 0xdaf   : > { %v9045_v22 = vadd.f32 %v9044_v56, %v9014_v0 }
 0xdb1   : > { %v9046_v53 = vadd.f32 %v9045_v22, %v9015_v54 }
 0xdb3   : > { %v9047_v16 = vrot.slane %v9046_v53, 4 }
 0xdb5   : > { %v9048_v58 = vadd.f32 %v9047_v16, %v9046_v53 }
 0xdb7   : > { %v9049_v42 = vrot.slane %v9048_v58, 2 }
 0xdb9   : > { %v9050_v47 = vadd.f32 %v9049_v42, %v9048_v58 }
 0xdbb   : > { %v9051_v5 = vrot.slane %v9050_v47, 1 }
 0xdbd   : > { %v9052_v49 = vadd.f32 %v9051_v5, %v9050_v47 }
 0xdbf   : > { %v9085_v33 = vand.u32 4294901760, %v9052_v49 }
 0xdc1   : > { %9191 = vmatmul.f32.vlgmr.msrb.gmra.mxu1 %v9085_v33  ;;  %v9086_v15 = vsub.f32 %v9052_v49, %v9085_v33 }
 0xdc2   : > { %9455 = vmatpush.msrb.mxu1 %v18245_v61 }
 0xdc3   : > { %9245 = vmatmul.f32.vlgmr.msrb.gmra.mxu2 %v9086_v15  ;;  %v9087_v28 = vand.u32 4294901760, %v9086_v15 }
 0xdc4   : > { %9478 = vmatpush.msrb.mxu2 %v18251_v32 }
 0xdc5   : > { %v9088_v35 = vsub.f32 %v9086_v15, %v9087_v28 }
 0xdc7   : > { %v9089_v2 = vand.u32 4294901760, %v9088_v35 }
 0xdc9   : > { %9090 = vmatmul.f32.vlgmr.msrb.gmra.mxu3 %v9089_v2  ;;  %9353 = vmatmul.f32.vlgmr.msra.gmra.mxu1 %v9085_v33 }
 0xdca   : > { %9425 = vmatpush.msrb.mxu3 %v18247_v29  ;;  %9527 = vmatpush.msra.mxu1 %v18246_v62 }
 0xdcb   : > { %9390 = vmatmul.f32.vlgmr.msra.gmra.mxu2 %v9085_v33 }
 0xdcc   : > { %9549 = vmatpush.msra.mxu2 %v18247_v29 }
 0xdd1   : > { %9284 = vmatmul.f32.vlgmr.msra.gmra.mxu3 %v9087_v28 }
 0xdd2   : > { %9501 = vmatpush.msra.mxu3 %v18247_v29 }
 0xe3e   : > { %v9192_v59 = vpop.f32.mrf.mxu1 }
 0xe46   : > { %v9246_v8 = vpop.f32.mrf.mxu2  ;;  %v9354_v51 = vpop.f32.mrf.mxu1 }
 0xe4c   : > { %v9091_v61 = vpop.f32.mrf.mxu3 }
 0xe4d   : > { %v9193_v4 = vadd.f32 %v9192_v59, %v9091_v61 }
 0xe4e   : > { %v9391_v23 = vpop.f32.mrf.mxu2 }
 0xe4f   : > { %v9247_v46 = vadd.f32 %v9246_v8, %v9193_v4 }
 0xe54   : > { %v9285_v32 = vpop.f32.mrf.mxu3 }
 0xe55   : > { %v9286_v14 = vadd.f32 %v9285_v32, %v9247_v46 }
 0xe57   : > { %v9355_v52 = vadd.f32 %v9354_v51, %v9286_v14 }
 0xe59   : > { %v9392_v36 = vadd.f32 %v9391_v23, %v9355_v52 }
 0xe5b   : > { %v9394_v44 = vmul.f32 0.00390625, %v9392_v36 }
 0xe5d   : > { %v9395_v13 = vadd.f32 1e-05, %v9394_v44 }
 0xe5f   : > { %12548 = vrsqrt.f32 %v9395_v13  ;;  %vm9402_vm7 = vweird.f32 %v9395_v13 }
 0xe65   : > { %v12549_v62 = vpop.eup %12548 }
 0xe66   : > { %v9397_v45 = vmul.f32 %v12549_v62, %v9395_v13  ;;  %vm9403_vm6 = vweird.f32 %v12549_v62 }
 0xe67   : > { %vm9404_vm8 = vmor %vm9402_vm7, %vm9403_vm6 }
 0xe68   : > { %v9398_v0 = vmul.f32 %v12549_v62, %v9397_v45 }
 0xe6a   : > { %v9399_v56 = vmul.f32 0.5, %v9398_v0 }
 0xe6c   : > { %v9400_v54 = vsub.f32 1.5, %v9399_v56 }
 0xe6e   : > { %v9401_v29 = vmul.f32 %v12549_v62, %v9400_v54 }
 0xe70   : > { %v9405_v22 = vsel %vm9404_vm8, %v12549_v62, %v9401_v29 }
 0xe71   : > { %v9407_v53 = vsel %vm4359_vm2, %v9405_v22, 0 }
 0xe72   : > { %v9426_v16 = vand.u32 4294901760, %v9407_v53 }
 0xe74   : > { %9457 = vmatmul.f32.vlgmr.msrb.gmra.mxu1 %v9426_v16  ;;  %v9427_v58 = vsub.f32 %v9407_v53, %v9426_v16 }
 0xe76   : > { %9481 = vmatmul.f32.vlgmr.msrb.gmra.mxu2 %v9427_v58  ;;  %v9428_v42 = vand.u32 4294901760, %v9427_v58 }
 0xe78   : > { %v9429_v47 = vsub.f32 %v9427_v58, %v9428_v42 }
 0xe7a   : > { %v9430_v5 = vand.u32 4294901760, %v9429_v47 }
 0xe7c   : > { %9431 = vmatmul.f32.vlgmr.msrb.gmra.mxu3 %v9430_v5  ;;  %9529 = vmatmul.f32.vlgmr.msra.gmra.mxu1 %v9426_v16 }
 0xe7e   : > { %9551 = vmatmul.f32.vlgmr.msra.gmra.mxu2 %v9426_v16 }
 0xe84   : > { %9505 = vmatmul.f32.vlgmr.msra.gmra.mxu3 %v9428_v42 }
 0xef1   : > { %v9458_v49 = vpop.f32.mrf.mxu1 }
 0xef9   : > { %v9482_v15 = vpop.f32.mrf.mxu2  ;;  %v9530_v61 = vpop.f32.mrf.mxu1 }
 0xeff   : > { %v9432_v33 = vpop.f32.mrf.mxu3 }
 0xf00   : > { %v9459_v28 = vadd.f32 %v9458_v49, %v9432_v33 }
 0xf01   : > { %v9552_v4 = vpop.f32.mrf.mxu2 }
 0xf02   : > { %v9483_v35 = vadd.f32 %v9482_v15, %v9459_v28 }
 0xf07   : > { %v9506_v2 = vpop.f32.mrf.mxu3 }
 0xf08   : > { %v9507_v59 = vadd.f32 %v9506_v2, %v9483_v35 }
 0xf0a   : > { %v9531_v8 = vadd.f32 %v9530_v61, %v9507_v59 }
 0xf0c   : > { %v9553_v46 = vadd.f32 %v9552_v4, %v9531_v8 }
 0xf0e   : > { %v9555_v32 = vperm.slane %v9553_v46, 0 }
 0xf10   : > { %v9556_v14 = vmul.f32 %v9555_v32, %v16379_v63  ;;  %v9557_v51 = vmul.f32 %v9555_v32, %v16383_v34  ;;  %v9558_v52 = vmul.f32 %v9555_v32, %v16387_v25  ;;  %v9559_v23 = vmul.f32 %v9555_v32, %v16395_v57 }
 0xf11   : > { %v9560_v36 = vmul.f32 %v9555_v32, %v16399_v19  ;;  %v9561_v44 = vmul.f32 %v9555_v32, %v16405_v24  ;;  %v9562_v13 = vmul.f32 %v9555_v32, %v16411_v48  ;;  %v9563_v62 = vmul.f32 %v9555_v32, %v16417_v10  ;;  %v12480_v19 = vld [vmem:[%s17113_s6] ss:$0 sm:$0xff] }
 0xf12   : > { %v9564_v45 = vmul.f32 %v9555_v32, %v16423_v7  ;;  %v9565_v0 = vmul.f32 %v9555_v32, %v16429_v30  ;;  %v9566_v63 = vmul.f32 %v9555_v32, %v16435_v37  ;;  %v9567_v34 = vmul.f32 %v9555_v32, %v16441_v18 }
 0xf13   : > { %v9568_v25 = vmul.f32 %v9555_v32, %v16447_v20  ;;  %v9569_v57 = vmul.f32 %v9555_v32, %v16453_v11  ;;  %v9570_v24 = vmul.f32 %v9555_v32, %v16459_v60  ;;  %v9571_v48 = vmul.f32 %v9555_v32, %v16465_v26 }
 0xf14   : > { %v9572_v10 = vmul.f32 %v9555_v32, %v16471_v1  ;;  %v9573_v7 = vmul.f32 %v9555_v32, %v16477_v38  ;;  %v9574_v30 = vmul.f32 %v9555_v32, %v16483_v17  ;;  %v9575_v37 = vmul.f32 %v9555_v32, %v16489_v50 }
 0xf15   : > { %v9576_v18 = vmul.f32 %v9555_v32, %v16495_v27  ;;  %v9577_v20 = vmul.f32 %v9555_v32, %v16501_v3  ;;  %v9578_v11 = vmul.f32 %v9555_v32, %v16507_v39  ;;  %v9579_v56 = vmul.f32 %v9555_v32, %v16513_v55 }
 0xf16   : > { %v9580_v60 = vmul.f32 %v9555_v32, %v16519_v40  ;;  %v9581_v26 = vmul.f32 %v9555_v32, %v16525_v43  ;;  %v9582_v1 = vmul.f32 %v9555_v32, %v16531_v6  ;;  %v9583_v38 = vmul.f32 %v9555_v32, %v16537_v31 }
 0xf17   : > { %v9584_v17 = vmul.f32 %v9555_v32, %v16543_v41  ;;  %v9585_v50 = vmul.f32 %v9555_v32, %v16549_v9  ;;  %v9586_v27 = vmul.f32 %v9555_v32, %v16555_v12  ;;  %v9587_v3 = vmul.f32 %v9555_v32, %v16561_v21  ;;  %v16614_v9 = vld [vmem:[%s17114_s7] ss:$0 sm:$0xff] }
 0xf18   : > { %v9592_v54 = vmul.f32 %v12480_v19, %v9556_v14  ;;  %v9593_v39 = vmul.f32 %v12480_v19, %v9557_v51  ;;  %v9594_v29 = vmul.f32 %v12480_v19, %v9558_v52  ;;  %v9595_v55 = vmul.f32 %v12480_v19, %v9559_v23 }
 0xf19   : > { %v9596_v22 = vmul.f32 %v12480_v19, %v9560_v36  ;;  %v9597_v40 = vmul.f32 %v12480_v19, %v9561_v44  ;;  %v9598_v53 = vmul.f32 %v12480_v19, %v9562_v13  ;;  %v9599_v43 = vmul.f32 %v12480_v19, %v9563_v62 }
 0xf1a   : > { %v9600_v16 = vmul.f32 %v12480_v19, %v9564_v45  ;;  %v9601_v6 = vmul.f32 %v12480_v19, %v9565_v0  ;;  %v9602_v58 = vmul.f32 %v12480_v19, %v9566_v63  ;;  %v9603_v31 = vmul.f32 %v12480_v19, %v9567_v34 }
 0xf1b   : > { %v9604_v42 = vmul.f32 %v12480_v19, %v9568_v25  ;;  %v9605_v41 = vmul.f32 %v12480_v19, %v9569_v57  ;;  %v9606_v12 = vmul.f32 %v12480_v19, %v9570_v24  ;;  %v9607_v21 = vmul.f32 %v12480_v19, %v9571_v48 }
 0xf1c   : > { %v9608_v47 = vmul.f32 %v12480_v19, %v9572_v10  ;;  %v9609_v5 = vmul.f32 %v12480_v19, %v9573_v7  ;;  %v9610_v49 = vmul.f32 %v12480_v19, %v9574_v30  ;;  %v9611_v33 = vmul.f32 %v12480_v19, %v9575_v37 }
 0xf1d   : > { %v9612_v15 = vmul.f32 %v12480_v19, %v9576_v18  ;;  %v9613_v28 = vmul.f32 %v12480_v19, %v9577_v20  ;;  %v9614_v35 = vmul.f32 %v12480_v19, %v9578_v11  ;;  %v9615_v2 = vmul.f32 %v12480_v19, %v9579_v56 }
 0xf1e   : > { %v9616_v59 = vmul.f32 %v12480_v19, %v9580_v60  ;;  %v9617_v61 = vmul.f32 %v12480_v19, %v9581_v26  ;;  %v9618_v8 = vmul.f32 %v12480_v19, %v9582_v1  ;;  %v9619_v4 = vmul.f32 %v12480_v19, %v9583_v38 }
 0xf1f   : > { %v9620_v46 = vmul.f32 %v12480_v19, %v9584_v17  ;;  %v9621_v32 = vmul.f32 %v12480_v19, %v9585_v50  ;;  %v9622_v14 = vmul.f32 %v12480_v19, %v9586_v27  ;;  %v16616_v51 = vmul.f32 %v12480_v19, %v9587_v3 }
 0xf20   : > { %v16619_v52 = vadd.f32 %v16614_v9, %v9592_v54  ;;  %v16622_v23 = vadd.f32 %v16614_v9, %v9593_v39  ;;  %v16625_v36 = vadd.f32 %v16614_v9, %v9594_v29  ;;  %v16628_v44 = vadd.f32 %v16614_v9, %v9595_v55 }
 0xf21   : > { %v16631_v13 = vadd.f32 %v16614_v9, %v9596_v22  ;;  %v16634_v62 = vadd.f32 %v16614_v9, %v9597_v40  ;;  %v16637_v45 = vadd.f32 %v16614_v9, %v9598_v53  ;;  %v16640_v0 = vadd.f32 %v16614_v9, %v9599_v43 }
 0xf22   : > { %18327 = vst [vmem:[#allocation61_spill] sm:$0xff] %v16619_v52  ;;  %v16643_v63 = vadd.f32 %v16614_v9, %v9600_v16  ;;  %v16646_v34 = vadd.f32 %v16614_v9, %v9601_v6  ;;  %v16649_v25 = vadd.f32 %v16614_v9, %v9602_v58  ;;  %v16652_v57 = vadd.f32 %v16614_v9, %v9603_v31 }
 0xf23   : > { %18328 = vst [vmem:[#allocation18_spill] sm:$0xff] %v16622_v23  ;;  %v16655_v19 = vadd.f32 %v16614_v9, %v9604_v42  ;;  %v16658_v24 = vadd.f32 %v16614_v9, %v9605_v41  ;;  %v16661_v48 = vadd.f32 %v16614_v9, %v9606_v12  ;;  %v16664_v10 = vadd.f32 %v16614_v9, %v9607_v21 }
 0xf24   : > { %18329 = vst [vmem:[#allocation38_spill] sm:$0xff] %v16625_v36  ;;  %v16667_v7 = vadd.f32 %v16614_v9, %v9608_v47  ;;  %v16670_v30 = vadd.f32 %v16614_v9, %v9609_v5  ;;  %v16673_v37 = vadd.f32 %v16614_v9, %v9610_v49  ;;  %v16676_v18 = vadd.f32 %v16614_v9, %v9611_v33 }
 0xf25   : > { %18330 = vst [vmem:[#allocation71_spill] sm:$0xff] %v16628_v44  ;;  %v16679_v20 = vadd.f32 %v16614_v9, %v9612_v15  ;;  %v16682_v11 = vadd.f32 %v16614_v9, %v9613_v28  ;;  %v16685_v56 = vadd.f32 %v16614_v9, %v9614_v35  ;;  %v16688_v60 = vadd.f32 %v16614_v9, %v9615_v2 }
 0xf26   : > { %18331 = vst [vmem:[#allocation74_spill] sm:$0xff] %v16631_v13  ;;  %v16691_v26 = vadd.f32 %v16614_v9, %v9616_v59  ;;  %v16694_v1 = vadd.f32 %v16614_v9, %v9617_v61  ;;  %v16697_v38 = vadd.f32 %v16614_v9, %v9618_v8  ;;  %v16700_v17 = vadd.f32 %v16614_v9, %v9619_v4 }
 0xf27   : > { %18332 = vst [vmem:[#allocation35_spill] sm:$0xff] %v16634_v62  ;;  %v16703_v50 = vadd.f32 %v16614_v9, %v9620_v46  ;;  %v16706_v27 = vadd.f32 %v16614_v9, %v9621_v32  ;;  %v16709_v3 = vadd.f32 %v16614_v9, %v9622_v14  ;;  %v16712_v54 = vmul.f32 0.5, %v16619_v52 }
 0xf28   : > { %18333 = vst [vmem:[#allocation19_spill] sm:$0xff] %v16637_v45  ;;  %v16715_v39 = vmul.f32 0.5, %v16622_v23  ;;  %v16718_v29 = vmul.f32 0.5, %v16625_v36  ;;  %v16721_v55 = vmul.f32 0.5, %v16628_v44  ;;  %v16724_v22 = vmul.f32 0.5, %v16631_v13 }
 0xf29   : > { %18334 = vst [vmem:[#allocation65_spill] sm:$0xff] %v16640_v0  ;;  %v16727_v40 = vmul.f32 0.5, %v16634_v62  ;;  %v16730_v53 = vmul.f32 0.5, %v16637_v45  ;;  %v16733_v43 = vmul.f32 0.5, %v16640_v0  ;;  %v16736_v16 = vmul.f32 0.5, %v16643_v63 }
 0xf2a   : > { %18335 = vst [vmem:[#allocation75_spill] sm:$0xff] %v16643_v63  ;;  %v16739_v6 = vmul.f32 0.5, %v16646_v34  ;;  %v16742_v58 = vmul.f32 0.5, %v16649_v25  ;;  %v16745_v31 = vmul.f32 0.5, %v16652_v57  ;;  %v16748_v42 = vmul.f32 0.5, %v16655_v19 }
 0xf2b   : > { %18336 = vst [vmem:[#allocation42_spill] sm:$0xff] %v16649_v25  ;;  %v16751_v41 = vmul.f32 0.5, %v16658_v24  ;;  %v16754_v12 = vmul.f32 0.5, %v16661_v48  ;;  %v16757_v21 = vmul.f32 0.5, %v16664_v10  ;;  %v16760_v47 = vmul.f32 0.5, %v16667_v7 }
 0xf2c   : > { %18337 = vst [vmem:[#allocation39_spill] sm:$0xff] %v16652_v57  ;;  %v16763_v5 = vmul.f32 0.5, %v16670_v30  ;;  %v16766_v49 = vmul.f32 0.5, %v16673_v37  ;;  %v16769_v33 = vmul.f32 0.5, %v16676_v18  ;;  %v16772_v15 = vmul.f32 0.5, %v16679_v20 }
 0xf2d   : > { %18338 = vst [vmem:[#allocation77_spill] sm:$0xff] %v16655_v19  ;;  %v16775_v28 = vmul.f32 0.5, %v16682_v11  ;;  %v16778_v35 = vmul.f32 0.5, %v16685_v56  ;;  %v16781_v2 = vmul.f32 0.5, %v16688_v60  ;;  %v16784_v59 = vmul.f32 0.5, %v16691_v26 }
 0xf2e   : > { %18339 = vst [vmem:[#allocation72_spill] sm:$0xff] %v16658_v24  ;;  %v9692_v61 = vmul.f32 0.044715, %v16619_v52  ;;  %v9693_v8 = vmul.f32 0.044715, %v16622_v23  ;;  %v16789_v4 = vmul.f32 0.5, %v16694_v1 }
 0xf2f   : > { %18340 = vst [vmem:[#allocation21_spill] sm:$0xff] %v16661_v48  ;;  %v16792_v46 = vmul.f32 0.5, %v16697_v38  ;;  %v9694_v32 = vmul.f32 0.044715, %v16625_v36  ;;  %v9695_v14 = vmul.f32 0.044715, %v16628_v44 }
 0xf30   : > { %18341 = vst [vmem:[#allocation45_spill] sm:$0xff] %v16664_v10 }
 0xf31   : > { %18342 = vst [vmem:[#allocation78_spill] sm:$0xff] %v16667_v7 }
 0xf32   : > { %18343 = vst [vmem:[#allocation80_spill] sm:$0xff] %v16670_v30 }
 0xf33   : > { %18344 = vst [vmem:[#allocation44_spill] sm:$0xff] %v16673_v37 }
 0xf34   : > { %18345 = vst [vmem:[#allocation25_spill] sm:$0xff] %v16676_v18 }
 0xf35   : > { %18346 = vst [vmem:[#allocation81_spill] sm:$0xff] %v16682_v11 }
 0xf36   : > { %18347 = vst [vmem:[#allocation83_spill] sm:$0xff] %v16685_v56 }
 0xf37   : > { %18348 = vst [vmem:[#allocation48_spill] sm:$0xff] %v16688_v60 }
 0xf38   : > { %18349 = vst [vmem:[#allocation47_spill] sm:$0xff] %v16691_v26 }
 0xf39   : > { %18350 = vst [vmem:[#allocation87_spill] sm:$0xff] %v16694_v1 }
 0xf3a   : > { %18351 = vst [vmem:[#allocation84_spill] sm:$0xff] %v16697_v38 }
 0xf3b   : > { %18352 = vst [vmem:[#allocation28_spill] sm:$0xff] %v16700_v17 }
 0xf3c   : > { %18353 = vst [vmem:[#allocation51_spill] sm:$0xff] %v16703_v50 }
 0xf3d   : > { %18354 = vst [vmem:[#allocation86_spill] sm:$0xff] %v16706_v27 }
 0xf3e   : > { %18355 = vst [vmem:[#allocation91_spill] sm:$0xff] %v16709_v3 }
 0xf3f   : > { %18356 = vst [vmem:[#allocation50_spill] sm:$0xff] %v16712_v54  ;;  %v9720_v54 = vmul.f32 0.044715, %v16703_v50 }
 0xf40   : > { %18357 = vst [vmem:[#allocation34_spill] sm:$0xff] %v16715_v39 }
 0xf41   : > { %18358 = vst [vmem:[#allocation88_spill] sm:$0xff] %v16718_v29  ;;  %v9719_v29 = vmul.f32 0.044715, %v16700_v17 }
 0xf42   : > { %18359 = vst [vmem:[#allocation90_spill] sm:$0xff] %v16721_v55  ;;  %v9717_v55 = vmul.f32 0.044715, %v16694_v1 }
 0xf43   : > { %18360 = vst [vmem:[#allocation56_spill] sm:$0xff] %v16724_v22 }
 0xf44   : > { %18361 = vst [vmem:[#allocation53_spill] sm:$0xff] %v16727_v40  ;;  %v9716_v40 = vmul.f32 0.044715, %v16691_v26 }
 0xf45   : > { %18362 = vst [vmem:[#allocation95_spill] sm:$0xff] %v16730_v53  ;;  %v9714_v53 = vmul.f32 0.044715, %v16685_v56 }
 0xf46   : > { %18363 = vst [vmem:[#allocation92_spill] sm:$0xff] %v16733_v43 }
 0xf47   : > { %18364 = vst [vmem:[#allocation37_spill] sm:$0xff] %v16736_v16  ;;  %v9713_v16 = vmul.f32 0.044715, %v16682_v11 }
 0xf48   : > { %18365 = vst [vmem:[#allocation60_spill] sm:$0xff] %v16739_v6  ;;  %v9711_v6 = vmul.f32 0.044715, %v16676_v18 }
 0xf49   : > { %18366 = vst [vmem:[#allocation94_spill] sm:$0xff] %v16742_v58  ;;  %v9727_v58 = vmul.f32 %v9695_v14, %v16628_v44  ;;  %v9718_v14 = vmul.f32 0.044715, %v16697_v38 }
 0xf4a   : > { %18367 = vst [vmem:[#allocation98_spill] sm:$0xff] %v16745_v31  ;;  %v9710_v31 = vmul.f32 0.044715, %v16673_v37 }
 0xf4b   : > { %18368 = vst [vmem:[#allocation58_spill] sm:$0xff] %v16748_v42  ;;  %v9708_v42 = vmul.f32 0.044715, %v16667_v7 }
 0xf4c   : > { %18369 = vst [vmem:[#allocation41_spill] sm:$0xff] %v16751_v41  ;;  %v9726_v41 = vmul.f32 %v9694_v32, %v16625_v36  ;;  %v9715_v32 = vmul.f32 0.044715, %v16688_v60 }
 0xf4d   : > { %18370 = vst [vmem:[#allocation96_spill] sm:$0xff] %v16754_v12  ;;  %v9707_v12 = vmul.f32 0.044715, %v16664_v10 }
 0xf4e   : > { %18371 = vst [vmem:[#allocation99_spill] sm:$0xff] %v16757_v21  ;;  %v9706_v21 = vmul.f32 0.044715, %v16661_v48 }
 0xf4f   : > { %18372 = vst [vmem:[#allocation64_spill] sm:$0xff] %v16760_v47  ;;  %v9705_v47 = vmul.f32 0.044715, %v16658_v24 }
 0xf50   : > { %18373 = vst [vmem:[#allocation62_spill] sm:$0xff] %v16763_v5  ;;  %v9703_v5 = vmul.f32 0.044715, %v16652_v57 }
 0xf51   : > { %18374 = vst [vmem:[#allocation105_spill] sm:$0xff] %v16766_v49  ;;  %v9702_v49 = vmul.f32 0.044715, %v16649_v25 }
 0xf52   : > { %18375 = vst [vmem:[#allocation106_spill] sm:$0xff] %v16769_v33  ;;  %v9724_v33 = vmul.f32 %v9692_v61, %v16619_v52  ;;  %v9709_v61 = vmul.f32 0.044715, %v16670_v30  ;;  %v9735_v52 = vmul.f32 %v9703_v5, %v16652_v57  ;;  %v9745_v5 = vmul.f32 %v9713_v16, %v16682_v11  ;;  %v18386_v11 = vld [vmem:[#allocation61_spill] sm:$0xff] }
 0xf53   : > { %18376 = vst [vmem:[#allocation107_spill] sm:$0xff] %v16772_v15  ;;  %v9699_v15 = vmul.f32 0.044715, %v16640_v0 }
 0xf54   : > { %18377 = vst [vmem:[#allocation108_spill] sm:$0xff] %v16775_v28  ;;  %v9698_v28 = vmul.f32 0.044715, %v16637_v45 }
 0xf55   : > { %18378 = vst [vmem:[#allocation109_spill] sm:$0xff] %v16778_v35  ;;  %v9697_v35 = vmul.f32 0.044715, %v16634_v62  ;;  %v9731_v44 = vmul.f32 %v9699_v15, %v16640_v0  ;;  %v9740_v15 = vmul.f32 %v9708_v42, %v16667_v7  ;;  %v9741_v0 = vmul.f32 %v9709_v61, %v16670_v30 }
 0xf56   : > { %18379 = vst [vmem:[#allocation110_spill] sm:$0xff] %v16781_v2  ;;  %v16798_v2 = vadd.f32 %v16614_v9, %v16616_v51  ;;  %v9704_v9 = vmul.f32 0.044715, %v16655_v19  ;;  %v9725_v51 = vmul.f32 %v9693_v8, %v16622_v23  ;;  %v9712_v8 = vmul.f32 0.044715, %v16679_v20 }
 0xf57   : > { %18380 = vst [vmem:[#allocation111_spill] sm:$0xff] %v16784_v59  ;;  %v9696_v59 = vmul.f32 0.044715, %v16631_v13  ;;  %v9729_v22 = vmul.f32 %v9697_v35, %v16634_v62  ;;  %v9730_v39 = vmul.f32 %v9698_v28, %v16637_v45  ;;  %v9734_v23 = vmul.f32 %v9702_v49, %v16649_v25 }
 0xf58   : > { %18381 = vst [vmem:[#allocation112_spill] sm:$0xff] %v16789_v4  ;;  %v9700_v4 = vmul.f32 0.044715, %v16643_v63  ;;  %v9723_v36 = vmul.f32 0.044715, %v16798_v2  ;;  %v9736_v28 = vmul.f32 %v9704_v9, %v16655_v19  ;;  %v9737_v45 = vmul.f32 %v9705_v47, %v16658_v24 }
 0xf59   : > { %18382 = vst [vmem:[#allocation113_spill] sm:$0xff] %v16792_v46  ;;  %v9701_v46 = vmul.f32 0.044715, %v16646_v34  ;;  %v9728_v43 = vmul.f32 %v9696_v59, %v16631_v13  ;;  %v9721_v59 = vmul.f32 0.044715, %v16706_v27  ;;  %v9738_v27 = vmul.f32 %v9706_v21, %v16661_v48 }
 0xf5a   : > { %18383 = vst [vmem:[#allocation196_spill] sm:$0xff] %v16798_v2  ;;  %v9722_v13 = vmul.f32 0.044715, %v16709_v3  ;;  %v9732_v35 = vmul.f32 %v9700_v4, %v16643_v63  ;;  %v9739_v3 = vmul.f32 %v9707_v12, %v16664_v10  ;;  %v9742_v4 = vmul.f32 %v9710_v31, %v16673_v37  ;;  %v18384_v37 = vld [vmem:[#allocation86_spill] sm:$0xff] }
 0xf5b   : > { %v9733_v62 = vmul.f32 %v9701_v46, %v16646_v34  ;;  %v9743_v46 = vmul.f32 %v9711_v6, %v16676_v18  ;;  %v9744_v49 = vmul.f32 %v9712_v8, %v16679_v20  ;;  %v9746_v9 = vmul.f32 %v9714_v53, %v16685_v56  ;;  %v18385_v18 = vld [vmem:[#allocation91_spill] sm:$0xff]  ;;  %v18387_v56 = vld [vmem:[#allocation18_spill] sm:$0xff] }
 0xf5c   : > { %v9747_v47 = vmul.f32 %v9715_v32, %v16688_v60  ;;  %v9748_v21 = vmul.f32 %v9716_v40, %v16691_v26  ;;  %v9749_v12 = vmul.f32 %v9717_v55, %v16694_v1  ;;  %v9750_v42 = vmul.f32 %v9718_v14, %v16697_v38  ;;  %v18388_v60 = vld [vmem:[#allocation38_spill] sm:$0xff]  ;;  %v18389_v26 = vld [vmem:[#allocation71_spill] sm:$0xff] }
 0xf5d   : > { %v9751_v61 = vmul.f32 %v9719_v29, %v16700_v17  ;;  %v9752_v31 = vmul.f32 %v9720_v54, %v16703_v50  ;;  %v9753_v6 = vmul.f32 %v9721_v59, %v18384_v37  ;;  %v9754_v8 = vmul.f32 %v9722_v13, %v18385_v18  ;;  %v18390_v1 = vld [vmem:[#allocation74_spill] sm:$0xff]  ;;  %v18391_v38 = vld [vmem:[#allocation35_spill] sm:$0xff]  ;;  %v18393_v50 = vld [vmem:[#allocation65_spill] sm:$0xff] }
 0xf5e   : > { %v9755_v16 = vmul.f32 %v9723_v36, %v16798_v2  ;;  %v9756_v53 = vmul.f32 %v9724_v33, %v18386_v11  ;;  %v9757_v32 = vmul.f32 %v9725_v51, %v18387_v56  ;;  %v9758_v40 = vmul.f32 %v9726_v41, %v18388_v60  ;;  %v18392_v17 = vld [vmem:[#allocation19_spill] sm:$0xff] }
 0xf5f   : > { %v9759_v55 = vmul.f32 %v9727_v58, %v18389_v26  ;;  %v9760_v14 = vmul.f32 %v9728_v43, %v18390_v1  ;;  %v9761_v29 = vmul.f32 %v9729_v22, %v18391_v38  ;;  %v9762_v54 = vmul.f32 %v9730_v39, %v18392_v17 }
 0xf60   : > { %v9763_v59 = vmul.f32 %v9731_v44, %v18393_v50  ;;  %v9764_v13 = vmul.f32 %v9732_v35, %v16643_v63  ;;  %v9765_v36 = vmul.f32 %v9733_v62, %v16646_v34  ;;  %v9766_v33 = vmul.f32 %v9734_v23, %v16649_v25  ;;  %v18394_v50 = vld [vmem:[#allocation44_spill] sm:$0xff]  ;;  %v18395_v63 = vld [vmem:[#allocation25_spill] sm:$0xff] }
 0xf61   : > { %v9767_v51 = vmul.f32 %v9735_v52, %v16652_v57  ;;  %v9768_v41 = vmul.f32 %v9736_v28, %v16655_v19  ;;  %v9769_v58 = vmul.f32 %v9737_v45, %v16658_v24  ;;  %v9770_v43 = vmul.f32 %v9738_v27, %v16661_v48  ;;  %v18396_v25 = vld [vmem:[#allocation81_spill] sm:$0xff]  ;;  %v18397_v57 = vld [vmem:[#allocation83_spill] sm:$0xff]  ;;  %v18398_v19 = vld [vmem:[#allocation48_spill] sm:$0xff] }
 0xf62   : > { %v9771_v22 = vmul.f32 %v9739_v3, %v16664_v10  ;;  %v9772_v39 = vmul.f32 %v9740_v15, %v16667_v7  ;;  %v9773_v44 = vmul.f32 %v9741_v0, %v16670_v30  ;;  %v9774_v35 = vmul.f32 %v9742_v4, %v18394_v50  ;;  %v18399_v24 = vld [vmem:[#allocation47_spill] sm:$0xff]  ;;  %v18401_v10 = vld [vmem:[#allocation84_spill] sm:$0xff] }
 0xf63   : > { %v9775_v62 = vmul.f32 %v9743_v46, %v18395_v63  ;;  %v9776_v23 = vmul.f32 %v9744_v49, %v16679_v20  ;;  %v9777_v52 = vmul.f32 %v9745_v5, %v18396_v25  ;;  %v9778_v28 = vmul.f32 %v9746_v9, %v18397_v57  ;;  %v18400_v48 = vld [vmem:[#allocation87_spill] sm:$0xff]  ;;  %v18402_v7 = vld [vmem:[#allocation28_spill] sm:$0xff] }
 0xf64   : > { %v9779_v45 = vmul.f32 %v9747_v47, %v18398_v19  ;;  %v9780_v27 = vmul.f32 %v9748_v21, %v18399_v24  ;;  %v9781_v3 = vmul.f32 %v9749_v12, %v18400_v48  ;;  %v9782_v15 = vmul.f32 %v9750_v42, %v18401_v10  ;;  %v18403_v30 = vld [vmem:[#allocation51_spill] sm:$0xff] }
 0xf65   : > { %v9783_v0 = vmul.f32 %v9751_v61, %v18402_v7  ;;  %v9784_v4 = vmul.f32 %v9752_v31, %v18403_v30  ;;  %v9785_v46 = vmul.f32 %v9753_v6, %v18384_v37  ;;  %v9786_v49 = vmul.f32 %v9754_v8, %v18385_v18  ;;  %v18404_v30 = vld [vmem:[#allocation65_spill] sm:$0xff]  ;;  %v18405_v37 = vld [vmem:[#allocation75_spill] sm:$0xff] }
 0xf66   : > { %v9787_v5 = vmul.f32 %v9755_v16, %v16798_v2  ;;  %v9788_v9 = vadd.f32 %v9756_v53, %v18386_v11  ;;  %v9789_v47 = vadd.f32 %v9757_v32, %v18387_v56  ;;  %v9790_v21 = vadd.f32 %v9758_v40, %v18388_v60  ;;  %v18406_v2 = vld [vmem:[#allocation42_spill] sm:$0xff]  ;;  %v18407_v53 = vld [vmem:[#allocation39_spill] sm:$0xff]  ;;  %v18408_v32 = vld [vmem:[#allocation77_spill] sm:$0xff] }
 0xf67   : > { %v9791_v12 = vadd.f32 %v9759_v55, %v18389_v26  ;;  %v9792_v42 = vadd.f32 %v9760_v14, %v18390_v1  ;;  %v9793_v61 = vadd.f32 %v9761_v29, %v18391_v38  ;;  %v9794_v31 = vadd.f32 %v9762_v54, %v18392_v17  ;;  %v18409_v40 = vld [vmem:[#allocation72_spill] sm:$0xff]  ;;  %v18410_v55 = vld [vmem:[#allocation21_spill] sm:$0xff]  ;;  %v18412_v29 = vld [vmem:[#allocation78_spill] sm:$0xff] }
 0xf68   : > { %v9795_v6 = vadd.f32 %v9763_v59, %v18404_v30  ;;  %v9796_v8 = vadd.f32 %v9764_v13, %v18405_v37  ;;  %v9797_v16 = vadd.f32 %v9765_v36, %v16646_v34  ;;  %v9798_v11 = vadd.f32 %v9766_v33, %v18406_v2  ;;  %v18411_v14 = vld [vmem:[#allocation45_spill] sm:$0xff]  ;;  %v18413_v54 = vld [vmem:[#allocation80_spill] sm:$0xff] }
 0xf69   : > { %v9799_v56 = vadd.f32 %v9767_v51, %v18407_v53  ;;  %v9800_v60 = vadd.f32 %v9768_v41, %v18408_v32  ;;  %v9801_v26 = vadd.f32 %v9769_v58, %v18409_v40  ;;  %v9802_v1 = vadd.f32 %v9770_v43, %v18410_v55 }
 0xf6a   : > { %v9803_v38 = vadd.f32 %v9771_v22, %v18411_v14  ;;  %v9804_v17 = vadd.f32 %v9772_v39, %v18412_v29  ;;  %v9805_v30 = vadd.f32 %v9773_v44, %v18413_v54  ;;  %v9806_v37 = vadd.f32 %v9774_v35, %v18394_v50  ;;  %v18414_v50 = vld [vmem:[#allocation51_spill] sm:$0xff]  ;;  %v18415_v39 = vld [vmem:[#allocation86_spill] sm:$0xff] }
 0xf6b   : > { %v9807_v34 = vadd.f32 %v9775_v62, %v18395_v63  ;;  %v9808_v2 = vadd.f32 %v9776_v23, %v16679_v20  ;;  %v9809_v59 = vadd.f32 %v9777_v52, %v18396_v25  ;;  %v9810_v13 = vadd.f32 %v9778_v28, %v18397_v57  ;;  %v18417_v54 = vld [vmem:[#allocation50_spill] sm:$0xff] }
 0xf6c   : > { %v9811_v36 = vadd.f32 %v9779_v45, %v18398_v19  ;;  %v9812_v33 = vadd.f32 %v9780_v27, %v18399_v24  ;;  %v9813_v51 = vadd.f32 %v9781_v3, %v18400_v48  ;;  %v9814_v41 = vadd.f32 %v9782_v15, %v18401_v10  ;;  %v18416_v19 = vld [vmem:[#allocation196_spill] sm:$0xff] }
 0xf6d   : > { %v9815_v58 = vadd.f32 %v9783_v0, %v18402_v7  ;;  %v9816_v43 = vadd.f32 %v9784_v4, %v18414_v50  ;;  %v9820_v63 = vmul.f32 0.7978846, %v9788_v9  ;;  %v9821_v22 = vmul.f32 0.7978846, %v9789_v47 }
 0xf6e   : > { %v9817_v20 = vadd.f32 %v9785_v46, %v18415_v39  ;;  %v9818_v25 = vadd.f32 %v9786_v49, %v18385_v18  ;;  %v9822_v44 = vmul.f32 0.7978846, %v9790_v21  ;;  %v9823_v57 = vmul.f32 0.7978846, %v9791_v12 }
 0xf6f   : > { %v9819_v35 = vadd.f32 %v9787_v5, %v18416_v19  ;;  %v9824_v24 = vmul.f32 0.7978846, %v9792_v42  ;;  %v9825_v62 = vmul.f32 0.7978846, %v9793_v61  ;;  %12550 = vtanh.f32 %v9820_v63 }
 0xf70   : > { %v9826_v48 = vmul.f32 0.7978846, %v9794_v31  ;;  %v9827_v10 = vmul.f32 0.7978846, %v9795_v6  ;;  %v9828_v23 = vmul.f32 0.7978846, %v9796_v8  ;;  %12552 = vtanh.f32 %v9821_v22 }
 0xf71   : > { %v9829_v52 = vmul.f32 0.7978846, %v9797_v16  ;;  %v9830_v28 = vmul.f32 0.7978846, %v9798_v11  ;;  %v9831_v45 = vmul.f32 0.7978846, %v9799_v56  ;;  %12554 = vtanh.f32 %v9822_v44 }
 0xf72   : > { %v9832_v27 = vmul.f32 0.7978846, %v9800_v60  ;;  %v9833_v3 = vmul.f32 0.7978846, %v9801_v26  ;;  %v9834_v15 = vmul.f32 0.7978846, %v9802_v1  ;;  %12556 = vtanh.f32 %v9823_v57 }
 0xf73   : > { %v9835_v0 = vmul.f32 0.7978846, %v9803_v38  ;;  %v9836_v4 = vmul.f32 0.7978846, %v9804_v17  ;;  %v16925_v46 = vmul.f32 0.7978846, %v9805_v30  ;;  %12558 = vtanh.f32 %v9824_v24 }
 0xf74   : > { %v16927_v49 = vmul.f32 0.7978846, %v9806_v37  ;;  %v16929_v5 = vmul.f32 0.7978846, %v9807_v34  ;;  %v16931_v9 = vmul.f32 0.7978846, %v9808_v2  ;;  %12560 = vtanh.f32 %v9825_v62 }
 0xf75   : > { %v12551_v47 = vpop.eup %12550  ;;  %v16933_v21 = vmul.f32 0.7978846, %v9809_v59  ;;  %v16935_v12 = vmul.f32 0.7978846, %v9810_v13  ;;  %v16937_v42 = vmul.f32 0.7978846, %v9811_v36  ;;  %12562 = vtanh.f32 %v9826_v48 }
 0xf76   : > { %v12553_v61 = vpop.eup %12552  ;;  %v16939_v31 = vmul.f32 0.7978846, %v9812_v33  ;;  %v16941_v6 = vmul.f32 0.7978846, %v9813_v51  ;;  %v16943_v8 = vmul.f32 0.7978846, %v9814_v41  ;;  %12564 = vtanh.f32 %v9827_v10 }
 0xf77   : > { %v12555_v16 = vpop.eup %12554  ;;  %v16945_v11 = vmul.f32 0.7978846, %v9815_v58  ;;  %v16947_v53 = vmul.f32 0.7978846, %v9816_v43  ;;  %v16949_v56 = vmul.f32 0.7978846, %v9817_v20  ;;  %12566 = vtanh.f32 %v9828_v23 }
 0xf78   : > { %v12557_v32 = vpop.eup %12556  ;;  %12568 = vtanh.f32 %v9829_v52  ;;  %v9884_v60 = vadd.f32 1.0, %v12551_v47  ;;  %v9885_v40 = vadd.f32 1.0, %v12553_v61  ;;  %v9886_v26 = vadd.f32 1.0, %v12555_v16  ;;  %v18418_v37 = vld [vmem:[#allocation34_spill] sm:$0xff]  ;;  %v18419_v13 = vld [vmem:[#allocation88_spill] sm:$0xff]  ;;  %v18423_v57 = vld [vmem:[#allocation53_spill] sm:$0xff] }
 0xf79   : > { %v12559_v55 = vpop.eup %12558  ;;  %v16955_v1 = vmul.f32 0.7978846, %v9818_v25  ;;  %v16957_v14 = vmul.f32 0.7978846, %v9819_v35  ;;  %12570 = vtanh.f32 %v9830_v28  ;;  %v9887_v38 = vadd.f32 1.0, %v12557_v32  ;;  %v18420_v33 = vld [vmem:[#allocation90_spill] sm:$0xff] }
 0xf7a   : > { %v12561_v29 = vpop.eup %12560  ;;  %12572 = vtanh.f32 %v9831_v45  ;;  %v9888_v17 = vadd.f32 1.0, %v12559_v55  ;;  %v9916_v30 = vmul.f32 %v9884_v60, %v18417_v54  ;;  %v9917_v34 = vmul.f32 %v9885_v40, %v18418_v37  ;;  %v18421_v43 = vld [vmem:[#allocation56_spill] sm:$0xff]  ;;  %v18422_v22 = vld [vmem:[#allocation22_spill] sm:$0xff]  ;;  %v18425_v23 = vld [vmem:[#allocation95_spill] sm:$0xff] }
 0xf7b   : > { %v12563_v2 = vpop.eup %12562  ;;  %12574 = vtanh.f32 %v9832_v27  ;;  %v9889_v59 = vadd.f32 1.0, %v12561_v29  ;;  %v9918_v36 = vmul.f32 %v9886_v26, %v18419_v13  ;;  %v9919_v51 = vmul.f32 %v9887_v38, %v18420_v33  ;;  %v18424_v24 = vld [vmem:[#allocation26_spill] sm:$0xff]  ;;  %v18426_v28 = vld [vmem:[#allocation31_spill] sm:$0xff]  ;;  %v18428_v61 = vld [vmem:[#allocation36_spill] sm:$0xff] }
 0xf7c   : > { %v12565_v41 = vpop.eup %12564  ;;  %12576 = vtanh.f32 %v9833_v3  ;;  %v9890_v58 = vadd.f32 1.0, %v12563_v2  ;;  %v9920_v63 = vmul.f32 %v9888_v17, %v18421_v43  ;;  %v9948_v20 = vadd.f32 %v9916_v30, %v18422_v22  ;;  %v18429_v60 = vld [vmem:[#allocation37_spill] sm:$0xff]  ;;  %v18430_v26 = vld [vmem:[#allocation43_spill] sm:$0xff]  ;;  %v18431_v29 = vld [vmem:[#allocation60_spill] sm:$0xff] }
 0xf7d   : > { %v12567_v25 = vpop.eup %12566  ;;  %12578 = vtanh.f32 %v9834_v15  ;;  %v9891_v44 = vadd.f32 1.0, %v12565_v41  ;;  %v9921_v35 = vmul.f32 %v9889_v59, %v18423_v57  ;;  %v9949_v62 = vadd.f32 %v9917_v34, %v18424_v24  ;;  %v18427_v15 = vld [vmem:[#allocation92_spill] sm:$0xff]  ;;  %v18432_v54 = vld [vmem:[#allocation46_spill] sm:$0xff]  ;;  %v18434_v59 = vld [vmem:[#allocation49_spill] sm:$0xff] }
 0xf7e   : > { %v12569_v48 = vpop.eup %12568  ;;  %12580 = vtanh.f32 %v9835_v0  ;;  %v9892_v10 = vadd.f32 1.0, %v12567_v25  ;;  %v9922_v52 = vmul.f32 %v9890_v58, %v18425_v23  ;;  %v9950_v45 = vadd.f32 %v9918_v36, %v18426_v28  ;;  %9980 = vst [vmem:[%s16970_s16] sm:$0xff] %v9948_v20  ;;  %v18433_v34 = vld [vmem:[#allocation94_spill] sm:$0xff]  ;;  %v18436_v41 = vld [vmem:[#allocation57_spill] sm:$0xff]  ;;  %v18438_v20 = vld [vmem:[#allocation63_spill] sm:$0xff] }
 0xf7f   : > { %v12571_v27 = vpop.eup %12570  ;;  %12582 = vtanh.f32 %v9836_v4  ;;  %v9893_v3 = vadd.f32 1.0, %v12569_v48  ;;  %v9923_v47 = vmul.f32 %v9891_v44, %v18427_v15  ;;  %v9951_v16 = vadd.f32 %v9919_v51, %v18428_v61  ;;  %9981 = vst [vmem:[%s16970_s16 + $0x8] sm:$0xff] %v9949_v62  ;;  %v18435_v33 = vld [vmem:[#allocation98_spill] sm:$0xff]  ;;  %v18439_v57 = vld [vmem:[#allocation41_spill] sm:$0xff]  ;;  %v18440_v24 = vld [vmem:[#allocation67_spill] sm:$0xff] }
 0xf80   : > { %v12573_v0 = vpop.eup %12572  ;;  %12584 = vtanh.f32 %v16925_v46  ;;  %v9894_v32 = vadd.f32 1.0, %v12571_v27  ;;  %v9924_v40 = vmul.f32 %v9892_v10, %v18429_v60  ;;  %v9952_v55 = vadd.f32 %v9920_v63, %v18430_v26  ;;  %9982 = vst [vmem:[%s16970_s16 + $0x10] sm:$0xff] %v9950_v45  ;;  %v18437_v63 = vld [vmem:[#allocation58_spill] sm:$0xff]  ;;  %v18441_v10 = vld [vmem:[#allocation96_spill] sm:$0xff]  ;;  %v18443_v27 = vld [vmem:[#allocation99_spill] sm:$0xff] }
 0xf81   : > { %v12575_v38 = vpop.eup %12574  ;;  %12586 = vtanh.f32 %v16927_v49  ;;  %v9895_v4 = vadd.f32 1.0, %v12573_v0  ;;  %v9925_v17 = vmul.f32 %v9893_v3, %v18431_v29  ;;  %v9953_v30 = vadd.f32 %v9921_v35, %v18432_v54  ;;  %9983 = vst [vmem:[%s16970_s16 + $0x18] sm:$0xff] %v9951_v16  ;;  %v18444_v15 = vld [vmem:[#allocation73_spill] sm:$0xff]  ;;  %v18445_v16 = vld [vmem:[#allocation64_spill] sm:$0xff]  ;;  %v18447_v26 = vld [vmem:[#allocation62_spill] sm:$0xff] }
 0xf82   : > { %v12577_v37 = vpop.eup %12576  ;;  %12588 = vtanh.f32 %v16929_v5  ;;  %v9896_v46 = vadd.f32 1.0, %v12575_v38  ;;  %v9926_v2 = vmul.f32 %v9894_v32, %v18433_v34  ;;  %v9954_v13 = vadd.f32 %v9922_v52, %v18434_v59  ;;  %9984 = vst [vmem:[%s16970_s16 + $0x20] sm:$0xff] %v9952_v55  ;;  %v18442_v52 = vld [vmem:[#allocation70_spill] sm:$0xff]  ;;  %v18446_v32 = vld [vmem:[#allocation76_spill] sm:$0xff]  ;;  %v18448_v38 = vld [vmem:[#allocation79_spill] sm:$0xff] }
 0xf83   : > { %v12579_v36 = vpop.eup %12578  ;;  %12590 = vtanh.f32 %v16931_v9  ;;  %v9897_v49 = vadd.f32 1.0, %v12577_v37  ;;  %v9927_v51 = vmul.f32 %v9895_v4, %v18435_v33  ;;  %v9955_v58 = vadd.f32 %v9923_v47, %v18436_v41  ;;  %9985 = vst [vmem:[%s16970_s16 + $0x28] sm:$0xff] %v9953_v30  ;;  %v18450_v30 = vld [vmem:[#allocation82_spill] sm:$0xff]  ;;  %v18452_v59 = vld [vmem:[#allocation85_spill] sm:$0xff] }
 0xf84   : > { %v12581_v43 = vpop.eup %12580  ;;  %12592 = vtanh.f32 %v16933_v21  ;;  %v9898_v5 = vadd.f32 1.0, %v12579_v36  ;;  %v9928_v22 = vmul.f32 %v9896_v46, %v18437_v63  ;;  %v9956_v25 = vadd.f32 %v9924_v40, %v18438_v20  ;;  %9986 = vst [vmem:[%s16970_s16 + $0x30] sm:$0xff] %v9954_v13  ;;  %v18451_v34 = vld [vmem:[#allocation106_spill] sm:$0xff]  ;;  %v18456_v63 = vld [vmem:[#allocation93_spill] sm:$0xff] }
 0xf85   : > { %v12583_v44 = vpop.eup %12582  ;;  %12594 = vtanh.f32 %v16935_v12  ;;  %v9899_v9 = vadd.f32 1.0, %v12581_v43  ;;  %v9929_v35 = vmul.f32 %v9897_v49, %v18439_v57  ;;  %v9957_v62 = vadd.f32 %v9925_v17, %v18440_v24  ;;  %9987 = vst [vmem:[%s16970_s16 + $0x38] sm:$0xff] %v9955_v58  ;;  %v18449_v17 = vld [vmem:[#allocation105_spill] sm:$0xff]  ;;  %v18453_v49 = vld [vmem:[#allocation107_spill] sm:$0xff]  ;;  %v18455_v43 = vld [vmem:[#allocation108_spill] sm:$0xff] }
 0xf86   : > { %v12585_v48 = vpop.eup %12584  ;;  %12596 = vtanh.f32 %v16937_v42  ;;  %v9900_v21 = vadd.f32 1.0, %v12583_v44  ;;  %v9930_v23 = vmul.f32 %v9898_v5, %v18441_v10  ;;  %v9958_v28 = vadd.f32 %v9926_v2, %v18442_v52  ;;  %9988 = vst [vmem:[%s16970_s16 + $0x40] sm:$0xff] %v9956_v25  ;;  %v18457_v25 = vld [vmem:[#allocation109_spill] sm:$0xff] }
 0xf87   : > { %v12587_v45 = vpop.eup %12586  ;;  %12598 = vtanh.f32 %v16939_v31  ;;  %v9901_v12 = vadd.f32 1.0, %v12585_v48  ;;  %v9931_v3 = vmul.f32 %v9899_v9, %v18443_v27  ;;  %v9959_v47 = vadd.f32 %v9927_v51, %v18444_v15  ;;  %9989 = vst [vmem:[%s16970_s16 + $0x48] sm:$0xff] %v9957_v62  ;;  %v18454_v51 = vld [vmem:[#allocation89_spill] sm:$0xff]  ;;  %v18460_v48 = vld [vmem:[#allocation100_spill] sm:$0xff] }
 0xf88   : > { %v12589_v61 = vpop.eup %12588  ;;  %12600 = vtanh.f32 %v16941_v6  ;;  %v9902_v42 = vadd.f32 1.0, %v12587_v45  ;;  %v9932_v0 = vmul.f32 %v9900_v21, %v18445_v16  ;;  %v9960_v60 = vadd.f32 %v9928_v22, %v18446_v32  ;;  %9990 = vst [vmem:[%s16970_s16 + $0x50] sm:$0xff] %v9958_v28  ;;  %v18458_v9 = vld [vmem:[#allocation97_spill] sm:$0xff]  ;;  %v18462_v28 = vld [vmem:[#allocation111_spill] sm:$0xff]  ;;  %v18465_v16 = vld [vmem:[#allocation112_spill] sm:$0xff] }
 0xf89   : > { %v12591_v40 = vpop.eup %12590  ;;  %12602 = vtanh.f32 %v16943_v8  ;;  %v9903_v31 = vadd.f32 1.0, %v12589_v61  ;;  %v9933_v55 = vmul.f32 %v9901_v12, %v18447_v26  ;;  %v9961_v4 = vadd.f32 %v9929_v35, %v18448_v38  ;;  %9991 = vst [vmem:[%s16970_s16 + $0x58] sm:$0xff] %v9959_v47  ;;  %v18461_v10 = vld [vmem:[#allocation101_spill] sm:$0xff]  ;;  %v18463_v12 = vld [vmem:[#allocation102_spill] sm:$0xff]  ;;  %v18466_v32 = vld [vmem:[#allocation27_spill] sm:$0xff] }
 0xf8a   : > { %v12593_v29 = vpop.eup %12592  ;;  %12604 = vtanh.f32 %v16945_v11  ;;  %v9904_v6 = vadd.f32 1.0, %v12591_v40  ;;  %v9934_v54 = vmul.f32 %v9902_v42, %v18449_v17  ;;  %v9962_v37 = vadd.f32 %v9930_v23, %v18450_v30  ;;  %9992 = vst [vmem:[%s16970_s16 + $0x60] sm:$0xff] %v9960_v60  ;;  %v18469_v30 = vld [vmem:[#allocation52_spill] sm:$0xff] }
 0xf8b   : > { %v12595_v46 = vpop.eup %12594  ;;  %12606 = vtanh.f32 %v16947_v53  ;;  %v9905_v8 = vadd.f32 1.0, %v12593_v29  ;;  %v9935_v2 = vmul.f32 %v9903_v31, %v18451_v34  ;;  %v9963_v13 = vadd.f32 %v9931_v3, %v18452_v59  ;;  %9993 = vst [vmem:[%s16970_s16 + $0x68] sm:$0xff] %v9961_v4  ;;  %v18464_v3 = vld [vmem:[#allocation23_spill] sm:$0xff]  ;;  %v18468_v4 = vld [vmem:[#allocation32_spill] sm:$0xff] }
 0xf8c   : > { %v12597_v36 = vpop.eup %12596  ;;  %12608 = vtanh.f32 %v16949_v56  ;;  %v9906_v11 = vadd.f32 1.0, %v12595_v46  ;;  %v9936_v33 = vmul.f32 %v9904_v6, %v18453_v49  ;;  %v9964_v41 = vadd.f32 %v9932_v0, %v18454_v51  ;;  %9994 = vst [vmem:[%s16970_s16 + $0x70] sm:$0xff] %v9962_v37 }
 0xf8d   : > { %v12599_v58 = vpop.eup %12598  ;;  %12610 = vtanh.f32 %v16955_v1  ;;  %v9907_v53 = vadd.f32 1.0, %v12597_v36  ;;  %v9937_v5 = vmul.f32 %v9905_v8, %v18455_v43  ;;  %v9965_v22 = vadd.f32 %v9933_v55, %v18456_v63  ;;  %9995 = vst [vmem:[%s16970_s16 + $0x78] sm:$0xff] %v9963_v13  ;;  %v18459_v1 = vld [vmem:[#allocation110_spill] sm:$0xff]  ;;  %v18467_v55 = vld [vmem:[#allocation113_spill] sm:$0xff] }
 0xf8e   : > { %v12601_v20 = vpop.eup %12600  ;;  %12612 = vtanh.f32 %v16957_v14  ;;  %v9908_v56 = vadd.f32 1.0, %v12599_v58  ;;  %v9938_v44 = vmul.f32 %v9906_v11, %v18457_v25  ;;  %v9966_v57 = vadd.f32 %v9934_v54, %v18458_v9  ;;  %9996 = vst [vmem:[%s16970_s16 + $0x80] sm:$0xff] %v9964_v41  ;;  %v18471_v11 = vld [vmem:[#allocation40_spill] sm:$0xff]  ;;  %v18473_v58 = vld [vmem:[#allocation59_spill] sm:$0xff] }
 0xf8f   : > { %v12603_v35 = vpop.eup %12602  ;;  %v9909_v24 = vadd.f32 1.0, %v12601_v20  ;;  %v9939_v62 = vmul.f32 %v9907_v53, %v18459_v1  ;;  %v9967_v21 = vadd.f32 %v9935_v2, %v18460_v48  ;;  %v9968_v23 = vadd.f32 %v9936_v33, %v18461_v10  ;;  %9997 = vst [vmem:[%s16970_s16 + $0x88] sm:$0xff] %v9965_v22  ;;  %v18470_v2 = vld [vmem:[#allocation30_spill] sm:$0xff] }
 0xf90   : > { %v12605_v52 = vpop.eup %12604  ;;  %v9910_v14 = vadd.f32 1.0, %v12603_v35  ;;  %v9940_v45 = vmul.f32 %v9908_v56, %v18462_v28  ;;  %v9969_v27 = vadd.f32 %v9937_v5, %v18463_v12  ;;  %v9970_v15 = vadd.f32 %v9938_v44, %v18464_v3  ;;  %9998 = vst [vmem:[%s16970_s16 + $0x90] sm:$0xff] %v9966_v57  ;;  %v18472_v33 = vld [vmem:[#allocation54_spill] sm:$0xff]  ;;  %v18475_v5 = vld [vmem:[#allocation104_spill] sm:$0xff] }
 0xf91   : > { %v12607_v47 = vpop.eup %12606  ;;  %v9687_v61 = vmul.f32 0.5, %v18402_v7  ;;  %v9911_v42 = vadd.f32 1.0, %v12605_v52  ;;  %v9941_v0 = vmul.f32 %v9909_v24, %v18465_v16  ;;  %v9971_v60 = vadd.f32 %v9939_v62, %v18466_v32  ;;  %9999 = vst [vmem:[%s16970_s16 + $0x98] sm:$0xff] %v9967_v21 }
 0xf92   : > { %v12609_v40 = vpop.eup %12608  ;;  %v9688_v31 = vmul.f32 0.5, %v18414_v50  ;;  %v9912_v26 = vadd.f32 1.0, %v12607_v47  ;;  %v9942_v38 = vmul.f32 %v9910_v14, %v18467_v55  ;;  %v9972_v29 = vadd.f32 %v9940_v45, %v18468_v4  ;;  %10000 = vst [vmem:[%s16970_s16 + $0xa0] sm:$0xff] %v9968_v23 }
 0xf93   : > { %v12611_v6 = vpop.eup %12610  ;;  %v9689_v7 = vmul.f32 0.5, %v18415_v39  ;;  %v9913_v17 = vadd.f32 1.0, %v12609_v40  ;;  %v9943_v54 = vmul.f32 %v9911_v42, %v9687_v61  ;;  %v9973_v37 = vadd.f32 %v9941_v0, %v18469_v30  ;;  %10001 = vst [vmem:[%s16970_s16 + $0xa8] sm:$0xff] %v9969_v27 }
 0xf94   : > { %v12613_v46 = vpop.eup %12612  ;;  %v9690_v50 = vmul.f32 0.5, %v18385_v18  ;;  %v9914_v8 = vadd.f32 1.0, %v12611_v6  ;;  %v9944_v34 = vmul.f32 %v9912_v26, %v9688_v31  ;;  %v9974_v59 = vadd.f32 %v9942_v38, %v18470_v2  ;;  %10002 = vst [vmem:[%s16970_s16 + $0xb0] sm:$0xff] %v9970_v15 }
 0xf95   : > { %v9691_v39 = vmul.f32 0.5, %v18416_v19  ;;  %v9915_v13 = vadd.f32 1.0, %v12613_v46  ;;  %v9945_v36 = vmul.f32 %v9913_v17, %v9689_v7  ;;  %v9975_v18 = vadd.f32 %v9943_v54, %v18471_v11  ;;  %10003 = vst [vmem:[%s16970_s16 + $0xb8] sm:$0xff] %v9971_v60  ;;  %v18474_v19 = vld [vmem:[#allocation103_spill] sm:$0xff] }
 0xf96   : > { %v9946_v49 = vmul.f32 %v9914_v8, %v9690_v50  ;;  %v9976_v51 = vadd.f32 %v9944_v34, %v18472_v33  ;;  %10004 = vst [vmem:[%s16970_s16 + $0xc0] sm:$0xff] %v9972_v29 }
 0xf97   : > { %v9947_v41 = vmul.f32 %v9915_v13, %v9691_v39  ;;  %v9977_v53 = vadd.f32 %v9945_v36, %v18473_v58  ;;  %10005 = vst [vmem:[%s16970_s16 + $0xc8] sm:$0xff] %v9973_v37 }
 0xf98   : > { %v9978_v43 = vadd.f32 %v9946_v49, %v18474_v19  ;;  %10006 = vst [vmem:[%s16970_s16 + $0xd0] sm:$0xff] %v9974_v59 }
 0xf99   : > { %v9979_v63 = vadd.f32 %v9947_v41, %v18475_v5  ;;  %10007 = vst [vmem:[%s16970_s16 + $0xd8] sm:$0xff] %v9975_v18 }
 0xf9a   : > { %10008 = vst [vmem:[%s16970_s16 + $0xe0] sm:$0xff] %v9976_v51 }
 0xf9b   : > { %10009 = vst [vmem:[%s16970_s16 + $0xe8] sm:$0xff] %v9977_v53 }
 0xf9c   : > { %10010 = vst [vmem:[%s16970_s16 + $0xf0] sm:$0xff] %v9978_v43 }
 0xf9d   : > { %10011 = vst [vmem:[%s16970_s16 + $0xf8] sm:$0xff] %v9979_v63 }
 0xf9e   : > { %12702 = shalt.err (!%p12699_p8)
}
 0xf9f   : > { %s12755_s17 = smov 128   ;;  %s12756_s16 = smov 8  }
 0xfa0   : > { %12405 = dma.vmem_to_hbm [thread:$0]  (%p12860_p5), %s10026_s19, 4096, %s10028_s20, %s10013_s23, %s12755_s17, %s12755_s17, %s12756_s16  }
 0xfa1 PF: > { %p12422_p9 = scmp.ge.s32.totalorder %s12745_s24, 2  ;;  %s10042_s18 = sand.u32 1, %s12733_s21  }
 0xfa2   : > { %s10043_s28 = scalar_lea.sflag [#allocation6], %s10042_s18 }
 0xfa3   : > { %p12415_p10 = pnand %p12422_p9, %p12864_p6 }
 0xfa5   : > { %p12416_p11 = pneg %p12415_p10 }
 0xfa7   : > { %12728 = dma.done.wait (%p12416_p11), %s10043_s28, 4096  }
 0xfa8   : > { %12730 = vsyncadd (%p12416_p11), %s10043_s28, 4294963200  ;;  %s18476_s24 = sld [smem:[#allocation14_spill]]  ;;  %s18479_s21 = smov %s12737_s22 }
 0xfa9   : > { %s18477_s30 = sld [smem:[#allocation13_spill]] }
 0xfaa   : > { %s18478_s23 = sld [smem:[#allocation15_spill]] }
 0xfae   : > { %p24_p12 = scmp.ge.s32.totalorder %s18476_s24, 4  }
 0xfaf   : > { %s18480_s22 = smov %s18477_s30 }
 0xfb0   :  { %26 = sbr.rel (!%p24_p12) target bundleno = 5 (0x5), region = 115 }
 0xfb5   :  { %10049 = vsyncpa [#allocation5], 1 }
 0xfb6   :  { %10051 = vsyncpa [#allocation5 + $0x1], 1 }
 0xfb7   :  { %10052 = vsyncpa [#allocation8], 1 }
 0xfb8   :  { %10053 = vsyncpa [#allocation6], 1 }
 0xfb9   :  { %10055 = vsyncpa [#allocation6 + $0x1], 1 }

</bundles_post_ra>
